<compile_context>
chip_gen: v7x
topology: tpu7x:2x2x1
jax: 0.10.0
libtpu: 0.0.40
codegen_flags: <defaults>
</compile_context>

<pallas_src>
import functools

import jax
import jax.numpy as jnp
from jax.experimental import pallas as pl
from jax.experimental.pallas import tpu as pltpu

EPS = 1e-5                       # nn.BatchNorm2d default eps
LANE = 128                       # TPU lane width; channel dims padded to this
_VMEM_LIMIT = 48 * 1024 * 1024   # explicit scoped-VMEM budget (<= v7x 64 MiB per TC)


def _round_up(x, m):
    return (x + m - 1) // m * m


def _pick_tile(m, target=512):
    """Largest row tile <= target that divides m and is a multiple of 8 (or m itself)."""
    if m <= target:
        return m
    for t in range(target, 7, -1):
        if m % t == 0 and t % 8 == 0:
            return t
    # TODO(synk): pad M to a multiple of 8 with masked stats for awkward N*H*W.
    return m


def _cparams(dimension_semantics):
    return pltpu.CompilerParams(dimension_semantics=dimension_semantics,
                                vmem_limit_bytes=_VMEM_LIMIT)


# ----------------------------- Pallas kernels -----------------------------

def _stats_kernel(x_ref, sum_ref, ssq_ref):
    """Per-channel sum / sum-of-squares accumulated across M tiles (bn1 pass 1)."""
    @pl.when(pl.program_id(0) == 0)
    def _():
        sum_ref[...] = jnp.zeros_like(sum_ref)
        ssq_ref[...] = jnp.zeros_like(ssq_ref)
    x = x_ref[...].astype(jnp.float32)
    sum_ref[...] += jnp.sum(x, axis=0, keepdims=True)
    ssq_ref[...] += jnp.sum(x * x, axis=0, keepdims=True)


def _bnrelu_matmul_stats_kernel(x_ref, scale_ref, shift_ref, w_ref,
                                y_ref, sum_ref, ssq_ref):
    """y = relu(x*scale + shift) @ w (bf16 MXU, f32 accum), stored bf16, + stats of y."""
    @pl.when(pl.program_id(0) == 0)
    def _():
        sum_ref[...] = jnp.zeros_like(sum_ref)
        ssq_ref[...] = jnp.zeros_like(ssq_ref)
    a = jnp.maximum(x_ref[...].astype(jnp.float32) * scale_ref[...] + shift_ref[...], 0.0)
    y = jnp.dot(a.astype(jnp.bfloat16), w_ref[...], preferred_element_type=jnp.float32)
    yb = y.astype(jnp.bfloat16)
    y_ref[...] = yb
    yf = yb.astype(jnp.float32)          # stats of the bf16 values the consumer sees
    sum_ref[...] += jnp.sum(yf, axis=0, keepdims=True)
    ssq_ref[...] += jnp.sum(yf * yf, axis=0, keepdims=True)


def _bnrelu_matmul2_stats_kernel(x_ref, scale_ref, shift_ref, w_ref, wsc_ref,
                                 y_ref, res_ref, sum_ref, ssq_ref):
    """Fused conv1 + shortcut (stride==1): both 1x1 convs share the relu(bn1(x)) tile."""
    @pl.when(pl.program_id(0) == 0)
    def _():
        sum_ref[...] = jnp.zeros_like(sum_ref)
        ssq_ref[...] = jnp.zeros_like(ssq_ref)
    a = jnp.maximum(x_ref[...].astype(jnp.float32) * scale_ref[...] + shift_ref[...], 0.0)
    ab = a.astype(jnp.bfloat16)
    y = jnp.dot(ab, w_ref[...], preferred_element_type=jnp.float32)
    yb = y.astype(jnp.bfloat16)
    y_ref[...] = yb
    res_ref[...] = jnp.dot(ab, wsc_ref[...],
                           preferred_element_type=jnp.float32).astype(jnp.bfloat16)
    yf = yb.astype(jnp.float32)
    sum_ref[...] += jnp.sum(yf, axis=0, keepdims=True)
    ssq_ref[...] += jnp.sum(yf * yf, axis=0, keepdims=True)


def _bnrelu_matmul_kernel(x_ref, scale_ref, shift_ref, w_ref, o_ref):
    """o = relu(x*scale + shift) @ w   (used for the strided shortcut, Mo rows only)."""
    a = jnp.maximum(x_ref[...].astype(jnp.float32) * scale_ref[...] + shift_ref[...], 0.0)
    o_ref[...] = jnp.dot(a.astype(jnp.bfloat16), w_ref[...],
                         preferred_element_type=jnp.float32).astype(o_ref.dtype)


def _bnrelu_matmul_add_kernel(x_ref, scale_ref, shift_ref, w_ref, res_ref, o_ref):
    """o = relu(x*scale + shift) @ w + residual   (final 1x1 conv, fused add)."""
    a = jnp.maximum(x_ref[...].astype(jnp.float32) * scale_ref[...] + shift_ref[...], 0.0)
    o_ref[...] = (jnp.dot(a.astype(jnp.bfloat16), w_ref[...],
                          preferred_element_type=jnp.float32)
                  + res_ref[...].astype(jnp.float32))


def _conv3x3_kernel(y1_ref, scale_ref, shift_ref, w_ref, o_ref, sum_ref, ssq_ref,
                    apad_ref, *, H, W, Ho, Wo, stride):
    """conv3x3(relu(bn2(y1)), stride, pad=1) for one whole image per grid step,
    as 9 shifted (Ho*Wo, C)x(C, C) matmuls accumulated in f32, + bn3 stats."""
    @pl.when(pl.program_id(0) == 0)
    def _():
        sum_ref[...] = jnp.zeros_like(sum_ref)
        ssq_ref[...] = jnp.zeros_like(ssq_ref)

    C = o_ref.shape[-1]
    Hp = stride * Ho + 2
    Wp = stride * Wo + 2

    # bn2 + relu prologue (f32 VPU math), rounded to bf16 for the MXU taps.
    y1 = y1_ref[...].reshape(H, W, C).astype(jnp.float32)
    a = jnp.maximum(y1 * scale_ref[...].reshape(1, 1, C)
                    + shift_ref[...].reshape(1, 1, C), 0.0).astype(jnp.bfloat16)

    # Zero-padded activation image in VMEM. Borders (and the stride overhang rows/cols)
    # are re-zeroed every step so the batch grid axis could be parallelized safely.
    apad_ref[0:1, :, :] = jnp.zeros((1, Wp, C), jnp.bfloat16)
    apad_ref[H + 1:Hp, :, :] = jnp.zeros((Hp - H - 1, Wp, C), jnp.bfloat16)
    apad_ref[1:H + 1, 0:1, :] = jnp.zeros((H, 1, C), jnp.bfloat16)
    apad_ref[1:H + 1, W + 1:Wp, :] = jnp.zeros((H, Wp - W - 1, C), jnp.bfloat16)
    apad_ref[1:H + 1, 1:W + 1, :] = a

    acc = jnp.zeros((Ho * Wo, C), jnp.float32)
    for ky in range(3):
        for kx in range(3):
            # contiguous static slice of the padded image; phase-select for stride > 1
            slab = apad_ref[ky:ky + stride * Ho, kx:kx + stride * Wo, :]
            if stride > 1:
                # TODO(synk): on Mosaic this static reshape+slice may cost a relayout;
                # a strided-ref read would be the native path but is unsupported by
                # the Pallas interpreter.
                slab = slab.reshape(Ho, stride, Wo, stride, C)[:, 0, :, 0, :]
            wk = w_ref[ky:ky + 1, kx:kx + 1, :, :].reshape(C, C)
            acc += jnp.dot(slab.reshape(Ho * Wo, C), wk,
                           preferred_element_type=jnp.float32)

    yb = acc.astype(jnp.bfloat16)
    o_ref[...] = yb.reshape(1, Ho, Wo, C)
    yf = yb.astype(jnp.float32)
    sum_ref[...] += jnp.sum(yf, axis=0, keepdims=True)
    ssq_ref[...] += jnp.sum(yf * yf, axis=0, keepdims=True)


# ----------------------------- pallas_call wrappers -----------------------------

def channel_stats(x2d):
    M, C = x2d.shape
    tm = _pick_tile(M)
    return pl.pallas_call(
        _stats_kernel,
        out_shape=(jax.ShapeDtypeStruct((1, C), jnp.float32),
                   jax.ShapeDtypeStruct((1, C), jnp.float32)),
        grid=(M // tm,),
        in_specs=[pl.BlockSpec((tm, C), lambda i: (i, 0))],
        out_specs=(pl.BlockSpec((1, C), lambda i: (0, 0)),
                   pl.BlockSpec((1, C), lambda i: (0, 0))),
        compiler_params=_cparams(("arbitrary",)),   # running reduction over M tiles
    )(x2d)


def bnrelu_matmul_stats(x2d, scale, shift, w):
    M, Cin = x2d.shape
    Co = w.shape[1]
    tm = _pick_tile(M)
    return pl.pallas_call(
        _bnrelu_matmul_stats_kernel,
        out_shape=(jax.ShapeDtypeStruct((M, Co), jnp.bfloat16),
                   jax.ShapeDtypeStruct((1, Co), jnp.float32),
                   jax.ShapeDtypeStruct((1, Co), jnp.float32)),
        grid=(M // tm,),
        in_specs=[pl.BlockSpec((tm, Cin), lambda i: (i, 0)),
                  pl.BlockSpec((1, Cin), lambda i: (0, 0)),
                  pl.BlockSpec((1, Cin), lambda i: (0, 0)),
                  pl.BlockSpec((Cin, Co), lambda i: (0, 0))],
        out_specs=(pl.BlockSpec((tm, Co), lambda i: (i, 0)),
                   pl.BlockSpec((1, Co), lambda i: (0, 0)),
                   pl.BlockSpec((1, Co), lambda i: (0, 0))),
        compiler_params=_cparams(("arbitrary",)),   # stats accumulate across M tiles
    )(x2d, scale, shift, w)


def bnrelu_matmul2_stats(x2d, scale, shift, w, wsc):
    M, Cin = x2d.shape
    Cb, Co = w.shape[1], wsc.shape[1]
    tm = _pick_tile(M)
    return pl.pallas_call(
        _bnrelu_matmul2_stats_kernel,
        out_shape=(jax.ShapeDtypeStruct((M, Cb), jnp.bfloat16),
                   jax.ShapeDtypeStruct((M, Co), jnp.bfloat16),
                   jax.ShapeDtypeStruct((1, Cb), jnp.float32),
                   jax.ShapeDtypeStruct((1, Cb), jnp.float32)),
        grid=(M // tm,),
        in_specs=[pl.BlockSpec((tm, Cin), lambda i: (i, 0)),
                  pl.BlockSpec((1, Cin), lambda i: (0, 0)),
                  pl.BlockSpec((1, Cin), lambda i: (0, 0)),
                  pl.BlockSpec((Cin, Cb), lambda i: (0, 0)),
                  pl.BlockSpec((Cin, Co), lambda i: (0, 0))],
        out_specs=(pl.BlockSpec((tm, Cb), lambda i: (i, 0)),
                   pl.BlockSpec((tm, Co), lambda i: (i, 0)),
                   pl.BlockSpec((1, Cb), lambda i: (0, 0)),
                   pl.BlockSpec((1, Cb), lambda i: (0, 0))),
        compiler_params=_cparams(("arbitrary",)),
    )(x2d, scale, shift, w, wsc)


def bnrelu_matmul(x2d, scale, shift, w, out_dtype=jnp.bfloat16):
    M, Cin = x2d.shape
    Co = w.shape[1]
    tm = _pick_tile(M)
    return pl.pallas_call(
        _bnrelu_matmul_kernel,
        out_shape=jax.ShapeDtypeStruct((M, Co), out_dtype),
        grid=(M // tm,),
        in_specs=[pl.BlockSpec((tm, Cin), lambda i: (i, 0)),
                  pl.BlockSpec((1, Cin), lambda i: (0, 0)),
                  pl.BlockSpec((1, Cin), lambda i: (0, 0)),
                  pl.BlockSpec((Cin, Co), lambda i: (0, 0))],
        out_specs=pl.BlockSpec((tm, Co), lambda i: (i, 0)),
        compiler_params=_cparams(("parallel",)),    # independent M tiles
    )(x2d, scale, shift, w)


def bnrelu_matmul_add(x2d, scale, shift, w, res):
    M, Cin = x2d.shape
    Co = w.shape[1]
    tm = _pick_tile(M)
    return pl.pallas_call(
        _bnrelu_matmul_add_kernel,
        out_shape=jax.ShapeDtypeStruct((M, Co), jnp.float32),
        grid=(M // tm,),
        in_specs=[pl.BlockSpec((tm, Cin), lambda i: (i, 0)),
                  pl.BlockSpec((1, Cin), lambda i: (0, 0)),
                  pl.BlockSpec((1, Cin), lambda i: (0, 0)),
                  pl.BlockSpec((Cin, Co), lambda i: (0, 0)),
                  pl.BlockSpec((tm, Co), lambda i: (i, 0))],
        out_specs=pl.BlockSpec((tm, Co), lambda i: (i, 0)),
        compiler_params=_cparams(("parallel",)),    # independent M tiles
    )(x2d, scale, shift, w, res)


def conv3x3_bnrelu_stats(y1_4d, scale, shift, w2, stride):
    N, H, W, C = y1_4d.shape
    Ho = (H - 1) // stride + 1
    Wo = (W - 1) // stride + 1
    Hp, Wp = stride * Ho + 2, stride * Wo + 2
    kern = functools.partial(_conv3x3_kernel, H=H, W=W, Ho=Ho, Wo=Wo, stride=stride)
    return pl.pallas_call(
        kern,
        out_shape=(jax.ShapeDtypeStruct((N, Ho, Wo, C), jnp.bfloat16),
                   jax.ShapeDtypeStruct((1, C), jnp.float32),
                   jax.ShapeDtypeStruct((1, C), jnp.float32)),
        grid=(N,),
        in_specs=[pl.BlockSpec((1, H, W, C), lambda n: (n, 0, 0, 0)),
                  pl.BlockSpec((1, C), lambda n: (0, 0)),
                  pl.BlockSpec((1, C), lambda n: (0, 0)),
                  pl.BlockSpec((3, 3, C, C), lambda n: (0, 0, 0, 0))],
        out_specs=(pl.BlockSpec((1, Ho, Wo, C), lambda n: (n, 0, 0, 0)),
                   pl.BlockSpec((1, C), lambda n: (0, 0)),
                   pl.BlockSpec((1, C), lambda n: (0, 0))),
        scratch_shapes=[pltpu.VMEM((Hp, Wp, C), jnp.bfloat16)],
        compiler_params=_cparams(("arbitrary",)),   # bn3 stats accumulate over images
    )(y1_4d, scale, shift, w2)


# ----------------------------- glue (JAX) -----------------------------

def _bn_affine(s, ss, count, gamma, beta):
    """Fold training-mode BatchNorm (batch statistics) into per-channel scale/shift."""
    mean = s / count
    var = jnp.maximum(ss / count - mean * mean, 0.0)
    scale = gamma * jax.lax.rsqrt(var + EPS)
    return scale, beta - mean * scale


def _pad_last(a, target):
    pad = [(0, 0)] * (a.ndim - 1) + [(0, target - a.shape[-1])]
    return jnp.pad(a, pad)


def _pad_mat(w, rows, cols):
    return jnp.pad(w, ((0, rows - w.shape[0]), (0, cols - w.shape[1])))


@functools.partial(jax.jit, static_argnames=("stride",))
def preact_bottleneck_forward(x_nchw, params, stride):
    N, Cin, H, W = x_nchw.shape
    bp = params["w1"].shape[1]
    Cout = params["w3"].shape[1]
    Ho = (H - 1) // stride + 1
    Wo = (W - 1) // stride + 1
    M, Mo = N * H * W, N * Ho * Wo

    # lane-dense channel padding (multiples of 128), carried through the whole block
    Cin_p, Cb_p, Co_p = (_round_up(c, LANE) for c in (Cin, bp, Cout))

    w1 = _pad_mat(params["w1"], Cin_p, Cb_p).astype(jnp.bfloat16)
    w2 = jnp.pad(params["w2"], ((0, 0), (0, 0),
                                (0, Cb_p - bp), (0, Cb_p - bp))).astype(jnp.bfloat16)
    w3 = _pad_mat(params["w3"], Cb_p, Co_p).astype(jnp.bfloat16)
    g1, b1 = (_pad_last(params[k], Cin_p).reshape(1, Cin_p) for k in ("g1", "b1"))
    g2, b2 = (_pad_last(params[k], Cb_p).reshape(1, Cb_p) for k in ("g2", "b2"))
    g3, b3 = (_pad_last(params[k], Cb_p).reshape(1, Cb_p) for k in ("g3", "b3"))

    # input: NCHW -> NHWC f32, channels padded to Cin_p
    x4d = _pad_last(jnp.transpose(x_nchw, (0, 2, 3, 1)).astype(jnp.float32), Cin_p)
    x2d = x4d.reshape(M, Cin_p)

    # ---- bn1 statistics folded into a per-channel scale/shift ----
    s1, ss1 = channel_stats(x2d)
    scale1, shift1 = _bn_affine(s1, ss1, M, g1, b1)

    have_sc = "wsc" in params
    if have_sc:
        wsc = _pad_mat(params["wsc"], Cin_p, Co_p).astype(jnp.bfloat16)

    # ---- conv1 (1x1) fused with bn1+relu (+ shortcut when stride==1); bn2 stats ----
    if have_sc and stride == 1:
        y1_2d, res2d, s2, ss2 = bnrelu_matmul2_stats(x2d, scale1, shift1, w1, wsc)
    else:
        y1_2d, s2, ss2 = bnrelu_matmul_stats(x2d, scale1, shift1, w1)
        if have_sc:
            # strided 1x1 shortcut: subsample x in XLA (reads only Mo rows), big-M matmul
            xs2d = x4d[:, ::stride, ::stride, :].reshape(Mo, Cin_p)
            res2d = bnrelu_matmul(xs2d, scale1, shift1, wsc)
        else:
            # identity shortcut (PyTorch uses raw x, not relu(bn1(x)))
            assert stride == 1 and Cin == Cout, (
                "identity shortcut requires stride==1 and in_planes == expansion*planes")
            res2d = x2d                                 # Cin_p == Co_p here
    scale2, shift2 = _bn_affine(s2, ss2, M, g2, b2)

    # ---- conv2 (3x3, stride, pad 1) fused with bn2+relu; emits bn3 statistics ----
    y1_4d = y1_2d.reshape(N, H, W, Cb_p)
    y2_4d, s3, ss3 = conv3x3_bnrelu_stats(y1_4d, scale2, shift2, w2, stride)
    scale3, shift3 = _bn_affine(s3, ss3, Mo, g3, b3)

    # ---- conv3 (1x1) fused with bn3+relu and the residual add ----
    out2d = bnrelu_matmul_add(y2_4d.reshape(Mo, Cb_p), scale3, shift3, w3, res2d)

    out = out2d.reshape(N, Ho, Wo, Co_p)[..., :Cout]
    return jnp.transpose(out, (0, 3, 1, 2))            # back to NCHW


# ----------------------------- pure-JAX reference -----------------------------

def reference_forward(x_nchw, params, stride):
    """Training-mode BN reference; intermediates rounded to bf16 like the Pallas path."""
    def bn_relu(t, g, b):
        mean = t.mean(axis=(0, 1, 2), keepdims=True)
        var = ((t - mean) ** 2).mean(axis=(0, 1, 2), keepdims=True)
        return jnp.maximum((t - mean) * jax.lax.rsqrt(var + EPS) * g + b, 0.0)

    def mm(a, w):
        return jnp.einsum("nhwc,cd->nhwd", a.astype(jnp.bfloat16),
                          w.astype(jnp.bfloat16),
                          preferred_element_type=jnp.float32)

    def rnd(t):   # mimic bf16 storage of intermediates
        return t.astype(jnp.bfloat16).astype(jnp.float32)

    x = jnp.transpose(x_nchw, (0, 2, 3, 1)).astype(jnp.float32)
    a1 = bn_relu(x, params["g1"], params["b1"])
    if "wsc" in params:
        shortcut = rnd(mm(a1[:, ::stride, ::stride, :], params["wsc"]))
    else:
        shortcut = x
    y1 = rnd(mm(a1, params["w1"]))
    a2 = bn_relu(y1, params["g2"], params["b2"])
    y2 = rnd(jax.lax.conv_general_dilated(
        a2.astype(jnp.bfloat16), params["w2"].astype(jnp.bfloat16),
        window_strides=(stride, stride), padding=((1, 1), (1, 1)),
        dimension_numbers=("NHWC", "HWIO", "NHWC"),
        preferred_element_type=jnp.float32))
    a3 = bn_relu(y2, params["g3"], params["b3"])
    out = mm(a3, params["w3"]) + shortcut
    return jnp.transpose(out, (0, 3, 1, 2))


# ----------------------------- main -----------------------------

if __name__ == "__main__":
    N, H, W = 2, 16, 16
    expansion = 4
    configs = [
        dict(in_planes=8, block_planes=4, stride=2),    # strided conv shortcut
        dict(in_planes=8, block_planes=4, stride=1),    # conv shortcut, fused into conv1
        dict(in_planes=16, block_planes=4, stride=1),   # identity shortcut
    ]

    key = jax.random.PRNGKey(0)
    for cfg in configs:
        in_planes, bp, stride = cfg["in_planes"], cfg["block_planes"], cfg["stride"]
        key, kx_, k1, k2, k3, ksc, kg = jax.random.split(key, 7)
        x = jax.random.normal(kx_, (N, in_planes, H, W), dtype=jnp.float32)
        gk = jax.random.split(kg, 6)
        params = {
            "g1": 1.0 + 0.1 * jax.random.normal(gk[0], (in_planes,), jnp.float32),
            "b1": 0.1 * jax.random.normal(gk[1], (in_planes,), jnp.float32),
            "g2": 1.0 + 0.1 * jax.random.normal(gk[2], (bp,), jnp.float32),
            "b2": 0.1 * jax.random.normal(gk[3], (bp,), jnp.float32),
            "g3": 1.0 + 0.1 * jax.random.normal(gk[4], (bp,), jnp.float32),
            "b3": 0.1 * jax.random.normal(gk[5], (bp,), jnp.float32),
            # conv1: torch (bp, Cin, 1, 1) -> (Cin, bp)
            "w1": 0.2 * jax.random.normal(k1, (in_planes, bp), jnp.float32),
            # conv2: torch (bp, bp, 3, 3) -> HWIO (3, 3, bp, bp)
            "w2": 0.2 * jax.random.normal(k2, (3, 3, bp, bp), jnp.float32),
            # conv3: torch (4*bp, bp, 1, 1) -> (bp, 4*bp)
            "w3": 0.2 * jax.random.normal(k3, (bp, expansion * bp), jnp.float32),
        }
        if in_planes != expansion * bp or stride != 1:
            # shortcut conv: torch (4*bp, Cin, 1, 1) -> (Cin, 4*bp)
            params["wsc"] = 0.2 * jax.random.normal(
                ksc, (in_planes, expansion * bp), jnp.float32)

        out = jax.block_until_ready(preact_bottleneck_forward(x, params, stride=stride))
        ref = jax.block_until_ready(reference_forward(x, params, stride))

        Ho = (H - 1) // stride + 1
        assert out.shape == (N, expansion * bp, Ho, Ho), (cfg, out.shape)
        err = float(jnp.max(jnp.abs(out - ref)))
        assert jnp.allclose(out, ref, atol=2e-2, rtol=2e-2), (cfg, err)

    print("KERNEL_OK")
</pallas_src>

<mosaic_0001>
module attributes {stable_mosaic.version = 11 : i64} {
  func.func @_stats_kernel(%arg0: i32, %arg1: memref<512x128xf32, #tpu.memory_space<vmem>>, %arg2: memref<1x128xf32, #tpu.memory_space<vmem>>, %arg3: memref<1x128xf32, #tpu.memory_space<vmem>>) attributes {dimension_semantics = [#tpu.dimension_semantics<arbitrary>], iteration_bounds = array<i64: 1>, scalar_prefetch = 0 : i64, scratch_operands = 0 : i64, tpu.core_type = #tpu.core_type<tc>, window_params = [{transform_indices = @transform_0, window_bounds = array<i64: 512, 128>}, {pipeline_mode = #tpu.pipeline_mode<synchronous>, transform_indices = @transform_1, window_bounds = array<i64: 1, 128>}, {pipeline_mode = #tpu.pipeline_mode<synchronous>, transform_indices = @transform_2, window_bounds = array<i64: 1, 128>}]} {
    %c0_i32 = arith.constant 0 : i32
    %0 = arith.cmpi eq, %arg0, %c0_i32 : i32
    %1 = arith.extui %0 : i1 to i32
    %c0_i32_0 = arith.constant 0 : i32
    %2 = arith.cmpi ne, %1, %c0_i32_0 : i32
    scf.if %2 {
      %cst_11 = arith.constant 0.000000e+00 : f32
      %15 = vector.broadcast %cst_11 : f32 to vector<1x128xf32>
      %c0_12 = arith.constant 0 : index
      %c0_13 = arith.constant 0 : index
      %16 = vector.load %arg2[%c0_12, %c0_13] : memref<1x128xf32, #tpu.memory_space<vmem>>, vector<1x128xf32>
      tpu.vector_store %arg2[%c0_12, %c0_13], %15 {strides = array<i32>} : memref<1x128xf32, #tpu.memory_space<vmem>>, vector<1x128xf32>,
      %cst_14 = arith.constant 0.000000e+00 : f32
      %17 = vector.broadcast %cst_14 : f32 to vector<1x128xf32>
      %c0_15 = arith.constant 0 : index
      %c0_16 = arith.constant 0 : index
      %18 = vector.load %arg3[%c0_15, %c0_16] : memref<1x128xf32, #tpu.memory_space<vmem>>, vector<1x128xf32>
      tpu.vector_store %arg3[%c0_15, %c0_16], %17 {strides = array<i32>} : memref<1x128xf32, #tpu.memory_space<vmem>>, vector<1x128xf32>,
    } else {
    }
    %c0 = arith.constant 0 : index
    %c0_1 = arith.constant 0 : index
    %3 = vector.load %arg1[%c0, %c0_1] : memref<512x128xf32, #tpu.memory_space<vmem>>, vector<512x128xf32>
    %c0_2 = arith.constant 0 : index
    %c0_3 = arith.constant 0 : index
    %4 = vector.load %arg2[%c0_2, %c0_3] : memref<1x128xf32, #tpu.memory_space<vmem>>, vector<1x128xf32>
    %cst = arith.constant dense<0.000000e+00> : vector<128xf32>
    %5 = vector.multi_reduction <add>, %3, %cst [0] : vector<512x128xf32> to vector<128xf32>
    %6 = vector.shape_cast %5 : vector<128xf32> to vector<1x128xf32>
    %7 = arith.addf %4, %6 : vector<1x128xf32>
    %c0_4 = arith.constant 0 : index
    %c0_5 = arith.constant 0 : index
    %8 = vector.load %arg2[%c0_4, %c0_5] : memref<1x128xf32, #tpu.memory_space<vmem>>, vector<1x128xf32>
    tpu.vector_store %arg2[%c0_4, %c0_5], %7 {strides = array<i32>} : memref<1x128xf32, #tpu.memory_space<vmem>>, vector<1x128xf32>,
    %c0_6 = arith.constant 0 : index
    %c0_7 = arith.constant 0 : index
    %9 = vector.load %arg3[%c0_6, %c0_7] : memref<1x128xf32, #tpu.memory_space<vmem>>, vector<1x128xf32>
    %10 = arith.mulf %3, %3 : vector<512x128xf32>
    %cst_8 = arith.constant dense<0.000000e+00> : vector<128xf32>
    %11 = vector.multi_reduction <add>, %10, %cst_8 [0] : vector<512x128xf32> to vector<128xf32>
    %12 = vector.shape_cast %11 : vector<128xf32> to vector<1x128xf32>
    %13 = arith.addf %9, %12 : vector<1x128xf32>
    %c0_9 = arith.constant 0 : index
    %c0_10 = arith.constant 0 : index
    %14 = vector.load %arg3[%c0_9, %c0_10] : memref<1x128xf32, #tpu.memory_space<vmem>>, vector<1x128xf32>
    tpu.vector_store %arg3[%c0_9, %c0_10], %13 {strides = array<i32>} : memref<1x128xf32, #tpu.memory_space<vmem>>, vector<1x128xf32>,
    return
  }
  func.func @transform_0(%arg0: i32) -> (i32, i32) {
    %c0_i32 = arith.constant 0 : i32
    %c0_i32_0 = arith.constant 0 : i32
    return %arg0, %c0_i32 : i32, i32
  }
  func.func @transform_1(%arg0: i32) -> (i32, i32) {
    %c0_i32 = arith.constant 0 : i32
    %c0_i32_0 = arith.constant 0 : i32
    %c0_i32_1 = arith.constant 0 : i32
    return %c0_i32, %c0_i32_0 : i32, i32
  }
  func.func @transform_2(%arg0: i32) -> (i32, i32) {
    %c0_i32 = arith.constant 0 : i32
    %c0_i32_0 = arith.constant 0 : i32
    %c0_i32_1 = arith.constant 0 : i32
    return %c0_i32, %c0_i32_0 : i32, i32
  }
}

module attributes {stable_mosaic.version = 11 : i64} {
  func.func @_bnrelu_matmul_stats_kernel(%arg0: i32, %arg1: memref<512x128xf32, #tpu.memory_space<vmem>>, %arg2: memref<1x128xf32, #tpu.memory_space<vmem>>, %arg3: memref<1x128xf32, #tpu.memory_space<vmem>>, %arg4: memref<128x128xbf16, #tpu.memory_space<vmem>>, %arg5: memref<512x128xbf16, #tpu.memory_space<vmem>>, %arg6: memref<1x128xf32, #tpu.memory_space<vmem>>, %arg7: memref<1x128xf32, #tpu.memory_space<vmem>>) attributes {dimension_semantics = [#tpu.dimension_semantics<arbitrary>], iteration_bounds = array<i64: 1>, scalar_prefetch = 0 : i64, scratch_operands = 0 : i64, tpu.core_type = #tpu.core_type<tc>, window_params = [{transform_indices = @transform_0, window_bounds = array<i64: 512, 128>}, {pipeline_mode = #tpu.pipeline_mode<synchronous>, transform_indices = @transform_1, window_bounds = array<i64: 1, 128>}, {pipeline_mode = #tpu.pipeline_mode<synchronous>, transform_indices = @transform_2, window_bounds = array<i64: 1, 128>}, {pipeline_mode = #tpu.pipeline_mode<synchronous>, transform_indices = @transform_3, window_bounds = array<i64: 128, 128>}, {transform_indices = @transform_4, window_bounds = array<i64: 512, 128>}, {pipeline_mode = #tpu.pipeline_mode<synchronous>, transform_indices = @transform_5, window_bounds = array<i64: 1, 128>}, {pipeline_mode = #tpu.pipeline_mode<synchronous>, transform_indices = @transform_6, window_bounds = array<i64: 1, 128>}]} {
    %c0_i32 = arith.constant 0 : i32
    %0 = arith.cmpi eq, %arg0, %c0_i32 : i32
    %1 = arith.extui %0 : i1 to i32
    %c0_i32_0 = arith.constant 0 : i32
    %2 = arith.cmpi ne, %1, %c0_i32_0 : i32
    scf.if %2 {
      %cst_21 = arith.constant 0.000000e+00 : f32
      %29 = vector.broadcast %cst_21 : f32 to vector<1x128xf32>
      %c0_22 = arith.constant 0 : index
      %c0_23 = arith.constant 0 : index
      %30 = vector.load %arg6[%c0_22, %c0_23] : memref<1x128xf32, #tpu.memory_space<vmem>>, vector<1x128xf32>
      tpu.vector_store %arg6[%c0_22, %c0_23], %29 {strides = array<i32>} : memref<1x128xf32, #tpu.memory_space<vmem>>, vector<1x128xf32>,
      %cst_24 = arith.constant 0.000000e+00 : f32
      %31 = vector.broadcast %cst_24 : f32 to vector<1x128xf32>
      %c0_25 = arith.constant 0 : index
      %c0_26 = arith.constant 0 : index
      %32 = vector.load %arg7[%c0_25, %c0_26] : memref<1x128xf32, #tpu.memory_space<vmem>>, vector<1x128xf32>
      tpu.vector_store %arg7[%c0_25, %c0_26], %31 {strides = array<i32>} : memref<1x128xf32, #tpu.memory_space<vmem>>, vector<1x128xf32>,
    } else {
    }
    %c0 = arith.constant 0 : index
    %c0_1 = arith.constant 0 : index
    %3 = vector.load %arg1[%c0, %c0_1] : memref<512x128xf32, #tpu.memory_space<vmem>>, vector<512x128xf32>
    %c0_2 = arith.constant 0 : index
    %c0_3 = arith.constant 0 : index
    %4 = vector.load %arg2[%c0_2, %c0_3] : memref<1x128xf32, #tpu.memory_space<vmem>>, vector<1x128xf32>
    %5 = vector.broadcast %4 : vector<1x128xf32> to vector<512x128xf32>
    %6 = arith.mulf %3, %5 : vector<512x128xf32>
    %c0_4 = arith.constant 0 : index
    %c0_5 = arith.constant 0 : index
    %7 = vector.load %arg3[%c0_4, %c0_5] : memref<1x128xf32, #tpu.memory_space<vmem>>, vector<1x128xf32>
    %8 = vector.broadcast %7 : vector<1x128xf32> to vector<512x128xf32>
    %9 = arith.addf %6, %8 : vector<512x128xf32>
    %cst = arith.constant 0.000000e+00 : f32
    %10 = vector.broadcast %cst : f32 to vector<512x128xf32>
    %11 = arith.maximumf %9, %10 : vector<512x128xf32>
    %12 = arith.truncf %11 : vector<512x128xf32> to vector<512x128xbf16>
    %c0_6 = arith.constant 0 : index
    %c0_7 = arith.constant 0 : index
    %13 = vector.load %arg4[%c0_6, %c0_7] : memref<128x128xbf16, #tpu.memory_space<vmem>>, vector<128x128xbf16>
    %cst_8 = arith.constant dense<0.000000e+00> : vector<512x128xf32>
    %14 = tpu.matmul %12, %13, %cst_8 {dimension_numbers = #tpu.dot_dimension_numbers<[1], [0], [0], [1], [0, 0, 1, 1], [], []>} : vector<512x128xbf16>, vector<128x128xbf16>, vector<512x128xf32> -> vector<512x128xf32>
    %15 = arith.truncf %14 : vector<512x128xf32> to vector<512x128xbf16>
    %c0_9 = arith.constant 0 : index
    %c0_10 = arith.constant 0 : index
    %16 = vector.load %arg5[%c0_9, %c0_10] : memref<512x128xbf16, #tpu.memory_space<vmem>>, vector<512x128xbf16>
    tpu.vector_store %arg5[%c0_9, %c0_10], %15 {strides = array<i32>} : memref<512x128xbf16, #tpu.memory_space<vmem>>, vector<512x128xbf16>,
    %17 = arith.extf %15 : vector<512x128xbf16> to vector<512x128xf32>
    %c0_11 = arith.constant 0 : index
    %c0_12 = arith.constant 0 : index
    %18 = vector.load %arg6[%c0_11, %c0_12] : memref<1x128xf32, #tpu.memory_space<vmem>>, vector<1x128xf32>
    %cst_13 = arith.constant dense<0.000000e+00> : vector<128xf32>
    %19 = vector.multi_reduction <add>, %17, %cst_13 [0] : vector<512x128xf32> to vector<128xf32>
    %20 = vector.shape_cast %19 : vector<128xf32> to vector<1x128xf32>
    %21 = arith.addf %18, %20 : vector<1x128xf32>
    %c0_14 = arith.constant 0 : index
    %c0_15 = arith.constant 0 : index
    %22 = vector.load %arg6[%c0_14, %c0_15] : memref<1x128xf32, #tpu.memory_space<vmem>>, vector<1x128xf32>
    tpu.vector_store %arg6[%c0_14, %c0_15], %21 {strides = array<i32>} : memref<1x128xf32, #tpu.memory_space<vmem>>, vector<1x128xf32>,
    %c0_16 = arith.constant 0 : index
    %c0_17 = arith.constant 0 : index
    %23 = vector.load %arg7[%c0_16, %c0_17] : memref<1x128xf32, #tpu.memory_space<vmem>>, vector<1x128xf32>
    %24 = arith.mulf %17, %17 : vector<512x128xf32>
    %cst_18 = arith.constant dense<0.000000e+00> : vector<128xf32>
    %25 = vector.multi_reduction <add>, %24, %cst_18 [0] : vector<512x128xf32> to vector<128xf32>
    %26 = vector.shape_cast %25 : vector<128xf32> to vector<1x128xf32>
    %27 = arith.addf %23, %26 : vector<1x128xf32>
    %c0_19 = arith.constant 0 : index
    %c0_20 = arith.constant 0 : index
    %28 = vector.load %arg7[%c0_19, %c0_20] : memref<1x128xf32, #tpu.memory_space<vmem>>, vector<1x128xf32>
    tpu.vector_store %arg7[%c0_19, %c0_20], %27 {strides = array<i32>} : memref<1x128xf32, #tpu.memory_space<vmem>>, vector<1x128xf32>,
    return
  }
  func.func @transform_0(%arg0: i32) -> (i32, i32) {
    %c0_i32 = arith.constant 0 : i32
    %c0_i32_0 = arith.constant 0 : i32
    return %arg0, %c0_i32 : i32, i32
  }
  func.func @transform_1(%arg0: i32) -> (i32, i32) {
    %c0_i32 = arith.constant 0 : i32
    %c0_i32_0 = arith.constant 0 : i32
    %c0_i32_1 = arith.constant 0 : i32
    return %c0_i32, %c0_i32_0 : i32, i32
  }
  func.func @transform_2(%arg0: i32) -> (i32, i32) {
    %c0_i32 = arith.constant 0 : i32
    %c0_i32_0 = arith.constant 0 : i32
    %c0_i32_1 = arith.constant 0 : i32
    return %c0_i32, %c0_i32_0 : i32, i32
  }
  func.func @transform_3(%arg0: i32) -> (i32, i32) {
    %c0_i32 = arith.constant 0 : i32
    %c0_i32_0 = arith.constant 0 : i32
    %c0_i32_1 = arith.constant 0 : i32
    return %c0_i32, %c0_i32_0 : i32, i32
  }
  func.func @transform_4(%arg0: i32) -> (i32, i32) {
    %c0_i32 = arith.constant 0 : i32
    %c0_i32_0 = arith.constant 0 : i32
    return %arg0, %c0_i32 : i32, i32
  }
  func.func @transform_5(%arg0: i32) -> (i32, i32) {
    %c0_i32 = arith.constant 0 : i32
    %c0_i32_0 = arith.constant 0 : i32
    %c0_i32_1 = arith.constant 0 : i32
    return %c0_i32, %c0_i32_0 : i32, i32
  }
  func.func @transform_6(%arg0: i32) -> (i32, i32) {
    %c0_i32 = arith.constant 0 : i32
    %c0_i32_0 = arith.constant 0 : i32
    %c0_i32_1 = arith.constant 0 : i32
    return %c0_i32, %c0_i32_0 : i32, i32
  }
}

module attributes {stable_mosaic.version = 11 : i64} {
  func.func @_conv3x3_kernel(%arg0: i32, %arg1: memref<1x16x16x128xbf16, #tpu.memory_space<vmem>>, %arg2: memref<1x128xf32, #tpu.memory_space<vmem>>, %arg3: memref<1x128xf32, #tpu.memory_space<vmem>>, %arg4: memref<3x3x128x128xbf16, #tpu.memory_space<vmem>>, %arg5: memref<1x8x8x128xbf16, #tpu.memory_space<vmem>>, %arg6: memref<1x128xf32, #tpu.memory_space<vmem>>, %arg7: memref<1x128xf32, #tpu.memory_space<vmem>>, %arg8: memref<18x18x128xbf16, #tpu.memory_space<vmem>>) attributes {dimension_semantics = [#tpu.dimension_semantics<arbitrary>], iteration_bounds = array<i64: 2>, scalar_prefetch = 0 : i64, scratch_operands = 1 : i64, tpu.core_type = #tpu.core_type<tc>, window_params = [{transform_indices = @transform_0, window_bounds = array<i64: 1, 16, 16, 128>}, {pipeline_mode = #tpu.pipeline_mode<synchronous>, transform_indices = @transform_1, window_bounds = array<i64: 1, 128>}, {pipeline_mode = #tpu.pipeline_mode<synchronous>, transform_indices = @transform_2, window_bounds = array<i64: 1, 128>}, {pipeline_mode = #tpu.pipeline_mode<synchronous>, transform_indices = @transform_3, window_bounds = array<i64: 3, 3, 128, 128>}, {transform_indices = @transform_4, window_bounds = array<i64: 1, 8, 8, 128>}, {pipeline_mode = #tpu.pipeline_mode<synchronous>, transform_indices = @transform_5, window_bounds = array<i64: 1, 128>}, {pipeline_mode = #tpu.pipeline_mode<synchronous>, transform_indices = @transform_6, window_bounds = array<i64: 1, 128>}]} {
    %c0_i32 = arith.constant 0 : i32
    %0 = arith.cmpi eq, %arg0, %c0_i32 : i32
    %1 = arith.extui %0 : i1 to i32
    %c0_i32_0 = arith.constant 0 : i32
    %2 = arith.cmpi ne, %1, %c0_i32_0 : i32
    scf.if %2 {
      %cst_111 = arith.constant 0.000000e+00 : f32
      %123 = vector.broadcast %cst_111 : f32 to vector<1x128xf32>
      %c0_112 = arith.constant 0 : index
      %c0_113 = arith.constant 0 : index
      %124 = vector.load %arg6[%c0_112, %c0_113] : memref<1x128xf32, #tpu.memory_space<vmem>>, vector<1x128xf32>
      tpu.vector_store %arg6[%c0_112, %c0_113], %123 {strides = array<i32>} : memref<1x128xf32, #tpu.memory_space<vmem>>, vector<1x128xf32>,
      %cst_114 = arith.constant 0.000000e+00 : f32
      %125 = vector.broadcast %cst_114 : f32 to vector<1x128xf32>
      %c0_115 = arith.constant 0 : index
      %c0_116 = arith.constant 0 : index
      %126 = vector.load %arg7[%c0_115, %c0_116] : memref<1x128xf32, #tpu.memory_space<vmem>>, vector<1x128xf32>
      tpu.vector_store %arg7[%c0_115, %c0_116], %125 {strides = array<i32>} : memref<1x128xf32, #tpu.memory_space<vmem>>, vector<1x128xf32>,
    } else {
    }
    %c0 = arith.constant 0 : index
    %c0_1 = arith.constant 0 : index
    %c0_2 = arith.constant 0 : index
    %c0_3 = arith.constant 0 : index
    %3 = vector.load %arg1[%c0, %c0_1, %c0_2, %c0_3] : memref<1x16x16x128xbf16, #tpu.memory_space<vmem>>, vector<1x16x16x128xbf16>
    %4 = vector.shape_cast %3 : vector<1x16x16x128xbf16> to vector<16x16x128xbf16>
    %5 = arith.extf %4 : vector<16x16x128xbf16> to vector<16x16x128xf32>
    %c0_4 = arith.constant 0 : index
    %c0_5 = arith.constant 0 : index
    %6 = vector.load %arg2[%c0_4, %c0_5] : memref<1x128xf32, #tpu.memory_space<vmem>>, vector<1x128xf32>
    %7 = vector.shape_cast %6 : vector<1x128xf32> to vector<1x1x128xf32>
    %8 = vector.broadcast %7 : vector<1x1x128xf32> to vector<16x16x128xf32>
    %9 = arith.mulf %5, %8 : vector<16x16x128xf32>
    %c0_6 = arith.constant 0 : index
    %c0_7 = arith.constant 0 : index
    %10 = vector.load %arg3[%c0_6, %c0_7] : memref<1x128xf32, #tpu.memory_space<vmem>>, vector<1x128xf32>
    %11 = vector.shape_cast %10 : vector<1x128xf32> to vector<1x1x128xf32>
    %12 = vector.broadcast %11 : vector<1x1x128xf32> to vector<16x16x128xf32>
    %13 = arith.addf %9, %12 : vector<16x16x128xf32>
    %cst = arith.constant 0.000000e+00 : f32
    %14 = vector.broadcast %cst : f32 to vector<16x16x128xf32>
    %15 = arith.maximumf %13, %14 : vector<16x16x128xf32>
    %16 = arith.truncf %15 : vector<16x16x128xf32> to vector<16x16x128xbf16>
    %cst_8 = arith.constant 0.000000e+00 : bf16
    %17 = vector.broadcast %cst_8 : bf16 to vector<1x18x128xbf16>
    %c0_9 = arith.constant 0 : index
    %c0_10 = arith.constant 0 : index
    %c0_11 = arith.constant 0 : index
    %18 = vector.load %arg8[%c0_9, %c0_10, %c0_11] : memref<18x18x128xbf16, #tpu.memory_space<vmem>>, vector<1x18x128xbf16>
    tpu.vector_store %arg8[%c0_9, %c0_10, %c0_11], %17 {strides = array<i32>} : memref<18x18x128xbf16, #tpu.memory_space<vmem>>, vector<1x18x128xbf16>,
    %cst_12 = arith.constant 0.000000e+00 : bf16
    %19 = vector.broadcast %cst_12 : bf16 to vector<1x18x128xbf16>
    %c17 = arith.constant 17 : index
    %c0_13 = arith.constant 0 : index
    %c0_14 = arith.constant 0 : index
    %20 = vector.load %arg8[%c17, %c0_13, %c0_14] : memref<18x18x128xbf16, #tpu.memory_space<vmem>>, vector<1x18x128xbf16>
    tpu.vector_store %arg8[%c17, %c0_13, %c0_14], %19 {strides = array<i32>} : memref<18x18x128xbf16, #tpu.memory_space<vmem>>, vector<1x18x128xbf16>,
    %cst_15 = arith.constant 0.000000e+00 : bf16
    %21 = vector.broadcast %cst_15 : bf16 to vector<16x1x128xbf16>
    %c1 = arith.constant 1 : index
    %c0_16 = arith.constant 0 : index
    %c0_17 = arith.constant 0 : index
    %22 = vector.load %arg8[%c1, %c0_16, %c0_17] : memref<18x18x128xbf16, #tpu.memory_space<vmem>>, vector<16x1x128xbf16>
    tpu.vector_store %arg8[%c1, %c0_16, %c0_17], %21 {strides = array<i32>} : memref<18x18x128xbf16, #tpu.memory_space<vmem>>, vector<16x1x128xbf16>,
    %cst_18 = arith.constant 0.000000e+00 : bf16
    %23 = vector.broadcast %cst_18 : bf16 to vector<16x1x128xbf16>
    %c1_19 = arith.constant 1 : index
    %c17_20 = arith.constant 17 : index
    %c0_21 = arith.constant 0 : index
    %24 = vector.load %arg8[%c1_19, %c17_20, %c0_21] : memref<18x18x128xbf16, #tpu.memory_space<vmem>>, vector<16x1x128xbf16>
    tpu.vector_store %arg8[%c1_19, %c17_20, %c0_21], %23 {strides = array<i32>} : memref<18x18x128xbf16, #tpu.memory_space<vmem>>, vector<16x1x128xbf16>,
    %c1_22 = arith.constant 1 : index
    %c1_23 = arith.constant 1 : index
    %c0_24 = arith.constant 0 : index
    %25 = vector.load %arg8[%c1_22, %c1_23, %c0_24] : memref<18x18x128xbf16, #tpu.memory_space<vmem>>, vector<16x16x128xbf16>
    tpu.vector_store %arg8[%c1_22, %c1_23, %c0_24], %16 {strides = array<i32>} : memref<18x18x128xbf16, #tpu.memory_space<vmem>>, vector<16x16x128xbf16>,
    %cst_25 = arith.constant 0.000000e+00 : f32
    %26 = vector.broadcast %cst_25 : f32 to vector<64x128xf32>
    %c0_26 = arith.constant 0 : index
    %c0_27 = arith.constant 0 : index
    %c0_28 = arith.constant 0 : index
    %27 = vector.load %arg8[%c0_26, %c0_27, %c0_28] : memref<18x18x128xbf16, #tpu.memory_space<vmem>>, vector<16x16x128xbf16>
    %28 = vector.shape_cast %27 : vector<16x16x128xbf16> to vector<8x2x8x2x128xbf16>
    %29 = vector.extract_strided_slice %28 {offsets = [0, 0, 0, 0, 0], sizes = [8, 1, 8, 1, 128], strides = [1, 1, 1, 1, 1]} : vector<8x2x8x2x128xbf16> to vector<8x1x8x1x128xbf16>
    %30 = vector.shape_cast %29 : vector<8x1x8x1x128xbf16> to vector<8x8x128xbf16>
    %c0_29 = arith.constant 0 : index
    %c0_30 = arith.constant 0 : index
    %c0_31 = arith.constant 0 : index
    %c0_32 = arith.constant 0 : index
    %31 = vector.load %arg4[%c0_29, %c0_30, %c0_31, %c0_32] : memref<3x3x128x128xbf16, #tpu.memory_space<vmem>>, vector<1x1x128x128xbf16>
    %32 = vector.shape_cast %31 : vector<1x1x128x128xbf16> to vector<128x128xbf16>
    %33 = vector.shape_cast %30 : vector<8x8x128xbf16> to vector<64x128xbf16>
    %cst_33 = arith.constant dense<0.000000e+00> : vector<64x128xf32>
    %34 = tpu.matmul %33, %32, %cst_33 {dimension_numbers = #tpu.dot_dimension_numbers<[1], [0], [0], [1], [0, 0, 1, 1], [], []>} : vector<64x128xbf16>, vector<128x128xbf16>, vector<64x128xf32> -> vector<64x128xf32>
    %35 = arith.addf %26, %34 : vector<64x128xf32>
    %c0_34 = arith.constant 0 : index
    %c1_35 = arith.constant 1 : index
    %c0_36 = arith.constant 0 : index
    %36 = vector.load %arg8[%c0_34, %c1_35, %c0_36] : memref<18x18x128xbf16, #tpu.memory_space<vmem>>, vector<16x16x128xbf16>
    %37 = vector.shape_cast %36 : vector<16x16x128xbf16> to vector<8x2x8x2x128xbf16>
    %38 = vector.extract_strided_slice %37 {offsets = [0, 0, 0, 0, 0], sizes = [8, 1, 8, 1, 128], strides = [1, 1, 1, 1, 1]} : vector<8x2x8x2x128xbf16> to vector<8x1x8x1x128xbf16>
    %39 = vector.shape_cast %38 : vector<8x1x8x1x128xbf16> to vector<8x8x128xbf16>
    %c0_37 = arith.constant 0 : index
    %c1_38 = arith.constant 1 : index
    %c0_39 = arith.constant 0 : index
    %c0_40 = arith.constant 0 : index
    %40 = vector.load %arg4[%c0_37, %c1_38, %c0_39, %c0_40] : memref<3x3x128x128xbf16, #tpu.memory_space<vmem>>, vector<1x1x128x128xbf16>
    %41 = vector.shape_cast %40 : vector<1x1x128x128xbf16> to vector<128x128xbf16>
    %42 = vector.shape_cast %39 : vector<8x8x128xbf16> to vector<64x128xbf16>
    %cst_41 = arith.constant dense<0.000000e+00> : vector<64x128xf32>
    %43 = tpu.matmul %42, %41, %cst_41 {dimension_numbers = #tpu.dot_dimension_numbers<[1], [0], [0], [1], [0, 0, 1, 1], [], []>} : vector<64x128xbf16>, vector<128x128xbf16>, vector<64x128xf32> -> vector<64x128xf32>
    %44 = arith.addf %35, %43 : vector<64x128xf32>
    %c0_42 = arith.constant 0 : index
    %c2 = arith.constant 2 : index
    %c0_43 = arith.constant 0 : index
    %45 = vector.load %arg8[%c0_42, %c2, %c0_43] : memref<18x18x128xbf16, #tpu.memory_space<vmem>>, vector<16x16x128xbf16>
    %46 = vector.shape_cast %45 : vector<16x16x128xbf16> to vector<8x2x8x2x128xbf16>
    %47 = vector.extract_strided_slice %46 {offsets = [0, 0, 0, 0, 0], sizes = [8, 1, 8, 1, 128], strides = [1, 1, 1, 1, 1]} : vector<8x2x8x2x128xbf16> to vector<8x1x8x1x128xbf16>
    %48 = vector.shape_cast %47 : vector<8x1x8x1x128xbf16> to vector<8x8x128xbf16>
    %c0_44 = arith.constant 0 : index
    %c2_45 = arith.constant 2 : index
    %c0_46 = arith.constant 0 : index
    %c0_47 = arith.constant 0 : index
    %49 = vector.load %arg4[%c0_44, %c2_45, %c0_46, %c0_47] : memref<3x3x128x128xbf16, #tpu.memory_space<vmem>>, vector<1x1x128x128xbf16>
    %50 = vector.shape_cast %49 : vector<1x1x128x128xbf16> to vector<128x128xbf16>
    %51 = vector.shape_cast %48 : vector<8x8x128xbf16> to vector<64x128xbf16>
    %cst_48 = arith.constant dense<0.000000e+00> : vector<64x128xf32>
    %52 = tpu.matmul %51, %50, %cst_48 {dimension_numbers = #tpu.dot_dimension_numbers<[1], [0], [0], [1], [0, 0, 1, 1], [], []>} : vector<64x128xbf16>, vector<128x128xbf16>, vector<64x128xf32> -> vector<64x128xf32>
    %53 = arith.addf %44, %52 : vector<64x128xf32>
    %c1_49 = arith.constant 1 : index
    %c0_50 = arith.constant 0 : index
    %c0_51 = arith.constant 0 : index
    %54 = vector.load %arg8[%c1_49, %c0_50, %c0_51] : memref<18x18x128xbf16, #tpu.memory_space<vmem>>, vector<16x16x128xbf16>
    %55 = vector.shape_cast %54 : vector<16x16x128xbf16> to vector<8x2x8x2x128xbf16>
    %56 = vector.extract_strided_slice %55 {offsets = [0, 0, 0, 0, 0], sizes = [8, 1, 8, 1, 128], strides = [1, 1, 1, 1, 1]} : vector<8x2x8x2x128xbf16> to vector<8x1x8x1x128xbf16>
    %57 = vector.shape_cast %56 : vector<8x1x8x1x128xbf16> to vector<8x8x128xbf16>
    %c1_52 = arith.constant 1 : index
    %c0_53 = arith.constant 0 : index
    %c0_54 = arith.constant 0 : index
    %c0_55 = arith.constant 0 : index
    %58 = vector.load %arg4[%c1_52, %c0_53, %c0_54, %c0_55] : memref<3x3x128x128xbf16, #tpu.memory_space<vmem>>, vector<1x1x128x128xbf16>
    %59 = vector.shape_cast %58 : vector<1x1x128x128xbf16> to vector<128x128xbf16>
    %60 = vector.shape_cast %57 : vector<8x8x128xbf16> to vector<64x128xbf16>
    %cst_56 = arith.constant dense<0.000000e+00> : vector<64x128xf32>
    %61 = tpu.matmul %60, %59, %cst_56 {dimension_numbers = #tpu.dot_dimension_numbers<[1], [0], [0], [1], [0, 0, 1, 1], [], []>} : vector<64x128xbf16>, vector<128x128xbf16>, vector<64x128xf32> -> vector<64x128xf32>
    %62 = arith.addf %53, %61 : vector<64x128xf32>
    %c1_57 = arith.constant 1 : index
    %c1_58 = arith.constant 1 : index
    %c0_59 = arith.constant 0 : index
    %63 = vector.load %arg8[%c1_57, %c1_58, %c0_59] : memref<18x18x128xbf16, #tpu.memory_space<vmem>>, vector<16x16x128xbf16>
    %64 = vector.shape_cast %63 : vector<16x16x128xbf16> to vector<8x2x8x2x128xbf16>
    %65 = vector.extract_strided_slice %64 {offsets = [0, 0, 0, 0, 0], sizes = [8, 1, 8, 1, 128], strides = [1, 1, 1, 1, 1]} : vector<8x2x8x2x128xbf16> to vector<8x1x8x1x128xbf16>
    %66 = vector.shape_cast %65 : vector<8x1x8x1x128xbf16> to vector<8x8x128xbf16>
    %c1_60 = arith.constant 1 : index
    %c1_61 = arith.constant 1 : index
    %c0_62 = arith.constant 0 : index
    %c0_63 = arith.constant 0 : index
    %67 = vector.load %arg4[%c1_60, %c1_61, %c0_62, %c0_63] : memref<3x3x128x128xbf16, #tpu.memory_space<vmem>>, vector<1x1x128x128xbf16>
    %68 = vector.shape_cast %67 : vector<1x1x128x128xbf16> to vector<128x128xbf16>
    %69 = vector.shape_cast %66 : vector<8x8x128xbf16> to vector<64x128xbf16>
    %cst_64 = arith.constant dense<0.000000e+00> : vector<64x128xf32>
    %70 = tpu.matmul %69, %68, %cst_64 {dimension_numbers = #tpu.dot_dimension_numbers<[1], [0], [0], [1], [0, 0, 1, 1], [], []>} : vector<64x128xbf16>, vector<128x128xbf16>, vector<64x128xf32> -> vector<64x128xf32>
    %71 = arith.addf %62, %70 : vector<64x128xf32>
    %c1_65 = arith.constant 1 : index
    %c2_66 = arith.constant 2 : index
    %c0_67 = arith.constant 0 : index
    %72 = vector.load %arg8[%c1_65, %c2_66, %c0_67] : memref<18x18x128xbf16, #tpu.memory_space<vmem>>, vector<16x16x128xbf16>
    %73 = vector.shape_cast %72 : vector<16x16x128xbf16> to vector<8x2x8x2x128xbf16>
    %74 = vector.extract_strided_slice %73 {offsets = [0, 0, 0, 0, 0], sizes = [8, 1, 8, 1, 128], strides = [1, 1, 1, 1, 1]} : vector<8x2x8x2x128xbf16> to vector<8x1x8x1x128xbf16>
    %75 = vector.shape_cast %74 : vector<8x1x8x1x128xbf16> to vector<8x8x128xbf16>
    %c1_68 = arith.constant 1 : index
    %c2_69 = arith.constant 2 : index
    %c0_70 = arith.constant 0 : index
    %c0_71 = arith.constant 0 : index
    %76 = vector.load %arg4[%c1_68, %c2_69, %c0_70, %c0_71] : memref<3x3x128x128xbf16, #tpu.memory_space<vmem>>, vector<1x1x128x128xbf16>
    %77 = vector.shape_cast %76 : vector<1x1x128x128xbf16> to vector<128x128xbf16>
    %78 = vector.shape_cast %75 : vector<8x8x128xbf16> to vector<64x128xbf16>
    %cst_72 = arith.constant dense<0.000000e+00> : vector<64x128xf32>
    %79 = tpu.matmul %78, %77, %cst_72 {dimension_numbers = #tpu.dot_dimension_numbers<[1], [0], [0], [1], [0, 0, 1, 1], [], []>} : vector<64x128xbf16>, vector<128x128xbf16>, vector<64x128xf32> -> vector<64x128xf32>
    %80 = arith.addf %71, %79 : vector<64x128xf32>
    %c2_73 = arith.constant 2 : index
    %c0_74 = arith.constant 0 : index
    %c0_75 = arith.constant 0 : index
    %81 = vector.load %arg8[%c2_73, %c0_74, %c0_75] : memref<18x18x128xbf16, #tpu.memory_space<vmem>>, vector<16x16x128xbf16>
    %82 = vector.shape_cast %81 : vector<16x16x128xbf16> to vector<8x2x8x2x128xbf16>
    %83 = vector.extract_strided_slice %82 {offsets = [0, 0, 0, 0, 0], sizes = [8, 1, 8, 1, 128], strides = [1, 1, 1, 1, 1]} : vector<8x2x8x2x128xbf16> to vector<8x1x8x1x128xbf16>
    %84 = vector.shape_cast %83 : vector<8x1x8x1x128xbf16> to vector<8x8x128xbf16>
    %c2_76 = arith.constant 2 : index
    %c0_77 = arith.constant 0 : index
    %c0_78 = arith.constant 0 : index
    %c0_79 = arith.constant 0 : index
    %85 = vector.load %arg4[%c2_76, %c0_77, %c0_78, %c0_79] : memref<3x3x128x128xbf16, #tpu.memory_space<vmem>>, vector<1x1x128x128xbf16>
    %86 = vector.shape_cast %85 : vector<1x1x128x128xbf16> to vector<128x128xbf16>
    %87 = vector.shape_cast %84 : vector<8x8x128xbf16> to vector<64x128xbf16>
    %cst_80 = arith.constant dense<0.000000e+00> : vector<64x128xf32>
    %88 = tpu.matmul %87, %86, %cst_80 {dimension_numbers = #tpu.dot_dimension_numbers<[1], [0], [0], [1], [0, 0, 1, 1], [], []>} : vector<64x128xbf16>, vector<128x128xbf16>, vector<64x128xf32> -> vector<64x128xf32>
    %89 = arith.addf %80, %88 : vector<64x128xf32>
    %c2_81 = arith.constant 2 : index
    %c1_82 = arith.constant 1 : index
    %c0_83 = arith.constant 0 : index
    %90 = vector.load %arg8[%c2_81, %c1_82, %c0_83] : memref<18x18x128xbf16, #tpu.memory_space<vmem>>, vector<16x16x128xbf16>
    %91 = vector.shape_cast %90 : vector<16x16x128xbf16> to vector<8x2x8x2x128xbf16>
    %92 = vector.extract_strided_slice %91 {offsets = [0, 0, 0, 0, 0], sizes = [8, 1, 8, 1, 128], strides = [1, 1, 1, 1, 1]} : vector<8x2x8x2x128xbf16> to vector<8x1x8x1x128xbf16>
    %93 = vector.shape_cast %92 : vector<8x1x8x1x128xbf16> to vector<8x8x128xbf16>
    %c2_84 = arith.constant 2 : index
    %c1_85 = arith.constant 1 : index
    %c0_86 = arith.constant 0 : index
    %c0_87 = arith.constant 0 : index
    %94 = vector.load %arg4[%c2_84, %c1_85, %c0_86, %c0_87] : memref<3x3x128x128xbf16, #tpu.memory_space<vmem>>, vector<1x1x128x128xbf16>
    %95 = vector.shape_cast %94 : vector<1x1x128x128xbf16> to vector<128x128xbf16>
    %96 = vector.shape_cast %93 : vector<8x8x128xbf16> to vector<64x128xbf16>
    %cst_88 = arith.constant dense<0.000000e+00> : vector<64x128xf32>
    %97 = tpu.matmul %96, %95, %cst_88 {dimension_numbers = #tpu.dot_dimension_numbers<[1], [0], [0], [1], [0, 0, 1, 1], [], []>} : vector<64x128xbf16>, vector<128x128xbf16>, vector<64x128xf32> -> vector<64x128xf32>
    %98 = arith.addf %89, %97 : vector<64x128xf32>
    %c2_89 = arith.constant 2 : index
    %c2_90 = arith.constant 2 : index
    %c0_91 = arith.constant 0 : index
    %99 = vector.load %arg8[%c2_89, %c2_90, %c0_91] : memref<18x18x128xbf16, #tpu.memory_space<vmem>>, vector<16x16x128xbf16>
    %100 = vector.shape_cast %99 : vector<16x16x128xbf16> to vector<8x2x8x2x128xbf16>
    %101 = vector.extract_strided_slice %100 {offsets = [0, 0, 0, 0, 0], sizes = [8, 1, 8, 1, 128], strides = [1, 1, 1, 1, 1]} : vector<8x2x8x2x128xbf16> to vector<8x1x8x1x128xbf16>
    %102 = vector.shape_cast %101 : vector<8x1x8x1x128xbf16> to vector<8x8x128xbf16>
    %c2_92 = arith.constant 2 : index
    %c2_93 = arith.constant 2 : index
    %c0_94 = arith.constant 0 : index
    %c0_95 = arith.constant 0 : index
    %103 = vector.load %arg4[%c2_92, %c2_93, %c0_94, %c0_95] : memref<3x3x128x128xbf16, #tpu.memory_space<vmem>>, vector<1x1x128x128xbf16>
    %104 = vector.shape_cast %103 : vector<1x1x128x128xbf16> to vector<128x128xbf16>
    %105 = vector.shape_cast %102 : vector<8x8x128xbf16> to vector<64x128xbf16>
    %cst_96 = arith.constant dense<0.000000e+00> : vector<64x128xf32>
    %106 = tpu.matmul %105, %104, %cst_96 {dimension_numbers = #tpu.dot_dimension_numbers<[1], [0], [0], [1], [0, 0, 1, 1], [], []>} : vector<64x128xbf16>, vector<128x128xbf16>, vector<64x128xf32> -> vector<64x128xf32>
    %107 = arith.addf %98, %106 : vector<64x128xf32>
    %108 = arith.truncf %107 : vector<64x128xf32> to vector<64x128xbf16>
    %109 = vector.shape_cast %108 : vector<64x128xbf16> to vector<1x8x8x128xbf16>
    %c0_97 = arith.constant 0 : index
    %c0_98 = arith.constant 0 : index
    %c0_99 = arith.constant 0 : index
    %c0_100 = arith.constant 0 : index
    %110 = vector.load %arg5[%c0_97, %c0_98, %c0_99, %c0_100] : memref<1x8x8x128xbf16, #tpu.memory_space<vmem>>, vector<1x8x8x128xbf16>
    tpu.vector_store %arg5[%c0_97, %c0_98, %c0_99, %c0_100], %109 {strides = array<i32>} : memref<1x8x8x128xbf16, #tpu.memory_space<vmem>>, vector<1x8x8x128xbf16>,
    %111 = arith.extf %108 : vector<64x128xbf16> to vector<64x128xf32>
    %c0_101 = arith.constant 0 : index
    %c0_102 = arith.constant 0 : index
    %112 = vector.load %arg6[%c0_101, %c0_102] : memref<1x128xf32, #tpu.memory_space<vmem>>, vector<1x128xf32>
    %cst_103 = arith.constant dense<0.000000e+00> : vector<128xf32>
    %113 = vector.multi_reduction <add>, %111, %cst_103 [0] : vector<64x128xf32> to vector<128xf32>
    %114 = vector.shape_cast %113 : vector<128xf32> to vector<1x128xf32>
    %115 = arith.addf %112, %114 : vector<1x128xf32>
    %c0_104 = arith.constant 0 : index
    %c0_105 = arith.constant 0 : index
    %116 = vector.load %arg6[%c0_104, %c0_105] : memref<1x128xf32, #tpu.memory_space<vmem>>, vector<1x128xf32>
    tpu.vector_store %arg6[%c0_104, %c0_105], %115 {strides = array<i32>} : memref<1x128xf32, #tpu.memory_space<vmem>>, vector<1x128xf32>,
    %c0_106 = arith.constant 0 : index
    %c0_107 = arith.constant 0 : index
    %117 = vector.load %arg7[%c0_106, %c0_107] : memref<1x128xf32, #tpu.memory_space<vmem>>, vector<1x128xf32>
    %118 = arith.mulf %111, %111 : vector<64x128xf32>
    %cst_108 = arith.constant dense<0.000000e+00> : vector<128xf32>
    %119 = vector.multi_reduction <add>, %118, %cst_108 [0] : vector<64x128xf32> to vector<128xf32>
    %120 = vector.shape_cast %119 : vector<128xf32> to vector<1x128xf32>
    %121 = arith.addf %117, %120 : vector<1x128xf32>
    %c0_109 = arith.constant 0 : index
    %c0_110 = arith.constant 0 : index
    %122 = vector.load %arg7[%c0_109, %c0_110] : memref<1x128xf32, #tpu.memory_space<vmem>>, vector<1x128xf32>
    tpu.vector_store %arg7[%c0_109, %c0_110], %121 {strides = array<i32>} : memref<1x128xf32, #tpu.memory_space<vmem>>, vector<1x128xf32>,
    return
  }
  func.func @transform_0(%arg0: i32) -> (i32, i32, i32, i32) {
    %c0_i32 = arith.constant 0 : i32
    %c0_i32_0 = arith.constant 0 : i32
    %c0_i32_1 = arith.constant 0 : i32
    %c0_i32_2 = arith.constant 0 : i32
    return %arg0, %c0_i32, %c0_i32_0, %c0_i32_1 : i32, i32, i32, i32
  }
  func.func @transform_1(%arg0: i32) -> (i32, i32) {
    %c0_i32 = arith.constant 0 : i32
    %c0_i32_0 = arith.constant 0 : i32
    %c0_i32_1 = arith.constant 0 : i32
    return %c0_i32, %c0_i32_0 : i32, i32
  }
  func.func @transform_2(%arg0: i32) -> (i32, i32) {
    %c0_i32 = arith.constant 0 : i32
    %c0_i32_0 = arith.constant 0 : i32
    %c0_i32_1 = arith.constant 0 : i32
    return %c0_i32, %c0_i32_0 : i32, i32
  }
  func.func @transform_3(%arg0: i32) -> (i32, i32, i32, i32) {
    %c0_i32 = arith.constant 0 : i32
    %c0_i32_0 = arith.constant 0 : i32
    %c0_i32_1 = arith.constant 0 : i32
    %c0_i32_2 = arith.constant 0 : i32
    %c0_i32_3 = arith.constant 0 : i32
    return %c0_i32, %c0_i32_0, %c0_i32_1, %c0_i32_2 : i32, i32, i32, i32
  }
  func.func @transform_4(%arg0: i32) -> (i32, i32, i32, i32) {
    %c0_i32 = arith.constant 0 : i32
    %c0_i32_0 = arith.constant 0 : i32
    %c0_i32_1 = arith.constant 0 : i32
    %c0_i32_2 = arith.constant 0 : i32
    return %arg0, %c0_i32, %c0_i32_0, %c0_i32_1 : i32, i32, i32, i32
  }
  func.func @transform_5(%arg0: i32) -> (i32, i32) {
    %c0_i32 = arith.constant 0 : i32
    %c0_i32_0 = arith.constant 0 : i32
    %c0_i32_1 = arith.constant 0 : i32
    return %c0_i32, %c0_i32_0 : i32, i32
  }
  func.func @transform_6(%arg0: i32) -> (i32, i32) {
    %c0_i32 = arith.constant 0 : i32
    %c0_i32_0 = arith.constant 0 : i32
    %c0_i32_1 = arith.constant 0 : i32
    return %c0_i32, %c0_i32_0 : i32, i32
  }
}

module attributes {stable_mosaic.version = 11 : i64} {
  func.func @_bnrelu_matmul_kernel(%arg0: i32, %arg1: memref<128x128xf32, #tpu.memory_space<vmem>>, %arg2: memref<1x128xf32, #tpu.memory_space<vmem>>, %arg3: memref<1x128xf32, #tpu.memory_space<vmem>>, %arg4: memref<128x128xbf16, #tpu.memory_space<vmem>>, %arg5: memref<128x128xbf16, #tpu.memory_space<vmem>>) attributes {dimension_semantics = [#tpu.dimension_semantics<parallel>], iteration_bounds = array<i64: 1>, scalar_prefetch = 0 : i64, scratch_operands = 0 : i64, tpu.core_type = #tpu.core_type<tc>, window_params = [{transform_indices = @transform_0, window_bounds = array<i64: 128, 128>}, {pipeline_mode = #tpu.pipeline_mode<synchronous>, transform_indices = @transform_1, window_bounds = array<i64: 1, 128>}, {pipeline_mode = #tpu.pipeline_mode<synchronous>, transform_indices = @transform_2, window_bounds = array<i64: 1, 128>}, {pipeline_mode = #tpu.pipeline_mode<synchronous>, transform_indices = @transform_3, window_bounds = array<i64: 128, 128>}, {transform_indices = @transform_4, window_bounds = array<i64: 128, 128>}]} {
    %c0 = arith.constant 0 : index
    %c0_0 = arith.constant 0 : index
    %0 = vector.load %arg1[%c0, %c0_0] : memref<128x128xf32, #tpu.memory_space<vmem>>, vector<128x128xf32>
    %c0_1 = arith.constant 0 : index
    %c0_2 = arith.constant 0 : index
    %1 = vector.load %arg2[%c0_1, %c0_2] : memref<1x128xf32, #tpu.memory_space<vmem>>, vector<1x128xf32>
    %2 = vector.broadcast %1 : vector<1x128xf32> to vector<128x128xf32>
    %3 = arith.mulf %0, %2 : vector<128x128xf32>
    %c0_3 = arith.constant 0 : index
    %c0_4 = arith.constant 0 : index
    %4 = vector.load %arg3[%c0_3, %c0_4] : memref<1x128xf32, #tpu.memory_space<vmem>>, vector<1x128xf32>
    %5 = vector.broadcast %4 : vector<1x128xf32> to vector<128x128xf32>
    %6 = arith.addf %3, %5 : vector<128x128xf32>
    %cst = arith.constant 0.000000e+00 : f32
    %7 = vector.broadcast %cst : f32 to vector<128x128xf32>
    %8 = arith.maximumf %6, %7 : vector<128x128xf32>
    %9 = arith.truncf %8 : vector<128x128xf32> to vector<128x128xbf16>
    %c0_5 = arith.constant 0 : index
    %c0_6 = arith.constant 0 : index
    %10 = vector.load %arg4[%c0_5, %c0_6] : memref<128x128xbf16, #tpu.memory_space<vmem>>, vector<128x128xbf16>
    %cst_7 = arith.constant dense<0.000000e+00> : vector<128x128xf32>
    %11 = tpu.matmul %9, %10, %cst_7 {dimension_numbers = #tpu.dot_dimension_numbers<[1], [0], [0], [1], [0, 0, 1, 1], [], []>} : vector<128x128xbf16>, vector<128x128xbf16>, vector<128x128xf32> -> vector<128x128xf32>
    %12 = arith.truncf %11 : vector<128x128xf32> to vector<128x128xbf16>
    %c0_8 = arith.constant 0 : index
    %c0_9 = arith.constant 0 : index
    %13 = vector.load %arg5[%c0_8, %c0_9] : memref<128x128xbf16, #tpu.memory_space<vmem>>, vector<128x128xbf16>
    tpu.vector_store %arg5[%c0_8, %c0_9], %12 {strides = array<i32>} : memref<128x128xbf16, #tpu.memory_space<vmem>>, vector<128x128xbf16>,
    return
  }
  func.func @transform_0(%arg0: i32) -> (i32, i32) {
    %c0_i32 = arith.constant 0 : i32
    %c0_i32_0 = arith.constant 0 : i32
    return %arg0, %c0_i32 : i32, i32
  }
  func.func @transform_1(%arg0: i32) -> (i32, i32) {
    %c0_i32 = arith.constant 0 : i32
    %c0_i32_0 = arith.constant 0 : i32
    %c0_i32_1 = arith.constant 0 : i32
    return %c0_i32, %c0_i32_0 : i32, i32
  }
  func.func @transform_2(%arg0: i32) -> (i32, i32) {
    %c0_i32 = arith.constant 0 : i32
    %c0_i32_0 = arith.constant 0 : i32
    %c0_i32_1 = arith.constant 0 : i32
    return %c0_i32, %c0_i32_0 : i32, i32
  }
  func.func @transform_3(%arg0: i32) -> (i32, i32) {
    %c0_i32 = arith.constant 0 : i32
    %c0_i32_0 = arith.constant 0 : i32
    %c0_i32_1 = arith.constant 0 : i32
    return %c0_i32, %c0_i32_0 : i32, i32
  }
  func.func @transform_4(%arg0: i32) -> (i32, i32) {
    %c0_i32 = arith.constant 0 : i32
    %c0_i32_0 = arith.constant 0 : i32
    return %arg0, %c0_i32 : i32, i32
  }
}

module attributes {stable_mosaic.version = 11 : i64} {
  func.func @_bnrelu_matmul_add_kernel(%arg0: i32, %arg1: memref<128x128xbf16, #tpu.memory_space<vmem>>, %arg2: memref<1x128xf32, #tpu.memory_space<vmem>>, %arg3: memref<1x128xf32, #tpu.memory_space<vmem>>, %arg4: memref<128x128xbf16, #tpu.memory_space<vmem>>, %arg5: memref<128x128xbf16, #tpu.memory_space<vmem>>, %arg6: memref<128x128xf32, #tpu.memory_space<vmem>>) attributes {dimension_semantics = [#tpu.dimension_semantics<parallel>], iteration_bounds = array<i64: 1>, scalar_prefetch = 0 : i64, scratch_operands = 0 : i64, tpu.core_type = #tpu.core_type<tc>, window_params = [{transform_indices = @transform_0, window_bounds = array<i64: 128, 128>}, {pipeline_mode = #tpu.pipeline_mode<synchronous>, transform_indices = @transform_1, window_bounds = array<i64: 1, 128>}, {pipeline_mode = #tpu.pipeline_mode<synchronous>, transform_indices = @transform_2, window_bounds = array<i64: 1, 128>}, {pipeline_mode = #tpu.pipeline_mode<synchronous>, transform_indices = @transform_3, window_bounds = array<i64: 128, 128>}, {transform_indices = @transform_4, window_bounds = array<i64: 128, 128>}, {transform_indices = @transform_5, window_bounds = array<i64: 128, 128>}]} {
    %c0 = arith.constant 0 : index
    %c0_0 = arith.constant 0 : index
    %0 = vector.load %arg1[%c0, %c0_0] : memref<128x128xbf16, #tpu.memory_space<vmem>>, vector<128x128xbf16>
    %1 = arith.extf %0 : vector<128x128xbf16> to vector<128x128xf32>
    %c0_1 = arith.constant 0 : index
    %c0_2 = arith.constant 0 : index
    %2 = vector.load %arg2[%c0_1, %c0_2] : memref<1x128xf32, #tpu.memory_space<vmem>>, vector<1x128xf32>
    %3 = vector.broadcast %2 : vector<1x128xf32> to vector<128x128xf32>
    %4 = arith.mulf %1, %3 : vector<128x128xf32>
    %c0_3 = arith.constant 0 : index
    %c0_4 = arith.constant 0 : index
    %5 = vector.load %arg3[%c0_3, %c0_4] : memref<1x128xf32, #tpu.memory_space<vmem>>, vector<1x128xf32>
    %6 = vector.broadcast %5 : vector<1x128xf32> to vector<128x128xf32>
    %7 = arith.addf %4, %6 : vector<128x128xf32>
    %cst = arith.constant 0.000000e+00 : f32
    %8 = vector.broadcast %cst : f32 to vector<128x128xf32>
    %9 = arith.maximumf %7, %8 : vector<128x128xf32>
    %10 = arith.truncf %9 : vector<128x128xf32> to vector<128x128xbf16>
    %c0_5 = arith.constant 0 : index
    %c0_6 = arith.constant 0 : index
    %11 = vector.load %arg4[%c0_5, %c0_6] : memref<128x128xbf16, #tpu.memory_space<vmem>>, vector<128x128xbf16>
    %cst_7 = arith.constant dense<0.000000e+00> : vector<128x128xf32>
    %12 = tpu.matmul %10, %11, %cst_7 {dimension_numbers = #tpu.dot_dimension_numbers<[1], [0], [0], [1], [0, 0, 1, 1], [], []>} : vector<128x128xbf16>, vector<128x128xbf16>, vector<128x128xf32> -> vector<128x128xf32>
    %c0_8 = arith.constant 0 : index
    %c0_9 = arith.constant 0 : index
    %13 = vector.load %arg5[%c0_8, %c0_9] : memref<128x128xbf16, #tpu.memory_space<vmem>>, vector<128x128xbf16>
    %14 = arith.extf %13 : vector<128x128xbf16> to vector<128x128xf32>
    %15 = arith.addf %12, %14 : vector<128x128xf32>
    %c0_10 = arith.constant 0 : index
    %c0_11 = arith.constant 0 : index
    %16 = vector.load %arg6[%c0_10, %c0_11] : memref<128x128xf32, #tpu.memory_space<vmem>>, vector<128x128xf32>
    tpu.vector_store %arg6[%c0_10, %c0_11], %15 {strides = array<i32>} : memref<128x128xf32, #tpu.memory_space<vmem>>, vector<128x128xf32>,
    return
  }
  func.func @transform_0(%arg0: i32) -> (i32, i32) {
    %c0_i32 = arith.constant 0 : i32
    %c0_i32_0 = arith.constant 0 : i32
    return %arg0, %c0_i32 : i32, i32
  }
  func.func @transform_1(%arg0: i32) -> (i32, i32) {
    %c0_i32 = arith.constant 0 : i32
    %c0_i32_0 = arith.constant 0 : i32
    %c0_i32_1 = arith.constant 0 : i32
    return %c0_i32, %c0_i32_0 : i32, i32
  }
  func.func @transform_2(%arg0: i32) -> (i32, i32) {
    %c0_i32 = arith.constant 0 : i32
    %c0_i32_0 = arith.constant 0 : i32
    %c0_i32_1 = arith.constant 0 : i32
    return %c0_i32, %c0_i32_0 : i32, i32
  }
  func.func @transform_3(%arg0: i32) -> (i32, i32) {
    %c0_i32 = arith.constant 0 : i32
    %c0_i32_0 = arith.constant 0 : i32
    %c0_i32_1 = arith.constant 0 : i32
    return %c0_i32, %c0_i32_0 : i32, i32
  }
  func.func @transform_4(%arg0: i32) -> (i32, i32) {
    %c0_i32 = arith.constant 0 : i32
    %c0_i32_0 = arith.constant 0 : i32
    return %arg0, %c0_i32 : i32, i32
  }
  func.func @transform_5(%arg0: i32) -> (i32, i32) {
    %c0_i32 = arith.constant 0 : i32
    %c0_i32_0 = arith.constant 0 : i32
    return %arg0, %c0_i32 : i32, i32
  }
}

</mosaic_0001>

<bundles_post_ra>
// kernel: preact_bottleneck_forward.5
= control target key start
LH: loop header
LB: loop body
LE: loop exit
PB: predicated region body
PF: predicated region fallthrough
CT: control target
= control target key end

     0   :  { %v297_v0 = vmov 0.0   ;;  %s523_s0 = inlined_call_operand.vmem [shape: f32[512,128], index: 0, kind: input, shape index: {}]   ;;  %s524_s1 = inlined_call_operand.vmem [shape: f32[1,128], index: 1, kind: output, shape index: {0}]   ;;  %s525_s2 = inlined_call_operand.vmem [shape: f32[1,128], index: 2, kind: output, shape index: {1}]  }
   0x1   :  { %14 = vst [vmem:[%s524_s1] sm:$0x1] %v297_v0  ;;  %15 = vst [vmem:[%s525_s2] sm:$0x1] %v297_v0  ;;  %v16_v1 = vld [vmem:[%s523_s0] sm:$0xff]  ;;  %v17_v2 = vld [vmem:[%s523_s0 + $0x8] sm:$0xff] }
   0x2   :  { %v18_v3 = vld [vmem:[%s523_s0 + $0x10] sm:$0xff]  ;;  %v19_v4 = vld [vmem:[%s523_s0 + $0x18] sm:$0xff]  ;;  %v81_v5 = vadd.f32 %v17_v2, %v16_v1  ;;  %v153_v6 = vmul.f32 %v16_v1, %v16_v1  ;;  %v154_v7 = vmul.f32 %v17_v2, %v17_v2  ;;  %v20_v9 = vld [vmem:[%s523_s0 + $0x20] sm:$0xff] }
   0x3   :  { %v155_v8 = vmul.f32 %v18_v3, %v18_v3  ;;  %v156_v11 = vmul.f32 %v19_v4, %v19_v4  ;;  %v21_v13 = vld [vmem:[%s523_s0 + $0x28] sm:$0xff]  ;;  %v157_v15 = vmul.f32 %v20_v9, %v20_v9  ;;  %v22_v17 = vld [vmem:[%s523_s0 + $0x30] sm:$0xff]  ;;  %v23_v21 = vld [vmem:[%s523_s0 + $0x38] sm:$0xff] }
   0x4   :  { %v82_v10 = vadd.f32 %v81_v5, %v18_v3  ;;  %v217_v12 = vadd.f32 %v154_v7, %v153_v6  ;;  %v158_v19 = vmul.f32 %v21_v13, %v21_v13  ;;  %v159_v23 = vmul.f32 %v22_v17, %v22_v17  ;;  %v24_v25 = vld [vmem:[%s523_s0 + $0x40] sm:$0xff]  ;;  %v25_v29 = vld [vmem:[%s523_s0 + $0x48] sm:$0xff]  ;;  %v26_v33 = vld [vmem:[%s523_s0 + $0x50] sm:$0xff] }
   0x5   :  { %v160_v27 = vmul.f32 %v23_v21, %v23_v21  ;;  %v161_v31 = vmul.f32 %v24_v25, %v24_v25  ;;  %v162_v35 = vmul.f32 %v25_v29, %v25_v29  ;;  %v27_v37 = vld [vmem:[%s523_s0 + $0x58] sm:$0xff]  ;;  %v163_v39 = vmul.f32 %v26_v33, %v26_v33  ;;  %v28_v41 = vld [vmem:[%s523_s0 + $0x60] sm:$0xff]  ;;  %v29_v45 = vld [vmem:[%s523_s0 + $0x68] sm:$0xff] }
   0x6   :  { %v83_v14 = vadd.f32 %v82_v10, %v19_v4  ;;  %v218_v16 = vadd.f32 %v217_v12, %v155_v8  ;;  %v164_v43 = vmul.f32 %v27_v37, %v27_v37  ;;  %v165_v47 = vmul.f32 %v28_v41, %v28_v41  ;;  %v30_v49 = vld [vmem:[%s523_s0 + $0x70] sm:$0xff]  ;;  %v31_v53 = vld [vmem:[%s523_s0 + $0x78] sm:$0xff]  ;;  %v32_v57 = vld [vmem:[%s523_s0 + $0x80] sm:$0xff] }
   0x7   :  { %v166_v51 = vmul.f32 %v29_v45, %v29_v45  ;;  %v167_v55 = vmul.f32 %v30_v49, %v30_v49  ;;  %v168_v59 = vmul.f32 %v31_v53, %v31_v53  ;;  %v33_v61 = vld [vmem:[%s523_s0 + $0x88] sm:$0xff]  ;;  %v169_v63 = vmul.f32 %v32_v57, %v32_v57  ;;  %v34_v1 = vld [vmem:[%s523_s0 + $0x90] sm:$0xff]  ;;  %v35_v5 = vld [vmem:[%s523_s0 + $0x98] sm:$0xff] }
   0x8   :  { %v84_v18 = vadd.f32 %v83_v14, %v20_v9  ;;  %v219_v20 = vadd.f32 %v218_v16, %v156_v11  ;;  %v170_v3 = vmul.f32 %v33_v61, %v33_v61  ;;  %v171_v7 = vmul.f32 %v34_v1, %v34_v1  ;;  %v36_v9 = vld [vmem:[%s523_s0 + $0xa0] sm:$0xff] }
   0x9   :  { %v172_v11 = vmul.f32 %v35_v5, %v35_v5 }
   0xa   :  { %v85_v22 = vadd.f32 %v84_v18, %v21_v13  ;;  %v220_v24 = vadd.f32 %v219_v20, %v157_v15  ;;  %v37_v13 = vld [vmem:[%s523_s0 + $0xa8] sm:$0xff]  ;;  %v173_v15 = vmul.f32 %v36_v9, %v36_v9 }
   0xc   :  { %v86_v26 = vadd.f32 %v85_v22, %v22_v17  ;;  %v221_v28 = vadd.f32 %v220_v24, %v158_v19  ;;  %v38_v17 = vld [vmem:[%s523_s0 + $0xb0] sm:$0xff]  ;;  %v174_v19 = vmul.f32 %v37_v13, %v37_v13 }
   0xe   :  { %v87_v30 = vadd.f32 %v86_v26, %v23_v21  ;;  %v222_v32 = vadd.f32 %v221_v28, %v159_v23  ;;  %v39_v21 = vld [vmem:[%s523_s0 + $0xb8] sm:$0xff]  ;;  %v175_v23 = vmul.f32 %v38_v17, %v38_v17 }
  0x10   :  { %v88_v34 = vadd.f32 %v87_v30, %v24_v25  ;;  %v223_v36 = vadd.f32 %v222_v32, %v160_v27  ;;  %v40_v25 = vld [vmem:[%s523_s0 + $0xc0] sm:$0xff]  ;;  %v176_v27 = vmul.f32 %v39_v21, %v39_v21 }
  0x12   :  { %v89_v38 = vadd.f32 %v88_v34, %v25_v29  ;;  %v224_v40 = vadd.f32 %v223_v36, %v161_v31  ;;  %v41_v29 = vld [vmem:[%s523_s0 + $0xc8] sm:$0xff]  ;;  %v177_v31 = vmul.f32 %v40_v25, %v40_v25 }
  0x14   :  { %v90_v42 = vadd.f32 %v89_v38, %v26_v33  ;;  %v225_v44 = vadd.f32 %v224_v40, %v162_v35  ;;  %v42_v33 = vld [vmem:[%s523_s0 + $0xd0] sm:$0xff]  ;;  %v178_v35 = vmul.f32 %v41_v29, %v41_v29 }
  0x16   :  { %v91_v46 = vadd.f32 %v90_v42, %v27_v37  ;;  %v226_v48 = vadd.f32 %v225_v44, %v163_v39  ;;  %v43_v37 = vld [vmem:[%s523_s0 + $0xd8] sm:$0xff]  ;;  %v179_v39 = vmul.f32 %v42_v33, %v42_v33 }
  0x18   :  { %v92_v50 = vadd.f32 %v91_v46, %v28_v41  ;;  %v227_v52 = vadd.f32 %v226_v48, %v164_v43  ;;  %v44_v41 = vld [vmem:[%s523_s0 + $0xe0] sm:$0xff]  ;;  %v180_v43 = vmul.f32 %v43_v37, %v43_v37 }
  0x1a   :  { %v93_v54 = vadd.f32 %v92_v50, %v29_v45  ;;  %v228_v56 = vadd.f32 %v227_v52, %v165_v47  ;;  %v45_v45 = vld [vmem:[%s523_s0 + $0xe8] sm:$0xff]  ;;  %v181_v47 = vmul.f32 %v44_v41, %v44_v41 }
  0x1c   :  { %v94_v58 = vadd.f32 %v93_v54, %v30_v49  ;;  %v229_v60 = vadd.f32 %v228_v56, %v166_v51  ;;  %v46_v49 = vld [vmem:[%s523_s0 + $0xf0] sm:$0xff]  ;;  %v182_v51 = vmul.f32 %v45_v45, %v45_v45 }
  0x1e   :  { %v95_v62 = vadd.f32 %v94_v58, %v31_v53  ;;  %v230_v0 = vadd.f32 %v229_v60, %v167_v55  ;;  %v47_v53 = vld [vmem:[%s523_s0 + $0xf8] sm:$0xff]  ;;  %v183_v55 = vmul.f32 %v46_v49, %v46_v49 }
  0x20   :  { %v96_v2 = vadd.f32 %v95_v62, %v32_v57  ;;  %v231_v4 = vadd.f32 %v230_v0, %v168_v59  ;;  %v48_v57 = vld [vmem:[%s523_s0 + $0x100] sm:$0xff]  ;;  %v184_v59 = vmul.f32 %v47_v53, %v47_v53 }
  0x22   :  { %v97_v6 = vadd.f32 %v96_v2, %v33_v61  ;;  %v232_v8 = vadd.f32 %v231_v4, %v169_v63  ;;  %v49_v61 = vld [vmem:[%s523_s0 + $0x108] sm:$0xff]  ;;  %v185_v63 = vmul.f32 %v48_v57, %v48_v57 }
  0x24   :  { %v98_v10 = vadd.f32 %v97_v6, %v34_v1  ;;  %v233_v12 = vadd.f32 %v232_v8, %v170_v3  ;;  %v50_v1 = vld [vmem:[%s523_s0 + $0x110] sm:$0xff]  ;;  %v186_v3 = vmul.f32 %v49_v61, %v49_v61 }
  0x26   :  { %v99_v14 = vadd.f32 %v98_v10, %v35_v5  ;;  %v234_v16 = vadd.f32 %v233_v12, %v171_v7  ;;  %v51_v5 = vld [vmem:[%s523_s0 + $0x118] sm:$0xff]  ;;  %v187_v7 = vmul.f32 %v50_v1, %v50_v1 }
  0x28   :  { %v100_v18 = vadd.f32 %v99_v14, %v36_v9  ;;  %v235_v20 = vadd.f32 %v234_v16, %v172_v11  ;;  %v52_v9 = vld [vmem:[%s523_s0 + $0x120] sm:$0xff]  ;;  %v188_v11 = vmul.f32 %v51_v5, %v51_v5 }
  0x2a   :  { %v101_v22 = vadd.f32 %v100_v18, %v37_v13  ;;  %v236_v24 = vadd.f32 %v235_v20, %v173_v15  ;;  %v53_v13 = vld [vmem:[%s523_s0 + $0x128] sm:$0xff]  ;;  %v189_v15 = vmul.f32 %v52_v9, %v52_v9 }
  0x2c   :  { %v102_v26 = vadd.f32 %v101_v22, %v38_v17  ;;  %v237_v28 = vadd.f32 %v236_v24, %v174_v19  ;;  %v54_v17 = vld [vmem:[%s523_s0 + $0x130] sm:$0xff]  ;;  %v190_v19 = vmul.f32 %v53_v13, %v53_v13 }
  0x2e   :  { %v103_v30 = vadd.f32 %v102_v26, %v39_v21  ;;  %v238_v32 = vadd.f32 %v237_v28, %v175_v23  ;;  %v55_v21 = vld [vmem:[%s523_s0 + $0x138] sm:$0xff]  ;;  %v191_v23 = vmul.f32 %v54_v17, %v54_v17 }
  0x30   :  { %v104_v34 = vadd.f32 %v103_v30, %v40_v25  ;;  %v239_v36 = vadd.f32 %v238_v32, %v176_v27  ;;  %v56_v25 = vld [vmem:[%s523_s0 + $0x140] sm:$0xff]  ;;  %v192_v27 = vmul.f32 %v55_v21, %v55_v21 }
  0x32   :  { %v105_v38 = vadd.f32 %v104_v34, %v41_v29  ;;  %v240_v40 = vadd.f32 %v239_v36, %v177_v31  ;;  %v57_v29 = vld [vmem:[%s523_s0 + $0x148] sm:$0xff]  ;;  %v193_v31 = vmul.f32 %v56_v25, %v56_v25 }
  0x34   :  { %v106_v42 = vadd.f32 %v105_v38, %v42_v33  ;;  %v241_v44 = vadd.f32 %v240_v40, %v178_v35  ;;  %v58_v33 = vld [vmem:[%s523_s0 + $0x150] sm:$0xff]  ;;  %v194_v35 = vmul.f32 %v57_v29, %v57_v29 }
  0x36   :  { %v107_v46 = vadd.f32 %v106_v42, %v43_v37  ;;  %v242_v48 = vadd.f32 %v241_v44, %v179_v39  ;;  %v59_v37 = vld [vmem:[%s523_s0 + $0x158] sm:$0xff]  ;;  %v195_v39 = vmul.f32 %v58_v33, %v58_v33 }
  0x38   :  { %v108_v50 = vadd.f32 %v107_v46, %v44_v41  ;;  %v243_v52 = vadd.f32 %v242_v48, %v180_v43  ;;  %v60_v41 = vld [vmem:[%s523_s0 + $0x160] sm:$0xff]  ;;  %v196_v43 = vmul.f32 %v59_v37, %v59_v37 }
  0x3a   :  { %v109_v54 = vadd.f32 %v108_v50, %v45_v45  ;;  %v244_v56 = vadd.f32 %v243_v52, %v181_v47  ;;  %v61_v45 = vld [vmem:[%s523_s0 + $0x168] sm:$0xff]  ;;  %v197_v47 = vmul.f32 %v60_v41, %v60_v41 }
  0x3c   :  { %v110_v58 = vadd.f32 %v109_v54, %v46_v49  ;;  %v245_v60 = vadd.f32 %v244_v56, %v182_v51  ;;  %v62_v49 = vld [vmem:[%s523_s0 + $0x170] sm:$0xff]  ;;  %v198_v51 = vmul.f32 %v61_v45, %v61_v45 }
  0x3e   :  { %v111_v62 = vadd.f32 %v110_v58, %v47_v53  ;;  %v246_v0 = vadd.f32 %v245_v60, %v183_v55  ;;  %v63_v53 = vld [vmem:[%s523_s0 + $0x178] sm:$0xff]  ;;  %v199_v55 = vmul.f32 %v62_v49, %v62_v49 }
  0x40   :  { %v112_v2 = vadd.f32 %v111_v62, %v48_v57  ;;  %v247_v4 = vadd.f32 %v246_v0, %v184_v59  ;;  %v64_v57 = vld [vmem:[%s523_s0 + $0x180] sm:$0xff]  ;;  %v200_v59 = vmul.f32 %v63_v53, %v63_v53 }
  0x42   :  { %v113_v6 = vadd.f32 %v112_v2, %v49_v61  ;;  %v248_v8 = vadd.f32 %v247_v4, %v185_v63  ;;  %v65_v61 = vld [vmem:[%s523_s0 + $0x188] sm:$0xff]  ;;  %v201_v63 = vmul.f32 %v64_v57, %v64_v57 }
  0x44   :  { %v114_v10 = vadd.f32 %v113_v6, %v50_v1  ;;  %v249_v12 = vadd.f32 %v248_v8, %v186_v3  ;;  %v66_v1 = vld [vmem:[%s523_s0 + $0x190] sm:$0xff]  ;;  %v202_v3 = vmul.f32 %v65_v61, %v65_v61 }
  0x46   :  { %v115_v14 = vadd.f32 %v114_v10, %v51_v5  ;;  %v250_v16 = vadd.f32 %v249_v12, %v187_v7  ;;  %v67_v5 = vld [vmem:[%s523_s0 + $0x198] sm:$0xff]  ;;  %v203_v7 = vmul.f32 %v66_v1, %v66_v1 }
  0x48   :  { %v116_v18 = vadd.f32 %v115_v14, %v52_v9  ;;  %v251_v20 = vadd.f32 %v250_v16, %v188_v11  ;;  %v68_v9 = vld [vmem:[%s523_s0 + $0x1a0] sm:$0xff]  ;;  %v204_v11 = vmul.f32 %v67_v5, %v67_v5 }
  0x4a   :  { %v117_v22 = vadd.f32 %v116_v18, %v53_v13  ;;  %v252_v24 = vadd.f32 %v251_v20, %v189_v15  ;;  %v69_v13 = vld [vmem:[%s523_s0 + $0x1a8] sm:$0xff]  ;;  %v205_v15 = vmul.f32 %v68_v9, %v68_v9 }
  0x4c   :  { %v118_v26 = vadd.f32 %v117_v22, %v54_v17  ;;  %v253_v28 = vadd.f32 %v252_v24, %v190_v19  ;;  %v70_v17 = vld [vmem:[%s523_s0 + $0x1b0] sm:$0xff]  ;;  %v206_v19 = vmul.f32 %v69_v13, %v69_v13 }
  0x4e   :  { %v119_v30 = vadd.f32 %v118_v26, %v55_v21  ;;  %v254_v32 = vadd.f32 %v253_v28, %v191_v23  ;;  %v71_v21 = vld [vmem:[%s523_s0 + $0x1b8] sm:$0xff]  ;;  %v207_v23 = vmul.f32 %v70_v17, %v70_v17 }
  0x50   :  { %v120_v34 = vadd.f32 %v119_v30, %v56_v25  ;;  %v255_v36 = vadd.f32 %v254_v32, %v192_v27  ;;  %v72_v25 = vld [vmem:[%s523_s0 + $0x1c0] sm:$0xff]  ;;  %v208_v27 = vmul.f32 %v71_v21, %v71_v21 }
  0x52   :  { %v121_v38 = vadd.f32 %v120_v34, %v57_v29  ;;  %v256_v40 = vadd.f32 %v255_v36, %v193_v31  ;;  %v73_v29 = vld [vmem:[%s523_s0 + $0x1c8] sm:$0xff]  ;;  %v209_v31 = vmul.f32 %v72_v25, %v72_v25 }
  0x54   :  { %v122_v42 = vadd.f32 %v121_v38, %v58_v33  ;;  %v257_v44 = vadd.f32 %v256_v40, %v194_v35  ;;  %v74_v33 = vld [vmem:[%s523_s0 + $0x1d0] sm:$0xff]  ;;  %v210_v35 = vmul.f32 %v73_v29, %v73_v29 }
  0x56   :  { %v123_v46 = vadd.f32 %v122_v42, %v59_v37  ;;  %v258_v48 = vadd.f32 %v257_v44, %v195_v39  ;;  %v75_v37 = vld [vmem:[%s523_s0 + $0x1d8] sm:$0xff]  ;;  %v211_v39 = vmul.f32 %v74_v33, %v74_v33 }
  0x58   :  { %v124_v50 = vadd.f32 %v123_v46, %v60_v41  ;;  %v259_v52 = vadd.f32 %v258_v48, %v196_v43  ;;  %v76_v41 = vld [vmem:[%s523_s0 + $0x1e0] sm:$0xff]  ;;  %v212_v43 = vmul.f32 %v75_v37, %v75_v37 }
  0x5a   :  { %v125_v54 = vadd.f32 %v124_v50, %v61_v45  ;;  %v260_v56 = vadd.f32 %v259_v52, %v197_v47  ;;  %v77_v45 = vld [vmem:[%s523_s0 + $0x1e8] sm:$0xff]  ;;  %v213_v47 = vmul.f32 %v76_v41, %v76_v41 }
  0x5c   :  { %v126_v58 = vadd.f32 %v125_v54, %v62_v49  ;;  %v261_v60 = vadd.f32 %v260_v56, %v198_v51  ;;  %v78_v49 = vld [vmem:[%s523_s0 + $0x1f0] sm:$0xff]  ;;  %v214_v51 = vmul.f32 %v77_v45, %v77_v45 }
  0x5e   :  { %v127_v62 = vadd.f32 %v126_v58, %v63_v53  ;;  %v262_v0 = vadd.f32 %v261_v60, %v199_v55  ;;  %v79_v53 = vld [vmem:[%s523_s0 + $0x1f8] sm:$0xff]  ;;  %v215_v55 = vmul.f32 %v78_v49, %v78_v49 }
  0x5f   :  { %v216_v58 = vmul.f32 %v79_v53, %v79_v53 }
  0x60   :  { %v128_v2 = vadd.f32 %v127_v62, %v64_v57  ;;  %v263_v4 = vadd.f32 %v262_v0, %v200_v59 }
  0x62   :  { %v129_v6 = vadd.f32 %v128_v2, %v65_v61  ;;  %v264_v8 = vadd.f32 %v263_v4, %v201_v63 }
  0x64   :  { %v130_v10 = vadd.f32 %v129_v6, %v66_v1  ;;  %v265_v12 = vadd.f32 %v264_v8, %v202_v3 }
  0x66   :  { %v131_v14 = vadd.f32 %v130_v10, %v67_v5  ;;  %v266_v16 = vadd.f32 %v265_v12, %v203_v7  ;;  %v80_v7 = vld [vmem:[%s524_s1] sm:$0x1] }
  0x67   :  { %v152_v12 = vld [vmem:[%s525_s2] sm:$0x1] }
  0x68   :  { %v132_v18 = vadd.f32 %v131_v14, %v68_v9  ;;  %v267_v20 = vadd.f32 %v266_v16, %v204_v11 }
  0x6a   :  { %v133_v22 = vadd.f32 %v132_v18, %v69_v13  ;;  %v268_v24 = vadd.f32 %v267_v20, %v205_v15 }
  0x6c   :  { %v134_v26 = vadd.f32 %v133_v22, %v70_v17  ;;  %v269_v28 = vadd.f32 %v268_v24, %v206_v19 }
  0x6e   :  { %v135_v30 = vadd.f32 %v134_v26, %v71_v21  ;;  %v270_v32 = vadd.f32 %v269_v28, %v207_v23 }
  0x70   :  { %v136_v34 = vadd.f32 %v135_v30, %v72_v25  ;;  %v271_v36 = vadd.f32 %v270_v32, %v208_v27 }
  0x72   :  { %v137_v38 = vadd.f32 %v136_v34, %v73_v29  ;;  %v272_v40 = vadd.f32 %v271_v36, %v209_v31 }
  0x74   :  { %v138_v42 = vadd.f32 %v137_v38, %v74_v33  ;;  %v273_v44 = vadd.f32 %v272_v40, %v210_v35 }
  0x76   :  { %v139_v46 = vadd.f32 %v138_v42, %v75_v37  ;;  %v274_v48 = vadd.f32 %v273_v44, %v211_v39 }
  0x78   :  { %v140_v50 = vadd.f32 %v139_v46, %v76_v41  ;;  %v275_v52 = vadd.f32 %v274_v48, %v212_v43 }
  0x7a   :  { %v141_v54 = vadd.f32 %v140_v50, %v77_v45  ;;  %v276_v56 = vadd.f32 %v275_v52, %v213_v47 }
  0x7c   :  { %v142_v57 = vadd.f32 %v141_v54, %v78_v49  ;;  %v277_v59 = vadd.f32 %v276_v56, %v214_v51 }
  0x7e   :  { %v143_v60 = vadd.f32 %v142_v57, %v79_v53  ;;  %v278_v61 = vadd.f32 %v277_v59, %v215_v55 }
  0x80   :  { %v144_v62 = vrot.slane %v143_v60, 4  ;;  %v279_v63 = vadd.f32 %v278_v61, %v216_v58 }
  0x82   :  { %v145_v0 = vadd.f32 %v144_v62, %v143_v60  ;;  %v280_v1 = vrot.slane %v279_v63, 4 }
  0x84   :  { %v146_v2 = vrot.slane %v145_v0, 2  ;;  %v281_v3 = vadd.f32 %v280_v1, %v279_v63 }
  0x86   :  { %v147_v4 = vadd.f32 %v146_v2, %v145_v0  ;;  %v282_v5 = vrot.slane %v281_v3, 2 }
  0x88   :  { %v148_v6 = vrot.slane %v147_v4, 1  ;;  %v283_v8 = vadd.f32 %v282_v5, %v281_v3 }
  0x8a   :  { %v149_v9 = vadd.f32 %v148_v6, %v147_v4  ;;  %v284_v10 = vrot.slane %v283_v8, 1 }
  0x8c   :  { %v150_v11 = vadd.f32 %v149_v9, %v80_v7  ;;  %v285_v13 = vadd.f32 %v284_v10, %v283_v8 }
  0x8e   :  { %151 = vst [vmem:[%s524_s1] sm:$0x1] %v150_v11  ;;  %v286_v14 = vadd.f32 %v285_v13, %v152_v12 }
  0x90   :  { %287 = vst [vmem:[%s525_s2] sm:$0x1] %v286_v14 }

// kernel: preact_bottleneck_forward.6
= control target key start
LH: loop header
LB: loop body
LE: loop exit
PB: predicated region body
PF: predicated region fallthrough
CT: control target
= control target key end

     0   :  { %s2447_s3 = inlined_call_operand.vmem [shape: bf16[128,128], index: 3, kind: input, shape index: {}]   ;;  %s2448_s0 = inlined_call_operand.vmem [shape: f32[512,128], index: 0, kind: input, shape index: {}]   ;;  %s2449_s1 = inlined_call_operand.vmem [shape: f32[1,128], index: 1, kind: input, shape index: {}]   ;;  %s2450_s2 = inlined_call_operand.vmem [shape: f32[1,128], index: 2, kind: input, shape index: {}]   ;;  %s2451_s5 = inlined_call_operand.vmem [shape: f32[1,128], index: 5, kind: output, shape index: {1}]   ;;  %s2452_s6 = inlined_call_operand.vmem [shape: f32[1,128], index: 6, kind: output, shape index: {2}]   ;;  %s2453_s4 = inlined_call_operand.vmem [shape: bf16[512,128], index: 4, kind: output, shape index: {0}]  }
   0x1   :  { %v1752_v0 = vld [vmem:[%s2447_s3] sm:$0xff]   ;;  %v1753_v1 = vld [vmem:[%s2447_s3 + $0x8] sm:$0xff]   ;;  %v1754_v2 = vld [vmem:[%s2447_s3 + $0x10] sm:$0xff]  }
   0x2   :  { %1655 = vmatprep.subr.bf16.mxu0 %v1752_v0  ;;  %1735 = vmatprep.subr.bf16.mxu1 %v1752_v0  ;;  %v1755_v3 = vld [vmem:[%s2447_s3 + $0x18] sm:$0xff]   ;;  %v27_v4 = vld [vmem:[%s2448_s0] sm:$0xff]  ;;  %v28_v5 = vld [vmem:[%s2448_s0 + $0x8] sm:$0xff] }
   0x3   :  { %1656 = vmatpush3.bf16.msra.mxu0 %v1752_v0  ;;  %1743 = vmatpush3.bf16.msra.mxu1 %v1752_v0  ;;  %v1817_v6 = vld [vmem:[%s2449_s1] ss:$0 sm:$0xff]  ;;  %v29_v10 = vld [vmem:[%s2448_s0 + $0x10] sm:$0xff]  ;;  %v30_v14 = vld [vmem:[%s2448_s0 + $0x18] sm:$0xff] }
   0x4   :  { %1657 = vmatprep.subr.bf16.mxu0 %v1753_v1  ;;  %1736 = vmatprep.subr.bf16.mxu1 %v1753_v1  ;;  %v98_v7 = vmul.f32 %v1817_v6, %v27_v4  ;;  %v99_v8 = vmul.f32 %v1817_v6, %v28_v5  ;;  %v1824_v9 = vld [vmem:[%s2450_s2] ss:$0 sm:$0xff]  ;;  %v32_v16 = vld [vmem:[%s2448_s0 + $0x28] sm:$0xff]  ;;  %v33_v17 = vld [vmem:[%s2448_s0 + $0x30] sm:$0xff]  ;;  %v100_v21 = vmul.f32 %v1817_v6, %v29_v10 }
   0x5   :  { %v1832_v11 = vld [vmem:[%s2447_s3 + $0x20] sm:$0xff]   ;;  %v34_v18 = vld [vmem:[%s2448_s0 + $0x38] sm:$0xff]  ;;  %v36_v23 = vld [vmem:[%s2448_s0 + $0x48] sm:$0xff]  ;;  %v101_v24 = vmul.f32 %v1817_v6, %v30_v14  ;;  %v103_v29 = vmul.f32 %v1817_v6, %v32_v16  ;;  %v104_v30 = vmul.f32 %v1817_v6, %v33_v17 }
   0x6   :  { %v169_v12 = vadd.f32 %v1824_v9, %v98_v7  ;;  %v170_v13 = vadd.f32 %v1824_v9, %v99_v8  ;;  %v31_v15 = vld [vmem:[%s2448_s0 + $0x20] sm:$0xff]  ;;  %v37_v26 = vld [vmem:[%s2448_s0 + $0x50] sm:$0xff]  ;;  %v38_v27 = vld [vmem:[%s2448_s0 + $0x58] sm:$0xff]  ;;  %v105_v31 = vmul.f32 %v1817_v6, %v34_v18  ;;  %v107_v36 = vmul.f32 %v1817_v6, %v36_v23 }
   0x7   :  { %1658 = vmatpush3.bf16.msra.mxu0 %v1753_v1  ;;  %1744 = vmatpush3.bf16.msra.mxu1 %v1753_v1  ;;  %v35_v22 = vld [vmem:[%s2448_s0 + $0x40] sm:$0xff]  ;;  %v102_v25 = vmul.f32 %v1817_v6, %v31_v15  ;;  %v40_v33 = vld [vmem:[%s2448_s0 + $0x68] sm:$0xff]  ;;  %v171_v37 = vadd.f32 %v1824_v9, %v100_v21  ;;  %v108_v38 = vmul.f32 %v1817_v6, %v37_v26  ;;  %v41_v44 = vld [vmem:[%s2448_s0 + $0x70] sm:$0xff] }
   0x8   :  { %1659 = vmatprep.subr.bf16.mxu0 %v1754_v2  ;;  %1737 = vmatprep.subr.bf16.mxu1 %v1754_v2  ;;  %v233_v19 = vmax.f32 %v169_v12, 0.0  ;;  %v234_v20 = vmax.f32 %v170_v13, 0.0  ;;  %v39_v32 = vld [vmem:[%s2448_s0 + $0x60] sm:$0xff]  ;;  %v1757_v34 = vld [vmem:[%s2447_s3 + $0x28] sm:$0xff]   ;;  %v106_v35 = vmul.f32 %v1817_v6, %v35_v22  ;;  %v109_v39 = vmul.f32 %v1817_v6, %v38_v27  ;;  %v42_v48 = vld [vmem:[%s2448_s0 + $0x78] sm:$0xff] }
   0x9   :  { %v172_v40 = vadd.f32 %v1824_v9, %v101_v24  ;;  %v173_v41 = vadd.f32 %v1824_v9, %v102_v25  ;;  %v110_v42 = vmul.f32 %v1817_v6, %v39_v32  ;;  %v111_v43 = vmul.f32 %v1817_v6, %v40_v33  ;;  %v43_v49 = vld [vmem:[%s2448_s0 + $0x80] sm:$0xff]  ;;  %v1905_v50 = vld [vmem:[%s2447_s3 + $0x30] sm:$0xff]   ;;  %v44_v55 = vld [vmem:[%s2448_s0 + $0x88] sm:$0xff] }
   0xa   :  { %v297_v28 = vpack.c.bf16 %v234_v20, %v233_v19  ;;  %v174_v45 = vadd.f32 %v1824_v9, %v103_v29  ;;  %v175_v46 = vadd.f32 %v1824_v9, %v104_v30  ;;  %v176_v47 = vadd.f32 %v1824_v9, %v105_v31  ;;  %v45_v0 = vld [vmem:[%s2448_s0 + $0x90] sm:$0xff]  ;;  %v46_v5 = vld [vmem:[%s2448_s0 + $0x98] sm:$0xff]  ;;  %v47_v13 = vld [vmem:[%s2448_s0 + $0xa0] sm:$0xff] }
   0xb   :  { %1660 = vmatpush3.bf16.msra.mxu0 %v1754_v2  ;;  %1745 = vmatpush3.bf16.msra.mxu1 %v1754_v2  ;;  %v177_v51 = vadd.f32 %v1824_v9, %v106_v35  ;;  %v178_v52 = vadd.f32 %v1824_v9, %v107_v36  ;;  %v179_v53 = vadd.f32 %v1824_v9, %v108_v38  ;;  %v235_v56 = vmax.f32 %v171_v37, 0.0  ;;  %v1759_v7 = vld [vmem:[%s2447_s3 + $0x38] sm:$0xff]   ;;  %v48_v18 = vld [vmem:[%s2448_s0 + $0xa8] sm:$0xff]  ;;  %v49_v25 = vld [vmem:[%s2448_s0 + $0xb0] sm:$0xff] }
   0xc   :  { %1661 = vmatprep.subr.bf16.mxu0 %v1755_v3  ;;  %1738 = vmatprep.subr.bf16.mxu1 %v1755_v3  ;;  %v180_v54 = vadd.f32 %v1824_v9, %v109_v39  ;;  %v181_v57 = vadd.f32 %v1824_v9, %v110_v42  ;;  %v182_v58 = vadd.f32 %v1824_v9, %v111_v43  ;;  %v236_v60 = vmax.f32 %v172_v40, 0.0  ;;  %v53_v30 = vld [vmem:[%s2448_s0 + $0xd0] sm:$0xff]  ;;  %v54_v31 = vld [vmem:[%s2448_s0 + $0xd8] sm:$0xff]  ;;  %v55_v37 = vld [vmem:[%s2448_s0 + $0xe0] sm:$0xff] }
   0xd   :  { %1671 = vmatprep.mubr.bf16.mxu0 %v297_v28  ;;  %v112_v59 = vmul.f32 %v1817_v6, %v41_v44  ;;  %v237_v61 = vmax.f32 %v173_v41, 0.0  ;;  %v113_v62 = vmul.f32 %v1817_v6, %v42_v48  ;;  %v114_v63 = vmul.f32 %v1817_v6, %v43_v49  ;;  %v50_v36 = vld [vmem:[%s2448_s0 + $0xb8] sm:$0xff]  ;;  %v56_v38 = vld [vmem:[%s2448_s0 + $0xe8] sm:$0xff]  ;;  %v57_v43 = vld [vmem:[%s2448_s0 + $0xf0] sm:$0xff] }
   0xe   :  { %v238_v1 = vmax.f32 %v174_v45, 0.0  ;;  %v239_v2 = vmax.f32 %v175_v46, 0.0  ;;  %v115_v4 = vmul.f32 %v1817_v6, %v44_v55  ;;  %v241_v8 = vmax.f32 %v177_v51, 0.0  ;;  %v58_v48 = vld [vmem:[%s2448_s0 + $0xf8] sm:$0xff] }
   0xf   :  { %1662 = vmatpush3.bf16.msra.mxu0 %v1755_v3  ;;  %1746 = vmatpush3.bf16.msra.mxu1 %v1755_v3  ;;  %v240_v3 = vmax.f32 %v176_v47, 0.0  ;;  %v242_v10 = vmax.f32 %v178_v52, 0.0  ;;  %v244_v12 = vmax.f32 %v180_v54, 0.0  ;;  %v245_v14 = vmax.f32 %v181_v57, 0.0 }
  0x10   :  { %1663 = vmatprep.subr.bf16.mxu0 %v1832_v11  ;;  %1739 = vmatprep.subr.bf16.mxu1 %v1832_v11  ;;  %v246_v15 = vmax.f32 %v182_v58, 0.0  ;;  %v1935_v16 = vadd.f32 %v1824_v9, %v112_v59  ;;  %v116_v17 = vmul.f32 %v1817_v6, %v45_v0  ;;  %v1942_v19 = vadd.f32 %v1824_v9, %v113_v62  ;;  %v60_v62 = vld [vmem:[%s2448_s0 + $0x108] sm:$0xff] }
  0x11   :  { %v1945_v20 = vadd.f32 %v1824_v9, %v114_v63  ;;  %v117_v21 = vmul.f32 %v1817_v6, %v46_v5  ;;  %v298_v22 = vpack.c.bf16 %v236_v60, %v235_v56  ;;  %v1950_v23 = vadd.f32 %v1824_v9, %v115_v4  ;;  %v62_v4 = vld [vmem:[%s2448_s0 + $0x118] sm:$0xff] }
  0x12   :  { %v118_v24 = vmul.f32 %v1817_v6, %v47_v13  ;;  %v299_v26 = vpack.c.bf16 %v238_v1, %v237_v61  ;;  %v1957_v27 = vpack.c.bf16 %v240_v3, %v239_v2  ;;  %v1959_v28 = vpack.c.bf16 %v242_v10, %v241_v8  ;;  %v61_v3 = vld [vmem:[%s2448_s0 + $0x110] sm:$0xff] }
  0x13   :  { %1664 = vmatpush3.bf16.msra.mxu0 %v1832_v11  ;;  %1747 = vmatpush3.bf16.msra.mxu1 %v1832_v11  ;;  %v243_v11 = vmax.f32 %v179_v53, 0.0  ;;  %v119_v29 = vmul.f32 %v1817_v6, %v48_v18  ;;  %v1970_v33 = vpack.c.bf16 %v246_v15, %v245_v14  ;;  %v1974_v35 = vadd.f32 %v1824_v9, %v116_v17  ;;  %v59_v53 = vld [vmem:[%s2448_s0 + $0x100] sm:$0xff]  ;;  %v65_v18 = vld [vmem:[%s2448_s0 + $0x130] sm:$0xff] }
  0x14   :  { %1665 = vmatprep.subr.bf16.mxu0 %v1757_v34  ;;  %1740 = vmatprep.subr.bf16.mxu1 %v1757_v34  ;;  %v248_v39 = vmax.f32 %v1942_v19, 0.0  ;;  %v249_v40 = vmax.f32 %v1945_v20, 0.0  ;;  %v1988_v41 = vadd.f32 %v1824_v9, %v117_v21  ;;  %v120_v42 = vmul.f32 %v1817_v6, %v49_v25 }
  0x15   :  { %v1968_v32 = vpack.c.bf16 %v244_v12, %v243_v11  ;;  %v250_v44 = vmax.f32 %v1950_v23, 0.0  ;;  %v1997_v45 = vadd.f32 %v1824_v9, %v118_v24  ;;  %v124_v46 = vmul.f32 %v1817_v6, %v53_v30  ;;  %v63_v11 = vld [vmem:[%s2448_s0 + $0x120] sm:$0xff]  ;;  %v64_v12 = vld [vmem:[%s2448_s0 + $0x128] sm:$0xff] }
  0x16   :  { %v125_v47 = vmul.f32 %v1817_v6, %v54_v31  ;;  %v2005_v49 = vadd.f32 %v1824_v9, %v119_v29  ;;  %v126_v51 = vmul.f32 %v1817_v6, %v55_v37  ;;  %v127_v52 = vmul.f32 %v1817_v6, %v56_v38  ;;  %v67_v37 = vld [vmem:[%s2448_s0 + $0x140] sm:$0xff] }
  0x17   :  { %1666 = vmatpush3.bf16.msra.mxu0 %v1757_v34  ;;  %1748 = vmatpush3.bf16.msra.mxu1 %v1757_v34  ;;  %v247_v34 = vmax.f32 %v1935_v16, 0.0  ;;  %v251_v54 = vmax.f32 %v1974_v35, 0.0  ;;  %v195_v55 = vadd.f32 %v1824_v9, %v124_v46  ;;  %v128_v57 = vmul.f32 %v1817_v6, %v57_v43  ;;  %v82_v16 = vld [vmem:[%s2448_s0 + $0x1b8] sm:$0xff]  ;;  %v77_v35 = vld [vmem:[%s2448_s0 + $0x190] sm:$0xff] }
  0x18   :  { %1667 = vmatprep.subr.bf16.mxu0 %v1905_v50  ;;  %1741 = vmatprep.subr.bf16.mxu1 %v1905_v50  ;;  %v196_v56 = vadd.f32 %v1824_v9, %v125_v47  ;;  %v252_v58 = vmax.f32 %v1988_v41, 0.0  ;;  %v197_v59 = vadd.f32 %v1824_v9, %v126_v51  ;;  %v198_v60 = vadd.f32 %v1824_v9, %v127_v52  ;;  %v51_v47 = vld [vmem:[%s2448_s0 + $0xc0] sm:$0xff] }
  0x19   :  { %v129_v61 = vmul.f32 %v1817_v6, %v58_v48  ;;  %v259_v63 = vmax.f32 %v195_v55, 0.0  ;;  %v199_v1 = vadd.f32 %v1824_v9, %v128_v57  ;;  %v130_v2 = vmul.f32 %v1817_v6, %v59_v53  ;;  %v68_v55 = vld [vmem:[%s2448_s0 + $0x148] sm:$0xff] }
  0x1a   :  { %v260_v0 = vmax.f32 %v196_v56, 0.0  ;;  %v2035_v5 = vadd.f32 %v1824_v9, %v120_v42  ;;  %v262_v8 = vmax.f32 %v198_v60, 0.0  ;;  %v131_v15 = vmul.f32 %v1817_v6, %v60_v62  ;;  %v70_v62 = vld [vmem:[%s2448_s0 + $0x158] sm:$0xff] }
  0x1b   :  { %1668 = vmatpush3.bf16.msra.mxu0 %v1905_v50  ;;  %1749 = vmatpush3.bf16.msra.mxu1 %v1905_v50  ;;  %v2008_v50 = vmul.f32 %v1817_v6, %v50_v36  ;;  %v200_v10 = vadd.f32 %v1824_v9, %v129_v61  ;;  %v263_v14 = vmax.f32 %v199_v1, 0.0  ;;  %v201_v17 = vadd.f32 %v1824_v9, %v130_v2  ;;  %v69_v61 = vld [vmem:[%s2448_s0 + $0x150] sm:$0xff]  ;;  %v71_v2 = vld [vmem:[%s2448_s0 + $0x160] sm:$0xff] }
  0x1c   :  { %1669 = vmatprep.subr.bf16.mxu0 %v1759_v7  ;;  %1742 = vmatprep.subr.bf16.mxu1 %v1759_v7  ;;  %v2044_v13 = vpack.c.bf16 %v260_v0, %v259_v63  ;;  %v132_v24 = vmul.f32 %v1817_v6, %v61_v3  ;;  %v133_v25 = vmul.f32 %v1817_v6, %v62_v4  ;;  %v72_v3 = vld [vmem:[%s2448_s0 + $0x168] sm:$0xff]  ;;  %v255_v19 = vmax.f32 %v2035_v5, 0.0 }
  0x1d   :  { %v202_v29 = vadd.f32 %v1824_v9, %v131_v15  ;;  %v265_v30 = vmax.f32 %v201_v17, 0.0  ;;  %v134_v31 = vmul.f32 %v1817_v6, %v63_v11  ;;  %v135_v36 = vmul.f32 %v1817_v6, %v64_v12  ;;  %v74_v17 = vld [vmem:[%s2448_s0 + $0x178] sm:$0xff] }
  0x1e   :  { %v203_v42 = vadd.f32 %v1824_v9, %v132_v24  ;;  %v204_v43 = vadd.f32 %v1824_v9, %v133_v25  ;;  %v136_v46 = vmul.f32 %v1817_v6, %v65_v18  ;;  %v138_v60 = vmul.f32 %v1817_v6, %v67_v37 }
  0x1f   :  { %1670 = vmatpush3.bf16.msra.mxu0 %v1759_v7  ;;  %1750 = vmatpush3.bf16.msra.mxu1 %v1759_v7  ;;  %v261_v7 = vmax.f32 %v197_v59, 0.0  ;;  %v266_v48 = vmax.f32 %v202_v29, 0.0  ;;  %v205_v51 = vadd.f32 %v1824_v9, %v134_v31  ;;  %v206_v52 = vadd.f32 %v1824_v9, %v135_v36  ;;  %v52_v29 = vld [vmem:[%s2448_s0 + $0xc8] sm:$0xff] }
  0x20   :  { %v267_v56 = vmax.f32 %v203_v42, 0.0  ;;  %v268_v57 = vmax.f32 %v204_v43, 0.0  ;;  %v207_v59 = vadd.f32 %v1824_v9, %v136_v46  ;;  %v122_v4 = vmul.f32 %v1817_v6, %v51_v47 }
  0x21   :  { %v2051_v21 = vpack.c.bf16 %v262_v8, %v261_v7  ;;  %v313_v63 = vpack.c.bf16 %v266_v48, %v265_v30  ;;  %v269_v0 = vmax.f32 %v205_v51, 0.0  ;;  %v270_v1 = vmax.f32 %v206_v52, 0.0 }
  0x22   :  { %1672 = vmatmul.mubr.bf16.vlgmr.msra.gmra.mrb[0].mxu0 %v298_v22  ;;  %v264_v22 = vmax.f32 %v200_v10, 0.0  ;;  %v314_v7 = vpack.c.bf16 %v268_v57, %v267_v56  ;;  %v139_v8 = vmul.f32 %v1817_v6, %v68_v55  ;;  %v73_v10 = vld [vmem:[%s2448_s0 + $0x170] sm:$0xff]  ;;  %v271_v12 = vmax.f32 %v207_v59, 0.0 }
  0x23   :  { %1675 = vmatprep.mubr.bf16.mxu0 %v299_v26  ;;  %v66_v26 = vld [vmem:[%s2448_s0 + $0x138] sm:$0xff]  ;;  %1703 = vmatprep.mubr.bf16.mxu1 %v313_v63  ;;  %v315_v11 = vpack.c.bf16 %v270_v1, %v269_v0  ;;  %v141_v15 = vmul.f32 %v1817_v6, %v70_v62  ;;  %v142_v24 = vmul.f32 %v1817_v6, %v71_v2  ;;  %v253_v48 = vmax.f32 %v1997_v45, 0.0 }
  0x24   :  { %v2064_v38 = vpack.c.bf16 %v264_v22, %v263_v14  ;;  %v137_v53 = vmul.f32 %v1817_v6, %v66_v26  ;;  %v140_v14 = vmul.f32 %v1817_v6, %v69_v61  ;;  %1704 = vmatmul.mubr.bf16.vlgmr.msra.gmra.mrb[0].mxu1 %v314_v7  ;;  %v210_v22 = vadd.f32 %v1824_v9, %v139_v8  ;;  %v75_v26 = vld [vmem:[%s2448_s0 + $0x180] sm:$0xff]  ;;  %v84_v7 = vld [vmem:[%s2448_s0 + $0x1c8] sm:$0xff] }
  0x25   :  { %v143_v25 = vmul.f32 %v1817_v6, %v72_v3  ;;  %1707 = vmatprep.mubr.bf16.mxu1 %v315_v11  ;;  %v212_v36 = vadd.f32 %v1824_v9, %v141_v15  ;;  %v144_v37 = vmul.f32 %v1817_v6, %v73_v10  ;;  %v213_v43 = vadd.f32 %v1824_v9, %v142_v24  ;;  %v79_v3 = vld [vmem:[%s2448_s0 + $0x1a0] sm:$0xff]  ;;  %v80_v10 = vld [vmem:[%s2448_s0 + $0x1a8] sm:$0xff]  ;;  %v86_v15 = vld [vmem:[%s2448_s0 + $0x1d8] sm:$0xff] }
  0x26   :  { %v211_v31 = vadd.f32 %v1824_v9, %v140_v14  ;;  %v274_v42 = vmax.f32 %v210_v22, 0.0  ;;  %v145_v47 = vmul.f32 %v1817_v6, %v74_v17  ;;  %v254_v51 = vmax.f32 %v2005_v49, 0.0  ;;  %v85_v14 = vld [vmem:[%s2448_s0 + $0x1d0] sm:$0xff] }
  0x27   :  { %v214_v46 = vadd.f32 %v1824_v9, %v143_v25  ;;  %v2125_v52 = vadd.f32 %v1824_v9, %v2008_v50  ;;  %v123_v55 = vmul.f32 %v1817_v6, %v52_v29  ;;  %v276_v59 = vmax.f32 %v212_v36, 0.0  ;;  %v87_v25 = vld [vmem:[%s2448_s0 + $0x1e0] sm:$0xff] }
  0x28   :  { %v275_v57 = vmax.f32 %v211_v31, 0.0  ;;  %v277_v49 = vmax.f32 %v213_v43, 0.0  ;;  %v2135_v50 = vadd.f32 %v1824_v9, %v144_v37  ;;  %v304_v62 = vpack.c.bf16 %v248_v39, %v247_v34  ;;  %v83_v39 = vld [vmem:[%s2448_s0 + $0x1c0] sm:$0xff]  ;;  %v89_v37 = vld [vmem:[%s2448_s0 + $0x1f0] sm:$0xff] }
  0x29   :  { %v278_v61 = vmax.f32 %v214_v46, 0.0  ;;  %v2152_v63 = vpack.c.bf16 %v252_v58, %v251_v54  ;;  %v2155_v0 = vadd.f32 %v1824_v9, %v145_v47  ;;  %v2162_v20 = vadd.f32 %v1824_v9, %v122_v4  ;;  %v78_v54 = vld [vmem:[%s2448_s0 + $0x198] sm:$0xff] }
  0x2a   :  { %1676 = vmatmul.mubr.bf16.gmra.mrb[4].mxu0 %v1957_v27  ;;  %v208_v27 = vadd.f32 %v1824_v9, %v137_v53  ;;  %v146_v53 = vmul.f32 %v1817_v6, %v75_v26  ;;  %v256_v41 = vmax.f32 %v2125_v52, 0.0  ;;  %v318_v1 = vpack.c.bf16 %v276_v59, %v275_v57  ;;  %v88_v26 = vld [vmem:[%s2448_s0 + $0x1e8] sm:$0xff] }
  0x2b   :  { %1679 = vmatprep.mubr.bf16.mxu0 %v1959_v28  ;;  %v209_v28 = vadd.f32 %v1824_v9, %v138_v60  ;;  %v76_v60 = vld [vmem:[%s2448_s0 + $0x188] sm:$0xff]  ;;  %v279_v2 = vmax.f32 %v2135_v50, 0.0  ;;  %v153_v4 = vmul.f32 %v1817_v6, %v82_v16  ;;  %v280_v8 = vmax.f32 %v2155_v0, 0.0 }
  0x2c   :  { %v272_v18 = vmax.f32 %v208_v27, 0.0  ;;  %v147_v23 = vmul.f32 %v1817_v6, %v76_v60  ;;  %v2166_v34 = vadd.f32 %v1824_v9, %v146_v53  ;;  %v319_v27 = vpack.c.bf16 %v278_v61, %v277_v49 }
  0x2d   :  { %v273_v30 = vmax.f32 %v209_v28, 0.0  ;;  %v148_v28 = vmul.f32 %v1817_v6, %v77_v35  ;;  %v149_v22 = vmul.f32 %v1817_v6, %v78_v54  ;;  %v224_v24 = vadd.f32 %v1824_v9, %v153_v4 }
  0x2e   :  { %v316_v56 = vpack.c.bf16 %v272_v18, %v271_v12  ;;  %v154_v12 = vmul.f32 %v1817_v6, %v83_v39  ;;  %v218_v17 = vadd.f32 %v1824_v9, %v147_v23  ;;  %v281_v18 = vmax.f32 %v2166_v34, 0.0 }
  0x2f   :  { %v317_v45 = vpack.c.bf16 %v274_v42, %v273_v30  ;;  %v150_v29 = vmul.f32 %v1817_v6, %v79_v3  ;;  %v155_v31 = vmul.f32 %v1817_v6, %v84_v7  ;;  %v151_v42 = vmul.f32 %v1817_v6, %v80_v10 }
  0x30   :  { %1708 = vmatmul.mubr.bf16.gmra.mrb[4].mxu1 %v316_v56  ;;  %v225_v36 = vadd.f32 %v1824_v9, %v154_v12  ;;  %v288_v43 = vmax.f32 %v224_v24, 0.0  ;;  %v156_v46 = vmul.f32 %v1817_v6, %v85_v14  ;;  %v157_v47 = vmul.f32 %v1817_v6, %v86_v15 }
  0x31   :  { %1711 = vmatprep.mubr.bf16.mxu1 %v317_v45  ;;  %v159_v56 = vmul.f32 %v1817_v6, %v88_v26  ;;  %v160_v45 = vmul.f32 %v1817_v6, %v89_v37  ;;  %v257_v54 = vmax.f32 %v2162_v20, 0.0  ;;  %v221_v12 = vadd.f32 %v1824_v9, %v150_v29 }
  0x32   :  { %1680 = vmatmul.mubr.bf16.gmra.mrb[8].mxu0 %v1968_v32  ;;  %v81_v32 = vld [vmem:[%s2448_s0 + $0x1b0] sm:$0xff]  ;;  %v289_v53 = vmax.f32 %v225_v36, 0.0  ;;  %v227_v59 = vadd.f32 %v1824_v9, %v156_v46  ;;  %v228_v60 = vadd.f32 %v1824_v9, %v157_v47  ;;  %v222_v20 = vadd.f32 %v1824_v9, %v151_v42 }
  0x33   :  { %1683 = vmatprep.mubr.bf16.mxu0 %v1970_v33  ;;  %v305_v33 = vpack.c.bf16 %v250_v44, %v249_v40  ;;  %v2174_v40 = vpack.c.bf16 %v254_v51, %v253_v48  ;;  %v2178_v44 = vadd.f32 %v1824_v9, %v123_v55  ;;  %v152_v58 = vmul.f32 %v1817_v6, %v81_v32  ;;  %v90_v48 = vld [vmem:[%s2448_s0 + $0x1f8] sm:$0xff] }
  0x34   :  { %v226_v51 = vadd.f32 %v1824_v9, %v155_v31  ;;  %v158_v55 = vmul.f32 %v1817_v6, %v87_v25  ;;  %v230_v50 = vadd.f32 %v1824_v9, %v159_v56  ;;  %v161_v32 = vmul.f32 %v1817_v6, %v90_v48 }
  0x35   :  { %v223_v11 = vadd.f32 %v1824_v9, %v152_v58  ;;  %v292_v0 = vmax.f32 %v228_v60, 0.0  ;;  %v231_v16 = vadd.f32 %v1824_v9, %v160_v45  ;;  %v320_v58 = vpack.c.bf16 %v280_v8, %v279_v2 }
  0x36   :  { %v290_v49 = vmax.f32 %v226_v51, 0.0  ;;  %v229_v61 = vadd.f32 %v1824_v9, %v158_v55  ;;  %v294_v35 = vmax.f32 %v230_v50, 0.0  ;;  %v232_v39 = vadd.f32 %v1824_v9, %v161_v32 }
  0x37   :  { %v287_v30 = vmax.f32 %v223_v11, 0.0  ;;  %v295_v3 = vmax.f32 %v231_v16, 0.0  ;;  %v219_v6 = vadd.f32 %v1824_v9, %v148_v28  ;;  %v258_v10 = vmax.f32 %v2178_v44, 0.0 }
  0x38   :  { %1712 = vmatmul.mubr.bf16.gmra.mrb[8].mxu1 %v318_v1  ;;  %v325_v23 = vpack.c.bf16 %v290_v49, %v289_v53  ;;  %v293_v34 = vmax.f32 %v229_v61, 0.0  ;;  %v296_v7 = vmax.f32 %v232_v39, 0.0  ;;  %v285_v15 = vmax.f32 %v221_v12, 0.0 }
  0x39   :  { %v324_v57 = vpack.c.bf16 %v288_v43, %v287_v30  ;;  %1715 = vmatprep.mubr.bf16.mxu1 %v319_v27  ;;  %v220_v27 = vadd.f32 %v1824_v9, %v149_v22  ;;  %v283_v8 = vmax.f32 %v219_v6, 0.0  ;;  %v309_v14 = vpack.c.bf16 %v258_v10, %v257_v54 }
  0x3a   :  { %1684 = vmatmul.mubr.bf16.gmra.mrb[12].mxu0 %v304_v62  ;;  %v282_v62 = vmax.f32 %v218_v17, 0.0  ;;  %v327_v4 = vpack.c.bf16 %v294_v35, %v293_v34  ;;  %v328_v2 = vpack.c.bf16 %v296_v7, %v295_v3  ;;  %v1760_v9 = vmov 0.0  }
  0x3b   :  { %1687 = vmatprep.mubr.bf16.mxu0 %v305_v33  ;;  %v291_v33 = vmax.f32 %v227_v59, 0.0  ;;  %v284_v28 = vmax.f32 %v220_v27, 0.0  ;;  %25 = vst [vmem:[%s2451_s5] sm:$0x1] %v1760_v9  ;;  %26 = vst [vmem:[%s2452_s6] sm:$0x1] %v1760_v9 }
  0x3c   :  { %v321_v11 = vpack.c.bf16 %v282_v62, %v281_v18 }
  0x3d   :  { %v326_v1 = vpack.c.bf16 %v292_v0, %v291_v33  ;;  %v322_v44 = vpack.c.bf16 %v284_v28, %v283_v8 }
  0x40   :  { %1716 = vmatmul.mubr.bf16.gmra.mrb[12].mxu1 %v320_v58 }
  0x41   :  { %1719 = vmatprep.mubr.bf16.mxu1 %v321_v11 }
  0x42   :  { %1688 = vmatmul.mubr.bf16.gmra.mrb[16].mxu0 %v2152_v63  ;;  %v308_v63 = vpack.c.bf16 %v256_v41, %v255_v19 }
  0x43   :  { %1691 = vmatprep.mubr.bf16.mxu0 %v2174_v40  ;;  %v286_v40 = vmax.f32 %v222_v20, 0.0 }
  0x45   :  { %v323_v17 = vpack.c.bf16 %v286_v40, %v285_v15 }
  0x48   :  { %1720 = vmatmul.mubr.bf16.gmra.mrb[16].mxu1 %v322_v44 }
  0x49   :  { %1723 = vmatprep.mubr.bf16.mxu1 %v323_v17 }
  0x4a   :  { %1692 = vmatmul.mubr.bf16.gmra.mrb[20].mxu0 %v308_v63 }
  0x4b   :  { %1695 = vmatprep.mubr.bf16.mxu0 %v309_v14 }
  0x50   :  { %1724 = vmatmul.mubr.bf16.gmra.mrb[20].mxu1 %v324_v57 }
  0x51   :  { %1727 = vmatprep.mubr.bf16.mxu1 %v325_v23 }
  0x52   :  { %1696 = vmatmul.mubr.bf16.gmra.mrb[24].mxu0 %v2044_v13 }
  0x53   :  { %1699 = vmatprep.mubr.bf16.mxu0 %v2051_v21 }
  0x58   :  { %1728 = vmatmul.mubr.bf16.gmra.mrb[24].mxu1 %v326_v1 }
  0x59   :  { %1731 = vmatprep.mubr.bf16.mxu1 %v327_v4 }
  0x5a   :  { %1700 = vmatmul.mubr.bf16.gmra.mrb[28].mxu0 %v2064_v38 }
  0x60   :  { %1732 = vmatmul.mubr.bf16.gmra.mrb[28].mxu1 %v328_v2 }
  0xf5   :  { %v1673_v5 = vpop.f32.mrb[0].mxu0 }
  0xf6   :  { %v427_v13 = vpop.f32.mrb[1].mxu0 }
  0xf7   :  { %v1674_v52 = vpop.f32.mrb[2].mxu0  ;;  %v1705_v56 = vpop.f32.mrb[0].mxu1 }
  0xf8   :  { %v683_v21 = vpack.c.bf16 %v1674_v52, %v1673_v5  ;;  %v430_v19 = vpop.f32.mrb[3].mxu0  ;;  %v555_v57 = vpop.f32.mrb[1].mxu1 }
  0xf9   :  { %v682_v41 = vpack.c.bf16 %v430_v19, %v427_v13  ;;  %v1706_v49 = vpop.f32.mrb[2].mxu1 }
  0xfa   :  { %1584 = vst [vmem:[%s2453_s4 + $0x8] sm:$0xff] %v683_v21   ;;  %v1004_v38 = vunpack.c.l.bf16 %v683_v21  ;;  %v1005_v24 = vunpack.c.h.bf16 %v683_v21  ;;  %v2271_v61 = vpack.c.bf16 %v1706_v49, %v1705_v56  ;;  %v558_v50 = vpop.f32.mrb[3].mxu1 }
  0xfb   :  { %1428 = vst [vmem:[%s2453_s4] sm:$0xff] %v682_v41   ;;  %v1002_v18 = vunpack.c.l.bf16 %v682_v41  ;;  %v1003_v22 = vunpack.c.h.bf16 %v682_v41  ;;  %v2273_v16 = vpack.c.bf16 %v558_v50, %v555_v57 }
  0xfc   :  { %v1141_v36 = vmul.f32 %v1004_v38, %v1004_v38  ;;  %v1142_v48 = vmul.f32 %v1005_v24, %v1005_v24  ;;  %1600 = vst [vmem:[%s2453_s4 + $0x88] sm:$0xff] %v2271_v61  }
  0xfd   :  { %v1067_v25 = vadd.f32 %v1003_v22, %v1002_v18  ;;  %v1139_v26 = vmul.f32 %v1002_v18, %v1002_v18  ;;  %v1140_v29 = vmul.f32 %v1003_v22, %v1003_v22  ;;  %v1677_v30 = vpop.f32.mrb[4].mxu0  ;;  %1599 = vst [vmem:[%s2453_s4 + $0x80] sm:$0xff] %v2273_v16  }
  0xfe   :  { %v443_v31 = vpop.f32.mrb[5].mxu0 }
  0xff   :  { %v1068_v37 = vadd.f32 %v1067_v25, %v1004_v38  ;;  %v1203_v42 = vadd.f32 %v1140_v29, %v1139_v26  ;;  %v1678_v43 = vpop.f32.mrb[6].mxu0 }
 0x100   :  { %v685_v46 = vpack.c.bf16 %v1678_v43, %v1677_v30  ;;  %v446_v47 = vpop.f32.mrb[7].mxu0 }
 0x101   :  { %v1204_v51 = vadd.f32 %v1203_v42, %v1141_v36  ;;  %v684_v53 = vpack.c.bf16 %v446_v47, %v443_v31  ;;  %v1069_v55 = vadd.f32 %v1068_v37, %v1005_v24 }
 0x102   :  { %1586 = vst [vmem:[%s2453_s4 + $0x18] sm:$0xff] %v685_v46   ;;  %v1008_v32 = vunpack.c.l.bf16 %v685_v46  ;;  %v1009_v23 = vunpack.c.h.bf16 %v685_v46 }
 0x103   :  { %1585 = vst [vmem:[%s2453_s4 + $0x10] sm:$0xff] %v684_v53   ;;  %v1006_v59 = vunpack.c.l.bf16 %v684_v53  ;;  %v1007_v60 = vunpack.c.h.bf16 %v684_v53  ;;  %v1205_v45 = vadd.f32 %v1204_v51, %v1142_v48  ;;  %v1709_v10 = vpop.f32.mrb[4].mxu1 }
 0x104   :  { %v1145_v6 = vmul.f32 %v1008_v32, %v1008_v32  ;;  %v1146_v11 = vmul.f32 %v1009_v23, %v1009_v23  ;;  %v571_v12 = vpop.f32.mrb[5].mxu1 }
 0x105   :  { %v1070_v62 = vadd.f32 %v1069_v55, %v1006_v59  ;;  %v1143_v33 = vmul.f32 %v1006_v59, %v1006_v59  ;;  %v1681_v0 = vpop.f32.mrb[8].mxu0  ;;  %v1144_v39 = vmul.f32 %v1007_v60, %v1007_v60  ;;  %v1710_v28 = vpop.f32.mrb[6].mxu1 }
 0x106   :  { %v459_v34 = vpop.f32.mrb[9].mxu0  ;;  %v2289_v14 = vpack.c.bf16 %v1710_v28, %v1709_v10  ;;  %v574_v15 = vpop.f32.mrb[7].mxu1 }
 0x107   :  { %v1071_v35 = vadd.f32 %v1070_v62, %v1007_v60  ;;  %v1206_v54 = vadd.f32 %v1205_v45, %v1143_v33  ;;  %v1682_v58 = vpop.f32.mrb[10].mxu0  ;;  %v2295_v21 = vpack.c.bf16 %v574_v15, %v571_v12 }
 0x108   :  { %v687_v1 = vpack.c.bf16 %v1682_v58, %v1681_v0  ;;  %v462_v3 = vpop.f32.mrb[11].mxu0  ;;  %1602 = vst [vmem:[%s2453_s4 + $0x98] sm:$0xff] %v2289_v14  }
 0x109   :  { %v1072_v27 = vadd.f32 %v1071_v35, %v1008_v32  ;;  %v1207_v4 = vadd.f32 %v1206_v54, %v1144_v39  ;;  %v686_v7 = vpack.c.bf16 %v462_v3, %v459_v34  ;;  %1601 = vst [vmem:[%s2453_s4 + $0x90] sm:$0xff] %v2295_v21  }
 0x10a   :  { %1588 = vst [vmem:[%s2453_s4 + $0x28] sm:$0xff] %v687_v1   ;;  %v1012_v40 = vunpack.c.l.bf16 %v687_v1  ;;  %v1013_v13 = vunpack.c.h.bf16 %v687_v1 }
 0x10b   :  { %v1208_v20 = vadd.f32 %v1207_v4, %v1145_v6  ;;  %1587 = vst [vmem:[%s2453_s4 + $0x20] sm:$0xff] %v686_v7   ;;  %v1010_v2 = vunpack.c.l.bf16 %v686_v7  ;;  %v1011_v63 = vunpack.c.h.bf16 %v686_v7  ;;  %v1073_v8 = vadd.f32 %v1072_v27, %v1009_v23  ;;  %v1713_v31 = vpop.f32.mrb[8].mxu1 }
 0x10c   :  { %v1149_v25 = vmul.f32 %v1012_v40, %v1012_v40  ;;  %v1150_v36 = vmul.f32 %v1013_v13, %v1013_v13  ;;  %v587_v37 = vpop.f32.mrb[9].mxu1 }
 0x10d   :  { %v1074_v44 = vadd.f32 %v1073_v8, %v1010_v2  ;;  %v1147_v17 = vmul.f32 %v1010_v2, %v1010_v2  ;;  %v1209_v9 = vadd.f32 %v1208_v20, %v1146_v11  ;;  %v1685_v5 = vpop.f32.mrb[12].mxu0  ;;  %v1148_v41 = vmul.f32 %v1011_v63, %v1011_v63  ;;  %v1714_v48 = vpop.f32.mrb[10].mxu1 }
 0x10e   :  { %v475_v52 = vpop.f32.mrb[13].mxu0  ;;  %v2307_v51 = vpack.c.bf16 %v1714_v48, %v1713_v31  ;;  %v590_v53 = vpop.f32.mrb[11].mxu1 }
 0x10f   :  { %v1075_v19 = vadd.f32 %v1074_v44, %v1011_v63  ;;  %v1210_v38 = vadd.f32 %v1209_v9, %v1147_v17  ;;  %v1686_v18 = vpop.f32.mrb[14].mxu0  ;;  %v2313_v50 = vpack.c.bf16 %v590_v53, %v587_v37 }
 0x110   :  { %v689_v22 = vpack.c.bf16 %v1686_v18, %v1685_v5  ;;  %v478_v24 = vpop.f32.mrb[15].mxu0  ;;  %1604 = vst [vmem:[%s2453_s4 + $0xa8] sm:$0xff] %v2307_v51  }
 0x111   :  { %v1076_v26 = vadd.f32 %v1075_v19, %v1012_v40  ;;  %v1211_v29 = vadd.f32 %v1210_v38, %v1148_v41  ;;  %v688_v30 = vpack.c.bf16 %v478_v24, %v475_v52  ;;  %1603 = vst [vmem:[%s2453_s4 + $0xa0] sm:$0xff] %v2313_v50  }
 0x112   :  { %1590 = vst [vmem:[%s2453_s4 + $0x38] sm:$0xff] %v689_v22   ;;  %v1016_v55 = vunpack.c.l.bf16 %v689_v22  ;;  %v1017_v45 = vunpack.c.h.bf16 %v689_v22 }
 0x113   :  { %v1212_v42 = vadd.f32 %v1211_v29, %v1149_v25  ;;  %1589 = vst [vmem:[%s2453_s4 + $0x30] sm:$0xff] %v688_v30   ;;  %v1014_v43 = vunpack.c.l.bf16 %v688_v30  ;;  %v1015_v46 = vunpack.c.h.bf16 %v688_v30  ;;  %v1077_v47 = vadd.f32 %v1076_v26, %v1013_v13  ;;  %v1717_v1 = vpop.f32.mrb[12].mxu1 }
 0x114   :  { %v1153_v35 = vmul.f32 %v1016_v55, %v1016_v55  ;;  %v1154_v3 = vmul.f32 %v1017_v45, %v1017_v45  ;;  %v603_v6 = vpop.f32.mrb[13].mxu1 }
 0x115   :  { %v1078_v56 = vadd.f32 %v1077_v47, %v1014_v43  ;;  %v1151_v57 = vmul.f32 %v1014_v43, %v1014_v43  ;;  %v1213_v59 = vadd.f32 %v1212_v42, %v1150_v36  ;;  %v1689_v60 = vpop.f32.mrb[16].mxu0  ;;  %v1152_v62 = vmul.f32 %v1015_v46, %v1015_v46  ;;  %v1718_v11 = vpop.f32.mrb[14].mxu1 }
 0x116   :  { %v491_v49 = vpop.f32.mrb[17].mxu0  ;;  %v2325_v12 = vpack.c.bf16 %v1718_v11, %v1717_v1  ;;  %v606_v20 = vpop.f32.mrb[15].mxu1 }
 0x117   :  { %v1079_v32 = vadd.f32 %v1078_v56, %v1015_v46  ;;  %v1214_v33 = vadd.f32 %v1213_v59, %v1151_v57  ;;  %v1690_v0 = vpop.f32.mrb[18].mxu0  ;;  %v2331_v17 = vpack.c.bf16 %v606_v20, %v603_v6 }
 0x118   :  { %v691_v23 = vpack.c.bf16 %v1690_v0, %v1689_v60  ;;  %v494_v34 = vpop.f32.mrb[19].mxu0  ;;  %1606 = vst [vmem:[%s2453_s4 + $0xb8] sm:$0xff] %v2325_v12  }
 0x119   :  { %v1080_v39 = vadd.f32 %v1079_v32, %v1016_v55  ;;  %v1215_v54 = vadd.f32 %v1214_v33, %v1152_v62  ;;  %v690_v58 = vpack.c.bf16 %v494_v34, %v491_v49  ;;  %1605 = vst [vmem:[%s2453_s4 + $0xb0] sm:$0xff] %v2331_v17  }
 0x11a   :  { %1592 = vst [vmem:[%s2453_s4 + $0x48] sm:$0xff] %v691_v23   ;;  %v1020_v2 = vunpack.c.l.bf16 %v691_v23  ;;  %v1021_v40 = vunpack.c.h.bf16 %v691_v23 }
 0x11b   :  { %v1216_v27 = vadd.f32 %v1215_v54, %v1153_v35  ;;  %1591 = vst [vmem:[%s2453_s4 + $0x40] sm:$0xff] %v690_v58   ;;  %v1018_v4 = vunpack.c.l.bf16 %v690_v58  ;;  %v1019_v7 = vunpack.c.h.bf16 %v690_v58  ;;  %v1081_v10 = vadd.f32 %v1080_v39, %v1017_v45  ;;  %v1721_v25 = vpop.f32.mrb[16].mxu1 }
 0x11c   :  { %v1157_v38 = vmul.f32 %v1020_v2, %v1020_v2  ;;  %v1158_v26 = vmul.f32 %v1021_v40, %v1021_v40  ;;  %v619_v29 = vpop.f32.mrb[17].mxu1 }
 0x11d   :  { %v1082_v63 = vadd.f32 %v1081_v10, %v1018_v4  ;;  %v1155_v8 = vmul.f32 %v1018_v4, %v1018_v4  ;;  %v1217_v28 = vadd.f32 %v1216_v27, %v1154_v3  ;;  %v1693_v15 = vpop.f32.mrb[20].mxu0  ;;  %v1156_v5 = vmul.f32 %v1019_v7, %v1019_v7  ;;  %v1722_v42 = vpop.f32.mrb[18].mxu1 }
 0x11e   :  { %v507_v44 = vpop.f32.mrb[21].mxu0  ;;  %v2343_v43 = vpack.c.bf16 %v1722_v42, %v1721_v25  ;;  %v622_v46 = vpop.f32.mrb[19].mxu1 }
 0x11f   :  { %v1083_v9 = vadd.f32 %v1082_v63, %v1019_v7  ;;  %v1218_v13 = vadd.f32 %v1217_v28, %v1155_v8  ;;  %v1694_v52 = vpop.f32.mrb[22].mxu0  ;;  %v2349_v60 = vpack.c.bf16 %v622_v46, %v619_v29 }
 0x120   :  { %v693_v19 = vpack.c.bf16 %v1694_v52, %v1693_v15  ;;  %v510_v41 = vpop.f32.mrb[23].mxu0  ;;  %1608 = vst [vmem:[%s2453_s4 + $0xc8] sm:$0xff] %v2343_v43  }
 0x121   :  { %v1084_v18 = vadd.f32 %v1083_v9, %v1020_v2  ;;  %v1219_v22 = vadd.f32 %v1218_v13, %v1156_v5  ;;  %v692_v24 = vpack.c.bf16 %v510_v41, %v507_v44  ;;  %1607 = vst [vmem:[%s2453_s4 + $0xc0] sm:$0xff] %v2349_v60  }
 0x122   :  { %1594 = vst [vmem:[%s2453_s4 + $0x58] sm:$0xff] %v693_v19   ;;  %v1024_v47 = vunpack.c.l.bf16 %v693_v19  ;;  %v1025_v57 = vunpack.c.h.bf16 %v693_v19 }
 0x123   :  { %v1220_v30 = vadd.f32 %v1219_v22, %v1157_v38  ;;  %1593 = vst [vmem:[%s2453_s4 + $0x50] sm:$0xff] %v692_v24   ;;  %v1022_v31 = vunpack.c.l.bf16 %v692_v24  ;;  %v1023_v36 = vunpack.c.h.bf16 %v692_v24  ;;  %v1085_v37 = vadd.f32 %v1084_v18, %v1021_v40  ;;  %v1725_v54 = vpop.f32.mrb[20].mxu1 }
 0x124   :  { %v1161_v23 = vmul.f32 %v1024_v47, %v1024_v47  ;;  %v1162_v58 = vmul.f32 %v1025_v57, %v1025_v57  ;;  %v635_v1 = vpop.f32.mrb[21].mxu1 }
 0x125   :  { %v1086_v48 = vadd.f32 %v1085_v37, %v1022_v31  ;;  %v1159_v53 = vmul.f32 %v1022_v31, %v1022_v31  ;;  %v1221_v55 = vadd.f32 %v1220_v30, %v1158_v26  ;;  %v1697_v56 = vpop.f32.mrb[24].mxu0  ;;  %v1160_v49 = vmul.f32 %v1023_v36, %v1023_v36  ;;  %v1726_v7 = vpop.f32.mrb[22].mxu1 }
 0x126   :  { %v523_v59 = vpop.f32.mrb[25].mxu0  ;;  %v2361_v10 = vpack.c.bf16 %v1726_v7, %v1725_v54  ;;  %v638_v11 = vpop.f32.mrb[23].mxu1 }
 0x127   :  { %v1087_v45 = vadd.f32 %v1086_v48, %v1023_v36  ;;  %v1222_v32 = vadd.f32 %v1221_v55, %v1159_v53  ;;  %v1698_v62 = vpop.f32.mrb[26].mxu0  ;;  %v2367_v44 = vpack.c.bf16 %v638_v11, %v635_v1 }
 0x128   :  { %v695_v33 = vpack.c.bf16 %v1698_v62, %v1697_v56  ;;  %v526_v0 = vpop.f32.mrb[27].mxu0  ;;  %1610 = vst [vmem:[%s2453_s4 + $0xd8] sm:$0xff] %v2361_v10  }
 0x129   :  { %v1088_v34 = vadd.f32 %v1087_v45, %v1024_v47  ;;  %v1223_v35 = vadd.f32 %v1222_v32, %v1160_v49  ;;  %v694_v39 = vpack.c.bf16 %v526_v0, %v523_v59  ;;  %1609 = vst [vmem:[%s2453_s4 + $0xd0] sm:$0xff] %v2367_v44  }
 0x12a   :  { %1596 = vst [vmem:[%s2453_s4 + $0x68] sm:$0xff] %v695_v33   ;;  %v1028_v20 = vunpack.c.l.bf16 %v695_v33  ;;  %v1029_v15 = vunpack.c.h.bf16 %v695_v33 }
 0x12b   :  { %v1224_v3 = vadd.f32 %v1223_v35, %v1161_v23  ;;  %1595 = vst [vmem:[%s2453_s4 + $0x60] sm:$0xff] %v694_v39   ;;  %v1026_v6 = vunpack.c.l.bf16 %v694_v39  ;;  %v1027_v27 = vunpack.c.h.bf16 %v694_v39  ;;  %v1089_v4 = vadd.f32 %v1088_v34, %v1025_v57  ;;  %v1729_v25 = vpop.f32.mrb[24].mxu1 }
 0x12c   :  { %v1165_v38 = vmul.f32 %v1028_v20, %v1028_v20  ;;  %v1166_v26 = vmul.f32 %v1029_v15, %v1029_v15  ;;  %v651_v29 = vpop.f32.mrb[25].mxu1  ;;  %v1034_v23 = vunpack.c.l.bf16 %v2273_v16 }
 0x12d   :  { %v1090_v2 = vadd.f32 %v1089_v4, %v1026_v6  ;;  %v1163_v63 = vmul.f32 %v1026_v6, %v1026_v6  ;;  %v1225_v8 = vadd.f32 %v1224_v3, %v1162_v58  ;;  %v1701_v28 = vpop.f32.mrb[28].mxu0  ;;  %v1164_v5 = vmul.f32 %v1027_v27, %v1027_v27  ;;  %v1730_v42 = vpop.f32.mrb[26].mxu1 }
 0x12e   :  { %v539_v40 = vpop.f32.mrb[29].mxu0  ;;  %v2379_v46 = vpack.c.bf16 %v1730_v42, %v1729_v25  ;;  %v654_v47 = vpop.f32.mrb[27].mxu1  ;;  %v1035_v58 = vunpack.c.h.bf16 %v2273_v16  ;;  %v1036_v6 = vunpack.c.l.bf16 %v2271_v61  ;;  %v1171_v11 = vmul.f32 %v1034_v23, %v1034_v23 }
 0x12f   :  { %v1091_v9 = vadd.f32 %v1090_v2, %v1027_v27  ;;  %v1226_v13 = vadd.f32 %v1225_v8, %v1163_v63  ;;  %v1702_v52 = vpop.f32.mrb[30].mxu0  ;;  %v2385_v57 = vpack.c.bf16 %v654_v47, %v651_v29  ;;  %v1037_v63 = vunpack.c.h.bf16 %v2271_v61 }
 0x130   :  { %v697_v19 = vpack.c.bf16 %v1702_v52, %v1701_v28  ;;  %v542_v41 = vpop.f32.mrb[31].mxu0  ;;  %1612 = vst [vmem:[%s2453_s4 + $0xe8] sm:$0xff] %v2379_v46   ;;  %v1172_v8 = vmul.f32 %v1035_v58, %v1035_v58  ;;  %v1040_v61 = vunpack.c.l.bf16 %v2289_v14 }
 0x131   :  { %v1092_v18 = vadd.f32 %v1091_v9, %v1028_v20  ;;  %v1227_v22 = vadd.f32 %v1226_v13, %v1164_v5  ;;  %v696_v24 = vpack.c.bf16 %v542_v41, %v539_v40  ;;  %1611 = vst [vmem:[%s2453_s4 + $0xe0] sm:$0xff] %v2385_v57   ;;  %v1038_v5 = vunpack.c.l.bf16 %v2295_v21 }
 0x132   :  { %1598 = vst [vmem:[%s2453_s4 + $0x78] sm:$0xff] %v697_v19   ;;  %v1032_v48 = vunpack.c.l.bf16 %v697_v19  ;;  %v1033_v59 = vunpack.c.h.bf16 %v697_v19  ;;  %v1174_v13 = vmul.f32 %v1037_v63, %v1037_v63  ;;  %v1039_v19 = vunpack.c.h.bf16 %v2295_v21 }
 0x133   :  { %v1228_v30 = vadd.f32 %v1227_v22, %v1165_v38  ;;  %1597 = vst [vmem:[%s2453_s4 + $0x70] sm:$0xff] %v696_v24   ;;  %v1030_v31 = vunpack.c.l.bf16 %v696_v24  ;;  %v1031_v36 = vunpack.c.h.bf16 %v696_v24  ;;  %v1093_v37 = vadd.f32 %v1092_v18, %v1029_v15  ;;  %v1733_v34 = vpop.f32.mrb[28].mxu1 }
 0x134   :  { %v1169_v62 = vmul.f32 %v1032_v48, %v1032_v48  ;;  %v667_v35 = vpop.f32.mrb[29].mxu1  ;;  %v1170_v39 = vmul.f32 %v1033_v59, %v1033_v59  ;;  %v1173_v15 = vmul.f32 %v1036_v6, %v1036_v6  ;;  %v1175_v18 = vmul.f32 %v1038_v5, %v1038_v5 }
 0x135   :  { %v1094_v53 = vadd.f32 %v1093_v37, %v1030_v31  ;;  %v1167_v55 = vmul.f32 %v1030_v31, %v1030_v31  ;;  %v1229_v56 = vadd.f32 %v1228_v30, %v1166_v26  ;;  %v1168_v49 = vmul.f32 %v1031_v36, %v1031_v36  ;;  %v1734_v3 = vpop.f32.mrb[30].mxu1 }
 0x136   :  { %v2394_v27 = vpack.c.bf16 %v1734_v3, %v1733_v34  ;;  %v670_v4 = vpop.f32.mrb[31].mxu1  ;;  %v1041_v24 = vunpack.c.h.bf16 %v2289_v14  ;;  %v1176_v26 = vmul.f32 %v1039_v19, %v1039_v19  ;;  %v1177_v30 = vmul.f32 %v1040_v61, %v1040_v61 }
 0x137   :  { %v1095_v45 = vadd.f32 %v1094_v53, %v1031_v36  ;;  %v1230_v32 = vadd.f32 %v1229_v56, %v1167_v55  ;;  %v2396_v2 = vpack.c.bf16 %v670_v4, %v667_v35  ;;  %v1042_v37 = vunpack.c.l.bf16 %v2313_v50 }
 0x138   :  { %1614 = vst [vmem:[%s2453_s4 + $0xf8] sm:$0xff] %v2394_v27   ;;  %v1178_v42 = vmul.f32 %v1041_v24, %v1041_v24  ;;  %v1043_v21 = vunpack.c.h.bf16 %v2313_v50  ;;  %v1044_v53 = vunpack.c.l.bf16 %v2307_v51  ;;  %v1045_v14 = vunpack.c.h.bf16 %v2307_v51 }
 0x139   :  { %v1096_v33 = vadd.f32 %v1095_v45, %v1032_v48  ;;  %v1231_v0 = vadd.f32 %v1230_v32, %v1168_v49  ;;  %1613 = vst [vmem:[%s2453_s4 + $0xf0] sm:$0xff] %v2396_v2   ;;  %v1179_v56 = vmul.f32 %v1042_v37, %v1042_v37  ;;  %v1047_v50 = vunpack.c.h.bf16 %v2331_v17 }
 0x13a   :  { %v1180_v49 = vmul.f32 %v1043_v21, %v1043_v21  ;;  %v1182_v34 = vmul.f32 %v1045_v14, %v1045_v14  ;;  %v1049_v51 = vunpack.c.h.bf16 %v2325_v12 }
 0x13b   :  { %v1232_v54 = vadd.f32 %v1231_v0, %v1169_v62  ;;  %v1097_v1 = vadd.f32 %v1096_v33, %v1033_v59  ;;  %v1181_v62 = vmul.f32 %v1044_v53, %v1044_v53  ;;  %v1184_v4 = vmul.f32 %v1047_v50, %v1047_v50 }
 0x13d   :  { %v1098_v7 = vadd.f32 %v1097_v1, %v1034_v23  ;;  %v1233_v20 = vadd.f32 %v1232_v54, %v1170_v39  ;;  %v1046_v23 = vunpack.c.l.bf16 %v2331_v17  ;;  %v1048_v54 = vunpack.c.l.bf16 %v2325_v12 }
 0x13e   :  { %v1051_v17 = vunpack.c.h.bf16 %v2349_v60  ;;  %v1053_v12 = vunpack.c.h.bf16 %v2343_v43 }
 0x13f   :  { %v1099_v16 = vadd.f32 %v1098_v7, %v1035_v58  ;;  %v1234_v28 = vadd.f32 %v1233_v20, %v1171_v11  ;;  %v1183_v1 = vmul.f32 %v1046_v23, %v1046_v23  ;;  %v1185_v11 = vmul.f32 %v1048_v54, %v1048_v54 }
 0x141   :  { %v1100_v40 = vadd.f32 %v1099_v16, %v1036_v6  ;;  %v1235_v9 = vadd.f32 %v1234_v28, %v1172_v8  ;;  %v1050_v16 = vunpack.c.l.bf16 %v2349_v60  ;;  %v1186_v8 = vmul.f32 %v1049_v51, %v1049_v51 }
 0x142   :  { %v1055_v60 = vunpack.c.h.bf16 %v2367_v44 }
 0x143   :  { %v1236_v52 = vadd.f32 %v1235_v9, %v1173_v15  ;;  %v1101_v41 = vadd.f32 %v1100_v40, %v1037_v63  ;;  %v1052_v40 = vunpack.c.l.bf16 %v2343_v43  ;;  %v1057_v43 = vunpack.c.h.bf16 %v2361_v10 }
 0x145   :  { %v1102_v38 = vadd.f32 %v1101_v41, %v1038_v5  ;;  %v1237_v22 = vadd.f32 %v1236_v52, %v1174_v13  ;;  %v1187_v5 = vmul.f32 %v1050_v16, %v1050_v16 }
 0x147   :  { %v1103_v25 = vadd.f32 %v1102_v38, %v1039_v19  ;;  %v1238_v29 = vadd.f32 %v1237_v22, %v1175_v18  ;;  %v1188_v19 = vmul.f32 %v1051_v17, %v1051_v17  ;;  %v1054_v22 = vunpack.c.l.bf16 %v2367_v44 }
 0x148   :  { %v1059_v44 = vunpack.c.h.bf16 %v2385_v57 }
 0x149   :  { %v1104_v31 = vadd.f32 %v1103_v25, %v1040_v61  ;;  %v1239_v36 = vadd.f32 %v1238_v29, %v1176_v26  ;;  %v1189_v61 = vmul.f32 %v1052_v40, %v1052_v40  ;;  %v1056_v29 = vunpack.c.l.bf16 %v2361_v10 }
 0x14a   :  { %v1061_v10 = vunpack.c.h.bf16 %v2379_v46 }
 0x14b   :  { %v1240_v47 = vadd.f32 %v1239_v36, %v1177_v30  ;;  %v1105_v48 = vadd.f32 %v1104_v31, %v1041_v24  ;;  %v1190_v24 = vmul.f32 %v1053_v12, %v1053_v12  ;;  %v1191_v31 = vmul.f32 %v1054_v22, %v1054_v22 }
 0x14d   :  { %v1106_v55 = vadd.f32 %v1105_v48, %v1042_v37  ;;  %v1241_v59 = vadd.f32 %v1240_v47, %v1178_v42  ;;  %v1192_v42 = vmul.f32 %v1055_v60, %v1055_v60 }
 0x14f   :  { %v1107_v45 = vadd.f32 %v1106_v55, %v1043_v21  ;;  %v1242_v32 = vadd.f32 %v1241_v59, %v1179_v56  ;;  %v1193_v21 = vmul.f32 %v1056_v29, %v1056_v29  ;;  %v1058_v55 = vunpack.c.l.bf16 %v2385_v57 }
 0x150   :  { %v1194_v56 = vmul.f32 %v1057_v43, %v1057_v43  ;;  %v1063_v57 = vunpack.c.h.bf16 %v2396_v2 }
 0x151   :  { %v1108_v33 = vadd.f32 %v1107_v45, %v1044_v53  ;;  %v1243_v0 = vadd.f32 %v1242_v32, %v1180_v49  ;;  %v1060_v45 = vunpack.c.l.bf16 %v2379_v46  ;;  %v1195_v32 = vmul.f32 %v1058_v55, %v1058_v55 }
 0x152   :  { %v1065_v46 = vunpack.c.h.bf16 %v2394_v27 }
 0x153   :  { %v1244_v35 = vadd.f32 %v1243_v0, %v1181_v62  ;;  %v1109_v39 = vadd.f32 %v1108_v33, %v1045_v14  ;;  %v1196_v0 = vmul.f32 %v1059_v44, %v1059_v44 }
 0x155   :  { %v1110_v58 = vadd.f32 %v1109_v39, %v1046_v23  ;;  %v1245_v3 = vadd.f32 %v1244_v35, %v1182_v34  ;;  %v1197_v34 = vmul.f32 %v1060_v45, %v1060_v45  ;;  %v1062_v39 = vunpack.c.l.bf16 %v2396_v2 }
 0x157   :  { %v1111_v6 = vadd.f32 %v1110_v58, %v1047_v50  ;;  %v1246_v7 = vadd.f32 %v1245_v3, %v1183_v1  ;;  %v1064_v3 = vunpack.c.l.bf16 %v2394_v27  ;;  %v1066_v27 = vld [vmem:[%s2451_s5] sm:$0x1] }
 0x159   :  { %v1112_v20 = vadd.f32 %v1111_v6, %v1048_v54  ;;  %v1247_v63 = vadd.f32 %v1246_v7, %v1184_v4  ;;  %v1198_v54 = vmul.f32 %v1061_v10, %v1061_v10  ;;  %v1199_v6 = vmul.f32 %v1062_v39, %v1062_v39 }
 0x15b   :  { %v1248_v28 = vadd.f32 %v1247_v63, %v1185_v11  ;;  %v1113_v15 = vadd.f32 %v1112_v20, %v1049_v51  ;;  %v1200_v11 = vmul.f32 %v1063_v57, %v1063_v57  ;;  %v1201_v63 = vmul.f32 %v1064_v3, %v1064_v3 }
 0x15d   :  { %v1114_v9 = vadd.f32 %v1113_v15, %v1050_v16  ;;  %v1249_v13 = vadd.f32 %v1248_v28, %v1186_v8  ;;  %v1202_v28 = vmul.f32 %v1065_v46, %v1065_v46 }
 0x15f   :  { %v1115_v52 = vadd.f32 %v1114_v9, %v1051_v17  ;;  %v1250_v41 = vadd.f32 %v1249_v13, %v1187_v5 }
 0x161   :  { %v1116_v38 = vadd.f32 %v1115_v52, %v1052_v40  ;;  %v1251_v18 = vadd.f32 %v1250_v41, %v1188_v19 }
 0x163   :  { %v1252_v25 = vadd.f32 %v1251_v18, %v1189_v61  ;;  %v1117_v26 = vadd.f32 %v1116_v38, %v1053_v12 }
 0x165   :  { %v1118_v30 = vadd.f32 %v1117_v26, %v1054_v22  ;;  %v1253_v36 = vadd.f32 %v1252_v25, %v1190_v24  ;;  %v1138_v22 = vld [vmem:[%s2452_s6] sm:$0x1] }
 0x167   :  { %v1119_v37 = vadd.f32 %v1118_v30, %v1055_v60  ;;  %v1254_v47 = vadd.f32 %v1253_v36, %v1191_v31 }
 0x169   :  { %v1120_v48 = vadd.f32 %v1119_v37, %v1056_v29  ;;  %v1255_v53 = vadd.f32 %v1254_v47, %v1192_v42 }
 0x16b   :  { %v1256_v59 = vadd.f32 %v1255_v53, %v1193_v21  ;;  %v1121_v14 = vadd.f32 %v1120_v48, %v1057_v43 }
 0x16d   :  { %v1122_v49 = vadd.f32 %v1121_v14, %v1058_v55  ;;  %v1257_v62 = vadd.f32 %v1256_v59, %v1194_v56 }
 0x16f   :  { %v1123_v33 = vadd.f32 %v1122_v49, %v1059_v44  ;;  %v1258_v23 = vadd.f32 %v1257_v62, %v1195_v32 }
 0x171   :  { %v1124_v35 = vadd.f32 %v1123_v33, %v1060_v45  ;;  %v1259_v50 = vadd.f32 %v1258_v23, %v1196_v0 }
 0x173   :  { %v1260_v58 = vadd.f32 %v1259_v50, %v1197_v34  ;;  %v1125_v1 = vadd.f32 %v1124_v35, %v1061_v10 }
 0x175   :  { %v1126_v51 = vadd.f32 %v1125_v1, %v1062_v39  ;;  %v1261_v4 = vadd.f32 %v1260_v58, %v1198_v54 }
 0x177   :  { %v1127_v7 = vadd.f32 %v1126_v51, %v1063_v57  ;;  %v1262_v20 = vadd.f32 %v1261_v4, %v1199_v6 }
 0x179   :  { %v1128_v16 = vadd.f32 %v1127_v7, %v1064_v3  ;;  %v1263_v8 = vadd.f32 %v1262_v20, %v1200_v11 }
 0x17b   :  { %v1129_v17 = vadd.f32 %v1128_v16, %v1065_v46  ;;  %v1264_v15 = vadd.f32 %v1263_v8, %v1201_v63 }
 0x17d   :  { %v1130_v40 = vrot.slane %v1129_v17, 4  ;;  %v1265_v9 = vadd.f32 %v1264_v15, %v1202_v28 }
 0x17f   :  { %v1131_v2 = vadd.f32 %v1130_v40, %v1129_v17  ;;  %v1266_v5 = vrot.slane %v1265_v9, 4 }
 0x181   :  { %v1132_v13 = vrot.slane %v1131_v2, 2  ;;  %v1267_v12 = vadd.f32 %v1266_v5, %v1265_v9 }
 0x183   :  { %v1133_v52 = vadd.f32 %v1132_v13, %v1131_v2  ;;  %v1268_v19 = vrot.slane %v1267_v12, 2 }
 0x185   :  { %v1134_v41 = vrot.slane %v1133_v52, 1  ;;  %v1269_v61 = vadd.f32 %v1268_v19, %v1267_v12 }
 0x187   :  { %v1135_v38 = vadd.f32 %v1134_v41, %v1133_v52  ;;  %v1270_v18 = vrot.slane %v1269_v61, 1 }
 0x189   :  { %v1136_v24 = vadd.f32 %v1135_v38, %v1066_v27  ;;  %v1271_v25 = vadd.f32 %v1270_v18, %v1269_v61 }
 0x18b   :  { %1137 = vst [vmem:[%s2451_s5] sm:$0x1] %v1136_v24  ;;  %v1272_v60 = vadd.f32 %v1271_v25, %v1138_v22 }
 0x18d   :  { %1273 = vst [vmem:[%s2452_s6] sm:$0x1] %v1272_v60 }

// kernel: preact_bottleneck_forward.7
= control target key start
LH: loop header
LB: loop body
LE: loop exit
PB: predicated region body
PF: predicated region fallthrough
CT: control target
= control target key end

     0   :  { %s673_s3 = inlined_call_operand.vmem [shape: bf16[128,128], index: 3, kind: input, shape index: {}]   ;;  %s674_s0 = inlined_call_operand.vmem [shape: f32[128,128], index: 0, kind: input, shape index: {}]   ;;  %s675_s1 = inlined_call_operand.vmem [shape: f32[1,128], index: 1, kind: input, shape index: {}]   ;;  %s676_s2 = inlined_call_operand.vmem [shape: f32[1,128], index: 2, kind: input, shape index: {}]   ;;  %s677_s4 = inlined_call_operand.vmem [shape: bf16[128,128], index: 4, kind: output, shape index: {}]  }
   0x1   :  { %v502_v0 = vld [vmem:[%s673_s3] sm:$0xff]   ;;  %v503_v1 = vld [vmem:[%s673_s3 + $0x8] sm:$0xff]   ;;  %v504_v2 = vld [vmem:[%s673_s3 + $0x10] sm:$0xff]  }
   0x2   :  { %454 = vmatprep.subr.bf16.mxu0 %v502_v0  ;;  %486 = vmatprep.subr.bf16.mxu1 %v502_v0  ;;  %v505_v3 = vld [vmem:[%s673_s3 + $0x18] sm:$0xff]   ;;  %v18_v4 = vld [vmem:[%s674_s0] sm:$0xff]  ;;  %v19_v5 = vld [vmem:[%s674_s0 + $0x8] sm:$0xff] }
   0x3   :  { %455 = vmatpush3.bf16.msra.mxu0 %v502_v0  ;;  %494 = vmatpush3.bf16.msra.mxu1 %v502_v0  ;;  %v556_v6 = vld [vmem:[%s675_s1] ss:$0 sm:$0xff]  ;;  %v27_v11 = vld [vmem:[%s674_s0 + $0x48] sm:$0xff]  ;;  %v20_v21 = vld [vmem:[%s674_s0 + $0x10] sm:$0xff] }
   0x4   :  { %456 = vmatprep.subr.bf16.mxu0 %v503_v1  ;;  %487 = vmatprep.subr.bf16.mxu1 %v503_v1  ;;  %v41_v7 = vmul.f32 %v556_v6, %v18_v4  ;;  %v42_v8 = vmul.f32 %v556_v6, %v19_v5  ;;  %v563_v9 = vld [vmem:[%s676_s2] ss:$0 sm:$0xff]  ;;  %v50_v13 = vmul.f32 %v556_v6, %v27_v11  ;;  %v21_v24 = vld [vmem:[%s674_s0 + $0x18] sm:$0xff]  ;;  %v28_v25 = vld [vmem:[%s674_s0 + $0x50] sm:$0xff] }
   0x5   :  { %v26_v10 = vld [vmem:[%s674_s0 + $0x40] sm:$0xff]  ;;  %v29_v26 = vld [vmem:[%s674_s0 + $0x58] sm:$0xff]  ;;  %v507_v27 = vld [vmem:[%s673_s3 + $0x28] sm:$0xff]   ;;  %v43_v34 = vmul.f32 %v556_v6, %v20_v21  ;;  %v44_v35 = vmul.f32 %v556_v6, %v21_v24  ;;  %v51_v36 = vmul.f32 %v556_v6, %v28_v25 }
   0x6   :  { %v49_v12 = vmul.f32 %v556_v6, %v26_v10  ;;  %v64_v14 = vadd.f32 %v563_v9, %v41_v7  ;;  %v65_v15 = vadd.f32 %v563_v9, %v42_v8  ;;  %v506_v16 = vld [vmem:[%s673_s3 + $0x20] sm:$0xff]   ;;  %v73_v18 = vadd.f32 %v563_v9, %v50_v13  ;;  %v23_v31 = vld [vmem:[%s674_s0 + $0x28] sm:$0xff]  ;;  %v508_v42 = vld [vmem:[%s673_s3 + $0x30] sm:$0xff]  }
   0x7   :  { %457 = vmatpush3.bf16.msra.mxu0 %v503_v1  ;;  %495 = vmatpush3.bf16.msra.mxu1 %v503_v1  ;;  %v22_v29 = vld [vmem:[%s674_s0 + $0x20] sm:$0xff]  ;;  %v31_v33 = vld [vmem:[%s674_s0 + $0x68] sm:$0xff]  ;;  %v52_v37 = vmul.f32 %v556_v6, %v29_v26  ;;  %v46_v39 = vmul.f32 %v556_v6, %v23_v31  ;;  %v66_v43 = vadd.f32 %v563_v9, %v43_v34  ;;  %v24_v48 = vld [vmem:[%s674_s0 + $0x30] sm:$0xff] }
   0x8   :  { %458 = vmatprep.subr.bf16.mxu0 %v504_v2  ;;  %488 = vmatprep.subr.bf16.mxu1 %v504_v2  ;;  %v72_v17 = vadd.f32 %v563_v9, %v49_v12  ;;  %v80_v19 = vmax.f32 %v64_v14, 0.0  ;;  %v81_v20 = vmax.f32 %v65_v15, 0.0  ;;  %v89_v23 = vmax.f32 %v73_v18, 0.0  ;;  %v30_v32 = vld [vmem:[%s674_s0 + $0x60] sm:$0xff]  ;;  %v25_v52 = vld [vmem:[%s674_s0 + $0x38] sm:$0xff]  ;;  %v32_v53 = vld [vmem:[%s674_s0 + $0x70] sm:$0xff] }
   0x9   :  { %v45_v38 = vmul.f32 %v556_v6, %v22_v29  ;;  %v53_v40 = vmul.f32 %v556_v6, %v30_v32  ;;  %v54_v41 = vmul.f32 %v556_v6, %v31_v33  ;;  %v67_v44 = vadd.f32 %v563_v9, %v44_v35  ;;  %v33_v54 = vld [vmem:[%s674_s0 + $0x78] sm:$0xff] }
   0xa   :  { %v88_v22 = vmax.f32 %v72_v17, 0.0  ;;  %v96_v28 = vpack.c.bf16 %v81_v20, %v80_v19  ;;  %v74_v45 = vadd.f32 %v563_v9, %v51_v36  ;;  %v75_v46 = vadd.f32 %v563_v9, %v52_v37  ;;  %v509_v55 = vld [vmem:[%s673_s3 + $0x38] sm:$0xff]  }
   0xb   :  { %459 = vmatpush3.bf16.msra.mxu0 %v504_v2  ;;  %496 = vmatpush3.bf16.msra.mxu1 %v504_v2  ;;  %v68_v47 = vadd.f32 %v563_v9, %v45_v38  ;;  %v69_v49 = vadd.f32 %v563_v9, %v46_v39  ;;  %v76_v50 = vadd.f32 %v563_v9, %v53_v40  ;;  %v82_v56 = vmax.f32 %v66_v43, 0.0 }
   0xc   :  { %460 = vmatprep.subr.bf16.mxu0 %v505_v3  ;;  %489 = vmatprep.subr.bf16.mxu1 %v505_v3  ;;  %v100_v30 = vpack.c.bf16 %v89_v23, %v88_v22  ;;  %v77_v51 = vadd.f32 %v563_v9, %v54_v41  ;;  %v83_v57 = vmax.f32 %v67_v44, 0.0  ;;  %v90_v58 = vmax.f32 %v74_v45, 0.0 }
   0xd   :  { %470 = vmatprep.mubr.bf16.mxu0 %v96_v28  ;;  %v91_v59 = vmax.f32 %v75_v46, 0.0  ;;  %v47_v60 = vmul.f32 %v556_v6, %v24_v48  ;;  %v48_v61 = vmul.f32 %v556_v6, %v25_v52  ;;  %v55_v62 = vmul.f32 %v556_v6, %v32_v53 }
   0xe   :  { %478 = vmatprep.mubr.bf16.mxu1 %v100_v30  ;;  %v56_v63 = vmul.f32 %v556_v6, %v33_v54  ;;  %v84_v0 = vmax.f32 %v68_v47, 0.0  ;;  %v85_v1 = vmax.f32 %v69_v49, 0.0  ;;  %v92_v2 = vmax.f32 %v76_v50, 0.0 }
   0xf   :  { %461 = vmatpush3.bf16.msra.mxu0 %v505_v3  ;;  %497 = vmatpush3.bf16.msra.mxu1 %v505_v3  ;;  %v93_v3 = vmax.f32 %v77_v51, 0.0  ;;  %v97_v4 = vpack.c.bf16 %v83_v57, %v82_v56  ;;  %v101_v5 = vpack.c.bf16 %v91_v59, %v90_v58  ;;  %v70_v7 = vadd.f32 %v563_v9, %v47_v60 }
  0x10   :  { %462 = vmatprep.subr.bf16.mxu0 %v506_v16  ;;  %490 = vmatprep.subr.bf16.mxu1 %v506_v16  ;;  %v71_v8 = vadd.f32 %v563_v9, %v48_v61  ;;  %v78_v10 = vadd.f32 %v563_v9, %v55_v62  ;;  %v79_v11 = vadd.f32 %v563_v9, %v56_v63 }
  0x11   :  { %v98_v6 = vpack.c.bf16 %v85_v1, %v84_v0  ;;  %v102_v12 = vpack.c.bf16 %v93_v3, %v92_v2  ;;  %v86_v13 = vmax.f32 %v70_v7, 0.0 }
  0x12   :  { %v87_v14 = vmax.f32 %v71_v8, 0.0  ;;  %v94_v15 = vmax.f32 %v78_v10, 0.0 }
  0x13   :  { %463 = vmatpush3.bf16.msra.mxu0 %v506_v16  ;;  %498 = vmatpush3.bf16.msra.mxu1 %v506_v16  ;;  %v95_v16 = vmax.f32 %v79_v11, 0.0 }
  0x14   :  { %464 = vmatprep.subr.bf16.mxu0 %v507_v27  ;;  %491 = vmatprep.subr.bf16.mxu1 %v507_v27  ;;  %v99_v17 = vpack.c.bf16 %v87_v14, %v86_v13 }
  0x15   :  { %v103_v18 = vpack.c.bf16 %v95_v16, %v94_v15 }
  0x17   :  { %465 = vmatpush3.bf16.msra.mxu0 %v507_v27  ;;  %499 = vmatpush3.bf16.msra.mxu1 %v507_v27 }
  0x18   :  { %466 = vmatprep.subr.bf16.mxu0 %v508_v42  ;;  %492 = vmatprep.subr.bf16.mxu1 %v508_v42 }
  0x1b   :  { %467 = vmatpush3.bf16.msra.mxu0 %v508_v42  ;;  %500 = vmatpush3.bf16.msra.mxu1 %v508_v42 }
  0x1c   :  { %468 = vmatprep.subr.bf16.mxu0 %v509_v55  ;;  %493 = vmatprep.subr.bf16.mxu1 %v509_v55 }
  0x1f   :  { %469 = vmatpush3.bf16.msra.mxu0 %v509_v55  ;;  %501 = vmatpush3.bf16.msra.mxu1 %v509_v55 }
  0x22   :  { %471 = vmatmul.mubr.bf16.vlgmr.msra.gmra.mrb[0].mxu0 %v97_v4  ;;  %479 = vmatmul.mubr.bf16.vlgmr.msra.gmra.mrb[0].mxu1 %v101_v5 }
  0x23   :  { %474 = vmatprep.mubr.bf16.mxu0 %v98_v6  ;;  %482 = vmatprep.mubr.bf16.mxu1 %v102_v12 }
  0x2a   :  { %475 = vmatmul.mubr.bf16.gmra.mrb[4].mxu0 %v99_v17  ;;  %483 = vmatmul.mubr.bf16.gmra.mrb[4].mxu1 %v103_v18 }
  0xf5   :  { %v472_v19 = vpop.f32.mrb[0].mxu0  ;;  %v480_v20 = vpop.f32.mrb[0].mxu1 }
  0xf6   :  { %v202_v21 = vpop.f32.mrb[1].mxu0  ;;  %v234_v9 = vpop.f32.mrb[1].mxu1 }
  0xf7   :  { %v473_v22 = vpop.f32.mrb[2].mxu0  ;;  %v481_v23 = vpop.f32.mrb[2].mxu1 }
  0xf8   :  { %v399_v24 = vpack.c.bf16 %v473_v22, %v472_v19  ;;  %v419_v25 = vpack.c.bf16 %v481_v23, %v480_v20  ;;  %v205_v26 = vpop.f32.mrb[3].mxu0  ;;  %v237_v27 = vpop.f32.mrb[3].mxu1 }
  0xf9   :  { %v394_v28 = vpack.c.bf16 %v205_v26, %v202_v21  ;;  %v414_v29 = vpack.c.bf16 %v237_v27, %v234_v9 }
  0xfa   :  { %431 = vst [vmem:[%s677_s4 + $0x8] sm:$0xff] %v399_v24   ;;  %435 = vst [vmem:[%s677_s4 + $0x28] sm:$0xff] %v419_v25  }
  0xfb   :  { %395 = vst [vmem:[%s677_s4] sm:$0xff] %v394_v28   ;;  %434 = vst [vmem:[%s677_s4 + $0x20] sm:$0xff] %v414_v29  }
  0xfd   :  { %v476_v30 = vpop.f32.mrb[4].mxu0  ;;  %v484_v31 = vpop.f32.mrb[4].mxu1 }
  0xfe   :  { %v218_v32 = vpop.f32.mrb[5].mxu0  ;;  %v250_v33 = vpop.f32.mrb[5].mxu1 }
  0xff   :  { %v477_v34 = vpop.f32.mrb[6].mxu0  ;;  %v485_v35 = vpop.f32.mrb[6].mxu1 }
 0x100   :  { %v409_v36 = vpack.c.bf16 %v477_v34, %v476_v30  ;;  %v429_v37 = vpack.c.bf16 %v485_v35, %v484_v31  ;;  %v221_v38 = vpop.f32.mrb[7].mxu0  ;;  %v253_v39 = vpop.f32.mrb[7].mxu1 }
 0x101   :  { %v404_v40 = vpack.c.bf16 %v221_v38, %v218_v32  ;;  %v424_v41 = vpack.c.bf16 %v253_v39, %v250_v33 }
 0x102   :  { %433 = vst [vmem:[%s677_s4 + $0x18] sm:$0xff] %v409_v36   ;;  %437 = vst [vmem:[%s677_s4 + $0x38] sm:$0xff] %v429_v37  }
 0x103   :  { %432 = vst [vmem:[%s677_s4 + $0x10] sm:$0xff] %v404_v40   ;;  %436 = vst [vmem:[%s677_s4 + $0x30] sm:$0xff] %v424_v41  }

// kernel: preact_bottleneck_forward.9
= control target key start
LH: loop header
LB: loop body
LE: loop exit
PB: predicated region body
PF: predicated region fallthrough
CT: control target
= control target key end

     0   :  { %s688_s3 = inlined_call_operand.vmem [shape: bf16[128,128], index: 3, kind: input, shape index: {}]   ;;  %s689_s0 = inlined_call_operand.vmem [shape: bf16[128,128], index: 0, kind: input, shape index: {}]   ;;  %s690_s1 = inlined_call_operand.vmem [shape: f32[1,128], index: 1, kind: input, shape index: {}]   ;;  %s691_s2 = inlined_call_operand.vmem [shape: f32[1,128], index: 2, kind: input, shape index: {}]   ;;  %s692_s4 = inlined_call_operand.vmem [shape: bf16[128,128], index: 4, kind: input, shape index: {}]   ;;  %s693_s5 = inlined_call_operand.vmem [shape: f32[128,128], index: 5, kind: output, shape index: {}]  }
   0x1   :  { %v488_v0 = vld [vmem:[%s688_s3] sm:$0xff]   ;;  %v489_v1 = vld [vmem:[%s688_s3 + $0x8] sm:$0xff]   ;;  %v490_v2 = vld [vmem:[%s688_s3 + $0x10] sm:$0xff]  }
   0x2   :  { %440 = vmatprep.subr.bf16.mxu0 %v488_v0  ;;  %472 = vmatprep.subr.bf16.mxu1 %v488_v0  ;;  %v491_v3 = vld [vmem:[%s688_s3 + $0x18] sm:$0xff]   ;;  %v347_v4 = vld [vmem:[%s689_s0] sm:$0xff]   ;;  %v410_v9 = vld [vmem:[%s689_s0 + $0x8] sm:$0xff]  }
   0x3   :  { %441 = vmatpush3.bf16.msra.mxu0 %v488_v0  ;;  %480 = vmatpush3.bf16.msra.mxu1 %v488_v0  ;;  %v544_v5 = vld [vmem:[%s690_s1] ss:$0 sm:$0xff]  ;;  %v348_v6 = vunpack.c.l.bf16 %v347_v4  ;;  %v349_v7 = vunpack.c.h.bf16 %v347_v4  ;;  %v414_v13 = vld [vmem:[%s689_s0 + $0x28] sm:$0xff]   ;;  %v411_v16 = vld [vmem:[%s689_s0 + $0x10] sm:$0xff]   ;;  %v352_v20 = vunpack.c.l.bf16 %v410_v9  ;;  %v353_v21 = vunpack.c.h.bf16 %v410_v9 }
   0x4   :  { %442 = vmatprep.subr.bf16.mxu0 %v489_v1  ;;  %473 = vmatprep.subr.bf16.mxu1 %v489_v1  ;;  %v413_v8 = vld [vmem:[%s689_s0 + $0x20] sm:$0xff]   ;;  %v368_v24 = vunpack.c.l.bf16 %v414_v13  ;;  %v369_v25 = vunpack.c.h.bf16 %v414_v13  ;;  %v356_v28 = vunpack.c.l.bf16 %v411_v16  ;;  %v415_v31 = vld [vmem:[%s689_s0 + $0x30] sm:$0xff]   ;;  %v493_v32 = vld [vmem:[%s688_s3 + $0x28] sm:$0xff]   ;;  %v357_v40 = vunpack.c.h.bf16 %v411_v16 }
   0x5   :  { %v555_v10 = vld [vmem:[%s691_s2] ss:$0 sm:$0xff]  ;;  %v364_v11 = vunpack.c.l.bf16 %v413_v8  ;;  %v365_v12 = vunpack.c.h.bf16 %v413_v8  ;;  %v60_v14 = vmul.f32 %v348_v6, %v544_v5  ;;  %v61_v15 = vmul.f32 %v349_v7, %v544_v5  ;;  %v412_v44 = vld [vmem:[%s689_s0 + $0x18] sm:$0xff]   ;;  %v494_v48 = vld [vmem:[%s688_s3 + $0x30] sm:$0xff]  }
   0x6   :  { %v492_v17 = vld [vmem:[%s688_s3 + $0x20] sm:$0xff]   ;;  %v62_v35 = vmul.f32 %v352_v20, %v544_v5  ;;  %v63_v36 = vmul.f32 %v353_v21, %v544_v5  ;;  %v70_v38 = vmul.f32 %v368_v24, %v544_v5  ;;  %v71_v39 = vmul.f32 %v369_v25, %v544_v5  ;;  %v416_v47 = vld [vmem:[%s689_s0 + $0x38] sm:$0xff]  }
   0x7   :  { %443 = vmatpush3.bf16.msra.mxu0 %v489_v1  ;;  %481 = vmatpush3.bf16.msra.mxu1 %v489_v1  ;;  %v68_v18 = vmul.f32 %v364_v11, %v544_v5  ;;  %v69_v19 = vmul.f32 %v365_v12, %v544_v5  ;;  %v83_v22 = vadd.f32 %v555_v10, %v60_v14  ;;  %v372_v43 = vunpack.c.l.bf16 %v415_v31  ;;  %v495_v63 = vld [vmem:[%s688_s3 + $0x38] sm:$0xff]  }
   0x8   :  { %444 = vmatprep.subr.bf16.mxu0 %v490_v2  ;;  %474 = vmatprep.subr.bf16.mxu1 %v490_v2  ;;  %v84_v23 = vadd.f32 %v555_v10, %v61_v15  ;;  %v64_v42 = vmul.f32 %v356_v28, %v544_v5  ;;  %v65_v45 = vmul.f32 %v357_v40, %v544_v5  ;;  %v373_v46 = vunpack.c.h.bf16 %v415_v31  ;;  %v379_v28 = vld [vmem:[%s692_s4] sm:$0xff]  }
   0x9   :  { %v91_v26 = vadd.f32 %v555_v10, %v68_v18  ;;  %v92_v27 = vadd.f32 %v555_v10, %v69_v19  ;;  %v99_v29 = vmax.f32 %v83_v22, 0.0  ;;  %v85_v49 = vadd.f32 %v555_v10, %v62_v35 }
   0xa   :  { %v100_v30 = vmax.f32 %v84_v23, 0.0  ;;  %v86_v50 = vadd.f32 %v555_v10, %v63_v36  ;;  %v72_v51 = vmul.f32 %v372_v43, %v544_v5  ;;  %v93_v52 = vadd.f32 %v555_v10, %v70_v38 }
   0xb   :  { %445 = vmatpush3.bf16.msra.mxu0 %v490_v2  ;;  %482 = vmatpush3.bf16.msra.mxu1 %v490_v2  ;;  %v107_v33 = vmax.f32 %v91_v26, 0.0  ;;  %v108_v34 = vmax.f32 %v92_v27, 0.0  ;;  %v94_v53 = vadd.f32 %v555_v10, %v71_v39  ;;  %v73_v54 = vmul.f32 %v373_v46, %v544_v5  ;;  %v421_v27 = vld [vmem:[%s692_s4 + $0x28] sm:$0xff]  }
   0xc   :  { %446 = vmatprep.subr.bf16.mxu0 %v491_v3  ;;  %475 = vmatprep.subr.bf16.mxu1 %v491_v3  ;;  %v115_v37 = vpack.c.bf16 %v100_v30, %v99_v29  ;;  %v360_v55 = vunpack.c.l.bf16 %v412_v44  ;;  %v87_v56 = vadd.f32 %v555_v10, %v64_v42  ;;  %v361_v57 = vunpack.c.h.bf16 %v412_v44  ;;  %v420_v29 = vld [vmem:[%s692_s4 + $0x20] sm:$0xff]  }
   0xd   :  { %v119_v41 = vpack.c.bf16 %v108_v34, %v107_v33  ;;  %v376_v58 = vunpack.c.l.bf16 %v416_v47  ;;  %v377_v59 = vunpack.c.h.bf16 %v416_v47  ;;  %v88_v60 = vadd.f32 %v555_v10, %v65_v45 }
   0xe   :  { %456 = vmatprep.mubr.bf16.mxu0 %v115_v37  ;;  %v95_v61 = vadd.f32 %v555_v10, %v72_v51  ;;  %v96_v62 = vadd.f32 %v555_v10, %v73_v54  ;;  %v101_v0 = vmax.f32 %v85_v49, 0.0  ;;  %v102_v1 = vmax.f32 %v86_v50, 0.0  ;;  %v423_v49 = vld [vmem:[%s692_s4 + $0x38] sm:$0xff]   ;;  %v418_v54 = vld [vmem:[%s692_s4 + $0x10] sm:$0xff]  }
   0xf   :  { %447 = vmatpush3.bf16.msra.mxu0 %v491_v3  ;;  %483 = vmatpush3.bf16.msra.mxu1 %v491_v3  ;;  %v109_v2 = vmax.f32 %v93_v52, 0.0  ;;  %v110_v3 = vmax.f32 %v94_v53, 0.0  ;;  %v66_v4 = vmul.f32 %v360_v55, %v544_v5  ;;  %v67_v6 = vmul.f32 %v361_v57, %v544_v5  ;;  %v422_v55 = vld [vmem:[%s692_s4 + $0x30] sm:$0xff]  }
  0x10   :  { %448 = vmatprep.subr.bf16.mxu0 %v492_v17  ;;  %476 = vmatprep.subr.bf16.mxu1 %v492_v17  ;;  %v74_v7 = vmul.f32 %v376_v58, %v544_v5  ;;  %v75_v8 = vmul.f32 %v377_v59, %v544_v5  ;;  %v103_v9 = vmax.f32 %v87_v56, 0.0  ;;  %v104_v11 = vmax.f32 %v88_v60, 0.0 }
  0x11   :  { %464 = vmatprep.mubr.bf16.mxu1 %v119_v41  ;;  %v111_v12 = vmax.f32 %v95_v61, 0.0  ;;  %v112_v13 = vmax.f32 %v96_v62, 0.0  ;;  %v116_v14 = vpack.c.bf16 %v102_v1, %v101_v0  ;;  %v120_v15 = vpack.c.bf16 %v110_v3, %v109_v2 }
  0x12   :  { %v89_v16 = vadd.f32 %v555_v10, %v66_v4  ;;  %v97_v18 = vadd.f32 %v555_v10, %v74_v7  ;;  %v98_v19 = vadd.f32 %v555_v10, %v75_v8  ;;  %v117_v5 = vpack.c.bf16 %v104_v11, %v103_v9 }
  0x13   :  { %449 = vmatpush3.bf16.msra.mxu0 %v492_v17  ;;  %484 = vmatpush3.bf16.msra.mxu1 %v492_v17  ;;  %v90_v17 = vadd.f32 %v555_v10, %v67_v6  ;;  %v121_v20 = vpack.c.bf16 %v112_v13, %v111_v12  ;;  %v417_v10 = vld [vmem:[%s692_s4 + $0x8] sm:$0xff]   ;;  %v400_v31 = vunpack.c.l.bf16 %v421_v27  ;;  %v396_v33 = vunpack.c.l.bf16 %v420_v29 }
  0x14   :  { %450 = vmatprep.subr.bf16.mxu0 %v493_v32  ;;  %477 = vmatprep.subr.bf16.mxu1 %v493_v32  ;;  %v105_v21 = vmax.f32 %v89_v16, 0.0  ;;  %v113_v23 = vmax.f32 %v97_v18, 0.0  ;;  %v114_v24 = vmax.f32 %v98_v19, 0.0  ;;  %v384_v30 = vunpack.c.l.bf16 %v417_v10 }
  0x15   :  { %v106_v22 = vmax.f32 %v90_v17, 0.0  ;;  %v385_v34 = vunpack.c.h.bf16 %v417_v10  ;;  %v401_v35 = vunpack.c.h.bf16 %v421_v27  ;;  %v381_v38 = vunpack.c.h.bf16 %v379_v28 }
  0x16   :  { %v122_v26 = vpack.c.bf16 %v114_v24, %v113_v23  ;;  %v397_v39 = vunpack.c.h.bf16 %v420_v29  ;;  %v408_v59 = vunpack.c.l.bf16 %v423_v49  ;;  %v388_v60 = vunpack.c.l.bf16 %v418_v54 }
  0x17   :  { %451 = vmatpush3.bf16.msra.mxu0 %v493_v32  ;;  %485 = vmatpush3.bf16.msra.mxu1 %v493_v32  ;;  %v118_v25 = vpack.c.bf16 %v106_v22, %v105_v21  ;;  %v380_v32 = vunpack.c.l.bf16 %v379_v28  ;;  %v404_v61 = vunpack.c.l.bf16 %v422_v55  ;;  %v389_v2 = vunpack.c.h.bf16 %v418_v54 }
  0x18   :  { %452 = vmatprep.subr.bf16.mxu0 %v494_v48  ;;  %478 = vmatprep.subr.bf16.mxu1 %v494_v48  ;;  %v405_v3 = vunpack.c.h.bf16 %v422_v55 }
  0x1b   :  { %453 = vmatpush3.bf16.msra.mxu0 %v494_v48  ;;  %486 = vmatpush3.bf16.msra.mxu1 %v494_v48  ;;  %v419_v48 = vld [vmem:[%s692_s4 + $0x18] sm:$0xff]  }
  0x1c   :  { %454 = vmatprep.subr.bf16.mxu0 %v495_v63  ;;  %479 = vmatprep.subr.bf16.mxu1 %v495_v63  ;;  %v392_v58 = vunpack.c.l.bf16 %v419_v48  ;;  %v393_v62 = vunpack.c.h.bf16 %v419_v48 }
  0x1f   :  { %455 = vmatpush3.bf16.msra.mxu0 %v495_v63  ;;  %487 = vmatpush3.bf16.msra.mxu1 %v495_v63  ;;  %v409_v63 = vunpack.c.h.bf16 %v423_v49 }
  0x22   :  { %457 = vmatmul.mubr.bf16.vlgmr.msra.gmra.mrb[0].mxu0 %v116_v14  ;;  %465 = vmatmul.mubr.bf16.vlgmr.msra.gmra.mrb[0].mxu1 %v120_v15 }
  0x23   :  { %460 = vmatprep.mubr.bf16.mxu0 %v117_v5  ;;  %468 = vmatprep.mubr.bf16.mxu1 %v121_v20 }
  0x2a   :  { %461 = vmatmul.mubr.bf16.gmra.mrb[4].mxu0 %v118_v25  ;;  %469 = vmatmul.mubr.bf16.gmra.mrb[4].mxu1 %v122_v26 }
  0xf5   :  { %v458_v36 = vpop.f32.mrb[0].mxu0  ;;  %v466_v37 = vpop.f32.mrb[0].mxu1 }
  0xf6   :  { %v262_v40 = vadd.f32 %v458_v36, %v384_v30  ;;  %v294_v41 = vadd.f32 %v466_v37, %v400_v31  ;;  %v253_v42 = vpop.f32.mrb[1].mxu0  ;;  %v285_v43 = vpop.f32.mrb[1].mxu1 }
  0xf7   :  { %v254_v44 = vadd.f32 %v380_v32, %v253_v42  ;;  %v286_v45 = vadd.f32 %v396_v33, %v285_v43  ;;  %v459_v46 = vpop.f32.mrb[2].mxu0  ;;  %v467_v47 = vpop.f32.mrb[2].mxu1 }
  0xf8   :  { %318 = vst [vmem:[%s693_s5 + $0x10] sm:$0xff] %v262_v40  ;;  %326 = vst [vmem:[%s693_s5 + $0x50] sm:$0xff] %v294_v41  ;;  %v265_v50 = vadd.f32 %v459_v46, %v385_v34  ;;  %v297_v51 = vadd.f32 %v467_v47, %v401_v35  ;;  %v256_v52 = vpop.f32.mrb[3].mxu0  ;;  %v288_v53 = vpop.f32.mrb[3].mxu1 }
  0xf9   :  { %316 = vst [vmem:[%s693_s5] sm:$0xff] %v254_v44  ;;  %324 = vst [vmem:[%s693_s5 + $0x40] sm:$0xff] %v286_v45  ;;  %v257_v56 = vadd.f32 %v381_v38, %v256_v52  ;;  %v289_v57 = vadd.f32 %v397_v39, %v288_v53 }
  0xfa   :  { %319 = vst [vmem:[%s693_s5 + $0x18] sm:$0xff] %v265_v50  ;;  %327 = vst [vmem:[%s693_s5 + $0x58] sm:$0xff] %v297_v51 }
  0xfb   :  { %317 = vst [vmem:[%s693_s5 + $0x8] sm:$0xff] %v257_v56  ;;  %325 = vst [vmem:[%s693_s5 + $0x48] sm:$0xff] %v289_v57 }
  0xfd   :  { %v462_v0 = vpop.f32.mrb[4].mxu0  ;;  %v470_v1 = vpop.f32.mrb[4].mxu1 }
  0xfe   :  { %v278_v4 = vadd.f32 %v462_v0, %v392_v58  ;;  %v310_v6 = vadd.f32 %v470_v1, %v408_v59  ;;  %v269_v7 = vpop.f32.mrb[5].mxu0  ;;  %v301_v8 = vpop.f32.mrb[5].mxu1 }
  0xff   :  { %v270_v9 = vadd.f32 %v388_v60, %v269_v7  ;;  %v302_v11 = vadd.f32 %v404_v61, %v301_v8  ;;  %v463_v12 = vpop.f32.mrb[6].mxu0  ;;  %v471_v13 = vpop.f32.mrb[6].mxu1 }
 0x100   :  { %322 = vst [vmem:[%s693_s5 + $0x30] sm:$0xff] %v278_v4  ;;  %330 = vst [vmem:[%s693_s5 + $0x70] sm:$0xff] %v310_v6  ;;  %v281_v14 = vadd.f32 %v463_v12, %v393_v62  ;;  %v313_v15 = vadd.f32 %v471_v13, %v409_v63  ;;  %v272_v16 = vpop.f32.mrb[7].mxu0  ;;  %v304_v17 = vpop.f32.mrb[7].mxu1 }
 0x101   :  { %320 = vst [vmem:[%s693_s5 + $0x20] sm:$0xff] %v270_v9  ;;  %328 = vst [vmem:[%s693_s5 + $0x60] sm:$0xff] %v302_v11  ;;  %v273_v18 = vadd.f32 %v389_v2, %v272_v16  ;;  %v305_v19 = vadd.f32 %v405_v3, %v304_v17 }
 0x102   :  { %323 = vst [vmem:[%s693_s5 + $0x38] sm:$0xff] %v281_v14  ;;  %331 = vst [vmem:[%s693_s5 + $0x78] sm:$0xff] %v313_v15 }
 0x103   :  { %321 = vst [vmem:[%s693_s5 + $0x28] sm:$0xff] %v273_v18  ;;  %329 = vst [vmem:[%s693_s5 + $0x68] sm:$0xff] %v305_v19 }

// kernel: preact_bottleneck_forward.8
= control target key start
LH: loop header
LB: loop body
LE: loop exit
PB: predicated region body
PF: predicated region fallthrough
CT: control target
= control target key end

     0   :  { %s19158_s21 = smov 0   ;;  %s23039_s0 = inlined_call_operand.vmem [shape: bf16[2,16,16,128], index: 0, kind: input, shape index: {}]   ;;  %s23040_s1 = inlined_call_operand.vmem [shape: f32[1,128], index: 1, kind: input, shape index: {}]   ;;  %s23041_s2 = inlined_call_operand.vmem [shape: f32[1,128], index: 2, kind: input, shape index: {}]   ;;  %s23042_s3 = inlined_call_operand.vmem [shape: bf16[3,3,128,128], index: 3, kind: input, shape index: {}]   ;;  %s23043_s4 = inlined_call_operand.vmem [shape: bf16[2,8,8,128], index: 4, kind: output, shape index: {0}]   ;;  %s23044_s5 = inlined_call_operand.vmem [shape: f32[1,128], index: 5, kind: output, shape index: {1}]   ;;  %s23045_s6 = inlined_call_operand.vmem [shape: f32[1,128], index: 6, kind: output, shape index: {2}]  }
   0x1 LB: > { %s17846_s22 = sadd.s32 4294967295, %s19118_s21   ;;  %p17850_p0 = scmp.ge.s32.totalorder %s19118_s21, 1  ;;  %s19118_s21 = sphi %s19158_s21, %s17_s21  }
   0x2   : > { %p207_p1 = scmp.lt.s32.totalorder %s19118_s21, 3 }
   0x4   : > { %p208_p2 = pnand %p17850_p0, %p207_p1 }
   0x6   : > { %211 = sbr.rel (%p208_p2) target bundleno = 1377 (0x561), region = 36 }
   0xd   : > { %p237_p3 = scmp.lt.s32.totalorder %s17846_s22, 1  ;;  %p17855_p4 = scmp.ne.s32.totalorder %s17846_s22, 0 }
   0xe   : > { %v19120_v0 = vmov (!%p17855_p4), 0.0  }
   0xf   : > { %s238_s23 = scalar_select %p237_p3, %s17846_s22, 1 }
  0x10   : > { %251 = sbr.rel (%p17855_p4) target bundleno = 23 (0x17), region = 40  ;;  %252 = vst [vmem:[%s23044_s5] sm:$0x1] (!%p17855_p4), %v19120_v0  ;;  %253 = vst [vmem:[%s23045_s6] sm:$0x1] (!%p17855_p4), %v19120_v0 }
  0x11   : > { %s18468_s24 = sshll.u32 %s238_s23, 7  ;;  %s18469_s25 = sshll.u32 %s238_s23, 5 }
  0x12   : > { %s19169_s28 = scalar_lea.vmem %s23039_s0, %s18468_s24  ;;  %s19174_s7 = scalar_lea.vmem %s23043_s4, %s18469_s25 }
  0x17 PF: > { %v19027_v1 = vld [vmem:[%s23042_s3 + $0x40] sm:$0xff]   ;;  %v19121_v3 = vmov 0   ;;  %v19029_v4 = vld [vmem:[%s23042_s3 + $0x48] sm:$0xff]   ;;  %v19031_v6 = vld [vmem:[%s23042_s3 + $0x50] sm:$0xff]   ;;  %v1112_v11 = vlaneseq  ;;  %vm452_vm0 = vcmask 1040384   ;;  %v23094_v29 = vmov 0 }
  0x18   : > { %v19028_v2 = vld [vmem:[%s23042_s3 + $0x100] sm:$0xff]   ;;  %444 = vst [vmem:[#allocation2] sm:$0xf] %v19121_v3  ;;  %445 = vst [vmem:[#allocation2 + $0x4] sm:$0xf] %v19121_v3  ;;  %18720 = vmatprep.subr.bf16.mxu1 %v19027_v1  ;;  %v19030_v5 = vld [vmem:[%s23042_s3 + $0x108] sm:$0xff]  }
  0x19   : > { %446 = vst [vmem:[#allocation2 + $0x8] sm:$0x1] %v19121_v3  ;;  %18816 = vmatprep.subr.bf16.mxu0 %v19028_v2  ;;  %18721 = vmatpush3.bf16.msra.mxu1 %v19027_v1  ;;  %v19032_v7 = vld [vmem:[%s23042_s3 + $0x110] sm:$0xff]   ;;  %v19033_v8 = vld [vmem:[%s23042_s3 + $0x58] sm:$0xff]   ;;  %v19035_v10 = vld [vmem:[%s23042_s3 + $0x60] sm:$0xff]   ;;  %v1113_v18 = vshrl.u32 %v1112_v11, 7 }
  0x1a   : > { %18817 = vmatpush3.bf16.msra.mxu0 %v19028_v2  ;;  %18722 = vmatprep.subr.bf16.mxu1 %v19029_v4  ;;  %v19034_v9 = vld [vmem:[%s23042_s3 + $0x118] sm:$0xff]   ;;  %v19036_v12 = vld [vmem:[%s23042_s3 + $0x120] sm:$0xff]   ;;  %v19037_v13 = vld [vmem:[%s23042_s3 + $0x68] sm:$0xff]   ;;  %vm453_vm1 = vsmask.f32 256  ;;  %vm955_vm6 = vcmask 1043456  }
  0x1b   : > { %18818 = vmatprep.subr.bf16.mxu0 %v19030_v5  ;;  %v19038_v14 = vld [vmem:[%s23042_s3 + $0x128] sm:$0xff]   ;;  %v19222_v16 = vld [vmem:[%s23040_s1] ss:$0 sm:$0xff]  ;;  %v458_v21 = vld [vmem:[#allocation2 + $0x18] sm:$0x1] }
  0x1c   : > { %v18594_v15 = vld [vmem:[%s19169_s28 + $0x8] sm:$0xff]   ;;  %v19227_v17 = vld [vmem:[%s23041_s2] ss:$0 sm:$0xff]  ;;  %vm503_vm2 = vsmask.f32 7938  ;;  %v19039_v22 = vld [vmem:[%s23042_s3 + $0x70] sm:$0xff]  }
  0x1d   : > { %18723 = vmatpush3.bf16.msra.mxu1 %v19029_v4  ;;  %v18516_v19 = vunpack.c.l.bf16 %v18594_v15  ;;  %v18517_v20 = vunpack.c.h.bf16 %v18594_v15  ;;  %vm19234_vm3 = vmand %vm452_vm0, %vm453_vm1  ;;  %v508_v24 = vld [vmem:[#allocation2 + $0x20] sm:$0x1]  ;;  %vm633_vm4 = vsmask.f32 4368  ;;  %v19040_v25 = vld [vmem:[%s23042_s3 + $0x130] sm:$0xff]  }
  0x1e   : > { %18819 = vmatpush3.bf16.msra.mxu0 %v19030_v5  ;;  %18724 = vmatprep.subr.bf16.mxu1 %v19031_v6  ;;  %v459_v28 = vsel %vm19234_vm3, 0, %v458_v21  ;;  %vm19247_vm5 = vmand %vm452_vm0, %vm503_vm2  ;;  %v19122_v31 = vmov 1966171168   ;;  %v19254_v36 = vld [vmem:[%s19169_s28] sm:$0xff]   ;;  %vm1629_vm8 = vsmask.f32 1284 }
  0x1f   : > { %18820 = vmatprep.subr.bf16.mxu0 %v19032_v7  ;;  %v327_v26 = vmul.f32 %v18516_v19, %v19222_v16  ;;  %v328_v27 = vmul.f32 %v18517_v20, %v19222_v16  ;;  %v23095_v29 = vsel %vm19247_vm5, 4294967295, %v23094_v29  ;;  %v17890_v30 = vld.sshfl [vmem:[#allocation2] sm:$0x33 pattern:$0x75316420]  ;;  %v1110_v32 = vunpack.c.l.s4 %v19122_v31  ;;  %vm19262_vm7 = vmor %vm453_vm1, %vm633_vm4  ;;  %v19041_v47 = vld [vmem:[%s23042_s3 + $0x78] sm:$0xff]  }
  0x20   : > { %23096 = vst [vmem:[#allocation3_spill] sm:$0xff] %v23095_v29  ;;  %460 = vst [vmem:[#allocation2 + $0x18] sm:$0x1] %v459_v28  ;;  %v509_v33 = vsel %vm19247_vm5, 0, %v508_v24  ;;  %v1108_v35 = vcombine.high %v17890_v30, %v17890_v30  ;;  %vm1631_vm9 = vsmask.f32 2312  ;;  %v18512_v43 = vunpack.c.l.bf16 %v19254_v36 }
  0x21   : > { %18725 = vmatpush3.bf16.msra.mxu1 %v19031_v6  ;;  %v17891_v34 = vld.sshfl [vmem:[#allocation2 + $0x4] sm:$0x33 pattern:$0x75316420]  ;;  %v366_v37 = vadd.f32 %v19227_v17, %v327_v26  ;;  %v367_v38 = vadd.f32 %v19227_v17, %v328_v27  ;;  %510 = vst [vmem:[#allocation2 + $0x20] sm:$0x1] %v509_v33  ;;  %v1111_v39 = vunpack.c.0.s8 %v1110_v32  ;;  %vm1630_vm11 = vmor %vm453_vm1, %vm1629_vm8  ;;  %v18513_v48 = vunpack.c.h.bf16 %v19254_v36 }
  0x22   : > { %18821 = vmatpush3.bf16.msra.mxu0 %v19032_v7  ;;  %18726 = vmatprep.subr.bf16.mxu1 %v19033_v8  ;;  %v1132_v40 = vcombine.high %v17891_v34, %v17891_v34  ;;  %v19258_v41 = vld.sshfl [vmem:[#allocation2 + $0x8] sm:$0x1 pattern:$0x75316420]  ;;  %vm1633_vm10 = vsmask.f32 3340  ;;  %vm1632_vm13 = vmor %vm1630_vm11, %vm1631_vm9  ;;  %v19278_v50 = vmul.f32 %v18512_v43, %v19222_v16 }
  0x23   : > { %18822 = vmatprep.subr.bf16.mxu0 %v19034_v9  ;;  %v398_v44 = vmax.f32 %v366_v37, 0.0  ;;  %v399_v45 = vmax.f32 %v367_v38, 0.0  ;;  %v19267_v46 = vsub.s32 %v1111_v39, %v1113_v18  ;;  %vm1636_vm12 = vsmask.f32 5396  ;;  %v19275_v49 = vld [vmem:[%s19169_s28 + $0x10] sm:$0xff]   ;;  %v19042_v51 = vld [vmem:[%s23042_s3 + $0x138] sm:$0xff]   ;;  %vm1634_vm0 = vmor %vm1632_vm13, %vm1633_vm10 }
  0x24   : > { %vm1638_vm14 = vsmask.f32 6424  ;;  %vm1640_vm15 = vsmask.f32 7452  ;;  %vm1635_vm1 = vmor %vm1634_vm0, %vm633_vm4  ;;  %v19043_v0 = vld [vmem:[%s23042_s3] sm:$0xff]   ;;  %vm3146_vm11 = vcmask 1043459  }
  0x25   : > { %18727 = vmatpush3.bf16.msra.mxu1 %v19033_v8  ;;  %v18472_v52 = vpack.c.bf16 %v398_v44, %v398_v44  ;;  %v18473_v53 = vpack.c.bf16 %v399_v45, %v399_v45  ;;  %v19284_v54 = vrot.slane %v17890_v30, %v19267_v46  ;;  %v19287_v55 = vrot.slane %v1108_v35, %v19267_v46  ;;  %vm1637_vm8 = vmor %vm1635_vm1, %vm1636_vm12  ;;  %v19044_v11 = vld [vmem:[%s23042_s3 + $0x140] sm:$0xff]  }
  0x26   : > { %18823 = vmatpush3.bf16.msra.mxu0 %v19034_v9  ;;  %18728 = vmatprep.subr.bf16.mxu1 %v19035_v10  ;;  %v19291_v56 = vrot.slane %v17891_v34, %v19267_v46  ;;  %v19294_v57 = vrot.slane %v1132_v40, %v19267_v46  ;;  %v1530_v58 = vrot.slane %v19258_v41, %v19267_v46  ;;  %vm1639_vm4 = vmor %vm1637_vm8, %vm1638_vm14  ;;  %vm3149_vm12 = vcmask 1044484  }
  0x27   : > { %18824 = vmatprep.subr.bf16.mxu0 %v19036_v12  ;;  %v653_v60 = vshrl.u32 %v18472_v52, 16  ;;  %v656_v61 = vshll.u32 %v18472_v52, 16  ;;  %v661_v62 = vshrl.u32 %v18473_v53, 16  ;;  %v664_v63 = vshll.u32 %v18473_v53, 16  ;;  %v964_v1 = vld [vmem:[#allocation2 + $0x18] sm:$0xf]  ;;  %vm19323_vm9 = vmor %vm1639_vm4, %vm1640_vm15 }
  0x28   : > { %v19306_v2 = vcombine.high %v19284_v54, %v19284_v54  ;;  %v19310_v3 = vcombine.high %v19287_v55, %v19287_v55  ;;  %v19314_v4 = vcombine.high %v19291_v56, %v19291_v56  ;;  %v1643_v5 = vshrl.u32 %v19284_v54, 16  ;;  %vm19333_vm10 = vmand %vm955_vm6, %vm503_vm2 }
  0x29   : > { %18729 = vmatpush3.bf16.msra.mxu1 %v19035_v10  ;;  %v655_v6 = vrot.slane %v653_v60, 7  ;;  %v663_v7 = vrot.slane %v661_v62, 7  ;;  %v19320_v8 = vcombine.high %v19294_v57, %v19294_v57  ;;  %v1648_v10 = vshll.u32 %v19287_v55, 16 }
  0x2a   : > { %18825 = vmatpush3.bf16.msra.mxu0 %v19036_v12  ;;  %18730 = vmatprep.subr.bf16.mxu1 %v19037_v13  ;;  %v1656_v15 = vshll.u32 %v19306_v2, 16  ;;  %v1659_v18 = vshrl.u32 %v19306_v2, 16  ;;  %v1664_v19 = vshll.u32 %v19310_v3, 16  ;;  %v1667_v28 = vshrl.u32 %v19310_v3, 16 }
  0x2b   : > { %18826 = vmatprep.subr.bf16.mxu0 %v19038_v14  ;;  %v658_v20 = vor.u32 %v656_v61, %v655_v6  ;;  %v659_v21 = vrot.slane %v655_v6, 4  ;;  %v668_v24 = vrot.slane %v663_v7, 4  ;;  %v1672_v33 = vshll.u32 %v19291_v56, 16 }
  0x2c   : > { %v1666_v27 = vsel %vm19323_vm9, %v1659_v18, %v1664_v19  ;;  %v1675_v34 = vshrl.u32 %v19291_v56, 16  ;;  %v1680_v35 = vshll.u32 %v19294_v57, 16  ;;  %v1683_v37 = vshrl.u32 %v19294_v57, 16 }
  0x2d   : > { %18731 = vmatpush3.bf16.msra.mxu1 %v19037_v13  ;;  %v968_v13 = vld [vmem:[#allocation2 + $0x20] sm:$0x1]  ;;  %v965_v31 = vsel %vm19333_vm10, %v658_v20, %v964_v1  ;;  %v1688_v38 = vshll.u32 %v19314_v4, 16  ;;  %v1674_v39 = vsel %vm19323_vm9, %v1667_v28, %v1672_v33  ;;  %v1691_v40 = vshrl.u32 %v19314_v4, 16 }
  0x2e   : > { %18827 = vmatpush3.bf16.msra.mxu0 %v19038_v14  ;;  %18732 = vmatprep.subr.bf16.mxu1 %v19039_v22  ;;  %v1651_v14 = vshrl.u32 %v19287_v55, 16  ;;  %v969_v32 = vsel %vm19234_vm3, %v668_v24, %v968_v13  ;;  %966 = vst [vmem:[#allocation2 + $0x18] sm:$0xf] %v965_v31  ;;  %v1696_v41 = vshll.u32 %v19320_v8, 16  ;;  %v1699_v43 = vshrl.u32 %v19320_v8, 16 }
  0x2f   : > { %18828 = vmatprep.subr.bf16.mxu0 %v19040_v25  ;;  %970 = vst [vmem:[#allocation2 + $0x20] sm:$0x1] %v969_v32  ;;  %v1682_v44 = vsel %vm19323_vm9, %v1675_v34, %v1680_v35  ;;  %v1690_v45 = vsel %vm19323_vm9, %v1683_v37, %v1688_v38  ;;  %v2213_v60 = vrot.slane %v1666_v27, %v19267_v46  ;;  %vm3140_vm2 = vcmask 1041409  }
  0x30   : > { %v1658_v26 = vsel %vm19323_vm9, %v1651_v14, %v1656_v15  ;;  %v1698_v52 = vsel %vm19323_vm9, %v1691_v40, %v1696_v41  ;;  %v2227_v61 = vrot.slane %v1674_v39, %v19267_v46  ;;  %vm3143_vm6 = vcmask 1042434  }
  0x31   : > { %18733 = vmatpush3.bf16.msra.mxu1 %v19039_v22  ;;  %v666_v22 = vor.u32 %v664_v63, %v663_v7  ;;  %v2199_v53 = vrot.slane %v1658_v26, %v19267_v46  ;;  %v2269_v7 = vrot.slane %v1698_v52, %v19267_v46  ;;  %vm3152_vm13 = vcmask 1045509  }
  0x32   : > { %18829 = vmatpush3.bf16.msra.mxu0 %v19040_v25  ;;  %18734 = vmatprep.subr.bf16.mxu1 %v19041_v47  ;;  %v1650_v25 = vsel %vm19323_vm9, %v1643_v5, %v1648_v10  ;;  %v19385_v5 = vrot.slane %v2213_v60, %v19267_v46  ;;  %v19388_v6 = vrot.slane %v2227_v61, %v19267_v46  ;;  %vm3155_vm14 = vcmask 1046534  }
  0x33   : > { %18830 = vmatprep.subr.bf16.mxu0 %v19042_v51  ;;  %v667_v30 = vsel %vm19262_vm7, %v659_v21, %v666_v22  ;;  %v19382_v1 = vrot.slane %v2199_v53, %v19267_v46  ;;  %v19400_v18 = vrot.slane %v2269_v7, %v19267_v46  ;;  %vm3158_vm15 = vcmask 1047559  }
  0x34   : > { %967 = vst [vmem:[#allocation2 + $0x1c] sm:$0xf] %v667_v30  ;;  %v3077_v20 = vunpack.c.l.b16 %v19385_v5  ;;  %v3078_v21 = vunpack.c.l.b16 %v19388_v6 }
  0x35   : > { %18735 = vmatpush3.bf16.msra.mxu1 %v19041_v47  ;;  %v1704_v47 = vshll.u32 %v1530_v58, 16  ;;  %v2255_v58 = vrot.slane %v1690_v45, %v19267_v46  ;;  %v17892_v15 = vld.sshfl [vmem:[#allocation2 + $0x18] sm:$0x33 pattern:$0x75316420]  ;;  %v3076_v19 = vunpack.c.l.b16 %v19382_v1  ;;  %v3081_v33 = vunpack.c.l.b16 %v19400_v18 }
  0x36   : > { %18831 = vmatpush3.bf16.msra.mxu0 %v19042_v51  ;;  %18744 = vmatprep.subr.bf16.mxu1 %v19043_v0  ;;  %v2185_v51 = vrot.slane %v1650_v25, %v19267_v46  ;;  %v2241_v0 = vrot.slane %v1682_v44, %v19267_v46  ;;  %v1156_v24 = vcombine.high %v17892_v15, %v17892_v15  ;;  %v17907_v31 = vld.sshfl [vmem:[#allocation2 + $0x20] sm:$0x1 pattern:$0x75316420]  ;;  %v18521_v18 = vunpack.c.h.bf16 %v19275_v49 }
  0x37   : > { %18840 = vmatprep.subr.bf16.mxu0 %v19044_v11  ;;  %v1706_v62 = vsel %vm19323_vm9, %v1699_v43, %v1704_v47  ;;  %v19395_v11 = vrot.slane %v2255_v58, %v19267_v46  ;;  %v19406_v25 = vrot.slane %v17892_v15, %v19267_v46  ;;  %v1544_v37 = vrot.slane %v17907_v31, %v19267_v46 }
  0x38   : > { %v19377_v63 = vrot.slane %v2185_v51, %v19267_v46  ;;  %v19392_v10 = vrot.slane %v2241_v0, %v19267_v46  ;;  %v2283_v13 = vrot.slane %v1706_v62, %v19267_v46  ;;  %v19418_v34 = vrot.slane %v1156_v24, %v19267_v46 }
  0x39   : > { %v3080_v32 = vunpack.c.l.b16 %v19395_v11  ;;  %v19422_v35 = vcombine.high %v19406_v25, %v19406_v25  ;;  %v1708_v38 = vshrl.u32 %v19406_v25, 16  ;;  %v3154_v1 = vrot.slane %v3081_v33, 2  ;;  %v461_v33 = vld [vmem:[#allocation2 + $0x24] sm:$0x1] }
  0x3a   : > { %v3075_v14 = vunpack.c.l.b16 %v19377_v63  ;;  %v19409_v26 = vrot.slane %v2283_v13, %v19267_v46  ;;  %v3079_v27 = vunpack.c.l.b16 %v19392_v10  ;;  %v19437_v44 = vcombine.high %v19418_v34, %v19418_v34  ;;  %v455_v63 = vld [vmem:[#allocation2 + $0xc] sm:$0x1] }
  0x3b   : > { %v17893_v22 = vld.sshfl [vmem:[#allocation2 + $0x1c] sm:$0x33 pattern:$0x75316420]  ;;  %v1713_v45 = vshll.u32 %v19418_v34, 16  ;;  %v1716_v47 = vshrl.u32 %v19418_v34, 16 }
  0x3c   : > { %v1180_v28 = vcombine.high %v17893_v22, %v17893_v22  ;;  %v19413_v30 = vrot.slane %v17893_v22, %v19267_v46  ;;  %v1721_v51 = vshll.u32 %v19422_v35, 16  ;;  %v1724_v53 = vshrl.u32 %v19422_v35, 16 }
  0x3d   : > { %v1715_v62 = vsel %vm19323_vm9, %v1708_v38, %v1713_v45  ;;  %v1729_v58 = vshll.u32 %v19437_v44, 16  ;;  %v1732_v7 = vshrl.u32 %v19437_v44, 16  ;;  %v1769_v45 = vshll.u32 %v1544_v37, 16 }
  0x3e   : > { %23103 = vst [vmem:[#allocation4_spill] sm:$0xff] %v19413_v30  ;;  %v19427_v39 = vrot.slane %v1180_v28, %v19267_v46  ;;  %v19431_v40 = vcombine.high %v19413_v30, %v19413_v30  ;;  %v1737_v41 = vshll.u32 %v19413_v30, 16  ;;  %v1740_v43 = vshrl.u32 %v19413_v30, 16 }
  0x3f   : > { %v1723_v0 = vsel %vm19323_vm9, %v1716_v47, %v1721_v51  ;;  %v1731_v28 = vsel %vm19323_vm9, %v1724_v53, %v1729_v58  ;;  %v2297_v51 = vrot.slane %v1715_v62, %v19267_v46 }
  0x40   : > { %23104 = vst [vmem:[#allocation5_spill] sm:$0xff] %v19427_v39  ;;  %23105 = vst [vmem:[#allocation6_spill] sm:$0xff] %v19431_v40  ;;  %v19444_v52 = vcombine.high %v19427_v39, %v19427_v39  ;;  %v1745_v60 = vshll.u32 %v19427_v39, 16  ;;  %v1748_v61 = vshrl.u32 %v19427_v39, 16  ;;  %v1753_v15 = vshll.u32 %v19431_v40, 16 }
  0x41   : > { %v1756_v22 = vshrl.u32 %v19431_v40, 16  ;;  %v1739_v31 = vsel %vm19323_vm9, %v1732_v7, %v1737_v41  ;;  %v2325_v41 = vrot.slane %v1731_v28, %v19267_v46 }
  0x42   : > { %23106 = vst [vmem:[#allocation7_spill] sm:$0xff] %v19444_v52  ;;  %v1747_v13 = vsel %vm19323_vm9, %v1740_v43, %v1745_v60  ;;  %v1761_v24 = vshll.u32 %v19444_v52, 16  ;;  %v1764_v38 = vshrl.u32 %v19444_v52, 16  ;;  %v1755_v43 = vsel %vm19323_vm9, %v1748_v61, %v1753_v15 }
  0x43   : > { %v2311_v60 = vrot.slane %v1723_v0, %v19267_v46  ;;  %v2339_v58 = vrot.slane %v1739_v31, %v19267_v46  ;;  %v2353_v37 = vrot.slane %v1747_v13, %v19267_v46  ;;  %v2304_v61 = vrot.slane %v2297_v51, %v19267_v46 }
  0x44   : > { %v1763_v47 = vsel %vm19323_vm9, %v1756_v22, %v1761_v24  ;;  %v1771_v53 = vsel %vm19323_vm9, %v1764_v38, %v1769_v45  ;;  %v2367_v15 = vrot.slane %v1755_v43, %v19267_v46  ;;  %v2332_v0 = vrot.slane %v2325_v41, %v19267_v46 }
  0x45   : > { %v2318_v7 = vrot.slane %v2311_v60, %v19267_v46  ;;  %v2381_v62 = vrot.slane %v1763_v47, %v19267_v46  ;;  %v2346_v22 = vrot.slane %v2339_v58, %v19267_v46  ;;  %v2360_v24 = vrot.slane %v2353_v37, %v19267_v46 }
  0x46   : > { %v2395_v28 = vrot.slane %v1771_v53, %v19267_v46  ;;  %v2374_v13 = vrot.slane %v2367_v15, %v19267_v46  ;;  %v3082_v38 = vunpack.c.l.b16 %v19409_v26  ;;  %v3083_v45 = vunpack.c.l.b16 %v2304_v61 }
  0x47   : > { %v2388_v31 = vrot.slane %v2381_v62, %v19267_v46  ;;  %v3084_v47 = vunpack.c.l.b16 %v2318_v7  ;;  %v3085_v51 = vunpack.c.l.b16 %v2332_v0  ;;  %v3086_v60 = vunpack.c.l.b16 %v2346_v22 }
  0x48   : > { %v2402_v43 = vrot.slane %v2395_v28, %v19267_v46  ;;  %v3087_v41 = vunpack.c.l.b16 %v2360_v24  ;;  %v3088_v59 = vunpack.c.l.b16 %v2374_v13  ;;  %v3139_v37 = vrot.slane %v3076_v19, 7 }
  0x49   : > { %v3089_v58 = vunpack.c.l.b16 %v2388_v31  ;;  %v3142_v15 = vrot.slane %v3077_v20, 6  ;;  %v3145_v62 = vrot.slane %v3078_v21, 5  ;;  %v3148_v26 = vrot.slane %v3079_v27, 4 }
  0x4a   : > { %v3090_v53 = vunpack.c.l.b16 %v2402_v43  ;;  %v3141_v61 = vsel %vm3140_vm2, %v3139_v37, %v3075_v14  ;;  %v3151_v7 = vrot.slane %v3080_v32, 3  ;;  %v3157_v19 = vrot.slane %v3082_v38, 1  ;;  %v505_v38 = vld [vmem:[#allocation2 + $0x14] sm:$0x1]  ;;  %v511_v43 = vld [vmem:[#allocation2 + $0x2c] sm:$0x1] }
  0x4b   : > { %v3144_v5 = vsel %vm3143_vm6, %v3142_v15, %v3141_v61  ;;  %v3160_v20 = vrot.slane %v3084_v47, 7  ;;  %v3162_v0 = vrot.slane %v3085_v51, 6  ;;  %v3164_v6 = vrot.slane %v3086_v60, 5 }
  0x4c   : > { %v3147_v21 = vsel %vm3146_vm11, %v3145_v62, %v3144_v5  ;;  %v3166_v10 = vrot.slane %v3087_v41, 4  ;;  %v3168_v27 = vrot.slane %v3088_v59, 3  ;;  %v3170_v22 = vrot.slane %v3089_v58, 2  ;;  %v18596_v58 = vld [vmem:[%s19169_s28 + $0x18] sm:$0xff]  }
  0x4d   : > { %v3150_v14 = vsel %vm3149_vm12, %v3148_v26, %v3147_v21  ;;  %v3161_v11 = vsel %vm3140_vm2, %v3160_v20, %v3083_v45  ;;  %v3172_v32 = vrot.slane %v3090_v53, 1  ;;  %v326_v13 = vmul.f32 %v18513_v48, %v19222_v16 }
  0x4e   : > { %v3153_v24 = vsel %vm3152_vm13, %v3151_v7, %v3150_v14  ;;  %v3163_v28 = vsel %vm3143_vm6, %v3162_v0, %v3161_v11  ;;  %v23107_v59 = vunpack.c.l.bf16 %v19275_v49  ;;  %v330_v51 = vmul.f32 %v18521_v18, %v19222_v16 }
  0x4f   : > { %v3156_v45 = vsel %vm3155_vm14, %v3154_v1, %v3153_v24  ;;  %v3165_v47 = vsel %vm3146_vm11, %v3164_v6, %v3163_v28  ;;  %v364_v60 = vadd.f32 %v19227_v17, %v19278_v50  ;;  %v365_v48 = vadd.f32 %v19227_v17, %v326_v13  ;;  %v18598_v1 = vld [vmem:[%s19169_s28 + $0x28] sm:$0xff]  }
  0x50   : > { %v329_v31 = vmul.f32 %v23107_v59, %v19222_v16  ;;  %v3159_v41 = vsel %vm3158_vm15, %v3157_v19, %v3156_v45  ;;  %v3167_v36 = vsel %vm3149_vm12, %v3166_v10, %v3165_v47  ;;  %v369_v53 = vadd.f32 %v19227_v17, %v330_v51 }
  0x51   : > { %v3169_v37 = vsel %vm3152_vm13, %v3168_v27, %v3167_v36  ;;  %v396_v15 = vmax.f32 %v364_v60, 0.0  ;;  %v456_v62 = vsel %vm19234_vm3, 0, %v455_v63  ;;  %v397_v50 = vmax.f32 %v365_v48, 0.0 }
  0x52   : > { %v368_v49 = vadd.f32 %v19227_v17, %v329_v31  ;;  %v3171_v26 = vsel %vm3155_vm14, %v3170_v22, %v3169_v37  ;;  %457 = vst [vmem:[#allocation2 + $0xc] sm:$0x1] %v456_v62  ;;  %v462_v7 = vsel %vm19234_vm3, 0, %v461_v33  ;;  %v401_v5 = vmax.f32 %v369_v53, 0.0 }
  0x53   : > { %v3173_v19 = vsel %vm3158_vm15, %v3172_v32, %v3171_v26  ;;  %463 = vst [vmem:[#allocation2 + $0x24] sm:$0x1] %v462_v7  ;;  %v506_v20 = vsel %vm19247_vm5, 0, %v505_v38  ;;  %v512_v0 = vsel %vm19247_vm5, 0, %v511_v43  ;;  %v18470_v21 = vpack.c.bf16 %v396_v15, %v396_v15  ;;  %v470_v26 = vld [vmem:[#allocation2 + $0x48] sm:$0x1] }
  0x54   : > { %v400_v61 = vmax.f32 %v368_v49, 0.0  ;;  %v3258_v6 = vpack.c.b16 %v3173_v19, %v3159_v41  ;;  %507 = vst [vmem:[#allocation2 + $0x14] sm:$0x1] %v506_v20  ;;  %513 = vst [vmem:[#allocation2 + $0x2c] sm:$0x1] %v512_v0  ;;  %v18471_v10 = vpack.c.bf16 %v397_v50, %v397_v50  ;;  %v18475_v22 = vpack.c.bf16 %v401_v5, %v401_v5  ;;  %v18597_v20 = vld [vmem:[%s19169_s28 + $0x20] sm:$0xff]  }
  0x55   : > { %v18524_v63 = vunpack.c.l.bf16 %v18596_v58  ;;  %v18525_v14 = vunpack.c.h.bf16 %v18596_v58  ;;  %v18532_v11 = vunpack.c.l.bf16 %v18598_v1  ;;  %v636_v32 = vshrl.u32 %v18470_v21, 16  ;;  %v464_v49 = vld [vmem:[#allocation2 + $0x30] sm:$0x1] }
  0x56   : > { %v18474_v27 = vpack.c.bf16 %v400_v61, %v400_v61  ;;  %18736 = vmatprep.mubr.bf16.mxu1 %v3258_v6  ;;  %v639_v18 = vshll.u32 %v18470_v21, 16  ;;  %v644_v33 = vshrl.u32 %v18471_v10, 16  ;;  %v647_v24 = vshll.u32 %v18471_v10, 16 }
  0x57   : > { %v678_v59 = vshrl.u32 %v18475_v22, 16  ;;  %v681_v31 = vshll.u32 %v18475_v22, 16  ;;  %v638_v38 = vrot.slane %v636_v32, 7  ;;  %v18533_v45 = vunpack.c.h.bf16 %v18598_v1  ;;  %v520_v22 = vld [vmem:[#allocation2 + $0x50] sm:$0x1] }
  0x58   : > { %v670_v28 = vshrl.u32 %v18474_v27, 16  ;;  %v673_v13 = vshll.u32 %v18474_v27, 16  ;;  %v646_v43 = vrot.slane %v644_v33, 7  ;;  %v331_v47 = vmul.f32 %v18524_v63, %v19222_v16  ;;  %v514_v27 = vld [vmem:[#allocation2 + $0x38] sm:$0x1] }
  0x59   : > { %v680_v60 = vrot.slane %v678_v59, 7  ;;  %v957_v41 = vld [vmem:[#allocation2 + $0xc] sm:$0xf]  ;;  %v332_v36 = vmul.f32 %v18525_v14, %v19222_v16  ;;  %v335_v48 = vmul.f32 %v18532_v11, %v19222_v16  ;;  %v641_v58 = vor.u32 %v639_v18, %v638_v38 }
  0x5a   : > { %v672_v51 = vrot.slane %v670_v28, 7  ;;  %v642_v37 = vrot.slane %v638_v38, 4  ;;  %v649_v53 = vor.u32 %v647_v24, %v646_v43  ;;  %v651_v15 = vrot.slane %v646_v43, 4  ;;  %v971_v62 = vld [vmem:[#allocation2 + $0x24] sm:$0xf] }
  0x5b   : > { %v683_v7 = vor.u32 %v681_v31, %v680_v60  ;;  %v685_v1 = vrot.slane %v680_v60, 4  ;;  %v961_v19 = vld [vmem:[#allocation2 + $0x14] sm:$0x1]  ;;  %v975_v5 = vld [vmem:[#allocation2 + $0x2c] sm:$0x1]  ;;  %v958_v6 = vsel %vm19333_vm10, %v641_v58, %v957_v41  ;;  %v336_v10 = vmul.f32 %v18533_v45, %v19222_v16 }
  0x5c   : > { %v675_v50 = vor.u32 %v673_v13, %v672_v51  ;;  %v676_v61 = vrot.slane %v672_v51, 4  ;;  %v650_v0 = vsel %vm19262_vm7, %v642_v37, %v649_v53  ;;  %v962_v21 = vsel %vm19234_vm3, %v651_v15, %v961_v19  ;;  %959 = vst [vmem:[#allocation2 + $0xc] sm:$0xf] %v958_v6  ;;  %v18599_v13 = vld [vmem:[%s19169_s28 + $0x30] sm:$0xff]  }
  0x5d   : > { %960 = vst [vmem:[#allocation2 + $0x10] sm:$0xf] %v650_v0  ;;  %963 = vst [vmem:[#allocation2 + $0x14] sm:$0x1] %v962_v21  ;;  %v976_v11 = vsel %vm19234_vm3, %v685_v1, %v975_v5  ;;  %v370_v32 = vadd.f32 %v19227_v17, %v331_v47  ;;  %v371_v18 = vadd.f32 %v19227_v17, %v332_v36  ;;  %v465_v28 = vsel %vm19234_vm3, 0, %v464_v49 }
  0x5e   : > { %v684_v63 = vsel %vm19262_vm7, %v676_v61, %v683_v7  ;;  %v972_v14 = vsel %vm19333_vm10, %v675_v50, %v971_v62  ;;  %977 = vst [vmem:[#allocation2 + $0x2c] sm:$0x1] %v976_v11  ;;  %v374_v33 = vadd.f32 %v19227_v17, %v335_v48  ;;  %v375_v24 = vadd.f32 %v19227_v17, %v336_v10 }
  0x5f   : > { %973 = vst [vmem:[#allocation2 + $0x24] sm:$0xf] %v972_v14  ;;  %974 = vst [vmem:[#allocation2 + $0x28] sm:$0xf] %v684_v63  ;;  %v402_v59 = vmax.f32 %v370_v32, 0.0  ;;  %v471_v31 = vsel %vm19234_vm3, 0, %v470_v26  ;;  %v18528_v60 = vunpack.c.l.bf16 %v18597_v20  ;;  %v18529_v36 = vunpack.c.h.bf16 %v18597_v20 }
  0x60   : > { %466 = vst [vmem:[#allocation2 + $0x30] sm:$0x1] %v465_v28  ;;  %v515_v38 = vsel %vm19247_vm5, 0, %v514_v27  ;;  %v521_v43 = vsel %vm19247_vm5, 0, %v520_v22  ;;  %v403_v45 = vmax.f32 %v371_v18, 0.0  ;;  %v406_v47 = vmax.f32 %v374_v33, 0.0 }
  0x61   : > { %v407_v51 = vmax.f32 %v375_v24, 0.0  ;;  %472 = vst [vmem:[#allocation2 + $0x48] sm:$0x1] %v471_v31  ;;  %516 = vst [vmem:[#allocation2 + $0x38] sm:$0x1] %v515_v38  ;;  %v19569_v41 = vpack.c.bf16 %v402_v59, %v402_v59  ;;  %v18536_v48 = vunpack.c.l.bf16 %v18599_v13  ;;  %v18537_v49 = vunpack.c.h.bf16 %v18599_v13 }
  0x62   : > { %522 = vst [vmem:[#allocation2 + $0x50] sm:$0x1] %v521_v43  ;;  %v19571_v58 = vpack.c.bf16 %v403_v45, %v403_v45  ;;  %v19573_v37 = vpack.c.bf16 %v406_v47, %v406_v47  ;;  %v333_v15 = vmul.f32 %v18528_v60, %v19222_v16  ;;  %v19581_v50 = vmul.f32 %v18529_v36, %v19222_v16 }
  0x63   : > { %v19575_v53 = vpack.c.bf16 %v407_v51, %v407_v51  ;;  %v687_v62 = vshrl.u32 %v19569_v41, 16  ;;  %v19584_v61 = vmul.f32 %v18536_v48, %v19222_v16  ;;  %v18098_v7 = vld.sshfl [vmem:[#allocation2 + $0xc] sm:$0x33 pattern:$0x75316420]  ;;  %v19589_v5 = vmul.f32 %v18537_v49, %v19222_v16 }
  0x64   : > { %v695_v1 = vshrl.u32 %v19571_v58, 16  ;;  %v19592_v20 = vadd.f32 %v19227_v17, %v333_v15  ;;  %v18099_v0 = vld.sshfl [vmem:[#allocation2 + $0x10] sm:$0x33 pattern:$0x75316420]  ;;  %v8023_v6 = vcombine.high %v18098_v7, %v18098_v7  ;;  %v8030_v21 = vrot.slane %v18098_v7, %v19267_v46 }
  0x65   : > { %v19595_v10 = vrot.slane %v687_v62, 7  ;;  %v18100_v22 = vld.sshfl [vmem:[#allocation2 + $0x14] sm:$0x1 pattern:$0x75316420]  ;;  %v8047_v63 = vcombine.high %v18099_v0, %v18099_v0  ;;  %v8054_v14 = vrot.slane %v18099_v0, %v19267_v46 }
  0x66   : > { %v19599_v11 = vrot.slane %v695_v1, 7  ;;  %v18101_v32 = vld.sshfl [vmem:[#allocation2 + $0x24] sm:$0x33 pattern:$0x75316420]  ;;  %v8037_v17 = vrot.slane %v8023_v6, %v19267_v46  ;;  %v8038_v18 = vcombine.high %v8030_v21, %v8030_v21  ;;  %v8077_v33 = vrot.slane %v18100_v22, %v19267_v46 }
  0x67   : > { %v8513_v24 = vshrl.u32 %v8030_v21, 16  ;;  %v18102_v28 = vld.sshfl [vmem:[#allocation2 + $0x28] sm:$0x33 pattern:$0x75316420]  ;;  %v8061_v13 = vrot.slane %v8047_v63, %v19267_v46  ;;  %v8062_v59 = vcombine.high %v8054_v14, %v8054_v14  ;;  %v8085_v31 = vcombine.high %v18101_v32, %v18101_v32 }
  0x68   : > { %v8092_v38 = vrot.slane %v18101_v32, %v19267_v46  ;;  %v18103_v43 = vld.sshfl [vmem:[#allocation2 + $0x2c] sm:$0x1 pattern:$0x75316420]  ;;  %v8039_v45 = vcombine.high %v8037_v17, %v8037_v17  ;;  %v8109_v47 = vcombine.high %v18102_v28, %v18102_v28  ;;  %v8116_v51 = vrot.slane %v18102_v28, %v19267_v46 }
  0x69   : > { %v8518_v60 = vshll.u32 %v8037_v17, 16  ;;  %v8063_v36 = vcombine.high %v8061_v13, %v8061_v13  ;;  %v8099_v48 = vrot.slane %v8085_v31, %v19267_v46  ;;  %v8139_v15 = vrot.slane %v18103_v43, %v19267_v46 }
  0x6a   : > { %v8100_v49 = vcombine.high %v8092_v38, %v8092_v38  ;;  %v8123_v62 = vrot.slane %v8109_v47, %v19267_v46  ;;  %v8124_v7 = vcombine.high %v8116_v51, %v8116_v51  ;;  %v8521_v0 = vshrl.u32 %v8037_v17, 16 }
  0x6b   : > { %v8520_v1 = vsel %vm19323_vm9, %v8513_v24, %v8518_v60  ;;  %v8101_v6 = vcombine.high %v8099_v48, %v8099_v48  ;;  %v8526_v21 = vshll.u32 %v8038_v18, 16  ;;  %v8529_v22 = vshrl.u32 %v8038_v18, 16 }
  0x6c   : > { %v8534_v63 = vshll.u32 %v8039_v45, 16  ;;  %v8125_v32 = vcombine.high %v8123_v62, %v8123_v62  ;;  %v8537_v28 = vshrl.u32 %v8039_v45, 16  ;;  %v8542_v16 = vshll.u32 %v8054_v14, 16 }
  0x6d   : > { %v8545_v27 = vshrl.u32 %v8054_v14, 16  ;;  %v8528_v31 = vsel %vm19323_vm9, %v8521_v0, %v8526_v21  ;;  %v8550_v47 = vshll.u32 %v8061_v13, 16  ;;  %v8553_v19 = vshrl.u32 %v8061_v13, 16 }
  0x6e   : > { %v8536_v43 = vsel %vm19323_vm9, %v8529_v22, %v8534_v63  ;;  %v8544_v24 = vsel %vm19323_vm9, %v8537_v28, %v8542_v16  ;;  %v8558_v17 = vshll.u32 %v8062_v59, 16  ;;  %v8561_v60 = vshrl.u32 %v8062_v59, 16 }
  0x6f   : > { %v8566_v26 = vshll.u32 %v8063_v36, 16  ;;  %v8552_v18 = vsel %vm19323_vm9, %v8545_v27, %v8550_v47  ;;  %v8569_v45 = vshrl.u32 %v8063_v36, 16  ;;  %v8574_v52 = vshll.u32 %v8077_v33, 16 }
  0x70   : > { %v8578_v14 = vshrl.u32 %v8092_v38, 16  ;;  %v8560_v0 = vsel %vm19323_vm9, %v8553_v19, %v8558_v17  ;;  %v8583_v22 = vshll.u32 %v8099_v48, 16  ;;  %v8586_v13 = vshrl.u32 %v8099_v48, 16 }
  0x71   : > { %v8568_v21 = vsel %vm19323_vm9, %v8561_v60, %v8566_v26  ;;  %v8576_v16 = vsel %vm19323_vm9, %v8569_v45, %v8574_v52  ;;  %v8591_v63 = vshll.u32 %v8100_v49, 16  ;;  %v8594_v59 = vshrl.u32 %v8100_v49, 16 }
  0x72   : > { %v8599_v28 = vshll.u32 %v8101_v6, 16  ;;  %v8585_v27 = vsel %vm19323_vm9, %v8578_v14, %v8583_v22  ;;  %v8602_v36 = vshrl.u32 %v8101_v6, 16  ;;  %v8607_v33 = vshll.u32 %v8116_v51, 16 }
  0x73   : > { %v8610_v38 = vshrl.u32 %v8116_v51, 16  ;;  %v8593_v19 = vsel %vm19323_vm9, %v8586_v13, %v8591_v63  ;;  %v8615_v47 = vshll.u32 %v8123_v62, 16  ;;  %v8618_v48 = vshrl.u32 %v8123_v62, 16 }
  0x74   : > { %v8601_v26 = vsel %vm19323_vm9, %v8594_v59, %v8599_v28  ;;  %v8609_v52 = vsel %vm19323_vm9, %v8602_v36, %v8607_v33  ;;  %v8623_v17 = vshll.u32 %v8124_v7, 16  ;;  %v8626_v49 = vshrl.u32 %v8124_v7, 16 }
  0x75   : > { %v8631_v60 = vshll.u32 %v8125_v32, 16  ;;  %v8617_v45 = vsel %vm19323_vm9, %v8610_v38, %v8615_v47  ;;  %v8634_v6 = vshrl.u32 %v8125_v32, 16  ;;  %v8639_v14 = vshll.u32 %v8139_v15, 16 }
  0x76   : > { %v9055_v51 = vrot.slane %v8520_v1, %v19267_v46  ;;  %v8625_v22 = vsel %vm19323_vm9, %v8618_v48, %v8623_v17  ;;  %v9069_v62 = vrot.slane %v8528_v31, %v19267_v46  ;;  %v9083_v63 = vrot.slane %v8536_v43, %v19267_v46 }
  0x77   : > { %v8633_v13 = vsel %vm19323_vm9, %v8626_v49, %v8631_v60  ;;  %v8641_v7 = vsel %vm19323_vm9, %v8634_v6, %v8639_v14  ;;  %v9097_v32 = vrot.slane %v8544_v24, %v19267_v46  ;;  %v9111_v15 = vrot.slane %v8552_v18, %v19267_v46 }
  0x78   : > { %v9062_v59 = vrot.slane %v9055_v51, %v19267_v46  ;;  %v9076_v1 = vrot.slane %v9069_v62, %v19267_v46  ;;  %v9090_v28 = vrot.slane %v9083_v63, %v19267_v46  ;;  %v9125_v36 = vrot.slane %v8560_v0, %v19267_v46 }
  0x79   : > { %v9139_v33 = vrot.slane %v8568_v21, %v19267_v46  ;;  %v9104_v31 = vrot.slane %v9097_v32, %v19267_v46  ;;  %v9118_v43 = vrot.slane %v9111_v15, %v19267_v46  ;;  %v9153_v38 = vrot.slane %v8576_v16, %v19267_v46 }
  0x7a   : > { %v9167_v47 = vrot.slane %v8585_v27, %v19267_v46  ;;  %v9132_v24 = vrot.slane %v9125_v36, %v19267_v46  ;;  %v9181_v48 = vrot.slane %v8593_v19, %v19267_v46  ;;  %v9195_v17 = vrot.slane %v8601_v26, %v19267_v46 }
  0x7b   : > { %v9146_v18 = vrot.slane %v9139_v33, %v19267_v46  ;;  %v9160_v0 = vrot.slane %v9153_v38, %v19267_v46  ;;  %v9209_v49 = vrot.slane %v8609_v52, %v19267_v46  ;;  %v9223_v60 = vrot.slane %v8617_v45, %v19267_v46 }
  0x7c   : > { %v9174_v21 = vrot.slane %v9167_v47, %v19267_v46  ;;  %v9188_v16 = vrot.slane %v9181_v48, %v19267_v46  ;;  %v9202_v27 = vrot.slane %v9195_v17, %v19267_v46  ;;  %v9237_v6 = vrot.slane %v8625_v22, %v19267_v46 }
  0x7d   : > { %v9251_v14 = vrot.slane %v8633_v13, %v19267_v46  ;;  %v9216_v19 = vrot.slane %v9209_v49, %v19267_v46  ;;  %v9230_v26 = vrot.slane %v9223_v60, %v19267_v46  ;;  %v9265_v51 = vrot.slane %v8641_v7, %v19267_v46 }
  0x7e   : > { %v9945_v62 = vunpack.c.l.b16 %v9062_v59  ;;  %v9244_v63 = vrot.slane %v9237_v6, %v19267_v46  ;;  %v9946_v45 = vunpack.c.l.b16 %v9076_v1  ;;  %v9947_v32 = vunpack.c.l.b16 %v9090_v28 }
  0x7f   : > { %v9258_v52 = vrot.slane %v9251_v14, %v19267_v46  ;;  %v9272_v15 = vrot.slane %v9265_v51, %v19267_v46  ;;  %v9948_v36 = vunpack.c.l.b16 %v9104_v31  ;;  %v9949_v33 = vunpack.c.l.b16 %v9118_v43 }
  0x80   : > { %v9950_v22 = vunpack.c.l.b16 %v9132_v24  ;;  %v9951_v38 = vunpack.c.l.b16 %v9146_v18  ;;  %v9952_v13 = vunpack.c.l.b16 %v9160_v0  ;;  %v9953_v47 = vunpack.c.l.b16 %v9174_v21 }
  0x81   : > { %v9954_v48 = vunpack.c.l.b16 %v9188_v16  ;;  %v9955_v17 = vunpack.c.l.b16 %v9202_v27  ;;  %v9956_v49 = vunpack.c.l.b16 %v9216_v19  ;;  %v9957_v60 = vunpack.c.l.b16 %v9230_v26 }
  0x82   : > { %v9958_v7 = vunpack.c.l.b16 %v9244_v63  ;;  %v9959_v59 = vunpack.c.l.b16 %v9258_v52  ;;  %v9960_v40 = vunpack.c.l.b16 %v9272_v15  ;;  %v10009_v6 = vrot.slane %v9946_v45, 7 }
  0x83   : > { %v10011_v39 = vrot.slane %v9947_v32, 6  ;;  %v10013_v14 = vrot.slane %v9948_v36, 5  ;;  %v10015_v1 = vrot.slane %v9949_v33, 4  ;;  %v10017_v28 = vrot.slane %v9950_v22, 3 }
  0x84   : > { %v10019_v30 = vrot.slane %v9951_v38, 2  ;;  %v10010_v31 = vsel %vm3140_vm2, %v10009_v6, %v9945_v62  ;;  %v10021_v43 = vrot.slane %v9952_v13, 1  ;;  %v10023_v24 = vrot.slane %v9954_v48, 7 }
  0x85   : > { %v10025_v18 = vrot.slane %v9955_v17, 6  ;;  %v10012_v0 = vsel %vm3143_vm6, %v10011_v39, %v10010_v31  ;;  %v10027_v21 = vrot.slane %v9956_v49, 5  ;;  %v10029_v16 = vrot.slane %v9957_v60, 4  ;;  %v982_v17 = vld [vmem:[#allocation2 + $0x38] sm:$0x1] }
  0x86   : > { %v10031_v27 = vrot.slane %v9958_v7, 3  ;;  %v10014_v19 = vsel %vm3146_vm11, %v10013_v14, %v10012_v0  ;;  %v10024_v26 = vsel %vm3140_vm2, %v10023_v24, %v9953_v47  ;;  %v10033_v51 = vrot.slane %v9959_v59, 2  ;;  %v992_v7 = vld [vmem:[#allocation2 + $0x48] sm:$0xf]  ;;  %v996_v24 = vld [vmem:[#allocation2 + $0x50] sm:$0x1] }
  0x87   : > { %v10035_v63 = vrot.slane %v9960_v40, 1  ;;  %v10016_v52 = vsel %vm3149_vm12, %v10015_v1, %v10014_v19  ;;  %v10026_v45 = vsel %vm3143_vm6, %v10025_v18, %v10024_v26  ;;  %v23108_v62 = vshll.u32 %v19569_v41, 16  ;;  %v467_v18 = vld [vmem:[#allocation2 + $0x3c] sm:$0x1]  ;;  %v473_v0 = vld [vmem:[#allocation2 + $0x54] sm:$0x1] }
  0x88   : > { %v693_v15 = vrot.slane %v19595_v10, 4  ;;  %v10018_v39 = vsel %vm3152_vm13, %v10017_v28, %v10016_v52  ;;  %v10028_v36 = vsel %vm3146_vm11, %v10027_v21, %v10026_v45  ;;  %v23109_v33 = vshll.u32 %v19571_v58, 16  ;;  %v517_v26 = vld [vmem:[#allocation2 + $0x44] sm:$0x1] }
  0x89   : > { %v692_v32 = vor.u32 %v23108_v62, %v19595_v10  ;;  %v702_v40 = vrot.slane %v19599_v11, 4  ;;  %v10020_v38 = vsel %vm3155_vm14, %v10019_v30, %v10018_v39  ;;  %v10030_v13 = vsel %vm3149_vm12, %v10029_v16, %v10028_v36  ;;  %v978_v10 = vld [vmem:[#allocation2 + $0x30] sm:$0xf]  ;;  %v18600_v62 = vld [vmem:[%s19169_s28 + $0x38] sm:$0xff]   ;;  %v19732_v36 = vld [vmem:[%s19169_s28 + $0x48] sm:$0xff]  }
  0x8a   : > { %v700_v22 = vor.u32 %v23109_v33, %v19599_v11  ;;  %v23110_v47 = vshrl.u32 %v19573_v37, 16  ;;  %v729_v48 = vshrl.u32 %v19575_v53, 16  ;;  %v10022_v49 = vsel %vm3158_vm15, %v10021_v43, %v10020_v38 }
  0x8b   : > { %v10032_v60 = vsel %vm3152_vm13, %v10031_v27, %v10030_v13  ;;  %v732_v11 = vshll.u32 %v19575_v53, 16  ;;  %v23111_v59 = vshll.u32 %v19573_v37, 16  ;;  %v979_v31 = vsel %vm19333_vm10, %v692_v32, %v978_v10  ;;  %v19711_v53 = vld [vmem:[%s23041_s2] ss:$0 sm:$0xff] }
  0x8c   : > { %v723_v41 = vrot.slane %v23110_v47, 7  ;;  %v701_v58 = vsel %vm19262_vm7, %v693_v15, %v700_v22  ;;  %v10034_v30 = vsel %vm3155_vm14, %v10033_v51, %v10032_v60  ;;  %v731_v1 = vrot.slane %v729_v48, 7  ;;  %980 = vst [vmem:[#allocation2 + $0x30] sm:$0xf] %v979_v31  ;;  %v523_v51 = vld [vmem:[#allocation2 + $0x5c] sm:$0x1] }
  0x8d   : > { %981 = vst [vmem:[#allocation2 + $0x34] sm:$0xf] %v701_v58  ;;  %v10036_v28 = vsel %vm3158_vm15, %v10035_v63, %v10034_v30  ;;  %v983_v43 = vsel %vm19234_vm3, %v702_v40, %v982_v17  ;;  %v373_v37 = vadd.f32 %v19711_v53, %v19581_v50  ;;  %v376_v63 = vadd.f32 %v19711_v53, %v19584_v61 }
  0x8e   : > { %v726_v6 = vor.u32 %v23111_v59, %v723_v41  ;;  %v727_v14 = vrot.slane %v723_v41, 4  ;;  %v10121_v21 = vpack.c.b16 %v10036_v28, %v10022_v49  ;;  %v734_v16 = vor.u32 %v732_v11, %v731_v1  ;;  %984 = vst [vmem:[#allocation2 + $0x38] sm:$0x1] %v983_v43 }
  0x8f   : > { %v736_v27 = vrot.slane %v731_v1, 4  ;;  %v377_v50 = vadd.f32 %v19711_v53, %v19589_v5  ;;  %v404_v52 = vmax.f32 %v19592_v20, 0.0  ;;  %v405_v45 = vmax.f32 %v373_v37, 0.0 }
  0x90   : > { %v993_v19 = vsel %vm19333_vm10, %v726_v6, %v992_v7  ;;  %18832 = vmatprep.mubr.bf16.mxu0 %v10121_v21  ;;  %v735_v32 = vsel %vm19262_vm7, %v727_v14, %v734_v16  ;;  %v468_v39 = vsel %vm19234_vm3, 0, %v467_v18  ;;  %v474_v61 = vsel %vm19234_vm3, 0, %v473_v0  ;;  %v19758_v14 = vld [vmem:[%s23040_s1] ss:$0 sm:$0xff] }
  0x91   : > { %994 = vst [vmem:[#allocation2 + $0x48] sm:$0xf] %v993_v19  ;;  %v997_v15 = vsel %vm19234_vm3, %v736_v27, %v996_v24  ;;  %995 = vst [vmem:[#allocation2 + $0x4c] sm:$0xf] %v735_v32  ;;  %v408_v5 = vmax.f32 %v376_v63, 0.0  ;;  %v409_v20 = vmax.f32 %v377_v50, 0.0  ;;  %v19738_v40 = vpack.c.bf16 %v404_v52, %v404_v52 }
  0x92   : > { %998 = vst [vmem:[#allocation2 + $0x50] sm:$0x1] %v997_v15  ;;  %469 = vst [vmem:[#allocation2 + $0x3c] sm:$0x1] %v468_v39  ;;  %v518_v33 = vsel %vm19247_vm5, 0, %v517_v26  ;;  %v524_v22 = vsel %vm19247_vm5, 0, %v523_v51  ;;  %v19740_v38 = vpack.c.bf16 %v405_v45, %v405_v45  ;;  %v18540_v13 = vunpack.c.l.bf16 %v18600_v62 }
  0x93   : > { %475 = vst [vmem:[#allocation2 + $0x54] sm:$0x1] %v474_v61  ;;  %519 = vst [vmem:[#allocation2 + $0x44] sm:$0x1] %v518_v33  ;;  %v18541_v47 = vunpack.c.h.bf16 %v18600_v62  ;;  %v19742_v48 = vpack.c.bf16 %v408_v5, %v408_v5  ;;  %v19744_v10 = vpack.c.bf16 %v409_v20, %v409_v20 }
  0x94   : > { %525 = vst [vmem:[#allocation2 + $0x5c] sm:$0x1] %v524_v22  ;;  %v17895_v41 = vld.sshfl [vmem:[#allocation2 + $0x34] sm:$0x33 pattern:$0x75316420]  ;;  %v19761_v1 = vmul.f32 %v19758_v14, %v18540_v13 }
  0x95   : > { %v1228_v60 = vcombine.high %v17895_v41, %v17895_v41  ;;  %v19749_v58 = vrot.slane %v17895_v41, %v19267_v46  ;;  %v17894_v30 = vld.sshfl [vmem:[#allocation2 + $0x30] sm:$0x33 pattern:$0x75316420]  ;;  %v19764_v28 = vmul.f32 %v19758_v14, %v18541_v47 }
  0x96   : > { %v1204_v43 = vcombine.high %v17894_v30, %v17894_v30  ;;  %v19767_v24 = vrot.slane %v17894_v30, %v19267_v46  ;;  %v17908_v16 = vld.sshfl [vmem:[#allocation2 + $0x38] sm:$0x1 pattern:$0x75316420] }
  0x97   : > { %23112 = vst [vmem:[#allocation8_spill] sm:$0xff] %v19749_v58  ;;  %v19770_v37 = vrot.slane %v1228_v60, %v19267_v46  ;;  %v19774_v18 = vcombine.high %v19749_v58, %v19749_v58  ;;  %v1802_v27 = vshll.u32 %v19749_v58, 16  ;;  %v1805_v19 = vshrl.u32 %v19749_v58, 16 }
  0x98   : > { %v17896_v31 = vld.sshfl [vmem:[#allocation2 + $0x48] sm:$0x33 pattern:$0x75316420]  ;;  %v19782_v51 = vrot.slane %v1204_v43, %v19267_v46  ;;  %v19786_v63 = vcombine.high %v19767_v24, %v19767_v24  ;;  %v1558_v52 = vrot.slane %v17908_v16, %v19267_v46  ;;  %v1773_v20 = vshrl.u32 %v19767_v24, 16 }
  0x99   : > { %23113 = vst [vmem:[#allocation9_spill] sm:$0xff] %v19770_v37  ;;  %23114 = vst [vmem:[#allocation10_spill] sm:$0xff] %v19774_v18  ;;  %v1252_v0 = vcombine.high %v17896_v31, %v17896_v31  ;;  %v19777_v21 = vrot.slane %v17896_v31, %v19267_v46  ;;  %v17897_v26 = vld.sshfl [vmem:[#allocation2 + $0x4c] sm:$0x33 pattern:$0x75316420]  ;;  %v19790_v50 = vcombine.high %v19770_v37, %v19770_v37 }
  0x9a   : > { %23116 = vst [vmem:[#allocation12_spill] sm:$0xff] %v19782_v51  ;;  %23117 = vst [vmem:[#allocation13_spill] sm:$0xff] %v19786_v63  ;;  %v1276_v32 = vcombine.high %v17897_v26, %v17897_v26  ;;  %v19801_v15 = vrot.slane %v17897_v26, %v19267_v46  ;;  %v17909_v39 = vld.sshfl [vmem:[#allocation2 + $0x50] sm:$0x1 pattern:$0x75316420]  ;;  %v19805_v61 = vcombine.high %v19782_v51, %v19782_v51 }
  0x9b   : > { %23115 = vst [vmem:[#allocation11_spill] sm:$0xff] %v19777_v21  ;;  %23118 = vst [vmem:[#allocation14_spill] sm:$0xff] %v19790_v50  ;;  %v19794_v45 = vrot.slane %v1252_v0, %v19267_v46  ;;  %v19798_v62 = vcombine.high %v19777_v21, %v19777_v21  ;;  %v1572_v5 = vrot.slane %v17909_v39, %v19267_v46  ;;  %v1778_v33 = vshll.u32 %v19782_v51, 16 }
  0x9c   : > { %23121 = vst [vmem:[#allocation17_spill] sm:$0xff] %v19801_v15  ;;  %23122 = vst [vmem:[#allocation18_spill] sm:$0xff] %v19805_v61  ;;  %v19815_v13 = vrot.slane %v1276_v32, %v19267_v46  ;;  %v19819_v47 = vcombine.high %v19801_v15, %v19801_v15  ;;  %v1781_v41 = vshrl.u32 %v19782_v51, 16  ;;  %v1786_v30 = vshll.u32 %v19786_v63, 16 }
  0x9d   : > { %23119 = vst [vmem:[#allocation15_spill] sm:$0xff] %v19794_v45  ;;  %23120 = vst [vmem:[#allocation16_spill] sm:$0xff] %v19798_v62  ;;  %v19812_v22 = vcombine.high %v19794_v45, %v19794_v45  ;;  %v1780_v60 = vsel %vm19323_vm9, %v1773_v20, %v1778_v33  ;;  %v1789_v31 = vshrl.u32 %v19786_v63, 16  ;;  %v1794_v43 = vshll.u32 %v19805_v61, 16 }
  0x9e   : > { %23124 = vst [vmem:[#allocation20_spill] sm:$0xff] %v19815_v13  ;;  %23125 = vst [vmem:[#allocation21_spill] sm:$0xff] %v19819_v47  ;;  %v19829_v0 = vcombine.high %v19815_v13, %v19815_v13  ;;  %v1797_v16 = vshrl.u32 %v19805_v61, 16  ;;  %v1810_v26 = vshll.u32 %v19770_v37, 16  ;;  %v1813_v32 = vshrl.u32 %v19770_v37, 16 }
  0x9f   : > { %23123 = vst [vmem:[#allocation19_spill] sm:$0xff] %v19812_v22  ;;  %v1788_v39 = vsel %vm19323_vm9, %v1781_v41, %v1786_v30  ;;  %v1796_v20 = vsel %vm19323_vm9, %v1789_v31, %v1794_v43  ;;  %v1818_v33 = vshll.u32 %v19774_v18, 16  ;;  %v1821_v49 = vshrl.u32 %v19774_v18, 16 }
  0xa0   : > { %23126 = vst [vmem:[#allocation22_spill] sm:$0xff] %v19829_v0  ;;  %v1804_v17 = vsel %vm19323_vm9, %v1797_v16, %v1802_v27  ;;  %v1812_v6 = vsel %vm19323_vm9, %v1805_v19, %v1810_v26  ;;  %v1826_v7 = vshll.u32 %v19790_v50, 16  ;;  %v1829_v59 = vshrl.u32 %v19790_v50, 16 }
  0xa1   : > { %v1820_v41 = vsel %vm19323_vm9, %v1813_v32, %v1818_v33  ;;  %v1834_v30 = vshll.u32 %v1558_v52, 16  ;;  %v1838_v31 = vshrl.u32 %v19777_v21, 16  ;;  %v1843_v43 = vshll.u32 %v19794_v45, 16 }
  0xa2   : > { %v1828_v11 = vsel %vm19323_vm9, %v1821_v49, %v1826_v7  ;;  %v1846_v27 = vshrl.u32 %v19794_v45, 16  ;;  %v1851_v16 = vshll.u32 %v19798_v62, 16  ;;  %v1854_v19 = vshrl.u32 %v19798_v62, 16 }
  0xa3   : > { %v1836_v26 = vsel %vm19323_vm9, %v1829_v59, %v1834_v30  ;;  %v1845_v32 = vsel %vm19323_vm9, %v1838_v31, %v1843_v43  ;;  %v1859_v52 = vshll.u32 %v19812_v22, 16  ;;  %v1862_v33 = vshrl.u32 %v19812_v22, 16 }
  0xa4   : > { %v1853_v21 = vsel %vm19323_vm9, %v1846_v27, %v1851_v16  ;;  %v1867_v49 = vshll.u32 %v19801_v15, 16  ;;  %v1870_v7 = vshrl.u32 %v19801_v15, 16  ;;  %v1875_v45 = vshll.u32 %v19815_v13, 16 }
  0xa5   : > { %v1861_v62 = vsel %vm19323_vm9, %v1854_v19, %v1859_v52  ;;  %v1878_v59 = vshrl.u32 %v19815_v13, 16  ;;  %v1883_v30 = vshll.u32 %v19819_v47, 16  ;;  %v1886_v31 = vshrl.u32 %v19819_v47, 16 }
  0xa6   : > { %v1869_v43 = vsel %vm19323_vm9, %v1862_v33, %v1867_v49  ;;  %v1877_v27 = vsel %vm19323_vm9, %v1870_v7, %v1875_v45  ;;  %v1891_v16 = vshll.u32 %v19829_v0, 16  ;;  %v1894_v15 = vshrl.u32 %v19829_v0, 16 }
  0xa7   : > { %v1885_v22 = vsel %vm19323_vm9, %v1878_v59, %v1883_v30  ;;  %v1899_v19 = vshll.u32 %v1572_v5, 16  ;;  %v2409_v52 = vrot.slane %v1780_v60, %v19267_v46  ;;  %v2423_v13 = vrot.slane %v1788_v39, %v19267_v46 }
  0xa8   : > { %v1893_v47 = vsel %vm19323_vm9, %v1886_v31, %v1891_v16  ;;  %v2437_v33 = vrot.slane %v1796_v20, %v19267_v46  ;;  %v2451_v49 = vrot.slane %v1804_v17, %v19267_v46  ;;  %v2465_v45 = vrot.slane %v1812_v6, %v19267_v46 }
  0xa9   : > { %v1901_v7 = vsel %vm19323_vm9, %v1894_v15, %v1899_v19  ;;  %v2416_v0 = vrot.slane %v2409_v52, %v19267_v46  ;;  %v2430_v5 = vrot.slane %v2423_v13, %v19267_v46  ;;  %v2479_v60 = vrot.slane %v1820_v41, %v19267_v46 }
  0xaa   : > { %v2444_v39 = vrot.slane %v2437_v33, %v19267_v46  ;;  %v2458_v59 = vrot.slane %v2451_v49, %v19267_v46  ;;  %v2472_v30 = vrot.slane %v2465_v45, %v19267_v46  ;;  %v2493_v20 = vrot.slane %v1828_v11, %v19267_v46 }
  0xab   : > { %v2486_v17 = vrot.slane %v2479_v60, %v19267_v46  ;;  %v2507_v6 = vrot.slane %v1836_v26, %v19267_v46  ;;  %v2521_v15 = vrot.slane %v1845_v32, %v19267_v46  ;;  %v2535_v31 = vrot.slane %v1853_v21, %v19267_v46 }
  0xac   : > { %v2500_v13 = vrot.slane %v2493_v20, %v19267_v46  ;;  %v2549_v41 = vrot.slane %v1861_v62, %v19267_v46  ;;  %v2563_v16 = vrot.slane %v1869_v43, %v19267_v46  ;;  %v2577_v19 = vrot.slane %v1877_v27, %v19267_v46 }
  0xad   : > { %v2514_v52 = vrot.slane %v2507_v6, %v19267_v46  ;;  %v2528_v11 = vrot.slane %v2521_v15, %v19267_v46  ;;  %v2542_v33 = vrot.slane %v2535_v31, %v19267_v46  ;;  %v2591_v26 = vrot.slane %v1885_v22, %v19267_v46 }
  0xae   : > { %v2556_v32 = vrot.slane %v2549_v41, %v19267_v46  ;;  %v2570_v21 = vrot.slane %v2563_v16, %v19267_v46  ;;  %v2584_v49 = vrot.slane %v2577_v19, %v19267_v46  ;;  %v2605_v62 = vrot.slane %v1893_v47, %v19267_v46 }
  0xaf   : > { %v2598_v43 = vrot.slane %v2591_v26, %v19267_v46  ;;  %v2619_v27 = vrot.slane %v1901_v7, %v19267_v46  ;;  %v3091_v45 = vunpack.c.l.b16 %v2416_v0  ;;  %v3092_v60 = vunpack.c.l.b16 %v2430_v5 }
  0xb0   : > { %v2612_v20 = vrot.slane %v2605_v62, %v19267_v46  ;;  %v3093_v6 = vunpack.c.l.b16 %v2444_v39  ;;  %v3094_v15 = vunpack.c.l.b16 %v2458_v59  ;;  %v3095_v31 = vunpack.c.l.b16 %v2472_v30 }
  0xb1   : > { %v2626_v22 = vrot.slane %v2619_v27, %v19267_v46  ;;  %v3096_v41 = vunpack.c.l.b16 %v2486_v17  ;;  %v3097_v50 = vunpack.c.l.b16 %v2500_v13  ;;  %v3098_v16 = vunpack.c.l.b16 %v2514_v52 }
  0xb2   : > { %v3099_v18 = vunpack.c.l.b16 %v2528_v11  ;;  %v3100_v19 = vunpack.c.l.b16 %v2542_v33  ;;  %v3101_v37 = vunpack.c.l.b16 %v2556_v32  ;;  %v3102_v47 = vunpack.c.l.b16 %v2570_v21 }
  0xb3   : > { %v3103_v58 = vunpack.c.l.b16 %v2584_v49  ;;  %v3104_v26 = vunpack.c.l.b16 %v2598_v43  ;;  %v3105_v61 = vunpack.c.l.b16 %v2612_v20  ;;  %v3106_v7 = vunpack.c.l.b16 %v2626_v22 }
  0xb4   : > { %v3174_v0 = vrot.slane %v3092_v60, 7  ;;  %v3176_v5 = vrot.slane %v3093_v6, 6  ;;  %v3178_v63 = vrot.slane %v3094_v15, 5  ;;  %v3180_v62 = vrot.slane %v3095_v31, 4 }
  0xb5   : > { %v3182_v39 = vrot.slane %v3096_v41, 3  ;;  %v3184_v59 = vrot.slane %v3097_v50, 2  ;;  %v3186_v30 = vrot.slane %v3098_v16, 1  ;;  %v3188_v51 = vrot.slane %v3100_v19, 7 }
  0xb6   : > { %v3175_v17 = vsel %vm3140_vm2, %v3174_v0, %v3091_v45  ;;  %v3190_v13 = vrot.slane %v3101_v37, 6  ;;  %v3192_v52 = vrot.slane %v3102_v47, 5  ;;  %v3194_v11 = vrot.slane %v3103_v58, 4 }
  0xb7   : > { %v3177_v33 = vsel %vm3143_vm6, %v3176_v5, %v3175_v17  ;;  %v3189_v32 = vsel %vm3140_vm2, %v3188_v51, %v3099_v18  ;;  %v3196_v21 = vrot.slane %v3104_v26, 3  ;;  %v3198_v49 = vrot.slane %v3105_v61, 2  ;;  %v985_v26 = vld [vmem:[#allocation2 + $0x3c] sm:$0xf] }
  0xb8   : > { %v3179_v43 = vsel %vm3146_vm11, %v3178_v63, %v3177_v33  ;;  %v3191_v27 = vsel %vm3143_vm6, %v3190_v13, %v3189_v32  ;;  %v3200_v60 = vrot.slane %v3106_v7, 1  ;;  %v23127_v50 = vshrl.u32 %v19738_v40, 16  ;;  %v999_v13 = vld [vmem:[#allocation2 + $0x54] sm:$0xf] }
  0xb9   : > { %v3181_v6 = vsel %vm3149_vm12, %v3180_v62, %v3179_v43  ;;  %v3193_v37 = vsel %vm3146_vm11, %v3192_v52, %v3191_v27  ;;  %v23128_v58 = vshrl.u32 %v19740_v38, 16  ;;  %v738_v15 = vshrl.u32 %v19742_v48, 16  ;;  %v476_v52 = vld [vmem:[#allocation2 + $0x60] sm:$0x1] }
  0xba   : > { %v706_v20 = vrot.slane %v23127_v50, 7  ;;  %v3183_v18 = vsel %vm3152_vm13, %v3182_v39, %v3181_v6  ;;  %v3195_v51 = vsel %vm3149_vm12, %v3194_v11, %v3193_v37  ;;  %v23129_v63 = vshll.u32 %v19738_v40, 16  ;;  %v989_v39 = vld [vmem:[#allocation2 + $0x44] sm:$0x1]  ;;  %v482_v50 = vld [vmem:[#allocation2 + $0x78] sm:$0x1] }
  0xbb   : > { %v714_v45 = vrot.slane %v23128_v58, 7  ;;  %v3185_v22 = vsel %vm3155_vm14, %v3184_v59, %v3183_v18  ;;  %v3197_v41 = vsel %vm3152_vm13, %v3196_v21, %v3195_v51  ;;  %v23130_v16 = vshll.u32 %v19740_v38, 16  ;;  %v1003_v37 = vld [vmem:[#allocation2 + $0x5c] sm:$0x1] }
  0xbc   : > { %v709_v61 = vor.u32 %v23129_v63, %v706_v20  ;;  %v710_v31 = vrot.slane %v706_v20, 4  ;;  %v3187_v7 = vsel %vm3158_vm15, %v3186_v30, %v3185_v22  ;;  %v3199_v0 = vsel %vm3155_vm14, %v3198_v49, %v3197_v41  ;;  %v526_v20 = vld [vmem:[#allocation2 + $0x68] sm:$0x1] }
  0xbd   : > { %v717_v19 = vor.u32 %v23130_v16, %v714_v45  ;;  %v719_v47 = vrot.slane %v714_v45, 4  ;;  %v740_v5 = vrot.slane %v738_v15, 7  ;;  %v741_v62 = vshll.u32 %v19742_v48, 16  ;;  %v19045_v48 = vld [vmem:[%s23042_s3 + $0x8] sm:$0xff]   ;;  %v19101_v15 = vld [vmem:[%s23042_s3] sm:$0xff]  }
  0xbe   : > { %v3201_v40 = vsel %vm3158_vm15, %v3200_v60, %v3199_v0  ;;  %v746_v17 = vshrl.u32 %v19744_v10, 16  ;;  %v749_v38 = vshll.u32 %v19744_v10, 16  ;;  %v986_v32 = vsel %vm19333_vm10, %v709_v61, %v985_v26 }
  0xbf   : > { %v718_v59 = vsel %vm19262_vm7, %v710_v31, %v717_v19  ;;  %v3259_v11 = vpack.c.b16 %v3201_v40, %v3187_v7  ;;  %v743_v33 = vor.u32 %v741_v62, %v740_v5  ;;  %v744_v30 = vrot.slane %v740_v5, 4  ;;  %987 = vst [vmem:[#allocation2 + $0x3c] sm:$0xf] %v986_v32  ;;  %v19970_v31 = vld [vmem:[%s19169_s28 + $0x40] sm:$0xff]  }
  0xc0   : > { %988 = vst [vmem:[#allocation2 + $0x40] sm:$0xf] %v718_v59  ;;  %v748_v21 = vrot.slane %v746_v17, 7  ;;  %v990_v49 = vsel %vm19234_vm3, %v719_v47, %v989_v39  ;;  %v23131_v10 = vunpack.c.l.bf16 %v19732_v36  ;;  %v23132_v27 = vunpack.c.h.bf16 %v19732_v36  ;;  %v19980_v47 = vld [vmem:[%s19169_s28 + $0x50] sm:$0xff]  }
  0xc1   : > { %18737 = vmatmul.mubr.bf16.vlgmr.msra.gmra.mrb[0].mxu1 %v3259_v11  ;;  %991 = vst [vmem:[#allocation2 + $0x44] sm:$0x1] %v990_v49  ;;  %v1000_v6 = vsel %vm19333_vm10, %v743_v33, %v999_v13  ;;  %v378_v58 = vadd.f32 %v19711_v53, %v19761_v1  ;;  %v379_v45 = vadd.f32 %v19711_v53, %v19764_v28  ;;  %v477_v36 = vsel %vm19234_vm3, 0, %v476_v52  ;;  %v532_v1 = vld [vmem:[#allocation2 + $0x80] sm:$0x1]  ;;  %v19047_v28 = vld [vmem:[%s23042_s3 + $0x10] sm:$0xff]  }
  0xc2   : > { %v343_v43 = vmul.f32 %v19758_v14, %v23131_v10  ;;  %v344_v60 = vmul.f32 %v19758_v14, %v23132_v27  ;;  %18745 = vmatpush3.bf16.msra.mxu1 %v19101_v15  ;;  %v751_v18 = vor.u32 %v749_v38, %v748_v21  ;;  %v753_v51 = vrot.slane %v748_v21, 4  ;;  %1001 = vst [vmem:[#allocation2 + $0x54] sm:$0xf] %v1000_v6  ;;  %v19049_v38 = vld [vmem:[%s23042_s3 + $0x18] sm:$0xff]  }
  0xc3   : > { %478 = vst [vmem:[#allocation2 + $0x60] sm:$0x1] %v477_v36  ;;  %18746 = vmatprep.subr.bf16.mxu1 %v19045_v48  ;;  %v410_v22 = vmax.f32 %v378_v58, 0.0  ;;  %v411_v41 = vmax.f32 %v379_v45, 0.0  ;;  %v483_v16 = vsel %vm19234_vm3, 0, %v482_v50  ;;  %v527_v19 = vsel %vm19247_vm5, 0, %v526_v20 }
  0xc4   : > { %v382_v63 = vadd.f32 %v19711_v53, %v343_v43  ;;  %v383_v61 = vadd.f32 %v19711_v53, %v344_v60  ;;  %v752_v26 = vsel %vm19262_vm7, %v744_v30, %v751_v18  ;;  %v1004_v7 = vsel %vm19234_vm3, %v753_v51, %v1003_v37  ;;  %484 = vst [vmem:[#allocation2 + $0x78] sm:$0x1] %v483_v16 }
  0xc5   : > { %528 = vst [vmem:[#allocation2 + $0x68] sm:$0x1] %v527_v19  ;;  %1002 = vst [vmem:[#allocation2 + $0x58] sm:$0xf] %v752_v26  ;;  %v533_v62 = vsel %vm19247_vm5, 0, %v532_v1  ;;  %v19988_v39 = vpack.c.bf16 %v410_v22, %v410_v22  ;;  %v19990_v40 = vpack.c.bf16 %v411_v41, %v411_v41  ;;  %v19051_v41 = vld [vmem:[%s23042_s3 + $0x20] sm:$0xff]  }
  0xc6   : > { %v414_v0 = vmax.f32 %v382_v63, 0.0  ;;  %v415_v5 = vmax.f32 %v383_v61, 0.0  ;;  %1005 = vst [vmem:[#allocation2 + $0x5c] sm:$0x1] %v1004_v7  ;;  %18747 = vmatpush3.bf16.msra.mxu1 %v19045_v48  ;;  %534 = vst [vmem:[#allocation2 + $0x80] sm:$0x1] %v533_v62 }
  0xc7   : > { %v18105_v17 = vld.sshfl [vmem:[#allocation2 + $0x40] sm:$0x33 pattern:$0x75316420]  ;;  %18748 = vmatprep.subr.bf16.mxu1 %v19047_v28  ;;  %v755_v48 = vshrl.u32 %v19988_v39, 16 }
  0xc8   : > { %v19996_v13 = vpack.c.bf16 %v414_v0, %v414_v0  ;;  %v19998_v52 = vpack.c.bf16 %v415_v5, %v415_v5  ;;  %v18104_v30 = vld.sshfl [vmem:[#allocation2 + $0x3c] sm:$0x33 pattern:$0x75316420]  ;;  %v8171_v32 = vcombine.high %v18105_v17, %v18105_v17  ;;  %v8178_v21 = vrot.slane %v18105_v17, %v19267_v46 }
  0xc9   : > { %v18106_v10 = vld.sshfl [vmem:[#allocation2 + $0x44] sm:$0x1 pattern:$0x75316420]  ;;  %v8147_v43 = vcombine.high %v18104_v30, %v18104_v30  ;;  %v8154_v27 = vrot.slane %v18104_v30, %v19267_v46 }
  0xca   : > { %v18107_v20 = vld.sshfl [vmem:[#allocation2 + $0x54] sm:$0x33 pattern:$0x75316420]  ;;  %v8185_v6 = vrot.slane %v8171_v32, %v19267_v46  ;;  %v8186_v37 = vcombine.high %v8178_v21, %v8178_v21  ;;  %v8201_v58 = vrot.slane %v18106_v10, %v19267_v46  ;;  %v8672_v45 = vshll.u32 %v8178_v21, 16  ;;  %18749 = vmatpush3.bf16.msra.mxu1 %v19047_v28 }
  0xcb   : > { %v8161_v36 = vrot.slane %v8147_v43, %v19267_v46  ;;  %v8162_v15 = vcombine.high %v8154_v27, %v8154_v27  ;;  %v8209_v18 = vcombine.high %v18107_v20, %v18107_v20  ;;  %v8216_v51 = vrot.slane %v18107_v20, %v19267_v46  ;;  %18750 = vmatprep.subr.bf16.mxu1 %v19049_v38 }
  0xcc   : > { %v8187_v63 = vcombine.high %v8185_v6, %v8185_v6  ;;  %v8643_v61 = vshrl.u32 %v8154_v27, 16  ;;  %v8675_v1 = vshrl.u32 %v8178_v21, 16  ;;  %v8680_v22 = vshll.u32 %v8185_v6, 16 }
  0xcd   : > { %v18108_v16 = vld.sshfl [vmem:[#allocation2 + $0x58] sm:$0x33 pattern:$0x75316420]  ;;  %v8163_v19 = vcombine.high %v8161_v36, %v8161_v36  ;;  %v8223_v26 = vrot.slane %v8209_v18, %v19267_v46  ;;  %v8224_v7 = vcombine.high %v8216_v51, %v8216_v51  ;;  %v8648_v0 = vshll.u32 %v8161_v36, 16 }
  0xce   : > { %v18109_v5 = vld.sshfl [vmem:[#allocation2 + $0x5c] sm:$0x1 pattern:$0x75316420]  ;;  %v8233_v62 = vcombine.high %v18108_v16, %v18108_v16  ;;  %v8240_v17 = vrot.slane %v18108_v16, %v19267_v46  ;;  %v8651_v28 = vshrl.u32 %v8161_v36, 16  ;;  %v8656_v30 = vshll.u32 %v8162_v15, 16  ;;  %18751 = vmatpush3.bf16.msra.mxu1 %v19049_v38 }
  0xcf   : > { %v8225_v32 = vcombine.high %v8223_v26, %v8223_v26  ;;  %v8263_v21 = vrot.slane %v18109_v5, %v19267_v46  ;;  %v8650_v10 = vsel %vm19323_vm9, %v8643_v61, %v8648_v0  ;;  %v8659_v43 = vshrl.u32 %v8162_v15, 16  ;;  %18752 = vmatprep.subr.bf16.mxu1 %v19051_v41  ;;  %v19053_v36 = vld [vmem:[%s23042_s3 + $0x28] sm:$0xff]  }
  0xd0   : > { %v8247_v27 = vrot.slane %v8233_v62, %v19267_v46  ;;  %v8248_v20 = vcombine.high %v8240_v17, %v8240_v17  ;;  %v8658_v18 = vsel %vm19323_vm9, %v8651_v28, %v8656_v30  ;;  %v8664_v33 = vshll.u32 %v8163_v19, 16 }
  0xd1   : > { %v8667_v16 = vshrl.u32 %v8163_v19, 16  ;;  %v8682_v5 = vsel %vm19323_vm9, %v8675_v1, %v8680_v22  ;;  %v8683_v11 = vshrl.u32 %v8185_v6, 16  ;;  %v8688_v61 = vshll.u32 %v8186_v37, 16 }
  0xd2   : > { %v8249_v15 = vcombine.high %v8247_v27, %v8247_v27  ;;  %v8666_v38 = vsel %vm19323_vm9, %v8659_v43, %v8664_v33  ;;  %v8691_v0 = vshrl.u32 %v8186_v37, 16  ;;  %v8696_v62 = vshll.u32 %v8187_v63, 16  ;;  %18753 = vmatpush3.bf16.msra.mxu1 %v19051_v41  ;;  %v19055_v33 = vld [vmem:[%s23042_s3 + $0x30] sm:$0xff]  }
  0xd3   : > { %v8674_v28 = vsel %vm19323_vm9, %v8667_v16, %v8672_v45  ;;  %v8690_v30 = vsel %vm19323_vm9, %v8683_v11, %v8688_v61  ;;  %v8699_v59 = vshrl.u32 %v8187_v63, 16  ;;  %v8704_v50 = vshll.u32 %v8201_v58, 16  ;;  %18754 = vmatprep.subr.bf16.mxu1 %v19053_v36 }
  0xd4   : > { %v8698_v1 = vsel %vm19323_vm9, %v8691_v0, %v8696_v62  ;;  %v8708_v6 = vshrl.u32 %v8216_v51, 16  ;;  %v8713_v22 = vshll.u32 %v8223_v26, 16  ;;  %v8716_v19 = vshrl.u32 %v8223_v26, 16 }
  0xd5   : > { %v8706_v37 = vsel %vm19323_vm9, %v8699_v59, %v8704_v50  ;;  %v8721_v45 = vshll.u32 %v8224_v7, 16  ;;  %v8724_v43 = vshrl.u32 %v8224_v7, 16  ;;  %v8729_v11 = vshll.u32 %v8225_v32, 16 }
  0xd6   : > { %v8715_v58 = vsel %vm19323_vm9, %v8708_v6, %v8713_v22  ;;  %v8732_v63 = vshrl.u32 %v8225_v32, 16  ;;  %v8737_v41 = vshll.u32 %v8240_v17, 16  ;;  %v8740_v16 = vshrl.u32 %v8240_v17, 16  ;;  %18755 = vmatpush3.bf16.msra.mxu1 %v19053_v36 }
  0xd7   : > { %v8723_v51 = vsel %vm19323_vm9, %v8716_v19, %v8721_v45  ;;  %v8731_v26 = vsel %vm19323_vm9, %v8724_v43, %v8729_v11  ;;  %v8745_v61 = vshll.u32 %v8247_v27, 16  ;;  %v8748_v0 = vshrl.u32 %v8247_v27, 16  ;;  %18756 = vmatprep.subr.bf16.mxu1 %v19055_v33 }
  0xd8   : > { %v8739_v59 = vsel %vm19323_vm9, %v8732_v63, %v8737_v41  ;;  %v8753_v50 = vshll.u32 %v8248_v20, 16  ;;  %v8756_v7 = vshrl.u32 %v8248_v20, 16  ;;  %v8761_v62 = vshll.u32 %v8249_v15, 16 }
  0xd9   : > { %v8747_v32 = vsel %vm19323_vm9, %v8740_v16, %v8745_v61  ;;  %v8764_v17 = vshrl.u32 %v8249_v15, 16  ;;  %v8769_v6 = vshll.u32 %v8263_v21, 16  ;;  %v9279_v22 = vrot.slane %v8650_v10, %v19267_v46 }
  0xda   : > { %v8755_v19 = vsel %vm19323_vm9, %v8748_v0, %v8753_v50  ;;  %v8763_v27 = vsel %vm19323_vm9, %v8756_v7, %v8761_v62  ;;  %v9293_v36 = vrot.slane %v8658_v18, %v19267_v46  ;;  %v9307_v45 = vrot.slane %v8666_v38, %v19267_v46  ;;  %18757 = vmatpush3.bf16.msra.mxu1 %v19055_v33 }
  0xdb   : > { %v8771_v20 = vsel %vm19323_vm9, %v8764_v17, %v8769_v6  ;;  %v9286_v43 = vrot.slane %v9279_v22, %v19267_v46  ;;  %v9321_v15 = vrot.slane %v8674_v28, %v19267_v46  ;;  %v9335_v21 = vrot.slane %v8682_v5, %v19267_v46 }
  0xdc   : > { %v9300_v10 = vrot.slane %v9293_v36, %v19267_v46  ;;  %v9314_v11 = vrot.slane %v9307_v45, %v19267_v46  ;;  %v9349_v63 = vrot.slane %v8690_v30, %v19267_v46  ;;  %v9363_v18 = vrot.slane %v8698_v1, %v19267_v46 }
  0xdd   : > { %v9328_v38 = vrot.slane %v9321_v15, %v19267_v46  ;;  %v9342_v41 = vrot.slane %v9335_v21, %v19267_v46  ;;  %v9377_v16 = vrot.slane %v8706_v37, %v19267_v46  ;;  %v9391_v61 = vrot.slane %v8715_v58, %v19267_v46 }
  0xde   : > { %v9356_v28 = vrot.slane %v9349_v63, %v19267_v46  ;;  %v9370_v5 = vrot.slane %v9363_v18, %v19267_v46  ;;  %v9405_v33 = vrot.slane %v8723_v51, %v19267_v46  ;;  %v9419_v0 = vrot.slane %v8731_v26, %v19267_v46 }
  0xdf   : > { %v9384_v30 = vrot.slane %v9377_v16, %v19267_v46  ;;  %v9398_v1 = vrot.slane %v9391_v61, %v19267_v46  ;;  %v9433_v50 = vrot.slane %v8739_v59, %v19267_v46  ;;  %v9447_v7 = vrot.slane %v8747_v32, %v19267_v46 }
  0xe0   : > { %v9412_v37 = vrot.slane %v9405_v33, %v19267_v46  ;;  %v9426_v58 = vrot.slane %v9419_v0, %v19267_v46  ;;  %v9461_v62 = vrot.slane %v8755_v19, %v19267_v46  ;;  %v9475_v17 = vrot.slane %v8763_v27, %v19267_v46 }
  0xe1   : > { %v9440_v51 = vrot.slane %v9433_v50, %v19267_v46  ;;  %v9454_v26 = vrot.slane %v9447_v7, %v19267_v46  ;;  %v9489_v6 = vrot.slane %v8771_v20, %v19267_v46  ;;  %v9961_v22 = vunpack.c.l.b16 %v9286_v43 }
  0xe2   : > { %v9468_v36 = vrot.slane %v9461_v62, %v19267_v46  ;;  %v9482_v59 = vrot.slane %v9475_v17, %v19267_v46  ;;  %v9962_v32 = vunpack.c.l.b16 %v9300_v10  ;;  %v9963_v45 = vunpack.c.l.b16 %v9314_v11 }
  0xe3   : > { %v9496_v15 = vrot.slane %v9489_v6, %v19267_v46  ;;  %v9964_v21 = vunpack.c.l.b16 %v9328_v38  ;;  %v9965_v63 = vunpack.c.l.b16 %v9342_v41  ;;  %v9966_v19 = vunpack.c.l.b16 %v9356_v28 }
  0xe4   : > { %v9967_v18 = vunpack.c.l.b16 %v9370_v5  ;;  %v9968_v27 = vunpack.c.l.b16 %v9384_v30  ;;  %v9969_v16 = vunpack.c.l.b16 %v9398_v1  ;;  %v9970_v61 = vunpack.c.l.b16 %v9412_v37 }
  0xe5   : > { %v9971_v33 = vunpack.c.l.b16 %v9426_v58  ;;  %v9972_v0 = vunpack.c.l.b16 %v9440_v51  ;;  %v9973_v50 = vunpack.c.l.b16 %v9454_v26  ;;  %v9974_v20 = vunpack.c.l.b16 %v9468_v36 }
  0xe6   : > { %v9975_v43 = vunpack.c.l.b16 %v9482_v59  ;;  %v9976_v7 = vunpack.c.l.b16 %v9496_v15  ;;  %v10037_v62 = vrot.slane %v9962_v32, 7  ;;  %v10039_v49 = vrot.slane %v9963_v45, 6 }
  0xe7   : > { %v10041_v17 = vrot.slane %v9964_v21, 5  ;;  %v10043_v10 = vrot.slane %v9965_v63, 4  ;;  %v10045_v11 = vrot.slane %v9966_v19, 3  ;;  %v10047_v60 = vrot.slane %v9967_v18, 2 }
  0xe8   : > { %v10038_v38 = vsel %vm3140_vm2, %v10037_v62, %v9961_v22  ;;  %v10049_v41 = vrot.slane %v9968_v27, 1  ;;  %v10051_v28 = vrot.slane %v9970_v61, 7  ;;  %v10053_v5 = vrot.slane %v9971_v33, 6 }
  0xe9   : > { %v10040_v30 = vsel %vm3143_vm6, %v10039_v49, %v10038_v38  ;;  %v10055_v1 = vrot.slane %v9972_v0, 5  ;;  %v10057_v37 = vrot.slane %v9973_v50, 4  ;;  %v10059_v58 = vrot.slane %v9974_v20, 3  ;;  %v1010_v0 = vld [vmem:[#allocation2 + $0x68] sm:$0x1] }
  0xea   : > { %v10042_v51 = vsel %vm3146_vm11, %v10041_v17, %v10040_v30  ;;  %v10052_v26 = vsel %vm3140_vm2, %v10051_v28, %v9969_v16  ;;  %v10061_v6 = vrot.slane %v9975_v43, 2  ;;  %v10063_v36 = vrot.slane %v9976_v7, 1  ;;  %v479_v28 = vld [vmem:[#allocation2 + $0x6c] sm:$0x1] }
  0xeb   : > { %v10044_v59 = vsel %vm3149_vm12, %v10043_v10, %v10042_v51  ;;  %v10054_v32 = vsel %vm3143_vm6, %v10053_v5, %v10052_v26  ;;  %v757_v22 = vrot.slane %v755_v48, 7  ;;  %v23133_v45 = vshrl.u32 %v19990_v40, 16  ;;  %v1006_v48 = vld [vmem:[#allocation2 + $0x60] sm:$0xf]  ;;  %v19046_v30 = vld [vmem:[%s23042_s3 + $0x148] sm:$0xff]  }
  0xec   : > { %v10046_v49 = vsel %vm3152_vm13, %v10045_v11, %v10044_v59  ;;  %v10056_v21 = vsel %vm3146_vm11, %v10055_v1, %v10054_v32  ;;  %v789_v63 = vshrl.u32 %v19996_v13, 16  ;;  %v792_v19 = vshll.u32 %v19996_v13, 16 }
  0xed   : > { %v765_v15 = vrot.slane %v23133_v45, 7  ;;  %v10048_v18 = vsel %vm3155_vm14, %v10047_v60, %v10046_v49  ;;  %v10058_v27 = vsel %vm3149_vm12, %v10057_v37, %v10056_v21  ;;  %v23134_v16 = vshll.u32 %v19988_v39, 16  ;;  %v485_v45 = vld [vmem:[#allocation2 + $0x84] sm:$0x1] }
  0xee   : > { %v761_v33 = vrot.slane %v757_v22, 4  ;;  %v10050_v50 = vsel %vm3158_vm15, %v10049_v41, %v10048_v18  ;;  %v10060_v20 = vsel %vm3152_vm13, %v10059_v58, %v10058_v27  ;;  %v23135_v43 = vshll.u32 %v19990_v40, 16  ;;  %v1020_v41 = vld [vmem:[#allocation2 + $0x78] sm:$0xf]  ;;  %v1024_v58 = vld [vmem:[#allocation2 + $0x80] sm:$0x1] }
  0xef   : > { %v760_v61 = vor.u32 %v23134_v16, %v757_v22  ;;  %v770_v62 = vrot.slane %v765_v15, 4  ;;  %v10062_v13 = vsel %vm3155_vm14, %v10061_v6, %v10060_v20  ;;  %v791_v17 = vrot.slane %v789_v63, 7 }
  0xf0   : > { %v768_v7 = vor.u32 %v23135_v43, %v765_v15  ;;  %v797_v60 = vshrl.u32 %v19998_v52, 16  ;;  %v800_v10 = vshll.u32 %v19998_v52, 16  ;;  %v10064_v39 = vsel %vm3158_vm15, %v10063_v36, %v10062_v13  ;;  %v529_v15 = vld [vmem:[#allocation2 + $0x74] sm:$0x1] }
  0xf1   : > { %v1007_v38 = vsel %vm19333_vm10, %v760_v61, %v1006_v48  ;;  %v1011_v40 = vsel %vm19234_vm3, %v770_v62, %v1010_v0  ;;  %v10122_v5 = vpack.c.b16 %v10064_v39, %v10050_v50  ;;  %v794_v1 = vor.u32 %v792_v19, %v791_v17  ;;  %v535_v61 = vld [vmem:[#allocation2 + $0x8c] sm:$0x1]  ;;  %v19048_v0 = vld [vmem:[%s23042_s3 + $0x150] sm:$0xff]  }
  0xf2   : > { %v769_v11 = vsel %vm19262_vm7, %v761_v33, %v768_v7  ;;  %v795_v52 = vrot.slane %v791_v17, 4  ;;  %v799_v37 = vrot.slane %v797_v60, 7  ;;  %1008 = vst [vmem:[#allocation2 + $0x60] sm:$0xf] %v1007_v38  ;;  %1012 = vst [vmem:[#allocation2 + $0x68] sm:$0x1] %v1011_v40  ;;  %v18553_v51 = vunpack.c.h.bf16 %v19980_v47 }
  0xf3   : > { %1009 = vst [vmem:[#allocation2 + $0x64] sm:$0xf] %v769_v11  ;;  %v23136_v26 = vunpack.c.l.bf16 %v19970_v31  ;;  %v23137_v36 = vunpack.c.h.bf16 %v19970_v31  ;;  %v23138_v32 = vunpack.c.l.bf16 %v19980_v47  ;;  %18833 = vmatmul.mubr.bf16.vlgmr.msra.gmra.mrb[0].mxu0 %v10122_v5  ;;  %v1021_v63 = vsel %vm19333_vm10, %v794_v1, %v1020_v41  ;;  %v19102_v31 = vld [vmem:[%s23042_s3 + $0x140] sm:$0xff]   ;;  %v18604_v33 = vld [vmem:[%s19169_s28 + $0x58] sm:$0xff]   ;;  %v20147_v48 = vld [vmem:[%s19169_s28 + $0x68] sm:$0xff]  }
  0xf4   : > { %v802_v49 = vor.u32 %v800_v10, %v799_v37  ;;  %v804_v21 = vrot.slane %v799_v37, 4  ;;  %v480_v19 = vsel %vm19234_vm3, 0, %v479_v28  ;;  %18841 = vmatpush3.bf16.msra.mxu0 %v19102_v31  ;;  %1022 = vst [vmem:[#allocation2 + $0x78] sm:$0xf] %v1021_v63  ;;  %v346_v47 = vmul.f32 %v19758_v14, %v18553_v51  ;;  %v19050_v1 = vld [vmem:[%s23042_s3 + $0x158] sm:$0xff]   ;;  %v19052_v63 = vld [vmem:[%s23042_s3 + $0x160] sm:$0xff]  }
  0xf5   : > { %v341_v6 = vmul.f32 %v19758_v14, %v23136_v26  ;;  %v342_v59 = vmul.f32 %v19758_v14, %v23137_v36  ;;  %v345_v22 = vmul.f32 %v19758_v14, %v23138_v32  ;;  %481 = vst [vmem:[#allocation2 + $0x6c] sm:$0x1] %v480_v19  ;;  %18842 = vmatprep.subr.bf16.mxu0 %v19046_v30  ;;  %v486_v43 = vsel %vm19234_vm3, 0, %v485_v45 }
  0xf6   : > { %v803_v50 = vsel %vm19262_vm7, %v795_v52, %v802_v49  ;;  %v1025_v20 = vsel %vm19234_vm3, %v804_v21, %v1024_v58  ;;  %v530_v7 = vsel %vm19247_vm5, 0, %v529_v15  ;;  %v385_v62 = vadd.f32 %v19711_v53, %v346_v47  ;;  %487 = vst [vmem:[#allocation2 + $0x84] sm:$0x1] %v486_v43 }
  0xf7   : > { %v380_v18 = vadd.f32 %v19711_v53, %v341_v6  ;;  %v381_v27 = vadd.f32 %v19711_v53, %v342_v59  ;;  %v384_v16 = vadd.f32 %v19711_v53, %v345_v22  ;;  %1023 = vst [vmem:[#allocation2 + $0x7c] sm:$0xf] %v803_v50  ;;  %1026 = vst [vmem:[#allocation2 + $0x80] sm:$0x1] %v1025_v20  ;;  %v536_v10 = vsel %vm19247_vm5, 0, %v535_v61 }
  0xf8   : > { %531 = vst [vmem:[#allocation2 + $0x74] sm:$0x1] %v530_v7  ;;  %v18556_v39 = vunpack.c.l.bf16 %v18604_v33  ;;  %v18557_v11 = vunpack.c.h.bf16 %v18604_v33  ;;  %18843 = vmatpush3.bf16.msra.mxu0 %v19046_v30  ;;  %v417_v41 = vmax.f32 %v385_v62, 0.0  ;;  %537 = vst [vmem:[#allocation2 + $0x8c] sm:$0x1] %v536_v10 }
  0xf9   : > { %v412_v13 = vmax.f32 %v380_v18, 0.0  ;;  %v413_v17 = vmax.f32 %v381_v27, 0.0  ;;  %v416_v60 = vmax.f32 %v384_v16, 0.0  ;;  %18844 = vmatprep.subr.bf16.mxu0 %v19048_v0 }
  0xfa   : > { %v17898_v40 = vld.sshfl [vmem:[#allocation2 + $0x60] sm:$0x33 pattern:$0x75316420]  ;;  %v20178_v51 = vmul.f32 %v19758_v14, %v18556_v39  ;;  %v20183_v59 = vpack.c.bf16 %v417_v41, %v417_v41  ;;  %v19054_v41 = vld [vmem:[%s23042_s3 + $0x168] sm:$0xff]  }
  0xfb   : > { %v20164_v28 = vpack.c.bf16 %v412_v13, %v412_v13  ;;  %v20166_v5 = vpack.c.bf16 %v413_v17, %v413_v17  ;;  %v20168_v53 = vpack.c.bf16 %v416_v60, %v416_v60  ;;  %v17899_v52 = vld.sshfl [vmem:[#allocation2 + $0x64] sm:$0x33 pattern:$0x75316420]  ;;  %v1300_v37 = vcombine.high %v17898_v40, %v17898_v40 }
  0xfc   : > { %v20174_v58 = vrot.slane %v17898_v40, %v19267_v46  ;;  %v1324_v26 = vcombine.high %v17899_v52, %v17899_v52  ;;  %v20181_v6 = vrot.slane %v17899_v52, %v19267_v46  ;;  %v17910_v36 = vld.sshfl [vmem:[#allocation2 + $0x68] sm:$0x1 pattern:$0x75316420]  ;;  %18845 = vmatpush3.bf16.msra.mxu0 %v19048_v0  ;;  %v20215_v0 = vmul.f32 %v19758_v14, %v18557_v11 }
  0xfd   : > { %v17900_v22 = vld.sshfl [vmem:[#allocation2 + $0x78] sm:$0x33 pattern:$0x75316420]  ;;  %v20187_v45 = vrot.slane %v1300_v37, %v19267_v46  ;;  %v1586_v49 = vrot.slane %v17910_v36, %v19267_v46  ;;  %18846 = vmatprep.subr.bf16.mxu0 %v19050_v1 }
  0xfe   : > { %23139 = vst [vmem:[#allocation23_spill] sm:$0xff] %v20174_v58  ;;  %23140 = vst [vmem:[#allocation24_spill] sm:$0xff] %v20181_v6  ;;  %v20191_v15 = vcombine.high %v20174_v58, %v20174_v58  ;;  %v1903_v21 = vshrl.u32 %v20174_v58, 16  ;;  %v20199_v19 = vrot.slane %v1324_v26, %v19267_v46  ;;  %v20203_v31 = vcombine.high %v20181_v6, %v20181_v6 }
  0xff   : > { %23141 = vst [vmem:[#allocation25_spill] sm:$0xff] %v20187_v45  ;;  %v1348_v47 = vcombine.high %v17900_v22, %v17900_v22  ;;  %v20206_v18 = vrot.slane %v17900_v22, %v19267_v46  ;;  %v17901_v27 = vld.sshfl [vmem:[#allocation2 + $0x7c] sm:$0x33 pattern:$0x75316420]  ;;  %v20210_v16 = vcombine.high %v20187_v45, %v20187_v45  ;;  %v1908_v61 = vshll.u32 %v20187_v45, 16 }
 0x100   : > { %23142 = vst [vmem:[#allocation26_spill] sm:$0xff] %v20191_v15  ;;  %23143 = vst [vmem:[#allocation27_spill] sm:$0xff] %v20199_v19  ;;  %v1911_v33 = vshrl.u32 %v20187_v45, 16  ;;  %v20219_v50 = vcombine.high %v20199_v19, %v20199_v19  ;;  %v1372_v7 = vcombine.high %v17901_v27, %v17901_v27  ;;  %v20229_v13 = vrot.slane %v17901_v27, %v19267_v46 }
 0x101   : > { %23144 = vst [vmem:[#allocation28_spill] sm:$0xff] %v20203_v31  ;;  %23145 = vst [vmem:[#allocation29_spill] sm:$0xff] %v20206_v18  ;;  %v20222_v20 = vrot.slane %v1348_v47, %v19267_v46  ;;  %v20226_v43 = vcombine.high %v20206_v18, %v20206_v18  ;;  %v17911_v62 = vld.sshfl [vmem:[#allocation2 + $0x80] sm:$0x1 pattern:$0x75316420]  ;;  %v20234_v14 = vsel %vm19323_vm9, %v1903_v21, %v1908_v61  ;;  %18847 = vmatpush3.bf16.msra.mxu0 %v19050_v1 }
 0x102   : > { %23146 = vst [vmem:[#allocation30_spill] sm:$0xff] %v20210_v16  ;;  %23147 = vst [vmem:[#allocation31_spill] sm:$0xff] %v20219_v50  ;;  %v1600_v17 = vrot.slane %v17911_v62, %v19267_v46  ;;  %v1916_v60 = vshll.u32 %v20191_v15, 16  ;;  %v20242_v39 = vrot.slane %v1372_v7, %v19267_v46  ;;  %v1919_v11 = vshrl.u32 %v20191_v15, 16  ;;  %18848 = vmatprep.subr.bf16.mxu0 %v19052_v63 }
 0x103   : > { %23148 = vst [vmem:[#allocation32_spill] sm:$0xff] %v20222_v20  ;;  %23149 = vst [vmem:[#allocation33_spill] sm:$0xff] %v20226_v43  ;;  %v20239_v10 = vcombine.high %v20222_v20, %v20222_v20  ;;  %v1924_v40 = vshll.u32 %v20210_v16, 16  ;;  %v20251_v52 = vcombine.high %v20229_v13, %v20229_v13  ;;  %v1927_v37 = vshrl.u32 %v20210_v16, 16 }
 0x104   : > { %23150 = vst [vmem:[#allocation34_spill] sm:$0xff] %v20229_v13  ;;  %23152 = vst [vmem:[#allocation36_spill] sm:$0xff] %v20242_v39  ;;  %v1918_v1 = vsel %vm19323_vm9, %v1911_v33, %v1916_v60  ;;  %v1932_v26 = vshll.u32 %v20181_v6, 16  ;;  %v20259_v36 = vcombine.high %v20242_v39, %v20242_v39  ;;  %v1935_v21 = vshrl.u32 %v20181_v6, 16 }
 0x105   : > { %23151 = vst [vmem:[#allocation35_spill] sm:$0xff] %v20239_v10  ;;  %23153 = vst [vmem:[#allocation37_spill] sm:$0xff] %v20251_v52  ;;  %v1926_v22 = vsel %vm19323_vm9, %v1919_v11, %v1924_v40  ;;  %v1940_v47 = vshll.u32 %v20199_v19, 16  ;;  %v1943_v61 = vshrl.u32 %v20199_v19, 16  ;;  %v1948_v33 = vshll.u32 %v20203_v31, 16  ;;  %18849 = vmatpush3.bf16.msra.mxu0 %v19052_v63  ;;  %v19056_v63 = vld [vmem:[%s23042_s3 + $0x170] sm:$0xff]  }
 0x106   : > { %23154 = vst [vmem:[#allocation38_spill] sm:$0xff] %v20259_v36  ;;  %v1934_v27 = vsel %vm19323_vm9, %v1927_v37, %v1932_v26  ;;  %v1951_v7 = vshrl.u32 %v20203_v31, 16  ;;  %v1956_v60 = vshll.u32 %v20219_v50, 16  ;;  %v1959_v11 = vshrl.u32 %v20219_v50, 16  ;;  %18850 = vmatprep.subr.bf16.mxu0 %v19054_v41 }
 0x107   : > { %v1942_v62 = vsel %vm19323_vm9, %v1935_v21, %v1940_v47  ;;  %v1964_v40 = vshll.u32 %v1586_v49, 16  ;;  %v1950_v30 = vsel %vm19323_vm9, %v1943_v61, %v1948_v33  ;;  %v1968_v37 = vshrl.u32 %v20206_v18, 16 }
 0x108   : > { %v1973_v26 = vshll.u32 %v20222_v20, 16  ;;  %v1976_v38 = vshrl.u32 %v20222_v20, 16  ;;  %v1958_v21 = vsel %vm19323_vm9, %v1951_v7, %v1956_v60  ;;  %v1981_v47 = vshll.u32 %v20226_v43, 16 }
 0x109   : > { %v1966_v49 = vsel %vm19323_vm9, %v1959_v11, %v1964_v40  ;;  %v1984_v61 = vshrl.u32 %v20226_v43, 16  ;;  %v1989_v32 = vshll.u32 %v20239_v10, 16  ;;  %v1992_v20 = vshrl.u32 %v20239_v10, 16  ;;  %18851 = vmatpush3.bf16.msra.mxu0 %v19054_v41 }
 0x10a   : > { %v1975_v33 = vsel %vm19323_vm9, %v1968_v37, %v1973_v26  ;;  %v1997_v18 = vshll.u32 %v20229_v13, 16  ;;  %v1983_v7 = vsel %vm19323_vm9, %v1976_v38, %v1981_v47  ;;  %v2000_v60 = vshrl.u32 %v20229_v13, 16  ;;  %18852 = vmatprep.subr.bf16.mxu0 %v19056_v63 }
 0x10b   : > { %v2005_v11 = vshll.u32 %v20242_v39, 16  ;;  %v2008_v40 = vshrl.u32 %v20242_v39, 16  ;;  %v1991_v43 = vsel %vm19323_vm9, %v1984_v61, %v1989_v32  ;;  %v2013_v26 = vshll.u32 %v20251_v52, 16 }
 0x10c   : > { %v1999_v37 = vsel %vm19323_vm9, %v1992_v20, %v1997_v18  ;;  %v2016_v10 = vshrl.u32 %v20251_v52, 16  ;;  %v2021_v41 = vshll.u32 %v20259_v36, 16  ;;  %v2024_v47 = vshrl.u32 %v20259_v36, 16 }
 0x10d   : > { %v2007_v38 = vsel %vm19323_vm9, %v2000_v60, %v2005_v11  ;;  %v2029_v13 = vshll.u32 %v1600_v17, 16  ;;  %v2015_v39 = vsel %vm19323_vm9, %v2008_v40, %v2013_v26  ;;  %v2633_v32 = vrot.slane %v20234_v14, %v19267_v46  ;;  %18853 = vmatpush3.bf16.msra.mxu0 %v19056_v63 }
 0x10e   : > { %v2647_v18 = vrot.slane %v1918_v1, %v19267_v46  ;;  %v2661_v20 = vrot.slane %v1926_v22, %v19267_v46  ;;  %v2023_v61 = vsel %vm19323_vm9, %v2016_v10, %v2021_v41  ;;  %v2675_v11 = vrot.slane %v1934_v27, %v19267_v46 }
 0x10f   : > { %v2031_v60 = vsel %vm19323_vm9, %v2024_v47, %v2029_v13  ;;  %v2689_v17 = vrot.slane %v1942_v62, %v19267_v46  ;;  %v2640_v40 = vrot.slane %v2633_v32, %v19267_v46  ;;  %v2703_v1 = vrot.slane %v1950_v30, %v19267_v46 }
 0x110   : > { %v2654_v26 = vrot.slane %v2647_v18, %v19267_v46  ;;  %v2668_v14 = vrot.slane %v2661_v20, %v19267_v46  ;;  %v2682_v22 = vrot.slane %v2675_v11, %v19267_v46  ;;  %v2717_v41 = vrot.slane %v1958_v21, %v19267_v46 }
 0x111   : > { %v2696_v10 = vrot.slane %v2689_v17, %v19267_v46  ;;  %v2731_v13 = vrot.slane %v1966_v49, %v19267_v46  ;;  %v2710_v27 = vrot.slane %v2703_v1, %v19267_v46  ;;  %v2745_v62 = vrot.slane %v1975_v33, %v19267_v46 }
 0x112   : > { %v2759_v63 = vrot.slane %v1983_v7, %v19267_v46  ;;  %v2773_v47 = vrot.slane %v1991_v43, %v19267_v46  ;;  %v2724_v32 = vrot.slane %v2717_v41, %v19267_v46  ;;  %v2787_v18 = vrot.slane %v1999_v37, %v19267_v46 }
 0x113   : > { %v2738_v30 = vrot.slane %v2731_v13, %v19267_v46  ;;  %v2801_v20 = vrot.slane %v2007_v38, %v19267_v46  ;;  %v2752_v21 = vrot.slane %v2745_v62, %v19267_v46  ;;  %v2815_v33 = vrot.slane %v2015_v39, %v19267_v46 }
 0x114   : > { %v2766_v49 = vrot.slane %v2759_v63, %v19267_v46  ;;  %v2780_v11 = vrot.slane %v2773_v47, %v19267_v46  ;;  %v2794_v7 = vrot.slane %v2787_v18, %v19267_v46  ;;  %v2829_v17 = vrot.slane %v2023_v61, %v19267_v46 }
 0x115   : > { %v2808_v43 = vrot.slane %v2801_v20, %v19267_v46  ;;  %v2843_v1 = vrot.slane %v2031_v60, %v19267_v46  ;;  %v2822_v37 = vrot.slane %v2815_v33, %v19267_v46  ;;  %v3107_v41 = vunpack.c.l.b16 %v2640_v40 }
 0x116   : > { %v3108_v38 = vunpack.c.l.b16 %v2654_v26  ;;  %v3109_v13 = vunpack.c.l.b16 %v2668_v14  ;;  %v2836_v62 = vrot.slane %v2829_v17, %v19267_v46  ;;  %v3110_v47 = vunpack.c.l.b16 %v2682_v22 }
 0x117   : > { %v2850_v63 = vrot.slane %v2843_v1, %v19267_v46  ;;  %v3111_v36 = vunpack.c.l.b16 %v2696_v10  ;;  %v3112_v39 = vunpack.c.l.b16 %v2710_v27  ;;  %v3113_v52 = vunpack.c.l.b16 %v2724_v32 }
 0x118   : > { %v3114_v18 = vunpack.c.l.b16 %v2738_v30  ;;  %v3115_v50 = vunpack.c.l.b16 %v2752_v21  ;;  %v3116_v20 = vunpack.c.l.b16 %v2766_v49  ;;  %v3117_v31 = vunpack.c.l.b16 %v2780_v11 }
 0x119   : > { %v3118_v61 = vunpack.c.l.b16 %v2794_v7  ;;  %v3119_v19 = vunpack.c.l.b16 %v2808_v43  ;;  %v3120_v60 = vunpack.c.l.b16 %v2822_v37  ;;  %v3121_v6 = vunpack.c.l.b16 %v2836_v62 }
 0x11a   : > { %v3122_v33 = vunpack.c.l.b16 %v2850_v63  ;;  %v3202_v40 = vrot.slane %v3108_v38, 7  ;;  %v3204_v26 = vrot.slane %v3109_v13, 6  ;;  %v3206_v14 = vrot.slane %v3110_v47, 5 }
 0x11b   : > { %v3208_v16 = vrot.slane %v3111_v36, 4  ;;  %v3210_v17 = vrot.slane %v3112_v39, 3  ;;  %v3212_v22 = vrot.slane %v3113_v52, 2  ;;  %v3214_v10 = vrot.slane %v3114_v18, 1 }
 0x11c   : > { %v3203_v1 = vsel %vm3140_vm2, %v3202_v40, %v3107_v41  ;;  %v3216_v27 = vrot.slane %v3116_v20, 7  ;;  %v3218_v30 = vrot.slane %v3117_v31, 6  ;;  %v3220_v21 = vrot.slane %v3118_v61, 5 }
 0x11d   : > { %v3205_v32 = vsel %vm3143_vm6, %v3204_v26, %v3203_v1  ;;  %v3222_v49 = vrot.slane %v3119_v19, 4  ;;  %v3224_v43 = vrot.slane %v3120_v60, 3  ;;  %v3226_v37 = vrot.slane %v3121_v6, 2  ;;  %v1013_v60 = vld [vmem:[#allocation2 + $0x6c] sm:$0xf] }
 0x11e   : > { %v3207_v11 = vsel %vm3146_vm11, %v3206_v14, %v3205_v32  ;;  %v3217_v7 = vsel %vm3140_vm2, %v3216_v27, %v3115_v50  ;;  %v3228_v13 = vrot.slane %v3122_v33, 1  ;;  %v23155_v52 = vshrl.u32 %v20164_v28, 16  ;;  %v1017_v14 = vld [vmem:[#allocation2 + $0x74] sm:$0x1] }
 0x11f   : > { %v3209_v38 = vsel %vm3149_vm12, %v3208_v16, %v3207_v11  ;;  %v3219_v36 = vsel %vm3143_vm6, %v3218_v30, %v3217_v7  ;;  %v775_v19 = vshll.u32 %v20164_v28, 16  ;;  %v780_v63 = vshrl.u32 %v20166_v5, 16  ;;  %v1031_v11 = vld [vmem:[#allocation2 + $0x8c] sm:$0x1]  ;;  %v20379_v7 = vld [vmem:[%s23040_s1] ss:$0 sm:$0xff] }
 0x120   : > { %v774_v41 = vrot.slane %v23155_v52, 7  ;;  %v3211_v62 = vsel %vm3152_vm13, %v3210_v17, %v3209_v38  ;;  %v3221_v31 = vsel %vm3146_vm11, %v3220_v21, %v3219_v36  ;;  %v783_v16 = vshll.u32 %v20166_v5, 16  ;;  %v488_v36 = vld [vmem:[#allocation2 + $0x90] sm:$0x1] }
 0x121   : > { %v3213_v50 = vsel %vm3155_vm14, %v3212_v22, %v3211_v62  ;;  %v3223_v6 = vsel %vm3149_vm12, %v3222_v49, %v3221_v31  ;;  %v782_v61 = vrot.slane %v780_v63, 7  ;;  %v806_v28 = vshrl.u32 %v20168_v53, 16  ;;  %v1027_v49 = vld [vmem:[#allocation2 + $0x84] sm:$0xf]  ;;  %v494_v31 = vld [vmem:[#allocation2 + $0xa8] sm:$0x1] }
 0x122   : > { %v778_v47 = vrot.slane %v774_v41, 4  ;;  %v3215_v39 = vsel %vm3158_vm15, %v3214_v10, %v3213_v50  ;;  %v3225_v18 = vsel %vm3152_vm13, %v3224_v43, %v3223_v6  ;;  %v777_v20 = vor.u32 %v775_v19, %v774_v41  ;;  %v20390_v19 = vld [vmem:[%s23041_s2] ss:$0 sm:$0xff] }
 0x123   : > { %v3227_v33 = vsel %vm3155_vm14, %v3226_v37, %v3225_v18  ;;  %v809_v40 = vshll.u32 %v20168_v53, 16  ;;  %v814_v26 = vshrl.u32 %v20183_v59, 16  ;;  %v785_v1 = vor.u32 %v783_v16, %v782_v61  ;;  %v544_v16 = vld [vmem:[#allocation2 + $0xb0] sm:$0x1] }
 0x124   : > { %v3229_v17 = vsel %vm3158_vm15, %v3228_v13, %v3227_v33  ;;  %v787_v5 = vrot.slane %v782_v61, 4  ;;  %v817_v22 = vshll.u32 %v20183_v59, 16  ;;  %v808_v27 = vrot.slane %v806_v28, 7 }
 0x125   : > { %v3260_v10 = vpack.c.b16 %v3229_v17, %v3215_v39  ;;  %v816_v32 = vrot.slane %v814_v26, 7  ;;  %v1014_v30 = vsel %vm19333_vm10, %v777_v20, %v1013_v60  ;;  %v786_v21 = vsel %vm19262_vm7, %v778_v47, %v785_v1  ;;  %v538_v47 = vld [vmem:[#allocation2 + $0x98] sm:$0x1]  ;;  %v20399_v39 = vld [vmem:[%s19169_s28 + $0x60] sm:$0xff]  }
 0x126   : > { %1015 = vst [vmem:[#allocation2 + $0x6c] sm:$0xf] %v1014_v30  ;;  %v1018_v53 = vsel %vm19234_vm3, %v787_v5, %v1017_v14  ;;  %v23156_v59 = vunpack.c.l.bf16 %v20147_v48  ;;  %v23157_v37 = vunpack.c.h.bf16 %v20147_v48  ;;  %v811_v13 = vor.u32 %v809_v40, %v808_v27  ;;  %1016 = vst [vmem:[#allocation2 + $0x70] sm:$0xf] %v786_v21  ;;  %v20410_v40 = vld [vmem:[%s19169_s28 + $0x70] sm:$0xff]  }
 0x127   : > { %18740 = vmatprep.mubr.bf16.mxu1 %v3260_v10  ;;  %v812_v52 = vrot.slane %v808_v27, 4  ;;  %v819_v41 = vor.u32 %v817_v22, %v816_v32  ;;  %v821_v62 = vrot.slane %v816_v32, 4  ;;  %1019 = vst [vmem:[#allocation2 + $0x74] sm:$0x1] %v1018_v53  ;;  %v386_v48 = vadd.f32 %v20390_v19, %v20178_v51 }
 0x128   : > { %v351_v43 = vmul.f32 %v20379_v7, %v23156_v59  ;;  %v352_v38 = vmul.f32 %v20379_v7, %v23157_v37  ;;  %v387_v63 = vadd.f32 %v20390_v19, %v20215_v0  ;;  %v1028_v20 = vsel %vm19333_vm10, %v811_v13, %v1027_v49 }
 0x129   : > { %v820_v18 = vsel %vm19262_vm7, %v812_v52, %v819_v41  ;;  %v1032_v51 = vsel %vm19234_vm3, %v821_v62, %v1031_v11  ;;  %v489_v0 = vsel %vm19234_vm3, 0, %v488_v36  ;;  %1029 = vst [vmem:[#allocation2 + $0x84] sm:$0xf] %v1028_v20  ;;  %v418_v61 = vmax.f32 %v386_v48, 0.0 }
 0x12a   : > { %v390_v50 = vadd.f32 %v20390_v19, %v351_v43  ;;  %v391_v6 = vadd.f32 %v20390_v19, %v352_v38  ;;  %1030 = vst [vmem:[#allocation2 + $0x88] sm:$0xf] %v820_v18  ;;  %1033 = vst [vmem:[#allocation2 + $0x8c] sm:$0x1] %v1032_v51  ;;  %v419_v60 = vmax.f32 %v387_v63, 0.0  ;;  %v495_v26 = vsel %vm19234_vm3, 0, %v494_v31 }
 0x12b   : > { %490 = vst [vmem:[#allocation2 + $0x90] sm:$0x1] %v489_v0  ;;  %v539_v14 = vsel %vm19247_vm5, 0, %v538_v47  ;;  %v545_v17 = vsel %vm19247_vm5, 0, %v544_v16  ;;  %v18560_v1 = vunpack.c.l.bf16 %v20399_v39  ;;  %496 = vst [vmem:[#allocation2 + $0xa8] sm:$0x1] %v495_v26  ;;  %v20419_v5 = vpack.c.bf16 %v418_v61, %v418_v61 }
 0x12c   : > { %v422_v33 = vmax.f32 %v390_v50, 0.0  ;;  %v423_v28 = vmax.f32 %v391_v6, 0.0  ;;  %540 = vst [vmem:[#allocation2 + $0x98] sm:$0x1] %v539_v14  ;;  %546 = vst [vmem:[#allocation2 + $0xb0] sm:$0x1] %v545_v17  ;;  %v20421_v22 = vpack.c.bf16 %v419_v60, %v419_v60 }
 0x12d   : > { %v18110_v32 = vld.sshfl [vmem:[#allocation2 + $0x6c] sm:$0x33 pattern:$0x75316420]  ;;  %v20431_v49 = vmul.f32 %v20379_v7, %v18560_v1 }
 0x12e   : > { %v20423_v10 = vpack.c.bf16 %v422_v33, %v422_v33  ;;  %v20425_v27 = vpack.c.bf16 %v423_v28, %v423_v28  ;;  %v18111_v11 = vld.sshfl [vmem:[#allocation2 + $0x70] sm:$0x33 pattern:$0x75316420]  ;;  %v8271_v59 = vcombine.high %v18110_v32, %v18110_v32  ;;  %v8278_v43 = vrot.slane %v18110_v32, %v19267_v46 }
 0x12f   : > { %v18112_v36 = vld.sshfl [vmem:[#allocation2 + $0x74] sm:$0x1 pattern:$0x75316420]  ;;  %v8295_v13 = vcombine.high %v18111_v11, %v18111_v11  ;;  %v8302_v52 = vrot.slane %v18111_v11, %v19267_v46 }
 0x130   : > { %v8285_v31 = vrot.slane %v8271_v59, %v19267_v46  ;;  %v8286_v48 = vcombine.high %v8278_v43, %v8278_v43  ;;  %v8325_v63 = vrot.slane %v18112_v36, %v19267_v46  ;;  %v8773_v50 = vshrl.u32 %v8278_v43, 16  ;;  %v18113_v6 = vld.sshfl [vmem:[#allocation2 + $0x84] sm:$0x33 pattern:$0x75316420] }
 0x131   : > { %v8309_v47 = vrot.slane %v8295_v13, %v19267_v46  ;;  %v8310_v16 = vcombine.high %v8302_v52, %v8302_v52  ;;  %v8802_v18 = vshll.u32 %v8302_v52, 16  ;;  %v8805_v20 = vshrl.u32 %v8302_v52, 16  ;;  %v18114_v51 = vld.sshfl [vmem:[#allocation2 + $0x88] sm:$0x33 pattern:$0x75316420] }
 0x132   : > { %v8287_v0 = vcombine.high %v8285_v31, %v8285_v31  ;;  %v8333_v61 = vcombine.high %v18113_v6, %v18113_v6  ;;  %v8340_v60 = vrot.slane %v18113_v6, %v19267_v46  ;;  %v8778_v33 = vshll.u32 %v8285_v31, 16  ;;  %v18115_v28 = vld.sshfl [vmem:[#allocation2 + $0x8c] sm:$0x1 pattern:$0x75316420] }
 0x133   : > { %v8311_v26 = vcombine.high %v8309_v47, %v8309_v47  ;;  %v8357_v14 = vcombine.high %v18114_v51, %v18114_v51  ;;  %v8364_v17 = vrot.slane %v18114_v51, %v19267_v46  ;;  %v8781_v1 = vshrl.u32 %v8285_v31, 16 }
 0x134   : > { %v8347_v32 = vrot.slane %v8333_v61, %v19267_v46  ;;  %v8348_v11 = vcombine.high %v8340_v60, %v8340_v60  ;;  %v8387_v59 = vrot.slane %v18115_v28, %v19267_v46  ;;  %v8780_v43 = vsel %vm19323_vm9, %v8773_v50, %v8778_v33 }
 0x135   : > { %v8371_v36 = vrot.slane %v8357_v14, %v19267_v46  ;;  %v8372_v13 = vcombine.high %v8364_v17, %v8364_v17  ;;  %v8786_v52 = vshll.u32 %v8286_v48, 16  ;;  %v8789_v6 = vshrl.u32 %v8286_v48, 16 }
 0x136   : > { %v8349_v53 = vcombine.high %v8347_v32, %v8347_v32  ;;  %v8794_v21 = vshll.u32 %v8287_v0, 16  ;;  %v8797_v30 = vshrl.u32 %v8287_v0, 16  ;;  %v8810_v62 = vshll.u32 %v8309_v47, 16 }
 0x137   : > { %v8373_v38 = vcombine.high %v8371_v36, %v8371_v36  ;;  %v8788_v31 = vsel %vm19323_vm9, %v8781_v1, %v8786_v52  ;;  %v8813_v51 = vshrl.u32 %v8309_v47, 16  ;;  %v8818_v61 = vshll.u32 %v8310_v16, 16 }
 0x138   : > { %v8796_v28 = vsel %vm19323_vm9, %v8789_v6, %v8794_v21  ;;  %v8804_v50 = vsel %vm19323_vm9, %v8797_v30, %v8802_v18  ;;  %v8812_v33 = vsel %vm19323_vm9, %v8805_v20, %v8810_v62  ;;  %v8821_v48 = vshrl.u32 %v8310_v16, 16  ;;  %v19057_v62 = vld [vmem:[%s23042_s3 + $0x38] sm:$0xff]  }
 0x139   : > { %v8820_v0 = vsel %vm19323_vm9, %v8813_v51, %v8818_v61  ;;  %v8826_v14 = vshll.u32 %v8311_v26, 16  ;;  %v8829_v41 = vshrl.u32 %v8311_v26, 16  ;;  %v8834_v37 = vshll.u32 %v8325_v63, 16  ;;  %v19058_v63 = vld [vmem:[%s23042_s3 + $0x178] sm:$0xff]   ;;  %18758 = vmatprep.subr.bf16.mxu1 %v19057_v62 }
 0x13a   : > { %v8838_v15 = vshrl.u32 %v8340_v60, 16  ;;  %v8843_v1 = vshll.u32 %v8347_v32, 16  ;;  %v8846_v47 = vshrl.u32 %v8347_v32, 16  ;;  %v8851_v52 = vshll.u32 %v8348_v11, 16  ;;  %18854 = vmatprep.subr.bf16.mxu0 %v19058_v63  ;;  %18759 = vmatpush3.bf16.msra.mxu1 %v19057_v62 }
 0x13b   : > { %v8828_v21 = vsel %vm19323_vm9, %v8821_v48, %v8826_v14  ;;  %v8836_v30 = vsel %vm19323_vm9, %v8829_v41, %v8834_v37  ;;  %v8854_v18 = vshrl.u32 %v8348_v11, 16  ;;  %v8859_v6 = vshll.u32 %v8349_v53, 16  ;;  %18855 = vmatpush3.bf16.msra.mxu0 %v19058_v63 }
 0x13c   : > { %v8845_v16 = vsel %vm19323_vm9, %v8838_v15, %v8843_v1  ;;  %v8853_v20 = vsel %vm19323_vm9, %v8846_v47, %v8851_v52  ;;  %v8862_v60 = vshrl.u32 %v8349_v53, 16  ;;  %v8867_v26 = vshll.u32 %v8364_v17, 16 }
 0x13d   : > { %v8861_v37 = vsel %vm19323_vm9, %v8854_v18, %v8859_v6  ;;  %v8870_v41 = vshrl.u32 %v8364_v17, 16  ;;  %v8875_v32 = vshll.u32 %v8371_v36, 16  ;;  %v8878_v11 = vshrl.u32 %v8371_v36, 16 }
 0x13e   : > { %v8869_v51 = vsel %vm19323_vm9, %v8862_v60, %v8867_v26  ;;  %v8883_v61 = vshll.u32 %v8372_v13, 16  ;;  %v8886_v48 = vshrl.u32 %v8372_v13, 16  ;;  %v8891_v14 = vshll.u32 %v8373_v38, 16 }
 0x13f   : > { %v8877_v15 = vsel %vm19323_vm9, %v8870_v41, %v8875_v32  ;;  %v8894_v53 = vshrl.u32 %v8373_v38, 16  ;;  %v8899_v1 = vshll.u32 %v8387_v59, 16  ;;  %v9503_v47 = vrot.slane %v8780_v43, %v19267_v46 }
 0x140   : > { %v8885_v17 = vsel %vm19323_vm9, %v8878_v11, %v8883_v61  ;;  %v8893_v36 = vsel %vm19323_vm9, %v8886_v48, %v8891_v14  ;;  %v9517_v52 = vrot.slane %v8788_v31, %v19267_v46  ;;  %v9531_v13 = vrot.slane %v8796_v28, %v19267_v46 }
 0x141   : > { %v8901_v18 = vsel %vm19323_vm9, %v8894_v53, %v8899_v1  ;;  %v9510_v6 = vrot.slane %v9503_v47, %v19267_v46  ;;  %v9545_v38 = vrot.slane %v8804_v50, %v19267_v46  ;;  %v9559_v59 = vrot.slane %v8812_v33, %v19267_v46 }
 0x142   : > { %v9524_v43 = vrot.slane %v9517_v52, %v19267_v46  ;;  %v9538_v62 = vrot.slane %v9531_v13, %v19267_v46  ;;  %v9573_v63 = vrot.slane %v8820_v0, %v19267_v46  ;;  %v9587_v60 = vrot.slane %v8828_v21, %v19267_v46  ;;  %v19059_v0 = vld [vmem:[%s23042_s3 + $0x80] sm:$0xff]  }
 0x143   : > { %v9552_v31 = vrot.slane %v9545_v38, %v19267_v46  ;;  %v9566_v28 = vrot.slane %v9559_v59, %v19267_v46  ;;  %v9601_v26 = vrot.slane %v8836_v30, %v19267_v46  ;;  %v9615_v41 = vrot.slane %v8845_v16, %v19267_v46  ;;  %18768 = vmatprep.subr.bf16.mxu1 %v19059_v0 }
 0x144   : > { %v9580_v50 = vrot.slane %v9573_v63, %v19267_v46  ;;  %v9594_v33 = vrot.slane %v9587_v60, %v19267_v46  ;;  %v9629_v32 = vrot.slane %v8853_v20, %v19267_v46  ;;  %v9643_v11 = vrot.slane %v8861_v37, %v19267_v46 }
 0x145   : > { %v9608_v21 = vrot.slane %v9601_v26, %v19267_v46  ;;  %v9622_v61 = vrot.slane %v9615_v41, %v19267_v46  ;;  %v9657_v30 = vrot.slane %v8869_v51, %v19267_v46  ;;  %v9671_v16 = vrot.slane %v8877_v15, %v19267_v46 }
 0x146   : > { %v9636_v48 = vrot.slane %v9629_v32, %v19267_v46  ;;  %v9650_v14 = vrot.slane %v9643_v11, %v19267_v46  ;;  %v9685_v20 = vrot.slane %v8885_v17, %v19267_v46  ;;  %v9699_v37 = vrot.slane %v8893_v36, %v19267_v46 }
 0x147   : > { %v9664_v53 = vrot.slane %v9657_v30, %v19267_v46  ;;  %v9678_v1 = vrot.slane %v9671_v16, %v19267_v46  ;;  %v9713_v47 = vrot.slane %v8901_v18, %v19267_v46  ;;  %v9977_v52 = vunpack.c.l.b16 %v9510_v6 }
 0x148   : > { %v9692_v51 = vrot.slane %v9685_v20, %v19267_v46  ;;  %v9706_v15 = vrot.slane %v9699_v37, %v19267_v46  ;;  %v9978_v13 = vunpack.c.l.b16 %v9524_v43  ;;  %v9979_v38 = vunpack.c.l.b16 %v9538_v62 }
 0x149   : > { %v9720_v59 = vrot.slane %v9713_v47, %v19267_v46  ;;  %v9980_v63 = vunpack.c.l.b16 %v9552_v31  ;;  %v9981_v17 = vunpack.c.l.b16 %v9566_v28  ;;  %v9982_v60 = vunpack.c.l.b16 %v9580_v50 }
 0x14a   : > { %v9983_v36 = vunpack.c.l.b16 %v9594_v33  ;;  %v9984_v26 = vunpack.c.l.b16 %v9608_v21  ;;  %v9985_v41 = vunpack.c.l.b16 %v9622_v61  ;;  %v9986_v32 = vunpack.c.l.b16 %v9636_v48 }
 0x14b   : > { %v9987_v11 = vunpack.c.l.b16 %v9650_v14  ;;  %v9988_v0 = vunpack.c.l.b16 %v9664_v53  ;;  %v9989_v30 = vunpack.c.l.b16 %v9678_v1  ;;  %v9990_v18 = vunpack.c.l.b16 %v9692_v51 }
 0x14c   : > { %v9991_v6 = vunpack.c.l.b16 %v9706_v15  ;;  %v9992_v16 = vunpack.c.l.b16 %v9720_v59  ;;  %v10065_v20 = vrot.slane %v9978_v13, 7  ;;  %v10067_v45 = vrot.slane %v9979_v38, 6 }
 0x14d   : > { %v10069_v37 = vrot.slane %v9980_v63, 5  ;;  %v10071_v43 = vrot.slane %v9981_v17, 4  ;;  %v10073_v62 = vrot.slane %v9982_v60, 3  ;;  %v10075_v58 = vrot.slane %v9983_v36, 2 }
 0x14e   : > { %v10066_v31 = vsel %vm3140_vm2, %v10065_v20, %v9977_v52  ;;  %v10077_v28 = vrot.slane %v9984_v26, 1  ;;  %v10079_v50 = vrot.slane %v9986_v32, 7  ;;  %v10081_v33 = vrot.slane %v9987_v11, 6 }
 0x14f   : > { %v10068_v21 = vsel %vm3143_vm6, %v10067_v45, %v10066_v31  ;;  %v10083_v61 = vrot.slane %v9988_v0, 5  ;;  %v10085_v48 = vrot.slane %v9989_v30, 4  ;;  %v10087_v14 = vrot.slane %v9990_v18, 3  ;;  %v1034_v30 = vld [vmem:[#allocation2 + $0x90] sm:$0xf] }
 0x150   : > { %v10070_v53 = vsel %vm3146_vm11, %v10069_v37, %v10068_v21  ;;  %v10080_v1 = vsel %vm3140_vm2, %v10079_v50, %v9985_v41  ;;  %v10089_v47 = vrot.slane %v9991_v6, 2  ;;  %v10091_v51 = vrot.slane %v9992_v16, 1  ;;  %v1038_v18 = vld [vmem:[#allocation2 + $0x98] sm:$0x1]  ;;  %v491_v21 = vld [vmem:[#allocation2 + $0x9c] sm:$0x1] }
 0x151   : > { %v10072_v15 = vsel %vm3149_vm12, %v10071_v43, %v10070_v53  ;;  %v10082_v13 = vsel %vm3143_vm6, %v10081_v33, %v10080_v1  ;;  %v23158_v52 = vshrl.u32 %v20419_v5, 16  ;;  %v23159_v59 = vshrl.u32 %v20421_v22, 16  ;;  %v1048_v33 = vld [vmem:[#allocation2 + $0xa8] sm:$0xf] }
 0x152   : > { %v10074_v45 = vsel %vm3152_vm13, %v10073_v62, %v10072_v15  ;;  %v10084_v17 = vsel %vm3146_vm11, %v10083_v61, %v10082_v13  ;;  %v857_v60 = vshrl.u32 %v20423_v10, 16  ;;  %v860_v36 = vshll.u32 %v20423_v10, 16 }
 0x153   : > { %v825_v38 = vrot.slane %v23158_v52, 7  ;;  %v833_v63 = vrot.slane %v23159_v59, 7  ;;  %v10076_v26 = vsel %vm3155_vm14, %v10075_v58, %v10074_v45  ;;  %v10086_v41 = vsel %vm3149_vm12, %v10085_v48, %v10084_v17  ;;  %v497_v59 = vld [vmem:[#allocation2 + $0xb4] sm:$0x1] }
 0x154   : > { %v23160_v32 = vshll.u32 %v20419_v5, 16  ;;  %v10078_v6 = vsel %vm3158_vm15, %v10077_v28, %v10076_v26  ;;  %v10088_v16 = vsel %vm3152_vm13, %v10087_v14, %v10086_v41  ;;  %v23161_v20 = vshll.u32 %v20421_v22, 16 }
 0x155   : > { %v829_v0 = vrot.slane %v825_v38, 4  ;;  %v838_v43 = vrot.slane %v833_v63, 4  ;;  %v10090_v10 = vsel %vm3155_vm14, %v10089_v47, %v10088_v16  ;;  %v859_v62 = vrot.slane %v857_v60, 7 }
 0x156   : > { %v828_v11 = vor.u32 %v23160_v32, %v825_v38  ;;  %v836_v37 = vor.u32 %v23161_v20, %v833_v63  ;;  %v865_v58 = vshrl.u32 %v20425_v27, 16  ;;  %v868_v31 = vshll.u32 %v20425_v27, 16  ;;  %v1052_v27 = vld [vmem:[#allocation2 + $0xb0] sm:$0x1]  ;;  %v541_v63 = vld [vmem:[#allocation2 + $0xa4] sm:$0x1] }
 0x157   : > { %v10092_v5 = vsel %vm3158_vm15, %v10091_v51, %v10090_v10  ;;  %v1039_v22 = vsel %vm19234_vm3, %v838_v43, %v1038_v18  ;;  %v862_v48 = vor.u32 %v860_v36, %v859_v62  ;;  %v863_v14 = vrot.slane %v859_v62, 4  ;;  %v547_v36 = vld [vmem:[#allocation2 + $0xbc] sm:$0x1]  ;;  %v19060_v10 = vld [vmem:[%s23042_s3 + $0x180] sm:$0xff]  }
 0x158   : > { %v837_v50 = vsel %vm19262_vm7, %v829_v0, %v836_v37  ;;  %v1035_v28 = vsel %vm19333_vm10, %v828_v11, %v1034_v30  ;;  %v10123_v61 = vpack.c.b16 %v10092_v5, %v10078_v6  ;;  %v867_v53 = vrot.slane %v865_v58, 7  ;;  %1040 = vst [vmem:[#allocation2 + $0x98] sm:$0x1] %v1039_v22  ;;  %18864 = vmatprep.subr.bf16.mxu0 %v19060_v10 }
 0x159   : > { %1036 = vst [vmem:[#allocation2 + $0x90] sm:$0xf] %v1035_v28  ;;  %1037 = vst [vmem:[#allocation2 + $0x94] sm:$0xf] %v837_v50  ;;  %v23162_v1 = vunpack.c.h.bf16 %v20399_v39  ;;  %v23163_v51 = vunpack.c.l.bf16 %v20410_v40  ;;  %v23164_v13 = vunpack.c.h.bf16 %v20410_v40  ;;  %v388_v38 = vadd.f32 %v20390_v19, %v20431_v49 }
 0x15a   : > { %18836 = vmatprep.mubr.bf16.mxu0 %v10123_v61  ;;  %v870_v45 = vor.u32 %v868_v31, %v867_v53  ;;  %v872_v17 = vrot.slane %v867_v53, 4  ;;  %v1049_v39 = vsel %vm19333_vm10, %v862_v48, %v1048_v33  ;;  %v492_v60 = vsel %vm19234_vm3, 0, %v491_v21 }
 0x15b   : > { %v350_v47 = vmul.f32 %v20379_v7, %v23162_v1  ;;  %v353_v15 = vmul.f32 %v20379_v7, %v23163_v51  ;;  %v354_v52 = vmul.f32 %v20379_v7, %v23164_v13  ;;  %1050 = vst [vmem:[#allocation2 + $0xa8] sm:$0xf] %v1049_v39  ;;  %v420_v49 = vmax.f32 %v388_v38, 0.0  ;;  %493 = vst [vmem:[#allocation2 + $0x9c] sm:$0x1] %v492_v60 }
 0x15c   : > { %v871_v41 = vsel %vm19262_vm7, %v863_v14, %v870_v45  ;;  %v1053_v32 = vsel %vm19234_vm3, %v872_v17, %v1052_v27  ;;  %v498_v11 = vsel %vm19234_vm3, 0, %v497_v59  ;;  %v542_v0 = vsel %vm19247_vm5, 0, %v541_v63 }
 0x15d   : > { %v389_v40 = vadd.f32 %v20390_v19, %v350_v47  ;;  %v392_v7 = vadd.f32 %v20390_v19, %v353_v15  ;;  %v393_v26 = vadd.f32 %v20390_v19, %v354_v52  ;;  %1051 = vst [vmem:[#allocation2 + $0xac] sm:$0xf] %v871_v41  ;;  %1054 = vst [vmem:[#allocation2 + $0xb0] sm:$0x1] %v1053_v32  ;;  %v548_v19 = vsel %vm19247_vm5, 0, %v547_v36 }
 0x15e   : > { %499 = vst [vmem:[#allocation2 + $0xb4] sm:$0x1] %v498_v11  ;;  %543 = vst [vmem:[#allocation2 + $0xa4] sm:$0x1] %v542_v0  ;;  %v20580_v16 = vpack.c.bf16 %v420_v49, %v420_v49  ;;  %v3385_v20 = vrot.slane %v19284_v54, %v19267_v46 }
 0x15f   : > { %v421_v30 = vmax.f32 %v389_v40, 0.0  ;;  %v424_v18 = vmax.f32 %v392_v7, 0.0  ;;  %v425_v6 = vmax.f32 %v393_v26, 0.0  ;;  %549 = vst [vmem:[#allocation2 + $0xbc] sm:$0x1] %v548_v19 }
 0x160   : > { %v17902_v62 = vld.sshfl [vmem:[#allocation2 + $0x90] sm:$0x33 pattern:$0x75316420]  ;;  %v20635_v36 = vrot.slane %v3385_v20, %v19267_v46 }
 0x161   : > { %v20591_v58 = vpack.c.bf16 %v421_v30, %v421_v30  ;;  %v20593_v31 = vpack.c.bf16 %v424_v18, %v424_v18  ;;  %v20595_v5 = vpack.c.bf16 %v425_v6, %v425_v6  ;;  %v17903_v50 = vld.sshfl [vmem:[#allocation2 + $0x94] sm:$0x33 pattern:$0x75316420]  ;;  %v1396_v28 = vcombine.high %v17902_v62, %v17902_v62 }
 0x162   : > { %v20600_v22 = vrot.slane %v17902_v62, %v19267_v46  ;;  %v1420_v61 = vcombine.high %v17903_v50, %v17903_v50  ;;  %v20605_v48 = vrot.slane %v17903_v50, %v19267_v46  ;;  %v17912_v14 = vld.sshfl [vmem:[#allocation2 + $0x98] sm:$0x1 pattern:$0x75316420] }
 0x163   : > { %v17904_v1 = vld.sshfl [vmem:[#allocation2 + $0xa8] sm:$0x33 pattern:$0x75316420]  ;;  %v20610_v47 = vrot.slane %v1396_v28, %v19267_v46  ;;  %v1614_v15 = vrot.slane %v17912_v14, %v19267_v46 }
 0x164   : > { %v20614_v51 = vcombine.high %v20600_v22, %v20600_v22  ;;  %v2033_v13 = vshrl.u32 %v20600_v22, 16  ;;  %v20619_v52 = vrot.slane %v1420_v61, %v19267_v46  ;;  %v20623_v38 = vcombine.high %v20605_v48, %v20605_v48  ;;  %v17905_v45 = vld.sshfl [vmem:[#allocation2 + $0xac] sm:$0x33 pattern:$0x75316420] }
 0x165   : > { %v1444_v59 = vcombine.high %v17904_v1, %v17904_v1  ;;  %v20626_v63 = vrot.slane %v17904_v1, %v19267_v46  ;;  %v20630_v17 = vcombine.high %v20610_v47, %v20610_v47  ;;  %v2038_v39 = vshll.u32 %v20610_v47, 16  ;;  %v17913_v41 = vld.sshfl [vmem:[#allocation2 + $0xb0] sm:$0x1 pattern:$0x75316420] }
 0x166   : > { %v2041_v60 = vshrl.u32 %v20610_v47, 16  ;;  %v20639_v40 = vcombine.high %v20619_v52, %v20619_v52  ;;  %v1468_v49 = vcombine.high %v17905_v45, %v17905_v45  ;;  %v20649_v32 = vrot.slane %v17905_v45, %v19267_v46 }
 0x167   : > { %23165 = vst [vmem:[#allocation39_spill] sm:$0xff] %v20626_v63  ;;  %v20642_v7 = vrot.slane %v1444_v59, %v19267_v46  ;;  %v20646_v26 = vcombine.high %v20626_v63, %v20626_v63  ;;  %v1628_v11 = vrot.slane %v17913_v41, %v19267_v46  ;;  %v2040_v0 = vsel %vm19323_vm9, %v2033_v13, %v2038_v39 }
 0x168   : > { %23166 = vst [vmem:[#allocation40_spill] sm:$0xff] %v20639_v40  ;;  %23169 = vst [vmem:[#allocation43_spill] sm:$0xff] %v20649_v32  ;;  %v2046_v30 = vshll.u32 %v20614_v51, 16  ;;  %v20660_v6 = vrot.slane %v1468_v49, %v19267_v46  ;;  %v2049_v19 = vshrl.u32 %v20614_v51, 16  ;;  %v2054_v20 = vshll.u32 %v20630_v17, 16 }
 0x169   : > { %23167 = vst [vmem:[#allocation41_spill] sm:$0xff] %v20642_v7  ;;  %23168 = vst [vmem:[#allocation42_spill] sm:$0xff] %v20646_v26  ;;  %v20657_v18 = vcombine.high %v20642_v7, %v20642_v7  ;;  %v20666_v10 = vcombine.high %v20649_v32, %v20649_v32  ;;  %v2057_v50 = vshrl.u32 %v20630_v17, 16  ;;  %v2062_v28 = vshll.u32 %v20605_v48, 16 }
 0x16a   : > { %23171 = vst [vmem:[#allocation45_spill] sm:$0xff] %v20660_v6  ;;  %v2048_v62 = vsel %vm19323_vm9, %v2041_v60, %v2046_v30  ;;  %v20674_v61 = vcombine.high %v20660_v6, %v20660_v6  ;;  %v2056_v14 = vsel %vm19323_vm9, %v2049_v19, %v2054_v20  ;;  %v2065_v1 = vshrl.u32 %v20605_v48, 16 }
 0x16b   : > { %23170 = vst [vmem:[#allocation44_spill] sm:$0xff] %v20657_v18  ;;  %23172 = vst [vmem:[#allocation46_spill] sm:$0xff] %v20666_v10  ;;  %v2070_v13 = vshll.u32 %v20619_v52, 16  ;;  %v2064_v59 = vsel %vm19323_vm9, %v2057_v50, %v2062_v28  ;;  %v2073_v45 = vshrl.u32 %v20619_v52, 16  ;;  %v2078_v39 = vshll.u32 %v20623_v38, 16 }
 0x16c   : > { %23173 = vst [vmem:[#allocation47_spill] sm:$0xff] %v20674_v61  ;;  %v2081_v60 = vshrl.u32 %v20623_v38, 16  ;;  %v2086_v41 = vshll.u32 %v20639_v40, 16  ;;  %v2089_v30 = vshrl.u32 %v20639_v40, 16  ;;  %v2094_v19 = vshll.u32 %v1614_v15, 16 }
 0x16d   : > { %v2072_v49 = vsel %vm19323_vm9, %v2065_v1, %v2070_v13  ;;  %v2080_v20 = vsel %vm19323_vm9, %v2073_v45, %v2078_v39  ;;  %v2098_v54 = vshrl.u32 %v20626_v63, 16  ;;  %v2103_v50 = vshll.u32 %v20642_v7, 16 }
 0x16e   : > { %v2106_v28 = vshrl.u32 %v20642_v7, 16  ;;  %v2088_v43 = vsel %vm19323_vm9, %v2081_v60, %v2086_v41  ;;  %v2096_v1 = vsel %vm19323_vm9, %v2089_v30, %v2094_v19  ;;  %v2111_v13 = vshll.u32 %v20646_v26, 16 }
 0x16f   : > { %v2114_v37 = vshrl.u32 %v20646_v26, 16  ;;  %v2105_v15 = vsel %vm19323_vm9, %v2098_v54, %v2103_v50  ;;  %v2119_v45 = vshll.u32 %v20657_v18, 16  ;;  %v2122_v39 = vshrl.u32 %v20657_v18, 16 }
 0x170   : > { %v2127_v27 = vshll.u32 %v20649_v32, 16  ;;  %v2113_v21 = vsel %vm19323_vm9, %v2106_v28, %v2111_v13  ;;  %v2130_v60 = vshrl.u32 %v20649_v32, 16  ;;  %v2135_v41 = vshll.u32 %v20660_v6, 16 }
 0x171   : > { %v2138_v30 = vshrl.u32 %v20660_v6, 16  ;;  %v2121_v19 = vsel %vm19323_vm9, %v2114_v37, %v2119_v45  ;;  %v2143_v50 = vshll.u32 %v20666_v10, 16  ;;  %v2146_v53 = vshrl.u32 %v20666_v10, 16 }
 0x172   : > { %v2129_v54 = vsel %vm19323_vm9, %v2122_v39, %v2127_v27  ;;  %v2137_v33 = vsel %vm19323_vm9, %v2130_v60, %v2135_v41  ;;  %v2151_v28 = vshll.u32 %v20674_v61, 16  ;;  %v2154_v13 = vshrl.u32 %v20674_v61, 16 }
 0x173   : > { %v2159_v29 = vshll.u32 %v1628_v11, 16  ;;  %v2145_v6 = vsel %vm19323_vm9, %v2138_v30, %v2143_v50  ;;  %v2857_v37 = vrot.slane %v2040_v0, %v19267_v46  ;;  %v2871_v45 = vrot.slane %v2048_v62, %v19267_v46 }
 0x174   : > { %v2885_v27 = vrot.slane %v2056_v14, %v19267_v46  ;;  %v2153_v39 = vsel %vm19323_vm9, %v2146_v53, %v2151_v28  ;;  %v2899_v41 = vrot.slane %v2064_v59, %v19267_v46  ;;  %v2913_v61 = vrot.slane %v2072_v49, %v19267_v46 }
 0x175   : > { %v2161_v60 = vsel %vm19323_vm9, %v2154_v13, %v2159_v29  ;;  %v2864_v11 = vrot.slane %v2857_v37, %v19267_v46  ;;  %v2878_v30 = vrot.slane %v2871_v45, %v19267_v46  ;;  %v2927_v62 = vrot.slane %v2080_v20, %v19267_v46 }
 0x176   : > { %v2892_v0 = vrot.slane %v2885_v27, %v19267_v46  ;;  %v2906_v14 = vrot.slane %v2899_v41, %v19267_v46  ;;  %v2920_v50 = vrot.slane %v2913_v61, %v19267_v46  ;;  %v2941_v53 = vrot.slane %v2088_v43, %v19267_v46 }
 0x177   : > { %v2955_v29 = vrot.slane %v2096_v1, %v19267_v46  ;;  %v2934_v59 = vrot.slane %v2927_v62, %v19267_v46  ;;  %v2969_v49 = vrot.slane %v2105_v15, %v19267_v46  ;;  %v2983_v28 = vrot.slane %v2113_v21, %v19267_v46 }
 0x178   : > { %v2997_v13 = vrot.slane %v2121_v19, %v19267_v46  ;;  %v2948_v37 = vrot.slane %v2941_v53, %v19267_v46  ;;  %v3011_v45 = vrot.slane %v2129_v54, %v19267_v46  ;;  %v3025_v61 = vrot.slane %v2137_v33, %v19267_v46 }
 0x179   : > { %v2962_v20 = vrot.slane %v2955_v29, %v19267_v46  ;;  %v2976_v43 = vrot.slane %v2969_v49, %v19267_v46  ;;  %v2990_v1 = vrot.slane %v2983_v28, %v19267_v46  ;;  %v3039_v15 = vrot.slane %v2145_v6, %v19267_v46 }
 0x17a   : > { %v3004_v27 = vrot.slane %v2997_v13, %v19267_v46  ;;  %v3018_v21 = vrot.slane %v3011_v45, %v19267_v46  ;;  %v3032_v19 = vrot.slane %v3025_v61, %v19267_v46  ;;  %v3053_v41 = vrot.slane %v2153_v39, %v19267_v46 }
 0x17b   : > { %v3067_v62 = vrot.slane %v2161_v60, %v19267_v46  ;;  %v3046_v54 = vrot.slane %v3039_v15, %v19267_v46  ;;  %v3123_v53 = vunpack.c.l.b16 %v2864_v11  ;;  %v3124_v33 = vunpack.c.l.b16 %v2878_v30 }
 0x17c   : > { %v3125_v29 = vunpack.c.l.b16 %v2892_v0  ;;  %v3060_v49 = vrot.slane %v3053_v41, %v19267_v46  ;;  %v3126_v13 = vunpack.c.l.b16 %v2906_v14  ;;  %v3127_v10 = vunpack.c.l.b16 %v2920_v50 }
 0x17d   : > { %v3074_v28 = vrot.slane %v3067_v62, %v19267_v46  ;;  %v3128_v6 = vunpack.c.l.b16 %v2934_v59  ;;  %v3129_v32 = vunpack.c.l.b16 %v2948_v37  ;;  %v3130_v45 = vunpack.c.l.b16 %v2962_v20 }
 0x17e   : > { %v3131_v18 = vunpack.c.l.b16 %v2976_v43  ;;  %v3132_v61 = vunpack.c.l.b16 %v2990_v1  ;;  %v3133_v26 = vunpack.c.l.b16 %v3004_v27  ;;  %v3134_v39 = vunpack.c.l.b16 %v3018_v21 }
 0x17f   : > { %v3135_v7 = vunpack.c.l.b16 %v3032_v19  ;;  %v3136_v60 = vunpack.c.l.b16 %v3046_v54  ;;  %v3137_v63 = vunpack.c.l.b16 %v3060_v49  ;;  %v3138_v15 = vunpack.c.l.b16 %v3074_v28 }
 0x180   : > { %v3230_v11 = vrot.slane %v3124_v33, 7  ;;  %v3232_v30 = vrot.slane %v3125_v29, 6  ;;  %v3234_v0 = vrot.slane %v3126_v13, 5  ;;  %v3236_v40 = vrot.slane %v3127_v10, 4 }
 0x181   : > { %v3238_v41 = vrot.slane %v3128_v6, 3  ;;  %v3240_v14 = vrot.slane %v3129_v32, 2  ;;  %v3242_v50 = vrot.slane %v3130_v45, 1  ;;  %v3244_v59 = vrot.slane %v3132_v61, 7  ;;  %v1041_v61 = vld [vmem:[#allocation2 + $0x9c] sm:$0xf] }
 0x182   : > { %v3231_v62 = vsel %vm3140_vm2, %v3230_v11, %v3123_v53  ;;  %v3246_v20 = vrot.slane %v3133_v26, 6  ;;  %v3248_v43 = vrot.slane %v3134_v39, 5  ;;  %v3250_v1 = vrot.slane %v3135_v7, 4 }
 0x183   : > { %v3233_v37 = vsel %vm3143_vm6, %v3232_v30, %v3231_v62  ;;  %v3245_v21 = vsel %vm3140_vm2, %v3244_v59, %v3131_v18  ;;  %v3252_v19 = vrot.slane %v3136_v60, 3  ;;  %v3254_v54 = vrot.slane %v3137_v63, 2  ;;  %v1045_v59 = vld [vmem:[#allocation2 + $0xa4] sm:$0x1] }
 0x184   : > { %v3235_v27 = vsel %vm3146_vm11, %v3234_v0, %v3233_v37  ;;  %v3247_v10 = vsel %vm3143_vm6, %v3246_v20, %v3245_v21  ;;  %v3256_v29 = vrot.slane %v3138_v15, 1  ;;  %v23174_v32 = vshrl.u32 %v20580_v16, 16  ;;  %v1055_v20 = vld [vmem:[#allocation2 + $0xb4] sm:$0xf] }
 0x185   : > { %v3237_v33 = vsel %vm3149_vm12, %v3236_v40, %v3235_v27  ;;  %v3249_v26 = vsel %vm3146_vm11, %v3248_v43, %v3247_v10  ;;  %v23175_v7 = vshrl.u32 %v20591_v58, 16  ;;  %v874_v13 = vshrl.u32 %v20593_v31, 16 }
 0x186   : > { %v842_v53 = vrot.slane %v23174_v32, 7  ;;  %v3239_v49 = vsel %vm3152_vm13, %v3238_v41, %v3237_v33  ;;  %v3251_v63 = vsel %vm3149_vm12, %v3250_v1, %v3249_v26  ;;  %v23176_v40 = vshll.u32 %v20580_v16, 16 }
 0x187   : > { %v850_v28 = vrot.slane %v23175_v7, 7  ;;  %v3241_v18 = vsel %vm3155_vm14, %v3240_v14, %v3239_v49  ;;  %v3253_v60 = vsel %vm3152_vm13, %v3252_v19, %v3251_v63  ;;  %v23177_v15 = vshll.u32 %v20591_v58, 16  ;;  %v1059_v19 = vld [vmem:[#allocation2 + $0xbc] sm:$0x1] }
 0x188   : > { %v845_v6 = vor.u32 %v23176_v40, %v842_v53  ;;  %v846_v45 = vrot.slane %v842_v53, 4  ;;  %v3243_v39 = vsel %vm3158_vm15, %v3242_v50, %v3241_v18  ;;  %v3255_v0 = vsel %vm3155_vm14, %v3254_v54, %v3253_v60  ;;  %v23182_v60 = vld [vmem:[#allocation5_spill] sm:$0xff] }
 0x189   : > { %v853_v11 = vor.u32 %v23177_v15, %v850_v28  ;;  %v855_v30 = vrot.slane %v850_v28, 4  ;;  %v876_v41 = vrot.slane %v874_v13, 7  ;;  %v877_v62 = vshll.u32 %v20593_v31, 16 }
 0x18a   : > { %v882_v14 = vshrl.u32 %v20595_v5, 16  ;;  %v3257_v16 = vsel %vm3158_vm15, %v3256_v29, %v3255_v0  ;;  %v885_v50 = vshll.u32 %v20595_v5, 16  ;;  %v1042_v58 = vsel %vm19333_vm10, %v845_v6, %v1041_v61  ;;  %v23184_v0 = vld [vmem:[#allocation7_spill] sm:$0xff] }
 0x18b   : > { %v854_v37 = vsel %vm19262_vm7, %v846_v45, %v853_v11  ;;  %v3261_v43 = vpack.c.b16 %v3257_v16, %v3243_v39  ;;  %v879_v1 = vor.u32 %v877_v62, %v876_v41  ;;  %v880_v27 = vrot.slane %v876_v41, 4  ;;  %1043 = vst [vmem:[#allocation2 + $0x9c] sm:$0xf] %v1042_v58  ;;  %v23181_v45 = vld [vmem:[#allocation4_spill] sm:$0xff]  ;;  %v23183_v11 = vld [vmem:[#allocation6_spill] sm:$0xff] }
 0x18c   : > { %v884_v21 = vrot.slane %v882_v14, 7  ;;  %1044 = vst [vmem:[#allocation2 + $0xa0] sm:$0xf] %v854_v37  ;;  %v1046_v31 = vsel %vm19234_vm3, %v855_v30, %v1045_v59  ;;  %v23178_v54 = vrot.slane %v19287_v55, %v19267_v46  ;;  %v23179_v5 = vrot.slane %v19306_v2, %v19267_v46 }
 0x18d   : > { %v23180_v29 = vrot.slane %v19310_v3, %v19267_v46  ;;  %18741 = vmatmul.mubr.bf16.gmra.mrb[4].mxu1 %v3261_v43  ;;  %1047 = vst [vmem:[#allocation2 + $0xa4] sm:$0x1] %v1046_v31  ;;  %v1056_v55 = vsel %vm19333_vm10, %v879_v1, %v1055_v20  ;;  %v3441_v26 = vrot.slane %v19291_v56, %v19267_v46 }
 0x18e   : > { %v20794_v33 = vrot.slane %v23178_v54, %v19267_v46  ;;  %v20800_v10 = vrot.slane %v23179_v5, %v19267_v46  ;;  %v887_v53 = vor.u32 %v885_v50, %v884_v21  ;;  %v889_v49 = vrot.slane %v884_v21, 4  ;;  %1057 = vst [vmem:[#allocation2 + $0xb4] sm:$0xf] %v1056_v55 }
 0x18f   : > { %v20806_v32 = vrot.slane %v23180_v29, %v19267_v46  ;;  %v3455_v2 = vrot.slane %v19294_v57, %v19267_v46  ;;  %v3469_v7 = vrot.slane %v19314_v4, %v19267_v46  ;;  %v3483_v3 = vrot.slane %v19320_v8, %v19267_v46 }
 0x190   : > { %v3497_v28 = vrot.slane %v19406_v25, %v19267_v46  ;;  %v888_v13 = vsel %vm19262_vm7, %v880_v27, %v887_v53  ;;  %v1060_v18 = vsel %vm19234_vm3, %v889_v49, %v1059_v19  ;;  %v20825_v56 = vrot.slane %v3441_v26, %v19267_v46 }
 0x191   : > { %v3511_v57 = vrot.slane %v19418_v34, %v19267_v46  ;;  %1058 = vst [vmem:[#allocation2 + $0xb8] sm:$0xf] %v888_v13  ;;  %1061 = vst [vmem:[#allocation2 + $0xbc] sm:$0x1] %v1060_v18  ;;  %v20830_v4 = vrot.slane %v3455_v2, %v19267_v46  ;;  %v20833_v8 = vrot.slane %v3469_v7, %v19267_v46 }
 0x192   : > { %v20836_v25 = vrot.slane %v3483_v3, %v19267_v46  ;;  %v20839_v63 = vrot.slane %v3497_v28, %v19267_v46  ;;  %v3525_v34 = vrot.slane %v19422_v35, %v19267_v46  ;;  %v3539_v6 = vrot.slane %v19437_v44, %v19267_v46  ;;  %v18116_v39 = vld.sshfl [vmem:[#allocation2 + $0x9c] sm:$0x33 pattern:$0x75316420] }
 0x193   : > { %v20842_v40 = vrot.slane %v3511_v57, %v19267_v46  ;;  %v3553_v61 = vrot.slane %v23181_v45, %v19267_v46  ;;  %v3567_v15 = vrot.slane %v23182_v60, %v19267_v46  ;;  %v3581_v30 = vrot.slane %v23183_v11, %v19267_v46  ;;  %v18117_v14 = vld.sshfl [vmem:[#allocation2 + $0xa0] sm:$0x33 pattern:$0x75316420] }
 0x194   : > { %v8395_v35 = vcombine.high %v18116_v39, %v18116_v39  ;;  %v8402_v59 = vrot.slane %v18116_v39, %v19267_v46  ;;  %v20859_v44 = vrot.slane %v3525_v34, %v19267_v46  ;;  %v20862_v16 = vrot.slane %v3539_v6, %v19267_v46  ;;  %v18118_v37 = vld.sshfl [vmem:[#allocation2 + $0xa4] sm:$0x1 pattern:$0x75316420] }
 0x195   : > { %v8419_v50 = vcombine.high %v18117_v14, %v18117_v14  ;;  %v8426_v58 = vrot.slane %v18117_v14, %v19267_v46  ;;  %v20866_v20 = vrot.slane %v3553_v61, %v19267_v46  ;;  %v20869_v43 = vrot.slane %v3567_v15, %v19267_v46  ;;  %v18119_v1 = vld.sshfl [vmem:[#allocation2 + $0xb4] sm:$0x33 pattern:$0x75316420] }
 0x196   : > { %v8409_v27 = vrot.slane %v8395_v35, %v19267_v46  ;;  %v8410_v21 = vcombine.high %v8402_v59, %v8402_v59  ;;  %v8449_v31 = vrot.slane %v18118_v37, %v19267_v46  ;;  %v8903_v19 = vshrl.u32 %v8402_v59, 16 }
 0x197   : > { %v8433_v54 = vrot.slane %v8419_v50, %v19267_v46  ;;  %v8434_v5 = vcombine.high %v8426_v58, %v8426_v58  ;;  %v8457_v29 = vcombine.high %v18119_v1, %v18119_v1  ;;  %v8464_v53 = vrot.slane %v18119_v1, %v19267_v46 }
 0x198   : > { %v18120_v49 = vld.sshfl [vmem:[#allocation2 + $0xb8] sm:$0x33 pattern:$0x75316420]  ;;  %v8411_v55 = vcombine.high %v8409_v27, %v8409_v27  ;;  %v8908_v26 = vshll.u32 %v8409_v27, 16  ;;  %v8911_v2 = vshrl.u32 %v8409_v27, 16  ;;  %v20876_v7 = vrot.slane %v3581_v30, %v19267_v46 }
 0x199   : > { %v18121_v3 = vld.sshfl [vmem:[#allocation2 + $0xbc] sm:$0x1 pattern:$0x75316420]  ;;  %v8435_v28 = vcombine.high %v8433_v54, %v8433_v54  ;;  %v8471_v13 = vrot.slane %v8457_v29, %v19267_v46  ;;  %v8472_v18 = vcombine.high %v8464_v53, %v8464_v53  ;;  %v8481_v57 = vcombine.high %v18120_v49, %v18120_v49 }
 0x19a   : > { %v8488_v34 = vrot.slane %v18120_v49, %v19267_v46  ;;  %v8511_v6 = vrot.slane %v18121_v3, %v19267_v46  ;;  %v8910_v45 = vsel %vm19323_vm9, %v8903_v19, %v8908_v26  ;;  %v8916_v61 = vshll.u32 %v8410_v21, 16 }
 0x19b   : > { %v8473_v39 = vcombine.high %v8471_v13, %v8471_v13  ;;  %v8495_v60 = vrot.slane %v8481_v57, %v19267_v46  ;;  %v8919_v15 = vshrl.u32 %v8410_v21, 16  ;;  %v8924_v11 = vshll.u32 %v8411_v55, 16 }
 0x19c   : > { %v8496_v30 = vcombine.high %v8488_v34, %v8488_v34  ;;  %v8918_v14 = vsel %vm19323_vm9, %v8911_v2, %v8916_v61  ;;  %v8927_v35 = vshrl.u32 %v8411_v55, 16  ;;  %v8932_v59 = vshll.u32 %v8426_v58, 16 }
 0x19d   : > { %v8497_v37 = vcombine.high %v8495_v60, %v8495_v60  ;;  %v8926_v50 = vsel %vm19323_vm9, %v8919_v15, %v8924_v11  ;;  %v8935_v1 = vshrl.u32 %v8426_v58, 16  ;;  %v8940_v27 = vshll.u32 %v8433_v54, 16 }
 0x19e   : > { %v8934_v19 = vsel %vm19323_vm9, %v8927_v35, %v8932_v59  ;;  %v8943_v29 = vshrl.u32 %v8433_v54, 16  ;;  %v8948_v49 = vshll.u32 %v8434_v5, 16  ;;  %v8951_v26 = vshrl.u32 %v8434_v5, 16 }
 0x19f   : > { %v8942_v21 = vsel %vm19323_vm9, %v8935_v1, %v8940_v27  ;;  %v8956_v3 = vshll.u32 %v8435_v28, 16  ;;  %v8959_v57 = vshrl.u32 %v8435_v28, 16  ;;  %v8964_v2 = vshll.u32 %v8449_v31, 16 }
 0x1a0   : > { %v8950_v55 = vsel %vm19323_vm9, %v8943_v29, %v8948_v49  ;;  %v8968_v61 = vshrl.u32 %v8464_v53, 16  ;;  %v8973_v62 = vshll.u32 %v8471_v13, 16  ;;  %v8976_v15 = vshrl.u32 %v8471_v13, 16 }
 0x1a1   : > { %v8958_v58 = vsel %vm19323_vm9, %v8951_v26, %v8956_v3  ;;  %v8966_v54 = vsel %vm19323_vm9, %v8959_v57, %v8964_v2  ;;  %v8981_v11 = vshll.u32 %v8472_v18, 16  ;;  %v8984_v5 = vshrl.u32 %v8472_v18, 16 }
 0x1a2   : > { %v8975_v35 = vsel %vm19323_vm9, %v8968_v61, %v8973_v62  ;;  %v8989_v59 = vshll.u32 %v8473_v39, 16  ;;  %v8992_v28 = vshrl.u32 %v8473_v39, 16  ;;  %v8997_v31 = vshll.u32 %v8488_v34, 16 }
 0x1a3   : > { %v8983_v1 = vsel %vm19323_vm9, %v8976_v15, %v8981_v11  ;;  %v9000_v53 = vshrl.u32 %v8488_v34, 16  ;;  %v9005_v27 = vshll.u32 %v8495_v60, 16  ;;  %v9008_v13 = vshrl.u32 %v8495_v60, 16 }
 0x1a4   : > { %v8991_v29 = vsel %vm19323_vm9, %v8984_v5, %v8989_v59  ;;  %v8999_v49 = vsel %vm19323_vm9, %v8992_v28, %v8997_v31  ;;  %v9013_v26 = vshll.u32 %v8496_v30, 16  ;;  %v9016_v18 = vshrl.u32 %v8496_v30, 16 }
 0x1a5   : > { %v9007_v62 = vsel %vm19323_vm9, %v9000_v53, %v9005_v27  ;;  %v9021_v3 = vshll.u32 %v8497_v37, 16  ;;  %v9024_v39 = vshrl.u32 %v8497_v37, 16  ;;  %v9029_v57 = vshll.u32 %v8511_v6, 16 }
 0x1a6   : > { %v9015_v2 = vsel %vm19323_vm9, %v9008_v13, %v9013_v26  ;;  %v9727_v34 = vrot.slane %v8910_v45, %v19267_v46  ;;  %v9741_v60 = vrot.slane %v8918_v14, %v19267_v46  ;;  %v9755_v61 = vrot.slane %v8926_v50, %v19267_v46 }
 0x1a7   : > { %v9023_v15 = vsel %vm19323_vm9, %v9016_v18, %v9021_v3  ;;  %v9031_v30 = vsel %vm19323_vm9, %v9024_v39, %v9029_v57  ;;  %v9769_v11 = vrot.slane %v8934_v19, %v19267_v46  ;;  %v9783_v37 = vrot.slane %v8942_v21, %v19267_v46 }
 0x1a8   : > { %v9734_v6 = vrot.slane %v9727_v34, %v19267_v46  ;;  %v9748_v5 = vrot.slane %v9741_v60, %v19267_v46  ;;  %v9762_v45 = vrot.slane %v9755_v61, %v19267_v46  ;;  %v9797_v14 = vrot.slane %v8950_v55, %v19267_v46 }
 0x1a9   : > { %v9776_v50 = vrot.slane %v9769_v11, %v19267_v46  ;;  %v9790_v59 = vrot.slane %v9783_v37, %v19267_v46  ;;  %v9811_v28 = vrot.slane %v8958_v58, %v19267_v46  ;;  %v9825_v31 = vrot.slane %v8966_v54, %v19267_v46 }
 0x1aa   : > { %v9804_v19 = vrot.slane %v9797_v14, %v19267_v46  ;;  %v9839_v21 = vrot.slane %v8975_v35, %v19267_v46  ;;  %v9853_v53 = vrot.slane %v8983_v1, %v19267_v46  ;;  %v9867_v27 = vrot.slane %v8991_v29, %v19267_v46 }
 0x1ab   : > { %v9818_v13 = vrot.slane %v9811_v28, %v19267_v46  ;;  %v9832_v55 = vrot.slane %v9825_v31, %v19267_v46  ;;  %v9881_v26 = vrot.slane %v8999_v49, %v19267_v46  ;;  %v9895_v18 = vrot.slane %v9007_v62, %v19267_v46 }
 0x1ac   : > { %v9846_v58 = vrot.slane %v9839_v21, %v19267_v46  ;;  %v9860_v54 = vrot.slane %v9853_v53, %v19267_v46  ;;  %v9874_v3 = vrot.slane %v9867_v27, %v19267_v46  ;;  %v9909_v35 = vrot.slane %v9015_v2, %v19267_v46 }
 0x1ad   : > { %v9888_v1 = vrot.slane %v9881_v26, %v19267_v46  ;;  %v9902_v29 = vrot.slane %v9895_v18, %v19267_v46  ;;  %v9923_v39 = vrot.slane %v9023_v15, %v19267_v46  ;;  %v9937_v57 = vrot.slane %v9031_v30, %v19267_v46 }
 0x1ae   : > { %v9916_v49 = vrot.slane %v9909_v35, %v19267_v46  ;;  %v9993_v34 = vunpack.c.l.b16 %v9734_v6  ;;  %v9994_v62 = vunpack.c.l.b16 %v9748_v5  ;;  %v9995_v60 = vunpack.c.l.b16 %v9762_v45 }
 0x1af   : > { %v9930_v61 = vrot.slane %v9923_v39, %v19267_v46  ;;  %v9944_v11 = vrot.slane %v9937_v57, %v19267_v46  ;;  %v9996_v37 = vunpack.c.l.b16 %v9776_v50  ;;  %v9997_v14 = vunpack.c.l.b16 %v9790_v59 }
 0x1b0   : > { %v9998_v2 = vunpack.c.l.b16 %v9804_v19  ;;  %v9999_v28 = vunpack.c.l.b16 %v9818_v13  ;;  %v10000_v31 = vunpack.c.l.b16 %v9832_v55  ;;  %v10001_v21 = vunpack.c.l.b16 %v9846_v58 }
 0x1b1   : > { %v10002_v53 = vunpack.c.l.b16 %v9860_v54  ;;  %v10003_v27 = vunpack.c.l.b16 %v9874_v3  ;;  %v10004_v15 = vunpack.c.l.b16 %v9888_v1  ;;  %v10005_v26 = vunpack.c.l.b16 %v9902_v29 }
 0x1b2   : > { %v10006_v30 = vunpack.c.l.b16 %v9916_v49  ;;  %v10007_v18 = vunpack.c.l.b16 %v9930_v61  ;;  %v10008_v35 = vunpack.c.l.b16 %v9944_v11  ;;  %v10093_v6 = vrot.slane %v9994_v62, 7 }
 0x1b3   : > { %v10095_v5 = vrot.slane %v9995_v60, 6  ;;  %v10097_v45 = vrot.slane %v9996_v37, 5  ;;  %v10099_v41 = vrot.slane %v9997_v14, 4  ;;  %v10101_v39 = vrot.slane %v9998_v2, 3 }
 0x1b4   : > { %v10094_v57 = vsel %vm3140_vm2, %v10093_v6, %v9993_v34  ;;  %v10103_v50 = vrot.slane %v9999_v28, 2  ;;  %v10105_v59 = vrot.slane %v10000_v31, 1  ;;  %v10107_v19 = vrot.slane %v10002_v53, 7 }
 0x1b5   : > { %v10096_v13 = vsel %vm3143_vm6, %v10095_v5, %v10094_v57  ;;  %v10109_v55 = vrot.slane %v10003_v27, 6  ;;  %v10111_v58 = vrot.slane %v10004_v15, 5  ;;  %v10113_v54 = vrot.slane %v10005_v26, 4 }
 0x1b6   : > { %v10098_v3 = vsel %vm3146_vm11, %v10097_v45, %v10096_v13  ;;  %v10108_v1 = vsel %vm3140_vm2, %v10107_v19, %v10001_v21  ;;  %v10115_v29 = vrot.slane %v10006_v30, 3  ;;  %v10117_v49 = vrot.slane %v10007_v18, 2 }
 0x1b7   : > { %v10100_v62 = vsel %vm3149_vm12, %v10099_v41, %v10098_v3  ;;  %v10110_v60 = vsel %vm3143_vm6, %v10109_v55, %v10108_v1  ;;  %v10119_v61 = vrot.slane %v10008_v35, 1  ;;  %v23185_v34 = vrot.slane %v23184_v0, %v19267_v46 }
 0x1b8   : > { %v10102_v37 = vsel %vm3152_vm13, %v10101_v39, %v10100_v62  ;;  %v10112_v14 = vsel %vm3146_vm11, %v10111_v58, %v10110_v60  ;;  %v4276_v2 = vunpack.c.l.b16 %v20794_v33  ;;  %v4277_v28 = vunpack.c.l.b16 %v20800_v10  ;;  %v18210_v39 = vld.sshfl [vmem:[#allocation2 + $0xc] sm:$0x32 pattern:$0x75316420] }
 0x1b9   : > { %v3602_v11 = vrot.slane %v23185_v34, %v19267_v46  ;;  %v10104_v31 = vsel %vm3155_vm14, %v10103_v50, %v10102_v37  ;;  %v10114_v41 = vsel %vm3149_vm12, %v10113_v54, %v10112_v14  ;;  %v4278_v21 = vunpack.c.l.b16 %v20806_v32  ;;  %v18212_v34 = vld.sshfl [vmem:[#allocation2 + $0x14] sm:$0x1 pattern:$0x75316420] }
 0x1ba   : > { %v4279_v53 = vunpack.c.l.b16 %v20825_v56  ;;  %v10106_v27 = vsel %vm3158_vm15, %v10105_v59, %v10104_v31  ;;  %v10116_v0 = vsel %vm3152_vm13, %v10115_v29, %v10114_v41  ;;  %v4280_v15 = vunpack.c.l.b16 %v20830_v4 }
 0x1bb   : > { %v4281_v26 = vunpack.c.l.b16 %v20833_v8  ;;  %v10118_v33 = vsel %vm3155_vm14, %v10117_v49, %v10116_v0  ;;  %v4282_v10 = vunpack.c.l.b16 %v20836_v25  ;;  %v4283_v30 = vunpack.c.l.b16 %v20839_v63 }
 0x1bc   : > { %v4284_v18 = vunpack.c.l.b16 %v20842_v40  ;;  %v10120_v32 = vsel %vm3158_vm15, %v10119_v61, %v10118_v33  ;;  %v4285_v56 = vunpack.c.l.b16 %v20859_v44  ;;  %v4286_v35 = vunpack.c.l.b16 %v20862_v16  ;;  %v18211_v40 = vld.sshfl [vmem:[#allocation2 + $0x10] sm:$0x33 pattern:$0x75316420] }
 0x1bd   : > { %v4287_v6 = vunpack.c.l.b16 %v20866_v20  ;;  %v10124_v5 = vpack.c.b16 %v10120_v32, %v10106_v27  ;;  %v4288_v4 = vunpack.c.l.b16 %v20869_v43  ;;  %v4289_v8 = vunpack.c.l.b16 %v20876_v7  ;;  %v18214_v27 = vld.sshfl [vmem:[#allocation2 + $0x28] sm:$0x33 pattern:$0x75316420] }
 0x1be   : > { %v4290_v45 = vunpack.c.l.b16 %v3602_v11  ;;  %v4339_v25 = vrot.slane %v4276_v2, 7  ;;  %v4341_v57 = vrot.slane %v4277_v28, 6  ;;  %v4343_v63 = vrot.slane %v4278_v21, 5 }
 0x1bf   : > { %v4345_v50 = vrot.slane %v4279_v53, 4  ;;  %18837 = vmatmul.mubr.bf16.gmra.mrb[4].mxu0 %v10124_v5  ;;  %v4347_v59 = vrot.slane %v4280_v15, 3  ;;  %v4349_v19 = vrot.slane %v4281_v26, 2  ;;  %v4351_v44 = vrot.slane %v4282_v10, 1 }
 0x1c0   : > { %v4353_v13 = vrot.slane %v4284_v18, 7  ;;  %v23186_v16 = vunpack.c.l.b16 %v20635_v36  ;;  %v4355_v55 = vrot.slane %v4285_v56, 6  ;;  %v4357_v43 = vrot.slane %v4286_v35, 5 }
 0x1c1   : > { %v4359_v58 = vrot.slane %v4287_v6, 4  ;;  %v4361_v3 = vrot.slane %v4288_v4, 3  ;;  %v4363_v1 = vrot.slane %v4289_v8, 2  ;;  %v4365_v62 = vrot.slane %v4290_v45, 1 }
 0x1c2   : > { %v4340_v20 = vsel %vm3140_vm2, %v4339_v25, %v23186_v16  ;;  %v4354_v54 = vsel %vm3140_vm2, %v4353_v13, %v4283_v30  ;;  %v10305_v60 = vcombine.high %v18210_v39, %v18210_v39  ;;  %v10312_v11 = vrot.slane %v18210_v39, %v19267_v46  ;;  %v18213_v28 = vld.sshfl [vmem:[#allocation2 + $0x24] sm:$0x32 pattern:$0x75316420] }
 0x1c3   : > { %v4342_v7 = vsel %vm3143_vm6, %v4341_v57, %v4340_v20  ;;  %v4356_v49 = vsel %vm3143_vm6, %v4355_v55, %v4354_v54  ;;  %v10329_v37 = vcombine.high %v18211_v40, %v18211_v40  ;;  %v10336_v41 = vrot.slane %v18211_v40, %v19267_v46  ;;  %v18215_v10 = vld.sshfl [vmem:[#allocation2 + $0x2c] sm:$0x1 pattern:$0x75316420] }
 0x1c4   : > { %v4344_v29 = vsel %vm3146_vm11, %v4343_v63, %v4342_v7  ;;  %v4358_v36 = vsel %vm3146_vm11, %v4357_v43, %v4356_v49  ;;  %v10319_v31 = vrot.slane %v10305_v60, %v19267_v46  ;;  %v10320_v0 = vcombine.high %v10312_v11, %v10312_v11 }
 0x1c5   : > { %v4346_v61 = vsel %vm3149_vm12, %v4345_v50, %v4344_v29  ;;  %v4360_v2 = vsel %vm3149_vm12, %v4359_v58, %v4358_v36  ;;  %v10343_v15 = vrot.slane %v10329_v37, %v19267_v46  ;;  %v10344_v18 = vcombine.high %v10336_v41, %v10336_v41 }
 0x1c6   : > { %v4348_v14 = vsel %vm3152_vm13, %v4347_v59, %v4346_v61  ;;  %v4362_v53 = vsel %vm3152_vm13, %v4361_v3, %v4360_v2  ;;  %v10321_v30 = vcombine.high %v10319_v31, %v10319_v31  ;;  %v10359_v35 = vrot.slane %v18212_v34, %v19267_v46 }
 0x1c7   : > { %v4350_v21 = vsel %vm3155_vm14, %v4349_v19, %v4348_v14  ;;  %v4364_v33 = vsel %vm3155_vm14, %v4363_v1, %v4362_v53  ;;  %v10345_v56 = vcombine.high %v10343_v15, %v10343_v15  ;;  %v10367_v6 = vcombine.high %v18213_v28, %v18213_v28 }
 0x1c8   : > { %v4352_v26 = vsel %vm3158_vm15, %v4351_v44, %v4350_v21  ;;  %v4366_v32 = vsel %vm3158_vm15, %v4365_v62, %v4364_v33  ;;  %v10374_v4 = vrot.slane %v18213_v28, %v19267_v46  ;;  %v10391_v8 = vcombine.high %v18214_v27, %v18214_v27 }
 0x1c9   : > { %v4451_v5 = vpack.c.b16 %v4366_v32, %v4352_v26  ;;  %v10398_v45 = vrot.slane %v18214_v27, %v19267_v46  ;;  %v10381_v39 = vrot.slane %v10367_v6, %v19267_v46  ;;  %v10421_v25 = vrot.slane %v18215_v10, %v19267_v46 }
 0x1ca   : > { %v10817_v57 = vrot.slane %v10319_v31, %v19267_v46  ;;  %v10831_v63 = vrot.slane %v10320_v0, %v19267_v46  ;;  %v10382_v50 = vcombine.high %v10374_v4, %v10374_v4  ;;  %v10405_v40 = vrot.slane %v10391_v8, %v19267_v46 }
 0x1cb   : > { %18760 = vmatprep.mubr.bf16.mxu1 %v4451_v5  ;;  %v10406_v59 = vcombine.high %v10398_v45, %v10398_v45  ;;  %v10845_v19 = vrot.slane %v10321_v30, %v19267_v46  ;;  %v10383_v44 = vcombine.high %v10381_v39, %v10381_v39  ;;  %v10859_v20 = vrot.slane %v10336_v41, %v19267_v46 }
 0x1cc   : > { %v10824_v13 = vrot.slane %v10817_v57, %v19267_v46  ;;  %v10838_v16 = vrot.slane %v10831_v63, %v19267_v46  ;;  %v10407_v55 = vcombine.high %v10405_v40, %v10405_v40  ;;  %v10873_v58 = vrot.slane %v10343_v15, %v19267_v46 }
 0x1cd   : > { %v10852_v43 = vrot.slane %v10845_v19, %v19267_v46  ;;  %v10887_v7 = vrot.slane %v10344_v18, %v19267_v46  ;;  %v10866_v54 = vrot.slane %v10859_v20, %v19267_v46  ;;  %v10901_v3 = vrot.slane %v10345_v56, %v19267_v46 }
 0x1ce   : > { %v10915_v1 = vrot.slane %v10359_v35, %v19267_v46  ;;  %v10929_v29 = vrot.slane %v10381_v39, %v19267_v46  ;;  %v10880_v49 = vrot.slane %v10873_v58, %v19267_v46  ;;  %v10943_v60 = vrot.slane %v10382_v50, %v19267_v46 }
 0x1cf   : > { %v10894_v62 = vrot.slane %v10887_v7, %v19267_v46  ;;  %v10957_v61 = vrot.slane %v10383_v44, %v19267_v46  ;;  %v10908_v36 = vrot.slane %v10901_v3, %v19267_v46  ;;  %v10971_v37 = vrot.slane %v10398_v45, %v19267_v46 }
 0x1d0   : > { %v10922_v34 = vrot.slane %v10915_v1, %v19267_v46  ;;  %v10936_v11 = vrot.slane %v10929_v29, %v19267_v46  ;;  %v10950_v14 = vrot.slane %v10943_v60, %v19267_v46  ;;  %v10985_v28 = vrot.slane %v10405_v40, %v19267_v46 }
 0x1d1   : > { %v10964_v2 = vrot.slane %v10957_v61, %v19267_v46  ;;  %v10999_v31 = vrot.slane %v10406_v59, %v19267_v46  ;;  %v10978_v41 = vrot.slane %v10971_v37, %v19267_v46  ;;  %v11013_v21 = vrot.slane %v10407_v55, %v19267_v46  ;;  %v23187_v37 = vld [vmem:[#allocation12_spill] sm:$0xff] }
 0x1d2   : > { %v11027_v53 = vrot.slane %v10421_v25, %v19267_v46  ;;  %v11707_v27 = vunpack.c.l.b16 %v10824_v13  ;;  %v10992_v0 = vrot.slane %v10985_v28, %v19267_v46  ;;  %v11708_v26 = vunpack.c.l.b16 %v10838_v16 }
 0x1d3   : > { %v11006_v15 = vrot.slane %v10999_v31, %v19267_v46  ;;  %v11709_v33 = vunpack.c.l.b16 %v10852_v43  ;;  %v11020_v10 = vrot.slane %v11013_v21, %v19267_v46  ;;  %v11710_v18 = vunpack.c.l.b16 %v10866_v54 }
 0x1d4   : > { %v11034_v30 = vrot.slane %v11027_v53, %v19267_v46  ;;  %v11711_v32 = vunpack.c.l.b16 %v10880_v49  ;;  %v11712_v56 = vunpack.c.l.b16 %v10894_v62  ;;  %v11713_v35 = vunpack.c.l.b16 %v10908_v36  ;;  %v23189_v53 = vld [vmem:[#allocation18_spill] sm:$0xff] }
 0x1d5   : > { %v11714_v6 = vunpack.c.l.b16 %v10922_v34  ;;  %v11715_v5 = vunpack.c.l.b16 %v10936_v11  ;;  %v11716_v4 = vunpack.c.l.b16 %v10950_v14  ;;  %v11717_v8 = vunpack.c.l.b16 %v10964_v2  ;;  %v23188_v2 = vld [vmem:[#allocation13_spill] sm:$0xff] }
 0x1d6   : > { %v11718_v45 = vunpack.c.l.b16 %v10978_v41  ;;  %v11719_v39 = vunpack.c.l.b16 %v10992_v0  ;;  %v11720_v25 = vunpack.c.l.b16 %v11006_v15  ;;  %v11721_v57 = vunpack.c.l.b16 %v11020_v10 }
 0x1d7   : > { %v11722_v63 = vunpack.c.l.b16 %v11034_v30  ;;  %v11771_v50 = vrot.slane %v11708_v26, 7  ;;  %v11773_v40 = vrot.slane %v11709_v33, 6  ;;  %v11775_v59 = vrot.slane %v11710_v18, 5  ;;  %v23190_v30 = vld [vmem:[#allocation8_spill] sm:$0xff] }
 0x1d8   : > { %v11777_v19 = vrot.slane %v11711_v32, 4  ;;  %v11779_v44 = vrot.slane %v11712_v56, 3  ;;  %v11781_v16 = vrot.slane %v11713_v35, 2  ;;  %v11783_v20 = vrot.slane %v11714_v6, 1  ;;  %v23191_v32 = vld [vmem:[#allocation9_spill] sm:$0xff]  ;;  %v23192_v6 = vld [vmem:[#allocation10_spill] sm:$0xff] }
 0x1d9   : > { %v11772_v13 = vsel %vm3140_vm2, %v11771_v50, %v11707_v27  ;;  %v11785_v55 = vrot.slane %v11716_v4, 7  ;;  %v11787_v58 = vrot.slane %v11717_v8, 6  ;;  %v11789_v7 = vrot.slane %v11718_v45, 5  ;;  %v23193_v4 = vld [vmem:[#allocation14_spill] sm:$0xff]  ;;  %v23194_v45 = vld [vmem:[#allocation11_spill] sm:$0xff] }
 0x1da   : > { %v11774_v43 = vsel %vm3143_vm6, %v11773_v40, %v11772_v13  ;;  %v11791_v54 = vrot.slane %v11719_v39, 4  ;;  %v11793_v29 = vrot.slane %v11720_v25, 3  ;;  %v11795_v49 = vrot.slane %v11721_v57, 2  ;;  %v23195_v50 = vld [vmem:[#allocation15_spill] sm:$0xff]  ;;  %v23196_v13 = vld [vmem:[#allocation16_spill] sm:$0xff] }
 0x1db   : > { %v11776_v3 = vsel %vm3146_vm11, %v11775_v59, %v11774_v43  ;;  %v11786_v1 = vsel %vm3140_vm2, %v11785_v55, %v11715_v5  ;;  %v11797_v61 = vrot.slane %v11722_v63, 1  ;;  %v3609_v36 = vrot.slane %v19767_v24, %v19267_v46  ;;  %v23197_v55 = vld [vmem:[#allocation19_spill] sm:$0xff] }
 0x1dc   : > { %v11778_v62 = vsel %vm3149_vm12, %v11777_v19, %v11776_v3  ;;  %v11788_v60 = vsel %vm3143_vm6, %v11787_v58, %v11786_v1  ;;  %v3623_v14 = vrot.slane %v23187_v37, %v19267_v46  ;;  %v3637_v28 = vrot.slane %v23188_v2, %v19267_v46  ;;  %v23198_v58 = vld [vmem:[#allocation17_spill] sm:$0xff] }
 0x1dd   : > { %v11780_v34 = vsel %vm3152_vm13, %v11779_v44, %v11778_v62  ;;  %v11790_v11 = vsel %vm3146_vm11, %v11789_v7, %v11788_v60  ;;  %v21053_v21 = vrot.slane %v3609_v36, %v19267_v46  ;;  %v3651_v24 = vrot.slane %v23189_v53, %v19267_v46  ;;  %v23201_v62 = vld [vmem:[#allocation22_spill] sm:$0xff] }
 0x1de   : > { %v11782_v31 = vsel %vm3155_vm14, %v11781_v16, %v11780_v34  ;;  %v11792_v41 = vsel %vm3149_vm12, %v11791_v54, %v11790_v11  ;;  %v3630_v15 = vrot.slane %v3623_v14, %v19267_v46  ;;  %v3644_v26 = vrot.slane %v3637_v28, %v19267_v46  ;;  %v23199_v54 = vld [vmem:[#allocation20_spill] sm:$0xff] }
 0x1df   : > { %v11784_v27 = vsel %vm3158_vm15, %v11783_v20, %v11782_v31  ;;  %v11794_v0 = vsel %vm3152_vm13, %v11793_v29, %v11792_v41  ;;  %v3658_v10 = vrot.slane %v3651_v24, %v19267_v46  ;;  %v3665_v18 = vrot.slane %v23190_v30, %v19267_v46  ;;  %v23200_v29 = vld [vmem:[#allocation21_spill] sm:$0xff] }
 0x1e0   : > { %v11796_v33 = vsel %vm3155_vm14, %v11795_v49, %v11794_v0  ;;  %v3679_v56 = vrot.slane %v23191_v32, %v19267_v46  ;;  %v3693_v5 = vrot.slane %v23192_v6, %v19267_v46  ;;  %v3707_v8 = vrot.slane %v23193_v4, %v19267_v46  ;;  %v18216_v6 = vld.sshfl [vmem:[#allocation2 + $0x3c] sm:$0x32 pattern:$0x75316420] }
 0x1e1   : > { %v11798_v35 = vsel %vm3158_vm15, %v11797_v61, %v11796_v33  ;;  %v3721_v39 = vrot.slane %v23194_v45, %v19267_v46  ;;  %v3672_v57 = vrot.slane %v3665_v18, %v19267_v46  ;;  %v3735_v40 = vrot.slane %v23195_v50, %v19267_v46  ;;  %v18217_v45 = vld.sshfl [vmem:[#allocation2 + $0x40] sm:$0x33 pattern:$0x75316420] }
 0x1e2   : > { %v11883_v25 = vpack.c.b16 %v11798_v35, %v11784_v27  ;;  %v3686_v63 = vrot.slane %v3679_v56, %v19267_v46  ;;  %v3700_v59 = vrot.slane %v3693_v5, %v19267_v46  ;;  %v3714_v19 = vrot.slane %v3707_v8, %v19267_v46 }
 0x1e3   : > { %v3728_v44 = vrot.slane %v3721_v39, %v19267_v46  ;;  %v3749_v16 = vrot.slane %v23196_v13, %v19267_v46  ;;  %v3742_v20 = vrot.slane %v3735_v40, %v19267_v46  ;;  %v3763_v43 = vrot.slane %v23197_v55, %v19267_v46 }
 0x1e4   : > { %18856 = vmatprep.mubr.bf16.mxu0 %v11883_v25  ;;  %v3777_v7 = vrot.slane %v23198_v58, %v19267_v46  ;;  %v3791_v3 = vrot.slane %v23199_v54, %v19267_v46  ;;  %v3805_v49 = vrot.slane %v23200_v29, %v19267_v46  ;;  %v3819_v60 = vrot.slane %v23201_v62, %v19267_v46  ;;  %v18218_v54 = vld.sshfl [vmem:[#allocation2 + $0x44] sm:$0x1 pattern:$0x75316420] }
 0x1e5   : > { %v3756_v1 = vrot.slane %v3749_v16, %v19267_v46  ;;  %v4291_v61 = vunpack.c.l.b16 %v21053_v21  ;;  %v3770_v36 = vrot.slane %v3763_v43, %v19267_v46  ;;  %v4292_v37 = vunpack.c.l.b16 %v3630_v15  ;;  %v18219_v62 = vld.sshfl [vmem:[#allocation2 + $0x54] sm:$0x32 pattern:$0x75316420] }
 0x1e6   : > { %v3784_v34 = vrot.slane %v3777_v7, %v19267_v46  ;;  %v3798_v11 = vrot.slane %v3791_v3, %v19267_v46  ;;  %v3812_v14 = vrot.slane %v3805_v49, %v19267_v46  ;;  %v3826_v2 = vrot.slane %v3819_v60, %v19267_v46 }
 0x1e7   : > { %v4293_v28 = vunpack.c.l.b16 %v3644_v26  ;;  %v4294_v31 = vunpack.c.l.b16 %v3658_v10  ;;  %v4295_v41 = vunpack.c.l.b16 %v3672_v57  ;;  %v4296_v53 = vunpack.c.l.b16 %v3686_v63 }
 0x1e8   : > { %v4297_v24 = vunpack.c.l.b16 %v3700_v59  ;;  %v4298_v27 = vunpack.c.l.b16 %v3714_v19  ;;  %v4299_v0 = vunpack.c.l.b16 %v3728_v44  ;;  %v4300_v33 = vunpack.c.l.b16 %v3742_v20 }
 0x1e9   : > { %v4301_v21 = vunpack.c.l.b16 %v3756_v1  ;;  %v4302_v30 = vunpack.c.l.b16 %v3770_v36  ;;  %v4303_v18 = vunpack.c.l.b16 %v3784_v34  ;;  %v4304_v32 = vunpack.c.l.b16 %v3798_v11  ;;  %v18220_v11 = vld.sshfl [vmem:[#allocation2 + $0x58] sm:$0x33 pattern:$0x75316420] }
 0x1ea   : > { %v4305_v56 = vunpack.c.l.b16 %v3812_v14  ;;  %v4306_v35 = vunpack.c.l.b16 %v3826_v2  ;;  %v4367_v15 = vrot.slane %v4292_v37, 7  ;;  %v4369_v5 = vrot.slane %v4293_v28, 6 }
 0x1eb   : > { %v4371_v4 = vrot.slane %v4294_v31, 5  ;;  %v4373_v8 = vrot.slane %v4295_v41, 4  ;;  %v4375_v26 = vrot.slane %v4296_v53, 3  ;;  %v4377_v10 = vrot.slane %v4297_v24, 2 }
 0x1ec   : > { %v4379_v39 = vrot.slane %v4298_v27, 1  ;;  %v4381_v25 = vrot.slane %v4300_v33, 7  ;;  %v4368_v57 = vsel %vm3140_vm2, %v4367_v15, %v4291_v61  ;;  %v4383_v63 = vrot.slane %v4301_v21, 6 }
 0x1ed   : > { %v4385_v50 = vrot.slane %v4302_v30, 5  ;;  %v4387_v40 = vrot.slane %v4303_v18, 4  ;;  %v4370_v59 = vsel %vm3143_vm6, %v4369_v5, %v4368_v57  ;;  %v4389_v44 = vrot.slane %v4304_v32, 3 }
 0x1ee   : > { %v4382_v19 = vsel %vm3140_vm2, %v4381_v25, %v4299_v0  ;;  %v4391_v13 = vrot.slane %v4305_v56, 2  ;;  %v4372_v16 = vsel %vm3146_vm11, %v4371_v4, %v4370_v59  ;;  %v4393_v55 = vrot.slane %v4306_v35, 1  ;;  %v18221_v31 = vld.sshfl [vmem:[#allocation2 + $0x5c] sm:$0x1 pattern:$0x75316420] }
 0x1ef   : > { %v4384_v20 = vsel %vm3143_vm6, %v4383_v63, %v4382_v19  ;;  %v10429_v43 = vcombine.high %v18216_v6, %v18216_v6  ;;  %v4374_v58 = vsel %vm3149_vm12, %v4373_v8, %v4372_v16  ;;  %v10436_v3 = vrot.slane %v18216_v6, %v19267_v46  ;;  %v19061_v56 = vld [vmem:[%s23042_s3 + $0x88] sm:$0xff]  }
 0x1f0   : > { %v4386_v7 = vsel %vm3146_vm11, %v4385_v50, %v4384_v20  ;;  %v10453_v1 = vcombine.high %v18217_v45, %v18217_v45  ;;  %v4376_v29 = vsel %vm3152_vm13, %v4375_v26, %v4374_v58  ;;  %v10460_v61 = vrot.slane %v18217_v45, %v19267_v46 }
 0x1f1   : > { %v4388_v49 = vsel %vm3149_vm12, %v4387_v40, %v4386_v7  ;;  %v10443_v60 = vrot.slane %v10429_v43, %v19267_v46  ;;  %v4378_v36 = vsel %vm3155_vm14, %v4377_v10, %v4376_v29  ;;  %v10444_v37 = vcombine.high %v10436_v3, %v10436_v3  ;;  %v19105_v10 = vld [vmem:[%s23042_s3 + $0x80] sm:$0xff]  }
 0x1f2   : > { %v4390_v34 = vsel %vm3152_vm13, %v4389_v44, %v4388_v49  ;;  %v10467_v14 = vrot.slane %v10453_v1, %v19267_v46  ;;  %v4380_v2 = vsel %vm3158_vm15, %v4379_v39, %v4378_v36  ;;  %v10468_v53 = vcombine.high %v10460_v61, %v10460_v61  ;;  %v19063_v44 = vld [vmem:[%s23042_s3 + $0x90] sm:$0xff]  }
 0x1f3   : > { %v4392_v28 = vsel %vm3155_vm14, %v4391_v13, %v4390_v34  ;;  %v10445_v41 = vcombine.high %v10443_v60, %v10443_v60  ;;  %v10483_v0 = vrot.slane %v18218_v54, %v19267_v46  ;;  %v10491_v33 = vcombine.high %v18219_v62, %v18219_v62  ;;  %v19065_v34 = vld [vmem:[%s23042_s3 + $0x98] sm:$0xff]  }
 0x1f4   : > { %v4394_v24 = vsel %vm3158_vm15, %v4393_v55, %v4392_v28  ;;  %v10469_v27 = vcombine.high %v10467_v14, %v10467_v14  ;;  %v10498_v30 = vrot.slane %v18219_v62, %v19267_v46  ;;  %v10515_v18 = vcombine.high %v18220_v11, %v18220_v11 }
 0x1f5   : > { %v4452_v21 = vpack.c.b16 %v4394_v24, %v4380_v2  ;;  %v10522_v32 = vrot.slane %v18220_v11, %v19267_v46  ;;  %v10505_v35 = vrot.slane %v10491_v33, %v19267_v46  ;;  %v10545_v6 = vrot.slane %v18221_v31, %v19267_v46 }
 0x1f6   : > { %v11041_v15 = vrot.slane %v10443_v60, %v19267_v46  ;;  %v11055_v5 = vrot.slane %v10444_v37, %v19267_v46  ;;  %v10506_v4 = vcombine.high %v10498_v30, %v10498_v30  ;;  %v10529_v8 = vrot.slane %v10515_v18, %v19267_v46 }
 0x1f7   : > { %18761 = vmatmul.mubr.bf16.vlgmr.msra.gmra.mrb[0].mxu1 %v4452_v21  ;;  %v10530_v45 = vcombine.high %v10522_v32, %v10522_v32  ;;  %v11069_v26 = vrot.slane %v10445_v41, %v19267_v46  ;;  %v10507_v39 = vcombine.high %v10505_v35, %v10505_v35  ;;  %v11083_v63 = vrot.slane %v10460_v61, %v19267_v46 }
 0x1f8   : > { %18769 = vmatpush3.bf16.msra.mxu1 %v19105_v10  ;;  %v11048_v25 = vrot.slane %v11041_v15, %v19267_v46  ;;  %v11062_v57 = vrot.slane %v11055_v5, %v19267_v46  ;;  %v10531_v50 = vcombine.high %v10529_v8, %v10529_v8  ;;  %v11097_v59 = vrot.slane %v10467_v14, %v19267_v46 }
 0x1f9   : > { %v11076_v40 = vrot.slane %v11069_v26, %v19267_v46  ;;  %v11111_v19 = vrot.slane %v10468_v53, %v19267_v46  ;;  %18770 = vmatprep.subr.bf16.mxu1 %v19061_v56  ;;  %v11090_v13 = vrot.slane %v11083_v63, %v19267_v46  ;;  %v11125_v16 = vrot.slane %v10469_v27, %v19267_v46 }
 0x1fa   : > { %v11139_v20 = vrot.slane %v10483_v0, %v19267_v46  ;;  %v11153_v55 = vrot.slane %v10505_v35, %v19267_v46  ;;  %v11104_v43 = vrot.slane %v11097_v59, %v19267_v46  ;;  %v11167_v7 = vrot.slane %v10506_v4, %v19267_v46 }
 0x1fb   : > { %v11118_v58 = vrot.slane %v11111_v19, %v19267_v46  ;;  %v11181_v54 = vrot.slane %v10507_v39, %v19267_v46  ;;  %v11132_v3 = vrot.slane %v11125_v16, %v19267_v46  ;;  %v11195_v49 = vrot.slane %v10522_v32, %v19267_v46  ;;  %v19069_v19 = vld [vmem:[%s23042_s3 + $0xa8] sm:$0xff]  }
 0x1fc   : > { %v11146_v1 = vrot.slane %v11139_v20, %v19267_v46  ;;  %v11160_v29 = vrot.slane %v11153_v55, %v19267_v46  ;;  %18771 = vmatpush3.bf16.msra.mxu1 %v19061_v56  ;;  %v11174_v62 = vrot.slane %v11167_v7, %v19267_v46  ;;  %v11209_v61 = vrot.slane %v10529_v8, %v19267_v46  ;;  %v19067_v56 = vld [vmem:[%s23042_s3 + $0xa0] sm:$0xff]  }
 0x1fd   : > { %v11188_v60 = vrot.slane %v11181_v54, %v19267_v46  ;;  %v11223_v36 = vrot.slane %v10530_v45, %v19267_v46  ;;  %18772 = vmatprep.subr.bf16.mxu1 %v19063_v44  ;;  %v11202_v11 = vrot.slane %v11195_v49, %v19267_v46  ;;  %v11237_v37 = vrot.slane %v10531_v50, %v19267_v46 }
 0x1fe   : > { %v11251_v14 = vrot.slane %v10545_v6, %v19267_v46  ;;  %v11723_v2 = vunpack.c.l.b16 %v11048_v25  ;;  %v11216_v28 = vrot.slane %v11209_v61, %v19267_v46  ;;  %v11724_v41 = vunpack.c.l.b16 %v11062_v57  ;;  %v23203_v61 = vld [vmem:[#allocation25_spill] sm:$0xff] }
 0x1ff   : > { %v11230_v31 = vrot.slane %v11223_v36, %v19267_v46  ;;  %v11725_v53 = vunpack.c.l.b16 %v11076_v40  ;;  %v11244_v24 = vrot.slane %v11237_v37, %v19267_v46  ;;  %v11726_v0 = vunpack.c.l.b16 %v11090_v13  ;;  %v19071_v37 = vld [vmem:[%s23042_s3 + $0xb0] sm:$0xff]  }
 0x200   : > { %v11258_v27 = vrot.slane %v11251_v14, %v19267_v46  ;;  %v11727_v33 = vunpack.c.l.b16 %v11104_v43  ;;  %18773 = vmatpush3.bf16.msra.mxu1 %v19063_v44  ;;  %v11728_v21 = vunpack.c.l.b16 %v11118_v58  ;;  %v11729_v30 = vunpack.c.l.b16 %v11132_v3 }
 0x201   : > { %v11730_v18 = vunpack.c.l.b16 %v11146_v1  ;;  %v11731_v32 = vunpack.c.l.b16 %v11160_v29  ;;  %18774 = vmatprep.subr.bf16.mxu1 %v19065_v34  ;;  %v11732_v35 = vunpack.c.l.b16 %v11174_v62  ;;  %v11733_v6 = vunpack.c.l.b16 %v11188_v60  ;;  %v23202_v29 = vld [vmem:[#allocation23_spill] sm:$0xff] }
 0x202   : > { %v11734_v15 = vunpack.c.l.b16 %v11202_v11  ;;  %v11735_v5 = vunpack.c.l.b16 %v11216_v28  ;;  %v11736_v4 = vunpack.c.l.b16 %v11230_v31  ;;  %v11737_v8 = vunpack.c.l.b16 %v11244_v24  ;;  %v23205_v31 = vld [vmem:[#allocation30_spill] sm:$0xff] }
 0x203   : > { %v11738_v45 = vunpack.c.l.b16 %v11258_v27  ;;  %v11799_v26 = vrot.slane %v11724_v41, 7  ;;  %v11801_v10 = vrot.slane %v11725_v53, 6  ;;  %v11803_v39 = vrot.slane %v11726_v0, 5 }
 0x204   : > { %v11805_v25 = vrot.slane %v11727_v33, 4  ;;  %v11807_v57 = vrot.slane %v11728_v21, 3  ;;  %18775 = vmatpush3.bf16.msra.mxu1 %v19065_v34  ;;  %v11809_v50 = vrot.slane %v11729_v30, 2  ;;  %v11811_v40 = vrot.slane %v11730_v18, 1  ;;  %v23204_v34 = vld [vmem:[#allocation26_spill] sm:$0xff]  ;;  %v23206_v30 = vld [vmem:[#allocation24_spill] sm:$0xff] }
 0x205   : > { %v11800_v63 = vsel %vm3140_vm2, %v11799_v26, %v11723_v2  ;;  %v11813_v59 = vrot.slane %v11732_v35, 7  ;;  %18776 = vmatprep.subr.bf16.mxu1 %v19067_v56  ;;  %v11815_v13 = vrot.slane %v11733_v6, 6  ;;  %v11817_v16 = vrot.slane %v11734_v15, 5  ;;  %v23208_v6 = vld [vmem:[#allocation28_spill] sm:$0xff] }
 0x206   : > { %v11802_v44 = vsel %vm3143_vm6, %v11801_v10, %v11800_v63  ;;  %v11819_v20 = vrot.slane %v11735_v5, 4  ;;  %v11821_v58 = vrot.slane %v11736_v4, 3  ;;  %v11823_v7 = vrot.slane %v11737_v8, 2  ;;  %v23209_v5 = vld [vmem:[#allocation31_spill] sm:$0xff]  ;;  %v23210_v8 = vld [vmem:[#allocation29_spill] sm:$0xff] }
 0x207   : > { %v11804_v55 = vsel %vm3146_vm11, %v11803_v39, %v11802_v44  ;;  %v11814_v43 = vsel %vm3140_vm2, %v11813_v59, %v11731_v32  ;;  %v11825_v1 = vrot.slane %v11738_v45, 1  ;;  %v3833_v49 = vrot.slane %v23202_v29, %v19267_v46  ;;  %v23207_v32 = vld [vmem:[#allocation27_spill] sm:$0xff]  ;;  %v19062_v10 = vld [vmem:[%s23042_s3 + $0x188] sm:$0xff]  }
 0x208   : > { %v11806_v54 = vsel %vm3149_vm12, %v11805_v25, %v11804_v55  ;;  %v11816_v3 = vsel %vm3143_vm6, %v11815_v13, %v11814_v43  ;;  %18777 = vmatpush3.bf16.msra.mxu1 %v19067_v56  ;;  %v3847_v36 = vrot.slane %v23203_v61, %v19267_v46  ;;  %v3861_v11 = vrot.slane %v23204_v34, %v19267_v46  ;;  %v23212_v44 = vld [vmem:[#allocation33_spill] sm:$0xff]  ;;  %v23214_v43 = vld [vmem:[#allocation34_spill] sm:$0xff] }
 0x209   : > { %v11808_v62 = vsel %vm3152_vm13, %v11807_v57, %v11806_v54  ;;  %v11818_v60 = vsel %vm3146_vm11, %v11817_v16, %v11816_v3  ;;  %18778 = vmatprep.subr.bf16.mxu1 %v19069_v19  ;;  %v21195_v28 = vrot.slane %v3833_v49, %v19267_v46  ;;  %v3875_v41 = vrot.slane %v23205_v31, %v19267_v46  ;;  %v23211_v57 = vld [vmem:[#allocation32_spill] sm:$0xff]  ;;  %v23216_v29 = vld [vmem:[#allocation37_spill] sm:$0xff] }
 0x20a   : > { %v11810_v14 = vsel %vm3155_vm14, %v11809_v50, %v11808_v62  ;;  %v11820_v2 = vsel %vm3149_vm12, %v11819_v20, %v11818_v60  ;;  %v21202_v27 = vrot.slane %v3847_v36, %v19267_v46  ;;  %v21205_v0 = vrot.slane %v3861_v11, %v19267_v46  ;;  %v19073_v50 = vld [vmem:[%s23042_s3 + $0xb8] sm:$0xff]   ;;  %v19106_v3 = vld [vmem:[%s23042_s3 + $0x180] sm:$0xff]   ;;  %v23217_v62 = vld [vmem:[#allocation38_spill] sm:$0xff] }
 0x20b   : > { %v11812_v53 = vsel %vm3158_vm15, %v11811_v40, %v11810_v14  ;;  %v11822_v24 = vsel %vm3152_vm13, %v11821_v58, %v11820_v2  ;;  %v3882_v21 = vrot.slane %v3875_v41, %v19267_v46  ;;  %v3889_v18 = vrot.slane %v23206_v30, %v19267_v46  ;;  %v23213_v20 = vld [vmem:[#allocation35_spill] sm:$0xff]  ;;  %v19064_v36 = vld [vmem:[%s23042_s3 + $0x190] sm:$0xff]   ;;  %v19075_v31 = vld [vmem:[%s23042_s3 + $0xc0] sm:$0xff]  }
 0x20c   : > { %v11824_v33 = vsel %vm3155_vm14, %v11823_v7, %v11822_v24  ;;  %18779 = vmatpush3.bf16.msra.mxu1 %v19069_v19  ;;  %v3903_v56 = vrot.slane %v23207_v32, %v19267_v46  ;;  %v3917_v15 = vrot.slane %v23208_v6, %v19267_v46  ;;  %v3931_v4 = vrot.slane %v23209_v5, %v19267_v46  ;;  %v23215_v7 = vld [vmem:[#allocation36_spill] sm:$0xff]  ;;  %v19066_v6 = vld [vmem:[%s23042_s3 + $0x198] sm:$0xff]  }
 0x20d   : > { %v11826_v35 = vsel %vm3158_vm15, %v11825_v1, %v11824_v33  ;;  %v3945_v45 = vrot.slane %v23210_v8, %v19267_v46  ;;  %18780 = vmatprep.subr.bf16.mxu1 %v19071_v37  ;;  %v3896_v39 = vrot.slane %v3889_v18, %v19267_v46  ;;  %v3959_v63 = vrot.slane %v23211_v57, %v19267_v46 }
 0x20e   : > { %v11884_v26 = vpack.c.b16 %v11826_v35, %v11812_v53  ;;  %v3910_v25 = vrot.slane %v3903_v56, %v19267_v46  ;;  %v3924_v40 = vrot.slane %v3917_v15, %v19267_v46  ;;  %v3938_v59 = vrot.slane %v3931_v4, %v19267_v46  ;;  %v18222_v4 = vld.sshfl [vmem:[#allocation2 + $0x6c] sm:$0x32 pattern:$0x75316420] }
 0x20f   : > { %v21233_v19 = vrot.slane %v3945_v45, %v19267_v46  ;;  %v3973_v13 = vrot.slane %v23212_v44, %v19267_v46  ;;  %v3966_v16 = vrot.slane %v3959_v63, %v19267_v46  ;;  %v3987_v55 = vrot.slane %v23213_v20, %v19267_v46 }
 0x210   : > { %18857 = vmatmul.mubr.bf16.vlgmr.msra.gmra.mrb[0].mxu0 %v11884_v26  ;;  %v4001_v58 = vrot.slane %v23214_v43, %v19267_v46  ;;  %v4015_v54 = vrot.slane %v23215_v7, %v19267_v46  ;;  %v4029_v49 = vrot.slane %v23216_v29, %v19267_v46  ;;  %v4043_v60 = vrot.slane %v23217_v62, %v19267_v46 }
 0x211   : > { %18865 = vmatpush3.bf16.msra.mxu0 %v19106_v3  ;;  %v3980_v1 = vrot.slane %v3973_v13, %v19267_v46  ;;  %v4307_v61 = vunpack.c.l.b16 %v21195_v28  ;;  %18781 = vmatpush3.bf16.msra.mxu1 %v19071_v37  ;;  %v3994_v34 = vrot.slane %v3987_v55, %v19267_v46  ;;  %v4308_v2 = vunpack.c.l.b16 %v21202_v27  ;;  %v19068_v13 = vld [vmem:[%s23042_s3 + $0x1a0] sm:$0xff]  }
 0x212   : > { %18866 = vmatprep.subr.bf16.mxu0 %v19062_v10  ;;  %v4008_v11 = vrot.slane %v4001_v58, %v19267_v46  ;;  %v4022_v14 = vrot.slane %v4015_v54, %v19267_v46  ;;  %18782 = vmatprep.subr.bf16.mxu1 %v19073_v50  ;;  %v4036_v37 = vrot.slane %v4029_v49, %v19267_v46  ;;  %v4309_v41 = vunpack.c.l.b16 %v21205_v0  ;;  %v18225_v49 = vld.sshfl [vmem:[#allocation2 + $0x84] sm:$0x32 pattern:$0x75316420] }
 0x213   : > { %v4050_v28 = vrot.slane %v4043_v60, %v19267_v46  ;;  %v4310_v53 = vunpack.c.l.b16 %v3882_v21  ;;  %v4311_v24 = vunpack.c.l.b16 %v3896_v39  ;;  %v4312_v33 = vunpack.c.l.b16 %v3910_v25  ;;  %v18223_v39 = vld.sshfl [vmem:[#allocation2 + $0x70] sm:$0x33 pattern:$0x75316420] }
 0x214   : > { %v4313_v30 = vunpack.c.l.b16 %v3924_v40  ;;  %v4314_v18 = vunpack.c.l.b16 %v3938_v59  ;;  %v4315_v32 = vunpack.c.l.b16 %v21233_v19  ;;  %v4316_v27 = vunpack.c.l.b16 %v3966_v16 }
 0x215   : > { %18867 = vmatpush3.bf16.msra.mxu0 %v19062_v10  ;;  %v4317_v56 = vunpack.c.l.b16 %v3980_v1  ;;  %v4318_v35 = vunpack.c.l.b16 %v3994_v34  ;;  %18783 = vmatpush3.bf16.msra.mxu1 %v19073_v50  ;;  %v4319_v15 = vunpack.c.l.b16 %v4008_v11  ;;  %v4320_v5 = vunpack.c.l.b16 %v4022_v14  ;;  %v18224_v34 = vld.sshfl [vmem:[#allocation2 + $0x74] sm:$0x1 pattern:$0x75316420] }
 0x216   : > { %18868 = vmatprep.subr.bf16.mxu0 %v19064_v36  ;;  %v4321_v0 = vunpack.c.l.b16 %v4036_v37  ;;  %v4322_v21 = vunpack.c.l.b16 %v4050_v28  ;;  %18792 = vmatprep.subr.bf16.mxu1 %v19075_v31  ;;  %v4395_v8 = vrot.slane %v4308_v2, 7  ;;  %v4397_v45 = vrot.slane %v4309_v41, 6  ;;  %v19070_v2 = vld [vmem:[%s23042_s3 + $0x1a8] sm:$0xff]  }
 0x217   : > { %v4399_v26 = vrot.slane %v4310_v53, 5  ;;  %v4401_v10 = vrot.slane %v4311_v24, 4  ;;  %v4403_v25 = vrot.slane %v4312_v33, 3  ;;  %v4405_v57 = vrot.slane %v4313_v30, 2 }
 0x218   : > { %v4407_v63 = vrot.slane %v4314_v18, 1  ;;  %v4409_v50 = vrot.slane %v4316_v27, 7  ;;  %v4396_v40 = vsel %vm3140_vm2, %v4395_v8, %v4307_v61  ;;  %v4411_v59 = vrot.slane %v4317_v56, 6 }
 0x219   : > { %18869 = vmatpush3.bf16.msra.mxu0 %v19064_v36  ;;  %v4413_v19 = vrot.slane %v4318_v35, 5  ;;  %v4415_v44 = vrot.slane %v4319_v15, 4  ;;  %v4398_v16 = vsel %vm3143_vm6, %v4397_v45, %v4396_v40  ;;  %v4417_v55 = vrot.slane %v4320_v5, 3 }
 0x21a   : > { %18870 = vmatprep.subr.bf16.mxu0 %v19066_v6  ;;  %v4410_v20 = vsel %vm3140_vm2, %v4409_v50, %v4315_v32  ;;  %v4419_v43 = vrot.slane %v4321_v0, 2  ;;  %v4400_v58 = vsel %vm3146_vm11, %v4399_v26, %v4398_v16  ;;  %v4421_v54 = vrot.slane %v4322_v21, 1  ;;  %v18226_v28 = vld.sshfl [vmem:[#allocation2 + $0x88] sm:$0x33 pattern:$0x75316420] }
 0x21b   : > { %v4412_v7 = vsel %vm3143_vm6, %v4411_v59, %v4410_v20  ;;  %v10553_v3 = vcombine.high %v18222_v4, %v18222_v4  ;;  %v4402_v1 = vsel %vm3149_vm12, %v4401_v10, %v4400_v58  ;;  %v10560_v62 = vrot.slane %v18222_v4, %v19267_v46  ;;  %v18227_v30 = vld.sshfl [vmem:[#allocation2 + $0x8c] sm:$0x1 pattern:$0x75316420]  ;;  %v19072_v10 = vld [vmem:[%s23042_s3 + $0x1b0] sm:$0xff]  }
 0x21c   : > { %v4414_v29 = vsel %vm3146_vm11, %v4413_v19, %v4412_v7  ;;  %v10577_v60 = vcombine.high %v18223_v39, %v18223_v39  ;;  %v4404_v61 = vsel %vm3152_vm13, %v4403_v25, %v4402_v1  ;;  %v10584_v14 = vrot.slane %v18223_v39, %v19267_v46 }
 0x21d   : > { %18871 = vmatpush3.bf16.msra.mxu0 %v19066_v6  ;;  %v4416_v36 = vsel %vm3149_vm12, %v4415_v44, %v4414_v29  ;;  %v10567_v11 = vrot.slane %v10553_v3, %v19267_v46  ;;  %v4406_v31 = vsel %vm3155_vm14, %v4405_v57, %v4404_v61  ;;  %v10568_v41 = vcombine.high %v10560_v62, %v10560_v62 }
 0x21e   : > { %18872 = vmatprep.subr.bf16.mxu0 %v19068_v13  ;;  %v4418_v37 = vsel %vm3152_vm13, %v4417_v55, %v4416_v36  ;;  %v10591_v53 = vrot.slane %v10577_v60, %v19267_v46  ;;  %v4408_v24 = vsel %vm3158_vm15, %v4407_v63, %v4406_v31  ;;  %v10592_v32 = vcombine.high %v10584_v14, %v10584_v14 }
 0x21f   : > { %v4420_v33 = vsel %vm3155_vm14, %v4419_v43, %v4418_v37  ;;  %v10569_v18 = vcombine.high %v10567_v11, %v10567_v11  ;;  %v10607_v35 = vrot.slane %v18224_v34, %v19267_v46  ;;  %v10615_v6 = vcombine.high %v18225_v49, %v18225_v49 }
 0x220   : > { %v4422_v27 = vsel %vm3158_vm15, %v4421_v54, %v4420_v33  ;;  %v10593_v56 = vcombine.high %v10591_v53, %v10591_v53  ;;  %v10622_v5 = vrot.slane %v18225_v49, %v19267_v46  ;;  %v10639_v0 = vcombine.high %v18226_v28, %v18226_v28  ;;  %v19074_v54 = vld [vmem:[%s23042_s3 + $0x1b8] sm:$0xff]  }
 0x221   : > { %18873 = vmatpush3.bf16.msra.mxu0 %v19068_v13  ;;  %v4453_v15 = vpack.c.b16 %v4422_v27, %v4408_v24  ;;  %v10646_v21 = vrot.slane %v18226_v28, %v19267_v46  ;;  %v10629_v4 = vrot.slane %v10615_v6, %v19267_v46  ;;  %v10669_v8 = vrot.slane %v18227_v30, %v19267_v46 }
 0x222   : > { %18874 = vmatprep.subr.bf16.mxu0 %v19070_v2  ;;  %v11265_v45 = vrot.slane %v10567_v11, %v19267_v46  ;;  %v11279_v26 = vrot.slane %v10568_v41, %v19267_v46  ;;  %v10630_v39 = vcombine.high %v10622_v5, %v10622_v5  ;;  %v10653_v25 = vrot.slane %v10639_v0, %v19267_v46 }
 0x223   : > { %18764 = vmatprep.mubr.bf16.mxu1 %v4453_v15  ;;  %v10654_v57 = vcombine.high %v10646_v21, %v10646_v21  ;;  %v11293_v63 = vrot.slane %v10569_v18, %v19267_v46  ;;  %v10631_v50 = vcombine.high %v10629_v4, %v10629_v4  ;;  %v11307_v19 = vrot.slane %v10584_v14, %v19267_v46 }
 0x224   : > { %v11272_v40 = vrot.slane %v11265_v45, %v19267_v46  ;;  %v11286_v59 = vrot.slane %v11279_v26, %v19267_v46  ;;  %v10655_v44 = vcombine.high %v10653_v25, %v10653_v25  ;;  %v11321_v16 = vrot.slane %v10591_v53, %v19267_v46  ;;  %v19076_v53 = vld [vmem:[%s23042_s3 + $0x1c0] sm:$0xff]  }
 0x225   : > { %18875 = vmatpush3.bf16.msra.mxu0 %v19070_v2  ;;  %v11300_v13 = vrot.slane %v11293_v63, %v19267_v46  ;;  %v11335_v20 = vrot.slane %v10592_v32, %v19267_v46  ;;  %v11314_v55 = vrot.slane %v11307_v19, %v19267_v46  ;;  %v11349_v43 = vrot.slane %v10593_v56, %v19267_v46 }
 0x226   : > { %v11363_v58 = vrot.slane %v10607_v35, %v19267_v46  ;;  %v11377_v7 = vrot.slane %v10629_v4, %v19267_v46  ;;  %18876 = vmatprep.subr.bf16.mxu0 %v19072_v10  ;;  %v11328_v3 = vrot.slane %v11321_v16, %v19267_v46  ;;  %v11391_v29 = vrot.slane %v10630_v39, %v19267_v46 }
 0x227   : > { %v11342_v1 = vrot.slane %v11335_v20, %v19267_v46  ;;  %v11405_v49 = vrot.slane %v10631_v50, %v19267_v46  ;;  %v11356_v62 = vrot.slane %v11349_v43, %v19267_v46  ;;  %v11419_v36 = vrot.slane %v10646_v21, %v19267_v46 }
 0x228   : > { %v11370_v60 = vrot.slane %v11363_v58, %v19267_v46  ;;  %v11384_v61 = vrot.slane %v11377_v7, %v19267_v46  ;;  %v11398_v34 = vrot.slane %v11391_v29, %v19267_v46  ;;  %v11433_v14 = vrot.slane %v10653_v25, %v19267_v46 }
 0x229   : > { %v11412_v11 = vrot.slane %v11405_v49, %v19267_v46  ;;  %v11447_v2 = vrot.slane %v10654_v57, %v19267_v46  ;;  %18877 = vmatpush3.bf16.msra.mxu0 %v19072_v10  ;;  %v11426_v31 = vrot.slane %v11419_v36, %v19267_v46  ;;  %v11461_v37 = vrot.slane %v10655_v44, %v19267_v46 }
 0x22a   : > { %v11475_v28 = vrot.slane %v10669_v8, %v19267_v46  ;;  %v11739_v41 = vunpack.c.l.b16 %v11272_v40  ;;  %18878 = vmatprep.subr.bf16.mxu0 %v19074_v54  ;;  %v11440_v24 = vrot.slane %v11433_v14, %v19267_v46  ;;  %v11740_v30 = vunpack.c.l.b16 %v11286_v59 }
 0x22b   : > { %v11454_v33 = vrot.slane %v11447_v2, %v19267_v46  ;;  %v11741_v18 = vunpack.c.l.b16 %v11300_v13  ;;  %v11468_v32 = vrot.slane %v11461_v37, %v19267_v46  ;;  %v11742_v56 = vunpack.c.l.b16 %v11314_v55 }
 0x22c   : > { %v11482_v27 = vrot.slane %v11475_v28, %v19267_v46  ;;  %v11743_v35 = vunpack.c.l.b16 %v11328_v3  ;;  %v11744_v6 = vunpack.c.l.b16 %v11342_v1  ;;  %v11745_v15 = vunpack.c.l.b16 %v11356_v62 }
 0x22d   : > { %v11746_v5 = vunpack.c.l.b16 %v11370_v60  ;;  %v11747_v0 = vunpack.c.l.b16 %v11384_v61  ;;  %18879 = vmatpush3.bf16.msra.mxu0 %v19074_v54  ;;  %v11748_v21 = vunpack.c.l.b16 %v11398_v34  ;;  %v11749_v4 = vunpack.c.l.b16 %v11412_v11 }
 0x22e   : > { %v11750_v8 = vunpack.c.l.b16 %v11426_v31  ;;  %v11751_v45 = vunpack.c.l.b16 %v11440_v24  ;;  %18888 = vmatprep.subr.bf16.mxu0 %v19076_v53  ;;  %v11752_v26 = vunpack.c.l.b16 %v11454_v33  ;;  %v11753_v10 = vunpack.c.l.b16 %v11468_v32  ;;  %v23219_v32 = vld [vmem:[#allocation39_spill] sm:$0xff] }
 0x22f   : > { %v11754_v39 = vunpack.c.l.b16 %v11482_v27  ;;  %v11827_v25 = vrot.slane %v11740_v30, 7  ;;  %v11829_v57 = vrot.slane %v11741_v18, 6  ;;  %v11831_v63 = vrot.slane %v11742_v56, 5  ;;  %v23218_v30 = vld [vmem:[#allocation40_spill] sm:$0xff] }
 0x230   : > { %v11833_v50 = vrot.slane %v11743_v35, 4  ;;  %v11835_v40 = vrot.slane %v11744_v6, 3  ;;  %v11837_v19 = vrot.slane %v11745_v15, 2  ;;  %v11839_v44 = vrot.slane %v11746_v5, 1 }
 0x231   : > { %v11828_v59 = vsel %vm3140_vm2, %v11827_v25, %v11739_v41  ;;  %v11841_v13 = vrot.slane %v11748_v21, 7  ;;  %v11843_v20 = vrot.slane %v11749_v4, 6  ;;  %v11845_v55 = vrot.slane %v11750_v8, 5  ;;  %v23222_v8 = vld [vmem:[#allocation44_spill] sm:$0xff] }
 0x232   : > { %v11830_v16 = vsel %vm3143_vm6, %v11829_v57, %v11828_v59  ;;  %v11847_v43 = vrot.slane %v11751_v45, 4  ;;  %v11849_v54 = vrot.slane %v11752_v26, 3  ;;  %v11851_v3 = vrot.slane %v11753_v10, 2  ;;  %v23223_v26 = vld [vmem:[#allocation43_spill] sm:$0xff] }
 0x233   : > { %v11832_v58 = vsel %vm3146_vm11, %v11831_v63, %v11830_v16  ;;  %v11842_v7 = vsel %vm3140_vm2, %v11841_v13, %v11747_v0  ;;  %v11853_v49 = vrot.slane %v11754_v39, 1  ;;  %v4057_v62 = vrot.slane %v20600_v22, %v19267_v46  ;;  %v23221_v0 = vld [vmem:[#allocation42_spill] sm:$0xff]  ;;  %v23224_v39 = vld [vmem:[#allocation45_spill] sm:$0xff] }
 0x234   : > { %v11834_v1 = vsel %vm3149_vm12, %v11833_v50, %v11832_v58  ;;  %v11844_v29 = vsel %vm3143_vm6, %v11843_v20, %v11842_v7  ;;  %v4071_v36 = vrot.slane %v20610_v47, %v19267_v46  ;;  %v4085_v34 = vrot.slane %v20614_v51, %v19267_v46  ;;  %v23225_v63 = vld [vmem:[#allocation46_spill] sm:$0xff] }
 0x235   : > { %v11836_v60 = vsel %vm3152_vm13, %v11835_v40, %v11834_v1  ;;  %v11846_v61 = vsel %vm3146_vm11, %v11845_v55, %v11844_v29  ;;  %v21358_v2 = vrot.slane %v4057_v62, %v19267_v46  ;;  %v4099_v22 = vrot.slane %v20630_v17, %v19267_v46  ;;  %v23226_v40 = vld [vmem:[#allocation47_spill] sm:$0xff] }
 0x236   : > { %v11838_v11 = vsel %vm3155_vm14, %v11837_v19, %v11836_v60  ;;  %v11848_v14 = vsel %vm3149_vm12, %v11847_v43, %v11846_v61  ;;  %v4078_v28 = vrot.slane %v4071_v36, %v19267_v46  ;;  %v4092_v47 = vrot.slane %v4085_v34, %v19267_v46 }
 0x237   : > { %v11840_v31 = vsel %vm3158_vm15, %v11839_v44, %v11838_v11  ;;  %v11850_v37 = vsel %vm3152_vm13, %v11849_v54, %v11848_v14  ;;  %v4106_v41 = vrot.slane %v4099_v22, %v19267_v46  ;;  %v4113_v53 = vrot.slane %v20605_v48, %v19267_v46  ;;  %v23220_v48 = vld [vmem:[#allocation41_spill] sm:$0xff] }
 0x238   : > { %v11852_v51 = vsel %vm3155_vm14, %v11851_v3, %v11850_v37  ;;  %v4127_v24 = vrot.slane %v20619_v52, %v19267_v46  ;;  %v4141_v33 = vrot.slane %v20623_v38, %v19267_v46  ;;  %v4155_v18 = vrot.slane %v23218_v30, %v19267_v46 }
 0x239   : > { %v11854_v17 = vsel %vm3158_vm15, %v11853_v49, %v11852_v51  ;;  %v4169_v27 = vrot.slane %v23219_v32, %v19267_v46  ;;  %v4120_v35 = vrot.slane %v4113_v53, %v19267_v46  ;;  %v4183_v15 = vrot.slane %v23220_v48, %v19267_v46  ;;  %v18229_v51 = vld.sshfl [vmem:[#allocation2 + $0xa0] sm:$0x33 pattern:$0x75316420] }
 0x23a   : > { %v11885_v56 = vpack.c.b16 %v11854_v17, %v11840_v31  ;;  %v4134_v6 = vrot.slane %v4127_v24, %v19267_v46  ;;  %v4148_v52 = vrot.slane %v4141_v33, %v19267_v46  ;;  %v4162_v5 = vrot.slane %v4155_v18, %v19267_v46 }
 0x23b   : > { %v4176_v38 = vrot.slane %v4169_v27, %v19267_v46  ;;  %v4197_v21 = vrot.slane %v23221_v0, %v19267_v46  ;;  %v4190_v4 = vrot.slane %v4183_v15, %v19267_v46  ;;  %v4211_v45 = vrot.slane %v23222_v8, %v19267_v46  ;;  %v18231_v0 = vld.sshfl [vmem:[#allocation2 + $0xb4] sm:$0x32 pattern:$0x75316420] }
 0x23c   : > { %18860 = vmatprep.mubr.bf16.mxu0 %v11885_v56  ;;  %v4225_v10 = vrot.slane %v23223_v26, %v19267_v46  ;;  %v4239_v25 = vrot.slane %v23224_v39, %v19267_v46  ;;  %v4253_v50 = vrot.slane %v23225_v63, %v19267_v46  ;;  %v4267_v59 = vrot.slane %v23226_v40, %v19267_v46  ;;  %v18230_v26 = vld.sshfl [vmem:[#allocation2 + $0xa4] sm:$0x1 pattern:$0x75316420] }
 0x23d   : > { %v4204_v57 = vrot.slane %v4197_v21, %v19267_v46  ;;  %v4323_v19 = vunpack.c.l.b16 %v21358_v2  ;;  %v4218_v44 = vrot.slane %v4211_v45, %v19267_v46  ;;  %v4324_v20 = vunpack.c.l.b16 %v4078_v28  ;;  %v18228_v2 = vld.sshfl [vmem:[#allocation2 + $0x9c] sm:$0x32 pattern:$0x75316420] }
 0x23e   : > { %v4232_v13 = vrot.slane %v4225_v10, %v19267_v46  ;;  %v4246_v16 = vrot.slane %v4239_v25, %v19267_v46  ;;  %v4260_v55 = vrot.slane %v4253_v50, %v19267_v46  ;;  %v4274_v43 = vrot.slane %v4267_v59, %v19267_v46  ;;  %v18232_v63 = vld.sshfl [vmem:[#allocation2 + $0xb8] sm:$0x33 pattern:$0x75316420] }
 0x23f   : > { %v4325_v58 = vunpack.c.l.b16 %v4092_v47  ;;  %v4326_v7 = vunpack.c.l.b16 %v4106_v41  ;;  %v4327_v54 = vunpack.c.l.b16 %v4120_v35  ;;  %v4328_v3 = vunpack.c.l.b16 %v4134_v6 }
 0x240   : > { %v4329_v1 = vunpack.c.l.b16 %v4148_v52  ;;  %v4330_v29 = vunpack.c.l.b16 %v4162_v5  ;;  %v4331_v49 = vunpack.c.l.b16 %v4176_v38  ;;  %v4332_v62 = vunpack.c.l.b16 %v4190_v4 }
 0x241   : > { %v4333_v60 = vunpack.c.l.b16 %v4204_v57  ;;  %v4334_v61 = vunpack.c.l.b16 %v4218_v44  ;;  %v4335_v36 = vunpack.c.l.b16 %v4232_v13  ;;  %v4336_v34 = vunpack.c.l.b16 %v4246_v16  ;;  %v18233_v44 = vld.sshfl [vmem:[#allocation2 + $0xbc] sm:$0x1 pattern:$0x75316420] }
 0x242   : > { %v4337_v11 = vunpack.c.l.b16 %v4260_v55  ;;  %v4338_v14 = vunpack.c.l.b16 %v4274_v43  ;;  %v4423_v22 = vrot.slane %v4324_v20, 7  ;;  %v4425_v31 = vrot.slane %v4325_v58, 6 }
 0x243   : > { %v4427_v37 = vrot.slane %v4326_v7, 5  ;;  %v4429_v28 = vrot.slane %v4327_v54, 4  ;;  %v4431_v47 = vrot.slane %v4328_v3, 3  ;;  %v4433_v41 = vrot.slane %v4329_v1, 2 }
 0x244   : > { %v4435_v53 = vrot.slane %v4330_v29, 1  ;;  %v4437_v24 = vrot.slane %v4332_v62, 7  ;;  %v4424_v17 = vsel %vm3140_vm2, %v4423_v22, %v4323_v19  ;;  %v4439_v33 = vrot.slane %v4333_v60, 6 }
 0x245   : > { %v4441_v30 = vrot.slane %v4334_v61, 5  ;;  %v4443_v18 = vrot.slane %v4335_v36, 4  ;;  %v4426_v32 = vsel %vm3143_vm6, %v4425_v31, %v4424_v17  ;;  %v4445_v56 = vrot.slane %v4336_v34, 3 }
 0x246   : > { %v4438_v27 = vsel %vm3140_vm2, %v4437_v24, %v4331_v49  ;;  %v4447_v35 = vrot.slane %v4337_v11, 2  ;;  %v4428_v6 = vsel %vm3146_vm11, %v4427_v37, %v4426_v32  ;;  %v4449_v15 = vrot.slane %v4338_v14, 1 }
 0x247   : > { %v4440_v48 = vsel %vm3143_vm6, %v4439_v33, %v4438_v27  ;;  %v10677_v52 = vcombine.high %v18228_v2, %v18228_v2  ;;  %v4430_v5 = vsel %vm3149_vm12, %v4429_v28, %v4428_v6  ;;  %v10684_v21 = vrot.slane %v18228_v2, %v19267_v46 }
 0x248   : > { %v4442_v38 = vsel %vm3146_vm11, %v4441_v30, %v4440_v48  ;;  %v10701_v4 = vcombine.high %v18229_v51, %v18229_v51  ;;  %v4432_v8 = vsel %vm3152_vm13, %v4431_v47, %v4430_v5  ;;  %v10708_v39 = vrot.slane %v18229_v51, %v19267_v46 }
 0x249   : > { %v4444_v45 = vsel %vm3149_vm12, %v4443_v18, %v4442_v38  ;;  %v10691_v10 = vrot.slane %v10677_v52, %v19267_v46  ;;  %v4434_v25 = vsel %vm3155_vm14, %v4433_v41, %v4432_v8  ;;  %v10692_v50 = vcombine.high %v10684_v21, %v10684_v21 }
 0x24a   : > { %v4446_v57 = vsel %vm3152_vm13, %v4445_v56, %v4444_v45  ;;  %v10715_v40 = vrot.slane %v10701_v4, %v19267_v46  ;;  %v4436_v59 = vsel %vm3158_vm15, %v4435_v53, %v4434_v25  ;;  %v10716_v16 = vcombine.high %v10708_v39, %v10708_v39 }
 0x24b   : > { %v4448_v19 = vsel %vm3155_vm14, %v4447_v35, %v4446_v57  ;;  %v10693_v13 = vcombine.high %v10691_v10, %v10691_v10  ;;  %v10731_v43 = vrot.slane %v18230_v26, %v19267_v46  ;;  %v10739_v58 = vcombine.high %v18231_v0, %v18231_v0 }
 0x24c   : > { %v4450_v20 = vsel %vm3158_vm15, %v4449_v15, %v4448_v19  ;;  %v10717_v55 = vcombine.high %v10715_v40, %v10715_v40  ;;  %v10746_v54 = vrot.slane %v18231_v0, %v19267_v46  ;;  %v10763_v3 = vcombine.high %v18232_v63, %v18232_v63 }
 0x24d   : > { %v4454_v7 = vpack.c.b16 %v4450_v20, %v4436_v59  ;;  %v10770_v1 = vrot.slane %v18232_v63, %v19267_v46  ;;  %v10753_v29 = vrot.slane %v10739_v58, %v19267_v46  ;;  %v10793_v49 = vrot.slane %v18233_v44, %v19267_v46 }
 0x24e   : > { %v11489_v62 = vrot.slane %v10691_v10, %v19267_v46  ;;  %v11503_v60 = vrot.slane %v10692_v50, %v19267_v46  ;;  %v10754_v61 = vcombine.high %v10746_v54, %v10746_v54  ;;  %v10777_v36 = vrot.slane %v10763_v3, %v19267_v46  ;;  %v18010_v54 = vld.sshfl [vmem:[#allocation2] sm:$0x32 pattern:$0x75316420] }
 0x24f   : > { %18765 = vmatmul.mubr.bf16.gmra.mrb[4].mxu1 %v4454_v7  ;;  %v10778_v34 = vcombine.high %v10770_v1, %v10770_v1  ;;  %v11517_v11 = vrot.slane %v10693_v13, %v19267_v46  ;;  %v10755_v14 = vcombine.high %v10753_v29, %v10753_v29  ;;  %v11531_v31 = vrot.slane %v10708_v39, %v19267_v46 }
 0x250   : > { %v11496_v2 = vrot.slane %v11489_v62, %v19267_v46  ;;  %v11510_v22 = vrot.slane %v11503_v60, %v19267_v46  ;;  %v10779_v37 = vcombine.high %v10777_v36, %v10777_v36  ;;  %v11545_v51 = vrot.slane %v10715_v40, %v19267_v46  ;;  %v18011_v62 = vld.sshfl [vmem:[#allocation2 + $0x4] sm:$0x33 pattern:$0x75316420] }
 0x251   : > { %v11524_v28 = vrot.slane %v11517_v11, %v19267_v46  ;;  %v11559_v47 = vrot.slane %v10716_v16, %v19267_v46  ;;  %v11538_v41 = vrot.slane %v11531_v31, %v19267_v46  ;;  %v11573_v53 = vrot.slane %v10717_v55, %v19267_v46 }
 0x252   : > { %v11587_v24 = vrot.slane %v10731_v43, %v19267_v46  ;;  %v11601_v17 = vrot.slane %v10753_v29, %v19267_v46  ;;  %v11552_v33 = vrot.slane %v11545_v51, %v19267_v46  ;;  %v11615_v18 = vrot.slane %v10754_v61, %v19267_v46 }
 0x253   : > { %v11566_v30 = vrot.slane %v11559_v47, %v19267_v46  ;;  %v11629_v32 = vrot.slane %v10755_v14, %v19267_v46  ;;  %v11580_v27 = vrot.slane %v11573_v53, %v19267_v46  ;;  %v11643_v6 = vrot.slane %v10770_v1, %v19267_v46 }
 0x254   : > { %v11594_v56 = vrot.slane %v11587_v24, %v19267_v46  ;;  %v11608_v35 = vrot.slane %v11601_v17, %v19267_v46  ;;  %v11622_v48 = vrot.slane %v11615_v18, %v19267_v46  ;;  %v11657_v52 = vrot.slane %v10777_v36, %v19267_v46  ;;  %v18013_v24 = vld.sshfl [vmem:[#allocation2 + $0x18] sm:$0x32 pattern:$0x75316420] }
 0x255   : > { %v11636_v15 = vrot.slane %v11629_v32, %v19267_v46  ;;  %v11671_v5 = vrot.slane %v10778_v34, %v19267_v46  ;;  %v11650_v38 = vrot.slane %v11643_v6, %v19267_v46  ;;  %v11685_v0 = vrot.slane %v10779_v37, %v19267_v46  ;;  %v18012_v18 = vld.sshfl [vmem:[#allocation2 + $0x8] sm:$0x1 pattern:$0x75316420] }
 0x256   : > { %v11699_v21 = vrot.slane %v10793_v49, %v19267_v46  ;;  %v11755_v4 = vunpack.c.l.b16 %v11496_v2  ;;  %v11664_v8 = vrot.slane %v11657_v52, %v19267_v46  ;;  %v11756_v26 = vunpack.c.l.b16 %v11510_v22  ;;  %v18014_v6 = vld.sshfl [vmem:[#allocation2 + $0x1c] sm:$0x33 pattern:$0x75316420] }
 0x257   : > { %v11678_v45 = vrot.slane %v11671_v5, %v19267_v46  ;;  %v11757_v10 = vunpack.c.l.b16 %v11524_v28  ;;  %v11692_v39 = vrot.slane %v11685_v0, %v19267_v46  ;;  %v11758_v57 = vunpack.c.l.b16 %v11538_v41 }
 0x258   : > { %v11706_v25 = vrot.slane %v11699_v21, %v19267_v46  ;;  %v11759_v63 = vunpack.c.l.b16 %v11552_v33  ;;  %v11760_v50 = vunpack.c.l.b16 %v11566_v30  ;;  %v11761_v40 = vunpack.c.l.b16 %v11580_v27 }
 0x259   : > { %v11762_v59 = vunpack.c.l.b16 %v11594_v56  ;;  %v11763_v19 = vunpack.c.l.b16 %v11608_v35  ;;  %v11764_v44 = vunpack.c.l.b16 %v11622_v48  ;;  %v11765_v13 = vunpack.c.l.b16 %v11636_v15 }
 0x25a   : > { %v11766_v16 = vunpack.c.l.b16 %v11650_v38  ;;  %v11767_v20 = vunpack.c.l.b16 %v11664_v8  ;;  %v11768_v55 = vunpack.c.l.b16 %v11678_v45  ;;  %v11769_v43 = vunpack.c.l.b16 %v11692_v39  ;;  %v18015_v38 = vld.sshfl [vmem:[#allocation2 + $0x20] sm:$0x1 pattern:$0x75316420] }
 0x25b   : > { %v11770_v58 = vunpack.c.l.b16 %v11706_v25  ;;  %v11855_v7 = vrot.slane %v11756_v26, 7  ;;  %v11857_v3 = vrot.slane %v11757_v10, 6  ;;  %v11859_v1 = vrot.slane %v11758_v57, 5 }
 0x25c   : > { %v11861_v29 = vrot.slane %v11759_v63, 4  ;;  %v11863_v49 = vrot.slane %v11760_v50, 3  ;;  %v11865_v61 = vrot.slane %v11761_v40, 2  ;;  %v11867_v36 = vrot.slane %v11762_v59, 1 }
 0x25d   : > { %v11856_v60 = vsel %vm3140_vm2, %v11855_v7, %v11755_v4  ;;  %v11869_v34 = vrot.slane %v11764_v44, 7  ;;  %v11871_v14 = vrot.slane %v11765_v13, 6  ;;  %v11873_v2 = vrot.slane %v11766_v16, 5 }
 0x25e   : > { %v11858_v11 = vsel %vm3143_vm6, %v11857_v3, %v11856_v60  ;;  %v11875_v22 = vrot.slane %v11767_v20, 4  ;;  %v11877_v28 = vrot.slane %v11768_v55, 3  ;;  %v11879_v51 = vrot.slane %v11769_v43, 2 }
 0x25f   : > { %v11860_v31 = vsel %vm3146_vm11, %v11859_v1, %v11858_v11  ;;  %v11870_v37 = vsel %vm3140_vm2, %v11869_v34, %v11763_v19  ;;  %v11881_v53 = vrot.slane %v11770_v58, 1  ;;  %v4627_v17 = vcombine.high %v18010_v54, %v18010_v54 }
 0x260   : > { %v11862_v47 = vsel %vm3149_vm12, %v11861_v29, %v11860_v31  ;;  %v11872_v41 = vsel %vm3143_vm6, %v11871_v14, %v11870_v37  ;;  %v4634_v32 = vrot.slane %v18010_v54, %v19267_v46  ;;  %v4651_v27 = vcombine.high %v18011_v62, %v18011_v62 }
 0x261   : > { %v11864_v33 = vsel %vm3152_vm13, %v11863_v49, %v11862_v47  ;;  %v11874_v30 = vsel %vm3146_vm11, %v11873_v2, %v11872_v41  ;;  %v4641_v48 = vrot.slane %v4627_v17, %v19267_v46  ;;  %v4658_v15 = vrot.slane %v18011_v62, %v19267_v46 }
 0x262   : > { %v11866_v56 = vsel %vm3155_vm14, %v11865_v61, %v11864_v33  ;;  %v11876_v35 = vsel %vm3149_vm12, %v11875_v22, %v11874_v30  ;;  %v4642_v0 = vcombine.high %v4634_v32, %v4634_v32  ;;  %v4665_v21 = vrot.slane %v4651_v27, %v19267_v46 }
 0x263   : > { %v11868_v52 = vsel %vm3158_vm15, %v11867_v36, %v11866_v56  ;;  %v11878_v5 = vsel %vm3152_vm13, %v11877_v28, %v11876_v35  ;;  %v4643_v8 = vcombine.high %v4641_v48, %v4641_v48  ;;  %v4666_v45 = vcombine.high %v4658_v15, %v4658_v15 }
 0x264   : > { %v11880_v4 = vsel %vm3155_vm14, %v11879_v51, %v11878_v5  ;;  %v4681_v26 = vrot.slane %v18012_v18, %v19267_v46  ;;  %v4667_v39 = vcombine.high %v4665_v21, %v4665_v21  ;;  %v4689_v25 = vcombine.high %v18013_v24, %v18013_v24 }
 0x265   : > { %v11882_v10 = vsel %vm3158_vm15, %v11881_v53, %v11880_v4  ;;  %v4696_v57 = vrot.slane %v18013_v24, %v19267_v46  ;;  %v4713_v50 = vcombine.high %v18014_v6, %v18014_v6  ;;  %v4720_v40 = vrot.slane %v18014_v6, %v19267_v46 }
 0x266   : > { %v11886_v63 = vpack.c.b16 %v11882_v10, %v11868_v52  ;;  %v4743_v59 = vrot.slane %v18015_v38, %v19267_v46  ;;  %v4703_v19 = vrot.slane %v4689_v25, %v19267_v46  ;;  %v5139_v13 = vrot.slane %v4641_v48, %v19267_v46 }
 0x267   : > { %v4704_v44 = vcombine.high %v4696_v57, %v4696_v57  ;;  %v5153_v16 = vrot.slane %v4642_v0, %v19267_v46  ;;  %v4727_v20 = vrot.slane %v4713_v50, %v19267_v46  ;;  %v4728_v55 = vcombine.high %v4720_v40, %v4720_v40  ;;  %v18258_v50 = vld.sshfl [vmem:[#allocation2 + $0x18] sm:$0x33 pattern:$0x75316420] }
 0x268   : > { %18861 = vmatmul.mubr.bf16.gmra.mrb[4].mxu0 %v11886_v63  ;;  %v5167_v43 = vrot.slane %v4643_v8, %v19267_v46  ;;  %v5181_v58 = vrot.slane %v4658_v15, %v19267_v46  ;;  %v4705_v7 = vcombine.high %v4703_v19, %v4703_v19  ;;  %v5146_v54 = vrot.slane %v5139_v13, %v19267_v46  ;;  %v18260_v13 = vld.sshfl [vmem:[#allocation2 + $0x30] sm:$0x33 pattern:$0x75316420] }
 0x269   : > { %v5160_v3 = vrot.slane %v5153_v16, %v19267_v46  ;;  %v5195_v1 = vrot.slane %v4665_v21, %v19267_v46  ;;  %v4729_v29 = vcombine.high %v4727_v20, %v4727_v20  ;;  %v5209_v60 = vrot.slane %v4666_v45, %v19267_v46 }
 0x26a   : > { %v5174_v49 = vrot.slane %v5167_v43, %v19267_v46  ;;  %v5188_v62 = vrot.slane %v5181_v58, %v19267_v46  ;;  %v5223_v36 = vrot.slane %v4667_v39, %v19267_v46  ;;  %v5237_v34 = vrot.slane %v4681_v26, %v19267_v46 }
 0x26b   : > { %v5202_v61 = vrot.slane %v5195_v1, %v19267_v46  ;;  %v5251_v11 = vrot.slane %v4703_v19, %v19267_v46  ;;  %v5216_v14 = vrot.slane %v5209_v60, %v19267_v46  ;;  %v5265_v2 = vrot.slane %v4704_v44, %v19267_v46 }
 0x26c   : > { %v5279_v22 = vrot.slane %v4705_v7, %v19267_v46  ;;  %v5293_v31 = vrot.slane %v4720_v40, %v19267_v46  ;;  %v5230_v37 = vrot.slane %v5223_v36, %v19267_v46  ;;  %v5244_v28 = vrot.slane %v5237_v34, %v19267_v46 }
 0x26d   : > { %v5258_v51 = vrot.slane %v5251_v11, %v19267_v46  ;;  %v5307_v47 = vrot.slane %v4727_v20, %v19267_v46  ;;  %v5272_v41 = vrot.slane %v5265_v2, %v19267_v46  ;;  %v5321_v17 = vrot.slane %v4728_v55, %v19267_v46  ;;  %v18261_v2 = vld.sshfl [vmem:[#allocation2 + $0x34] sm:$0x33 pattern:$0x75316420] }
 0x26e   : > { %v5286_v53 = vrot.slane %v5279_v22, %v19267_v46  ;;  %v21511_v24 = vrot.slane %v5293_v31, %v19267_v46  ;;  %v5335_v30 = vrot.slane %v4729_v29, %v19267_v46  ;;  %v5349_v18 = vrot.slane %v4743_v59, %v19267_v46 }
 0x26f   : > { %v21515_v33 = vrot.slane %v5307_v47, %v19267_v46  ;;  %v6029_v32 = vunpack.c.l.b16 %v5146_v54  ;;  %v5328_v27 = vrot.slane %v5321_v17, %v19267_v46  ;;  %v6030_v56 = vunpack.c.l.b16 %v5160_v3 }
 0x270   : > { %v6031_v35 = vunpack.c.l.b16 %v5174_v49  ;;  %v6032_v6 = vunpack.c.l.b16 %v5188_v62  ;;  %v5342_v48 = vrot.slane %v5335_v30, %v19267_v46  ;;  %v5356_v15 = vrot.slane %v5349_v18, %v19267_v46 }
 0x271   : > { %v6033_v52 = vunpack.c.l.b16 %v5202_v61  ;;  %v6034_v5 = vunpack.c.l.b16 %v5216_v14  ;;  %v6035_v38 = vunpack.c.l.b16 %v5230_v37  ;;  %v6036_v0 = vunpack.c.l.b16 %v5244_v28 }
 0x272   : > { %v6037_v21 = vunpack.c.l.b16 %v5258_v51  ;;  %v6038_v4 = vunpack.c.l.b16 %v5272_v41  ;;  %v6039_v8 = vunpack.c.l.b16 %v5286_v53  ;;  %v6040_v45 = vunpack.c.l.b16 %v21511_v24 }
 0x273   : > { %v6041_v26 = vunpack.c.l.b16 %v21515_v33  ;;  %v21524_v10 = vunpack.c.l.b16 %v5328_v27  ;;  %v21526_v39 = vunpack.c.l.b16 %v5342_v48  ;;  %v6044_v25 = vunpack.c.l.b16 %v5356_v15 }
 0x274   : > { %v6093_v57 = vrot.slane %v6030_v56, 7  ;;  %v6095_v63 = vrot.slane %v6031_v35, 6  ;;  %v6097_v40 = vrot.slane %v6032_v6, 5  ;;  %v6099_v59 = vrot.slane %v6033_v52, 4 }
 0x275   : > { %v6101_v19 = vrot.slane %v6034_v5, 3  ;;  %v6103_v44 = vrot.slane %v6035_v38, 2  ;;  %v6105_v20 = vrot.slane %v6036_v0, 1  ;;  %v6107_v55 = vrot.slane %v6038_v4, 7 }
 0x276   : > { %v6094_v16 = vsel %vm3140_vm2, %v6093_v57, %v6029_v32  ;;  %v6109_v43 = vrot.slane %v6039_v8, 6  ;;  %v6111_v7 = vrot.slane %v6040_v45, 5  ;;  %v6113_v54 = vrot.slane %v6041_v26, 4 }
 0x277   : > { %v6096_v58 = vsel %vm3143_vm6, %v6095_v63, %v6094_v16  ;;  %v6115_v3 = vrot.slane %v21524_v10, 3  ;;  %v6108_v29 = vsel %vm3140_vm2, %v6107_v55, %v6037_v21  ;;  %v6117_v49 = vrot.slane %v21526_v39, 2 }
 0x278   : > { %v6098_v1 = vsel %vm3146_vm11, %v6097_v40, %v6096_v58  ;;  %v6119_v62 = vrot.slane %v6044_v25, 1  ;;  %v6110_v61 = vsel %vm3143_vm6, %v6109_v43, %v6108_v29  ;;  %v12052_v36 = vcombine.high %v18258_v50, %v18258_v50 }
 0x279   : > { %v6100_v60 = vsel %vm3149_vm12, %v6099_v59, %v6098_v1  ;;  %v12059_v34 = vrot.slane %v18258_v50, %v19267_v46  ;;  %v6112_v14 = vsel %vm3146_vm11, %v6111_v7, %v6110_v61  ;;  %v12100_v22 = vcombine.high %v18260_v13, %v18260_v13 }
 0x27a   : > { %v6102_v11 = vsel %vm3152_vm13, %v6101_v19, %v6100_v60  ;;  %v12107_v31 = vrot.slane %v18260_v13, %v19267_v46  ;;  %v6114_v28 = vsel %vm3149_vm12, %v6113_v54, %v6112_v14  ;;  %v12066_v51 = vrot.slane %v12052_v36, %v19267_v46 }
 0x27b   : > { %v6104_v37 = vsel %vm3155_vm14, %v6103_v44, %v6102_v11  ;;  %v12067_v47 = vcombine.high %v12059_v34, %v12059_v34  ;;  %v6116_v53 = vsel %vm3152_vm13, %v6115_v3, %v6114_v28  ;;  %v12114_v17 = vrot.slane %v12100_v22, %v19267_v46 }
 0x27c   : > { %v6106_v41 = vsel %vm3158_vm15, %v6105_v20, %v6104_v37  ;;  %v12115_v30 = vcombine.high %v12107_v31, %v12107_v31  ;;  %v6118_v18 = vsel %vm3155_vm14, %v6117_v49, %v6116_v53  ;;  %v12068_v32 = vcombine.high %v12066_v51, %v12066_v51 }
 0x27d   : > { %v12124_v27 = vcombine.high %v18261_v2, %v18261_v2  ;;  %v12131_v56 = vrot.slane %v18261_v2, %v19267_v46  ;;  %v6120_v35 = vsel %vm3158_vm15, %v6119_v62, %v6118_v18  ;;  %v12116_v6 = vcombine.high %v12114_v17, %v12114_v17  ;;  %v18018_v18 = vld.sshfl [vmem:[#allocation2 + $0x38] sm:$0x1 pattern:$0x75316420] }
 0x27e   : > { %v12452_v48 = vrot.slane %v12059_v34, %v19267_v46  ;;  %v12466_v15 = vrot.slane %v12066_v51, %v19267_v46  ;;  %v6205_v52 = vpack.c.b16 %v6120_v35, %v6106_v41  ;;  %v12480_v0 = vrot.slane %v12067_v47, %v19267_v46  ;;  %v18016_v47 = vld.sshfl [vmem:[#allocation2 + $0x30] sm:$0x32 pattern:$0x75316420] }
 0x27f   : > { %v12138_v5 = vrot.slane %v12124_v27, %v19267_v46  ;;  %v12139_v38 = vcombine.high %v12131_v56, %v12131_v56  ;;  %v12494_v8 = vrot.slane %v12068_v32, %v19267_v46  ;;  %v12564_v25 = vrot.slane %v12107_v31, %v19267_v46  ;;  %v18019_v32 = vld.sshfl [vmem:[#allocation2 + $0x48] sm:$0x32 pattern:$0x75316420] }
 0x280   : > { %v12459_v21 = vrot.slane %v12452_v48, %v19267_v46  ;;  %v12473_v4 = vrot.slane %v12466_v15, %v19267_v46  ;;  %18784 = vmatprep.mubr.bf16.mxu1 %v6205_v52  ;;  %v12487_v63 = vrot.slane %v12480_v0, %v19267_v46  ;;  %v12578_v50 = vrot.slane %v12114_v17, %v19267_v46 }
 0x281   : > { %v12140_v57 = vcombine.high %v12138_v5, %v12138_v5  ;;  %v12592_v40 = vrot.slane %v12115_v30, %v19267_v46  ;;  %v12501_v59 = vrot.slane %v12494_v8, %v19267_v46  ;;  %v12571_v19 = vrot.slane %v12564_v25, %v19267_v46  ;;  %v18020_v8 = vld.sshfl [vmem:[#allocation2 + $0x4c] sm:$0x33 pattern:$0x75316420] }
 0x282   : > { %v12606_v44 = vrot.slane %v12116_v6, %v19267_v46  ;;  %v12620_v13 = vrot.slane %v12131_v56, %v19267_v46  ;;  %v12585_v16 = vrot.slane %v12578_v50, %v19267_v46  ;;  %v12634_v55 = vrot.slane %v12138_v5, %v19267_v46 }
 0x283   : > { %v12599_v20 = vrot.slane %v12592_v40, %v19267_v46  ;;  %v12648_v43 = vrot.slane %v12139_v38, %v19267_v46  ;;  %v12662_v54 = vrot.slane %v12140_v57, %v19267_v46  ;;  %v13342_v3 = vunpack.c.l.b16 %v12459_v21  ;;  %v18021_v40 = vld.sshfl [vmem:[#allocation2 + $0x50] sm:$0x1 pattern:$0x75316420] }
 0x284   : > { %v12613_v58 = vrot.slane %v12606_v44, %v19267_v46  ;;  %v21574_v7 = vrot.slane %v12620_v13, %v19267_v46  ;;  %v21578_v1 = vrot.slane %v12634_v55, %v19267_v46  ;;  %v13343_v49 = vunpack.c.l.b16 %v12473_v4 }
 0x285   : > { %v12655_v29 = vrot.slane %v12648_v43, %v19267_v46  ;;  %v13344_v62 = vunpack.c.l.b16 %v12487_v63  ;;  %v12669_v60 = vrot.slane %v12662_v54, %v19267_v46  ;;  %v13345_v61 = vunpack.c.l.b16 %v12501_v59 }
 0x286   : > { %v13350_v36 = vunpack.c.l.b16 %v12571_v19  ;;  %v13351_v34 = vunpack.c.l.b16 %v12585_v16  ;;  %v13352_v11 = vunpack.c.l.b16 %v12599_v20  ;;  %v13353_v14 = vunpack.c.l.b16 %v12613_v58 }
 0x287   : > { %v13354_v2 = vunpack.c.l.b16 %v21574_v7  ;;  %v13355_v22 = vunpack.c.l.b16 %v21578_v1  ;;  %v21584_v31 = vunpack.c.l.b16 %v12655_v29  ;;  %v21586_v37 = vunpack.c.l.b16 %v12669_v60 }
 0x288   : > { %v13406_v28 = vrot.slane %v13343_v49, 7  ;;  %v13408_v51 = vrot.slane %v13344_v62, 6  ;;  %v13410_v41 = vrot.slane %v13345_v61, 5  ;;  %v13412_v53 = vrot.slane %v6040_v45, 4 }
 0x289   : > { %v13414_v17 = vrot.slane %v6041_v26, 3  ;;  %v13416_v30 = vrot.slane %v21524_v10, 2  ;;  %v13418_v56 = vrot.slane %v21526_v39, 1  ;;  %v13420_v35 = vrot.slane %v13351_v34, 7 }
 0x28a   : > { %v13407_v27 = vsel %vm3140_vm2, %v13406_v28, %v13342_v3  ;;  %v13422_v6 = vrot.slane %v13352_v11, 6  ;;  %v13424_v15 = vrot.slane %v13353_v14, 5  ;;  %v13426_v24 = vrot.slane %v13354_v2, 4 }
 0x28b   : > { %v13409_v48 = vsel %vm3143_vm6, %v13408_v51, %v13407_v27  ;;  %v13428_v33 = vrot.slane %v13355_v22, 3  ;;  %v13421_v26 = vsel %vm3140_vm2, %v13420_v35, %v13350_v36  ;;  %v13430_v10 = vrot.slane %v21584_v31, 2 }
 0x28c   : > { %v13411_v45 = vsel %vm3146_vm11, %v13410_v41, %v13409_v48  ;;  %v13432_v52 = vrot.slane %v21586_v37, 1  ;;  %v13423_v5 = vsel %vm3143_vm6, %v13422_v6, %v13421_v26  ;;  %v4751_v38 = vcombine.high %v18016_v47, %v18016_v47 }
 0x28d   : > { %v13413_v39 = vsel %vm3149_vm12, %v13412_v53, %v13411_v45  ;;  %v4758_v0 = vrot.slane %v18016_v47, %v19267_v46  ;;  %v13425_v4 = vsel %vm3146_vm11, %v13424_v15, %v13423_v5  ;;  %v4805_v25 = vrot.slane %v18018_v18, %v19267_v46 }
 0x28e   : > { %v13415_v21 = vsel %vm3152_vm13, %v13414_v17, %v13413_v39  ;;  %v4813_v57 = vcombine.high %v18019_v32, %v18019_v32  ;;  %v13427_v50 = vsel %vm3149_vm12, %v13426_v24, %v13425_v4  ;;  %v4765_v59 = vrot.slane %v4751_v38, %v19267_v46 }
 0x28f   : > { %v13417_v63 = vsel %vm3155_vm14, %v13416_v30, %v13415_v21  ;;  %v4766_v19 = vcombine.high %v4758_v0, %v4758_v0  ;;  %v13429_v13 = vsel %vm3152_vm13, %v13428_v33, %v13427_v50  ;;  %v4820_v16 = vrot.slane %v18019_v32, %v19267_v46 }
 0x290   : > { %v13419_v44 = vsel %vm3158_vm15, %v13418_v56, %v13417_v63  ;;  %v4827_v20 = vrot.slane %v4813_v57, %v19267_v46  ;;  %v13431_v55 = vsel %vm3155_vm14, %v13430_v10, %v13429_v13  ;;  %v4767_v43 = vcombine.high %v4765_v59, %v4765_v59 }
 0x291   : > { %v4837_v58 = vcombine.high %v18020_v8, %v18020_v8  ;;  %v4844_v54 = vrot.slane %v18020_v8, %v19267_v46  ;;  %v13433_v3 = vsel %vm3158_vm15, %v13432_v52, %v13431_v55  ;;  %v4828_v29 = vcombine.high %v4820_v16, %v4820_v16  ;;  %v18264_v55 = vld.sshfl [vmem:[#allocation2 + $0x60] sm:$0x33 pattern:$0x75316420] }
 0x292   : > { %v4829_v49 = vcombine.high %v4827_v20, %v4827_v20  ;;  %v4867_v62 = vrot.slane %v18021_v40, %v19267_v46  ;;  %v13518_v60 = vpack.c.b16 %v13433_v3, %v13419_v44  ;;  %v5363_v34 = vrot.slane %v4765_v59, %v19267_v46 }
 0x293   : > { %v4851_v61 = vrot.slane %v4837_v58, %v19267_v46  ;;  %v4852_v36 = vcombine.high %v4844_v54, %v4844_v54  ;;  %v5377_v11 = vrot.slane %v4766_v19, %v19267_v46  ;;  %v5391_v14 = vrot.slane %v4767_v43, %v19267_v46  ;;  %v18262_v19 = vld.sshfl [vmem:[#allocation2 + $0x48] sm:$0x33 pattern:$0x75316420] }
 0x294   : > { %v5461_v28 = vrot.slane %v4805_v25, %v19267_v46  ;;  %v5475_v51 = vrot.slane %v4827_v20, %v19267_v46  ;;  %18880 = vmatprep.mubr.bf16.mxu0 %v13518_v60  ;;  %v5370_v41 = vrot.slane %v5363_v34, %v19267_v46  ;;  %v5489_v53 = vrot.slane %v4828_v29, %v19267_v46 }
 0x295   : > { %v4853_v47 = vcombine.high %v4851_v61, %v4851_v61  ;;  %v5503_v17 = vrot.slane %v4829_v49, %v19267_v46  ;;  %v5384_v30 = vrot.slane %v5377_v11, %v19267_v46  ;;  %v5398_v18 = vrot.slane %v5391_v14, %v19267_v46 }
 0x296   : > { %v5468_v32 = vrot.slane %v5461_v28, %v19267_v46  ;;  %v5482_v27 = vrot.slane %v5475_v51, %v19267_v46  ;;  %v5496_v56 = vrot.slane %v5489_v53, %v19267_v46  ;;  %v5517_v6 = vrot.slane %v4844_v54, %v19267_v46 }
 0x297   : > { %v5510_v35 = vrot.slane %v5503_v17, %v19267_v46  ;;  %v5531_v48 = vrot.slane %v4851_v61, %v19267_v46  ;;  %v5545_v15 = vrot.slane %v4852_v36, %v19267_v46  ;;  %v5559_v24 = vrot.slane %v4853_v47, %v19267_v46 }
 0x298   : > { %v5573_v33 = vrot.slane %v4867_v62, %v19267_v46  ;;  %v6045_v45 = vunpack.c.l.b16 %v5370_v41  ;;  %v21642_v26 = vrot.slane %v5517_v6, %v19267_v46  ;;  %v6046_v52 = vunpack.c.l.b16 %v5384_v30  ;;  %v18265_v41 = vld.sshfl [vmem:[#allocation2 + $0x64] sm:$0x33 pattern:$0x75316420] }
 0x299   : > { %v21645_v10 = vrot.slane %v5531_v48, %v19267_v46  ;;  %v6047_v39 = vunpack.c.l.b16 %v5398_v18  ;;  %v5552_v5 = vrot.slane %v5545_v15, %v19267_v46  ;;  %v5566_v38 = vrot.slane %v5559_v24, %v19267_v46 }
 0x29a   : > { %v5580_v0 = vrot.slane %v5573_v33, %v19267_v46  ;;  %v6052_v21 = vunpack.c.l.b16 %v5468_v32  ;;  %v6053_v4 = vunpack.c.l.b16 %v5482_v27  ;;  %v6054_v8 = vunpack.c.l.b16 %v5496_v56 }
 0x29b   : > { %v6055_v25 = vunpack.c.l.b16 %v5510_v35  ;;  %v6056_v57 = vunpack.c.l.b16 %v21642_v26  ;;  %v6057_v63 = vunpack.c.l.b16 %v21645_v10  ;;  %v21652_v50 = vunpack.c.l.b16 %v5552_v5  ;;  %v19083_v26 = vld [vmem:[%s23042_s3 + $0xe0] sm:$0xff]  }
 0x29c   : > { %v21654_v40 = vunpack.c.l.b16 %v5566_v38  ;;  %v6060_v59 = vunpack.c.l.b16 %v5580_v0  ;;  %v6121_v44 = vrot.slane %v6046_v52, 7  ;;  %v6123_v13 = vrot.slane %v6047_v39, 6  ;;  %v19077_v0 = vld [vmem:[%s23042_s3 + $0xc8] sm:$0xff]  }
 0x29d   : > { %v6125_v16 = vrot.slane %v13354_v2, 5  ;;  %v6127_v20 = vrot.slane %v13355_v22, 4  ;;  %v6129_v43 = vrot.slane %v21584_v31, 3  ;;  %v6131_v58 = vrot.slane %v21586_v37, 2 }
 0x29e   : > { %v6133_v54 = vrot.slane %v6052_v21, 1  ;;  %v6135_v3 = vrot.slane %v6054_v8, 7  ;;  %v6122_v29 = vsel %vm3140_vm2, %v6121_v44, %v6045_v45  ;;  %v6137_v49 = vrot.slane %v6055_v25, 6 }
 0x29f   : > { %v6139_v62 = vrot.slane %v6056_v57, 5  ;;  %v6141_v7 = vrot.slane %v6057_v63, 4  ;;  %v6124_v2 = vsel %vm3143_vm6, %v6123_v13, %v6122_v29  ;;  %v6143_v22 = vrot.slane %v21652_v50, 3 }
 0x2a0   : > { %v6136_v1 = vsel %vm3140_vm2, %v6135_v3, %v6053_v4  ;;  %v6145_v31 = vrot.slane %v21654_v40, 2  ;;  %v6126_v37 = vsel %vm3146_vm11, %v6125_v16, %v6124_v2  ;;  %v6147_v61 = vrot.slane %v6060_v59, 1  ;;  %v19107_v16 = vld [vmem:[%s23042_s3 + $0xc0] sm:$0xff]  }
 0x2a1   : > { %v6138_v60 = vsel %vm3143_vm6, %v6137_v49, %v6136_v1  ;;  %v12148_v36 = vcombine.high %v18262_v19, %v18262_v19  ;;  %v6128_v34 = vsel %vm3149_vm12, %v6127_v20, %v6126_v37  ;;  %v12155_v14 = vrot.slane %v18262_v19, %v19267_v46 }
 0x2a2   : > { %v6140_v11 = vsel %vm3146_vm11, %v6139_v62, %v6138_v60  ;;  %v12196_v28 = vcombine.high %v18264_v55, %v18264_v55  ;;  %v6130_v51 = vsel %vm3152_vm13, %v6129_v43, %v6128_v34  ;;  %v12203_v17 = vrot.slane %v18264_v55, %v19267_v46  ;;  %v19079_v62 = vld [vmem:[%s23042_s3 + $0xd0] sm:$0xff]  }
 0x2a3   : > { %v6142_v47 = vsel %vm3149_vm12, %v6141_v7, %v6140_v11  ;;  %v12162_v53 = vrot.slane %v12148_v36, %v19267_v46  ;;  %v6132_v30 = vsel %vm3155_vm14, %v6131_v58, %v6130_v51  ;;  %v12163_v32 = vcombine.high %v12155_v14, %v12155_v14 }
 0x2a4   : > { %v6144_v18 = vsel %vm3152_vm13, %v6143_v22, %v6142_v47  ;;  %v12210_v27 = vrot.slane %v12196_v28, %v19267_v46  ;;  %v6134_v56 = vsel %vm3158_vm15, %v6133_v54, %v6132_v30  ;;  %v12211_v48 = vcombine.high %v12203_v17, %v12203_v17 }
 0x2a5   : > { %v6146_v35 = vsel %vm3155_vm14, %v6145_v31, %v6144_v18  ;;  %v12164_v6 = vcombine.high %v12162_v53, %v12162_v53  ;;  %v12220_v33 = vcombine.high %v18265_v41, %v18265_v41  ;;  %v12227_v45 = vrot.slane %v18265_v41, %v19267_v46 }
 0x2a6   : > { %v6148_v15 = vsel %vm3158_vm15, %v6147_v61, %v6146_v35  ;;  %v12212_v24 = vcombine.high %v12210_v27, %v12210_v27  ;;  %v12676_v39 = vrot.slane %v12155_v14, %v19267_v46  ;;  %v12690_v5 = vrot.slane %v12162_v53, %v19267_v46  ;;  %v19081_v53 = vld [vmem:[%s23042_s3 + $0xd8] sm:$0xff]  }
 0x2a7   : > { %v6206_v52 = vpack.c.b16 %v6148_v15, %v6134_v56  ;;  %v12704_v38 = vrot.slane %v12163_v32, %v19267_v46  ;;  %v12234_v21 = vrot.slane %v12220_v33, %v19267_v46  ;;  %v12235_v4 = vcombine.high %v12227_v45, %v12227_v45  ;;  %v18024_v15 = vld.sshfl [vmem:[#allocation2 + $0x68] sm:$0x1 pattern:$0x75316420] }
 0x2a8   : > { %v12718_v8 = vrot.slane %v12164_v6, %v19267_v46  ;;  %v12788_v25 = vrot.slane %v12203_v17, %v19267_v46  ;;  %v12683_v59 = vrot.slane %v12676_v39, %v19267_v46  ;;  %v12697_v19 = vrot.slane %v12690_v5, %v19267_v46 }
 0x2a9   : > { %18785 = vmatmul.mubr.bf16.vlgmr.msra.gmra.mrb[0].mxu1 %v6206_v52  ;;  %v12711_v44 = vrot.slane %v12704_v38, %v19267_v46  ;;  %v12802_v13 = vrot.slane %v12210_v27, %v19267_v46  ;;  %v12236_v20 = vcombine.high %v12234_v21, %v12234_v21  ;;  %v12816_v58 = vrot.slane %v12211_v48, %v19267_v46  ;;  %v18022_v27 = vld.sshfl [vmem:[#allocation2 + $0x60] sm:$0x32 pattern:$0x75316420] }
 0x2aa   : > { %18793 = vmatpush3.bf16.msra.mxu1 %v19107_v16  ;;  %v12725_v55 = vrot.slane %v12718_v8, %v19267_v46  ;;  %v12795_v43 = vrot.slane %v12788_v25, %v19267_v46  ;;  %v12830_v3 = vrot.slane %v12212_v24, %v19267_v46  ;;  %v12844_v29 = vrot.slane %v12227_v45, %v19267_v46 }
 0x2ab   : > { %v12809_v54 = vrot.slane %v12802_v13, %v19267_v46  ;;  %v12858_v49 = vrot.slane %v12234_v21, %v19267_v46  ;;  %18794 = vmatprep.subr.bf16.mxu1 %v19077_v0  ;;  %v12823_v7 = vrot.slane %v12816_v58, %v19267_v46  ;;  %v12872_v2 = vrot.slane %v12235_v4, %v19267_v46 }
 0x2ac   : > { %v12886_v1 = vrot.slane %v12236_v20, %v19267_v46  ;;  %v13358_v22 = vunpack.c.l.b16 %v12683_v59  ;;  %v12837_v31 = vrot.slane %v12830_v3, %v19267_v46  ;;  %v21718_v37 = vrot.slane %v12844_v29, %v19267_v46 }
 0x2ad   : > { %v21721_v60 = vrot.slane %v12858_v49, %v19267_v46  ;;  %v13359_v61 = vunpack.c.l.b16 %v12697_v19  ;;  %v12879_v36 = vrot.slane %v12872_v2, %v19267_v46  ;;  %v13360_v11 = vunpack.c.l.b16 %v12711_v44  ;;  %v18027_v49 = vld.sshfl [vmem:[#allocation2 + $0x80] sm:$0x1 pattern:$0x75316420] }
 0x2ae   : > { %v12893_v34 = vrot.slane %v12886_v1, %v19267_v46  ;;  %v13361_v14 = vunpack.c.l.b16 %v12725_v55  ;;  %18795 = vmatpush3.bf16.msra.mxu1 %v19077_v0  ;;  %v13366_v28 = vunpack.c.l.b16 %v12795_v43  ;;  %v13367_v51 = vunpack.c.l.b16 %v12809_v54  ;;  %v19085_v55 = vld [vmem:[%s23042_s3 + $0xe8] sm:$0xff]   ;;  %v18026_v43 = vld.sshfl [vmem:[#allocation2 + $0x7c] sm:$0x33 pattern:$0x75316420] }
 0x2af   : > { %v13368_v47 = vunpack.c.l.b16 %v12823_v7  ;;  %v13369_v41 = vunpack.c.l.b16 %v12837_v31  ;;  %18796 = vmatprep.subr.bf16.mxu1 %v19079_v62  ;;  %v13370_v17 = vunpack.c.l.b16 %v21718_v37  ;;  %v13371_v30 = vunpack.c.l.b16 %v21721_v60 }
 0x2b0   : > { %v21730_v18 = vunpack.c.l.b16 %v12879_v36  ;;  %v21732_v32 = vunpack.c.l.b16 %v12893_v34  ;;  %v13434_v56 = vrot.slane %v13359_v61, 7  ;;  %v13436_v35 = vrot.slane %v13360_v11, 6 }
 0x2b1   : > { %v13438_v6 = vrot.slane %v13361_v14, 5  ;;  %v13440_v48 = vrot.slane %v6056_v57, 4  ;;  %v13442_v24 = vrot.slane %v6057_v63, 3  ;;  %v13444_v33 = vrot.slane %v21652_v50, 2 }
 0x2b2   : > { %v13446_v45 = vrot.slane %v21654_v40, 1  ;;  %v13448_v52 = vrot.slane %v13367_v51, 7  ;;  %18797 = vmatpush3.bf16.msra.mxu1 %v19079_v62  ;;  %v13435_v39 = vsel %vm3140_vm2, %v13434_v56, %v13358_v22  ;;  %v13450_v5 = vrot.slane %v13368_v47, 6 }
 0x2b3   : > { %v13452_v38 = vrot.slane %v13369_v41, 5  ;;  %v13454_v0 = vrot.slane %v13370_v17, 4  ;;  %18798 = vmatprep.subr.bf16.mxu1 %v19081_v53  ;;  %v13437_v10 = vsel %vm3143_vm6, %v13436_v35, %v13435_v39  ;;  %v13456_v63 = vrot.slane %v13371_v30, 3 }
 0x2b4   : > { %v13449_v57 = vsel %vm3140_vm2, %v13448_v52, %v13366_v28  ;;  %v13458_v50 = vrot.slane %v21730_v18, 2  ;;  %v18025_v40 = vld.sshfl [vmem:[#allocation2 + $0x78] sm:$0x32 pattern:$0x75316420]  ;;  %v13439_v21 = vsel %vm3146_vm11, %v13438_v6, %v13437_v10  ;;  %v13460_v8 = vrot.slane %v21732_v32, 1 }
 0x2b5   : > { %v13451_v4 = vsel %vm3143_vm6, %v13450_v5, %v13449_v57  ;;  %v4875_v25 = vcombine.high %v18022_v27, %v18022_v27  ;;  %v13441_v59 = vsel %vm3149_vm12, %v13440_v48, %v13439_v21  ;;  %v4882_v44 = vrot.slane %v18022_v27, %v19267_v46  ;;  %v19078_v28 = vld [vmem:[%s23042_s3 + $0x1c8] sm:$0xff]   ;;  %v19087_v6 = vld [vmem:[%s23042_s3 + $0xf0] sm:$0xff]   ;;  %v19089_v21 = vld [vmem:[%s23042_s3 + $0xf8] sm:$0xff]  }
 0x2b6   : > { %v13453_v19 = vsel %vm3146_vm11, %v13452_v38, %v13451_v4  ;;  %18799 = vmatpush3.bf16.msra.mxu1 %v19081_v53  ;;  %v4929_v13 = vrot.slane %v18024_v15, %v19267_v46  ;;  %v13443_v16 = vsel %vm3152_vm13, %v13442_v24, %v13441_v59  ;;  %v4937_v54 = vcombine.high %v18025_v40, %v18025_v40 }
 0x2b7   : > { %v13455_v20 = vsel %vm3149_vm12, %v13454_v0, %v13453_v19  ;;  %18800 = vmatprep.subr.bf16.mxu1 %v19083_v26  ;;  %v4889_v58 = vrot.slane %v4875_v25, %v19267_v46  ;;  %v13445_v3 = vsel %vm3155_vm14, %v13444_v33, %v13443_v16  ;;  %v4890_v62 = vcombine.high %v4882_v44, %v4882_v44  ;;  %v19080_v0 = vld [vmem:[%s23042_s3 + $0x1d0] sm:$0xff]  }
 0x2b8   : > { %v13457_v29 = vsel %vm3152_vm13, %v13456_v63, %v13455_v20  ;;  %v4944_v7 = vrot.slane %v18025_v40, %v19267_v46  ;;  %v13447_v2 = vsel %vm3158_vm15, %v13446_v45, %v13445_v3  ;;  %v4951_v31 = vrot.slane %v4937_v54, %v19267_v46  ;;  %v19108_v45 = vld [vmem:[%s23042_s3 + $0x1c0] sm:$0xff]   ;;  %v19082_v20 = vld [vmem:[%s23042_s3 + $0x1d8] sm:$0xff]  }
 0x2b9   : > { %v13459_v1 = vsel %vm3155_vm14, %v13458_v50, %v13457_v29  ;;  %v4891_v22 = vcombine.high %v4889_v58, %v4889_v58  ;;  %v4961_v34 = vcombine.high %v18026_v43, %v18026_v43  ;;  %v4968_v11 = vrot.slane %v18026_v43, %v19267_v46 }
 0x2ba   : > { %v13461_v61 = vsel %vm3158_vm15, %v13460_v8, %v13459_v1  ;;  %18801 = vmatpush3.bf16.msra.mxu1 %v19083_v26  ;;  %v4952_v36 = vcombine.high %v4944_v7, %v4944_v7  ;;  %v4953_v51 = vcombine.high %v4951_v31, %v4951_v31  ;;  %v4991_v47 = vrot.slane %v18027_v49, %v19267_v46 }
 0x2bb   : > { %v13519_v14 = vpack.c.b16 %v13461_v61, %v13447_v2  ;;  %18802 = vmatprep.subr.bf16.mxu1 %v19085_v55  ;;  %v5587_v41 = vrot.slane %v4889_v58, %v19267_v46  ;;  %v4975_v53 = vrot.slane %v4961_v34, %v19267_v46  ;;  %v4976_v27 = vcombine.high %v4968_v11, %v4968_v11 }
 0x2bc   : > { %v5601_v56 = vrot.slane %v4890_v62, %v19267_v46  ;;  %v5615_v35 = vrot.slane %v4891_v22, %v19267_v46  ;;  %v5685_v15 = vrot.slane %v4929_v13, %v19267_v46  ;;  %v5699_v24 = vrot.slane %v4951_v31, %v19267_v46  ;;  %v18266_v31 = vld.sshfl [vmem:[#allocation2 + $0x78] sm:$0x33 pattern:$0x75316420] }
 0x2bd   : > { %18881 = vmatmul.mubr.bf16.vlgmr.msra.gmra.mrb[0].mxu0 %v13519_v14  ;;  %v5594_v48 = vrot.slane %v5587_v41, %v19267_v46  ;;  %v5713_v33 = vrot.slane %v4952_v36, %v19267_v46  ;;  %v4977_v52 = vcombine.high %v4975_v53, %v4975_v53  ;;  %v6153_v38 = vrot.slane %v13370_v17, 5  ;;  %v18268_v14 = vld.sshfl [vmem:[#allocation2 + $0x90] sm:$0x33 pattern:$0x75316420] }
 0x2be   : > { %18889 = vmatpush3.bf16.msra.mxu0 %v19108_v45  ;;  %18803 = vmatpush3.bf16.msra.mxu1 %v19085_v55  ;;  %v5608_v39 = vrot.slane %v5601_v56, %v19267_v46  ;;  %v5622_v5 = vrot.slane %v5615_v35, %v19267_v46  ;;  %v5692_v26 = vrot.slane %v5685_v15, %v19267_v46  ;;  %v6155_v36 = vrot.slane %v13371_v30, 4  ;;  %v19086_v45 = vld [vmem:[%s23042_s3 + $0x1e8] sm:$0xff]  }
 0x2bf   : > { %18890 = vmatprep.subr.bf16.mxu0 %v19078_v28  ;;  %v5706_v10 = vrot.slane %v5699_v24, %v19267_v46  ;;  %v5720_v57 = vrot.slane %v5713_v33, %v19267_v46  ;;  %v5727_v63 = vrot.slane %v4953_v51, %v19267_v46  ;;  %v5741_v50 = vrot.slane %v4968_v11, %v19267_v46 }
 0x2c0   : > { %v5755_v40 = vrot.slane %v4975_v53, %v19267_v46  ;;  %v5769_v37 = vrot.slane %v4976_v27, %v19267_v46  ;;  %v5783_v17 = vrot.slane %v4977_v52, %v19267_v46  ;;  %18804 = vmatprep.subr.bf16.mxu1 %v19087_v6  ;;  %v5797_v8 = vrot.slane %v4991_v47, %v19267_v46 }
 0x2c1   : > { %v5734_v4 = vrot.slane %v5727_v63, %v19267_v46  ;;  %v6061_v25 = vunpack.c.l.b16 %v5594_v48  ;;  %v6062_v59 = vunpack.c.l.b16 %v5608_v39  ;;  %v21811_v19 = vrot.slane %v5741_v50, %v19267_v46 }
 0x2c2   : > { %18891 = vmatpush3.bf16.msra.mxu0 %v19078_v28  ;;  %v21814_v44 = vrot.slane %v5755_v40, %v19267_v46  ;;  %v5776_v13 = vrot.slane %v5769_v37, %v19267_v46  ;;  %v5790_v16 = vrot.slane %v5783_v17, %v19267_v46  ;;  %v5804_v55 = vrot.slane %v5797_v8, %v19267_v46  ;;  %v19084_v28 = vld [vmem:[%s23042_s3 + $0x1e0] sm:$0xff]  }
 0x2c3   : > { %18892 = vmatprep.subr.bf16.mxu0 %v19080_v0  ;;  %v6063_v43 = vunpack.c.l.b16 %v5622_v5  ;;  %v6068_v58 = vunpack.c.l.b16 %v5692_v26  ;;  %v6069_v54 = vunpack.c.l.b16 %v5706_v10  ;;  %18805 = vmatpush3.bf16.msra.mxu1 %v19087_v6  ;;  %v6070_v3 = vunpack.c.l.b16 %v5720_v57  ;;  %v18269_v5 = vld.sshfl [vmem:[#allocation2 + $0x94] sm:$0x33 pattern:$0x75316420] }
 0x2c4   : > { %v6071_v29 = vunpack.c.l.b16 %v5734_v4  ;;  %v6072_v49 = vunpack.c.l.b16 %v21811_v19  ;;  %v6073_v62 = vunpack.c.l.b16 %v21814_v44  ;;  %18806 = vmatprep.subr.bf16.mxu1 %v19089_v21  ;;  %v21824_v7 = vunpack.c.l.b16 %v5776_v13 }
 0x2c5   : > { %v21826_v2 = vunpack.c.l.b16 %v5790_v16  ;;  %v6076_v1 = vunpack.c.l.b16 %v5804_v55  ;;  %v6149_v22 = vrot.slane %v6062_v59, 7  ;;  %v6151_v61 = vrot.slane %v6063_v43, 6  ;;  %v19088_v55 = vld [vmem:[%s23042_s3 + $0x1f0] sm:$0xff]  }
 0x2c6   : > { %18893 = vmatpush3.bf16.msra.mxu0 %v19080_v0  ;;  %v6157_v34 = vrot.slane %v21730_v18, 3  ;;  %v6159_v11 = vrot.slane %v21732_v32, 2  ;;  %v6161_v47 = vrot.slane %v6068_v58, 1  ;;  %v6163_v41 = vrot.slane %v6070_v3, 7 }
 0x2c7   : > { %18894 = vmatprep.subr.bf16.mxu0 %v19082_v20  ;;  %v6150_v51 = vsel %vm3140_vm2, %v6149_v22, %v6061_v25  ;;  %v6165_v53 = vrot.slane %v6071_v29, 6  ;;  %18807 = vmatpush3.bf16.msra.mxu1 %v19089_v21  ;;  %v6167_v60 = vrot.slane %v6072_v49, 5  ;;  %v6169_v30 = vrot.slane %v6073_v62, 4 }
 0x2c8   : > { %v6152_v27 = vsel %vm3143_vm6, %v6151_v61, %v6150_v51  ;;  %v6171_v18 = vrot.slane %v21824_v7, 3  ;;  %v6164_v56 = vsel %vm3140_vm2, %v6163_v41, %v6069_v54  ;;  %v6173_v35 = vrot.slane %v21826_v2, 2  ;;  %v19090_v41 = vld [vmem:[%s23042_s3 + $0x1f8] sm:$0xff]  }
 0x2c9   : > { %v6154_v32 = vsel %vm3146_vm11, %v6153_v38, %v6152_v27  ;;  %v6175_v6 = vrot.slane %v6076_v1, 1  ;;  %v6166_v15 = vsel %vm3143_vm6, %v6165_v53, %v6164_v56  ;;  %v12244_v24 = vcombine.high %v18266_v31, %v18266_v31 }
 0x2ca   : > { %18895 = vmatpush3.bf16.msra.mxu0 %v19082_v20  ;;  %v6156_v48 = vsel %vm3149_vm12, %v6155_v36, %v6154_v32  ;;  %v12251_v33 = vrot.slane %v18266_v31, %v19267_v46  ;;  %v6168_v39 = vsel %vm3146_vm11, %v6167_v60, %v6166_v15  ;;  %v12292_v38 = vcombine.high %v18268_v14, %v18268_v14 }
 0x2cb   : > { %18896 = vmatprep.subr.bf16.mxu0 %v19084_v28  ;;  %v6158_v52 = vsel %vm3152_vm13, %v6157_v34, %v6156_v48  ;;  %v12299_v0 = vrot.slane %v18268_v14, %v19267_v46  ;;  %v6170_v10 = vsel %vm3149_vm12, %v6169_v30, %v6168_v39  ;;  %v12258_v57 = vrot.slane %v12244_v24, %v19267_v46 }
 0x2cc   : > { %v6160_v26 = vsel %vm3155_vm14, %v6159_v11, %v6158_v52  ;;  %v12259_v63 = vcombine.high %v12251_v33, %v12251_v33  ;;  %v6172_v40 = vsel %vm3152_vm13, %v6171_v18, %v6170_v10  ;;  %v12306_v37 = vrot.slane %v12292_v38, %v19267_v46 }
 0x2cd   : > { %v6162_v50 = vsel %vm3158_vm15, %v6161_v47, %v6160_v26  ;;  %v12307_v17 = vcombine.high %v12299_v0, %v12299_v0  ;;  %v6174_v21 = vsel %vm3155_vm14, %v6173_v35, %v6172_v40  ;;  %v12260_v4 = vcombine.high %v12258_v57, %v12258_v57 }
 0x2ce   : > { %18897 = vmatpush3.bf16.msra.mxu0 %v19084_v28  ;;  %v12316_v8 = vcombine.high %v18269_v5, %v18269_v5  ;;  %v12323_v25 = vrot.slane %v18269_v5, %v19267_v46  ;;  %v6176_v59 = vsel %vm3158_vm15, %v6175_v6, %v6174_v21  ;;  %v12308_v13 = vcombine.high %v12306_v37, %v12306_v37  ;;  %v18030_v21 = vld.sshfl [vmem:[#allocation2 + $0x98] sm:$0x1 pattern:$0x75316420] }
 0x2cf   : > { %18898 = vmatprep.subr.bf16.mxu0 %v19086_v45  ;;  %v12900_v16 = vrot.slane %v12251_v33, %v19267_v46  ;;  %v12914_v20 = vrot.slane %v12258_v57, %v19267_v46  ;;  %v6207_v43 = vpack.c.b16 %v6176_v59, %v6162_v50  ;;  %v12928_v3 = vrot.slane %v12259_v63, %v19267_v46  ;;  %v18028_v63 = vld.sshfl [vmem:[#allocation2 + $0x90] sm:$0x32 pattern:$0x75316420] }
 0x2d0   : > { %v12330_v58 = vrot.slane %v12316_v8, %v19267_v46  ;;  %v12331_v54 = vcombine.high %v12323_v25, %v12323_v25  ;;  %v12942_v22 = vrot.slane %v12260_v4, %v19267_v46  ;;  %v13012_v31 = vrot.slane %v12299_v0, %v19267_v46  ;;  %v18031_v4 = vld.sshfl [vmem:[#allocation2 + $0xa8] sm:$0x32 pattern:$0x75316420] }
 0x2d1   : > { %v12907_v29 = vrot.slane %v12900_v16, %v19267_v46  ;;  %v12921_v1 = vrot.slane %v12914_v20, %v19267_v46  ;;  %18788 = vmatprep.mubr.bf16.mxu1 %v6207_v43  ;;  %v12935_v36 = vrot.slane %v12928_v3, %v19267_v46  ;;  %v13026_v34 = vrot.slane %v12306_v37, %v19267_v46 }
 0x2d2   : > { %18899 = vmatpush3.bf16.msra.mxu0 %v19086_v45  ;;  %v12332_v61 = vcombine.high %v12330_v58, %v12330_v58  ;;  %v13468_v11 = vrot.slane %v6072_v49, 4  ;;  %v12949_v14 = vrot.slane %v12942_v22, %v19267_v46  ;;  %v13019_v28 = vrot.slane %v13012_v31, %v19267_v46  ;;  %v18032_v31 = vld.sshfl [vmem:[#allocation2 + $0xac] sm:$0x33 pattern:$0x75316420] }
 0x2d3   : > { %v13040_v51 = vrot.slane %v12307_v17, %v19267_v46  ;;  %v13054_v47 = vrot.slane %v12308_v13, %v19267_v46  ;;  %18900 = vmatprep.subr.bf16.mxu0 %v19088_v55  ;;  %v13033_v53 = vrot.slane %v13026_v34, %v19267_v46  ;;  %v13068_v27 = vrot.slane %v12323_v25, %v19267_v46 }
 0x2d4   : > { %v13082_v19 = vrot.slane %v12330_v58, %v19267_v46  ;;  %v13096_v49 = vrot.slane %v12331_v54, %v19267_v46  ;;  %v13110_v18 = vrot.slane %v12332_v61, %v19267_v46  ;;  %v13374_v32 = vunpack.c.l.b16 %v12907_v29 }
 0x2d5   : > { %v13047_v60 = vrot.slane %v13040_v51, %v19267_v46  ;;  %v13061_v30 = vrot.slane %v13054_v47, %v19267_v46  ;;  %v21893_v56 = vrot.slane %v13068_v27, %v19267_v46  ;;  %v13375_v48 = vunpack.c.l.b16 %v12921_v1 }
 0x2d6   : > { %v21896_v35 = vrot.slane %v13082_v19, %v19267_v46  ;;  %v13103_v6 = vrot.slane %v13096_v49, %v19267_v46  ;;  %18901 = vmatpush3.bf16.msra.mxu0 %v19088_v55  ;;  %v13117_v15 = vrot.slane %v13110_v18, %v19267_v46  ;;  %v13376_v24 = vunpack.c.l.b16 %v12935_v36 }
 0x2d7   : > { %v13377_v33 = vunpack.c.l.b16 %v12949_v14  ;;  %v13382_v45 = vunpack.c.l.b16 %v13019_v28  ;;  %18902 = vmatprep.subr.bf16.mxu0 %v19090_v41  ;;  %v13383_v52 = vunpack.c.l.b16 %v13033_v53  ;;  %v13384_v39 = vunpack.c.l.b16 %v13047_v60  ;;  %v18033_v28 = vld.sshfl [vmem:[#allocation2 + $0xb0] sm:$0x1 pattern:$0x75316420] }
 0x2d8   : > { %v13385_v5 = vunpack.c.l.b16 %v13061_v30  ;;  %v13386_v38 = vunpack.c.l.b16 %v21893_v56  ;;  %v13387_v0 = vunpack.c.l.b16 %v21896_v35  ;;  %v21902_v26 = vunpack.c.l.b16 %v13103_v6 }
 0x2d9   : > { %v21904_v10 = vunpack.c.l.b16 %v13117_v15  ;;  %v13462_v57 = vrot.slane %v13375_v48, 7  ;;  %v13464_v50 = vrot.slane %v13376_v24, 6  ;;  %v13466_v40 = vrot.slane %v13377_v33, 5 }
 0x2da   : > { %v13470_v37 = vrot.slane %v6073_v62, 3  ;;  %v13472_v17 = vrot.slane %v21824_v7, 2  ;;  %18903 = vmatpush3.bf16.msra.mxu0 %v19090_v41  ;;  %v13474_v25 = vrot.slane %v21826_v2, 1  ;;  %v13476_v59 = vrot.slane %v13383_v52, 7 }
 0x2db   : > { %v13463_v8 = vsel %vm3140_vm2, %v13462_v57, %v13374_v32  ;;  %v13478_v13 = vrot.slane %v13384_v39, 6  ;;  %v13480_v20 = vrot.slane %v13385_v5, 5  ;;  %v13482_v55 = vrot.slane %v13386_v38, 4 }
 0x2dc   : > { %v13465_v16 = vsel %vm3143_vm6, %v13464_v50, %v13463_v8  ;;  %v13484_v44 = vrot.slane %v13387_v0, 3  ;;  %v13477_v7 = vsel %vm3140_vm2, %v13476_v59, %v13382_v45  ;;  %v13486_v43 = vrot.slane %v21902_v26, 2 }
 0x2dd   : > { %v13467_v62 = vsel %vm3146_vm11, %v13466_v40, %v13465_v16  ;;  %v13488_v58 = vrot.slane %v21904_v10, 1  ;;  %v13479_v54 = vsel %vm3143_vm6, %v13478_v13, %v13477_v7  ;;  %v4999_v3 = vcombine.high %v18028_v63, %v18028_v63 }
 0x2de   : > { %v13469_v2 = vsel %vm3149_vm12, %v13468_v11, %v13467_v62  ;;  %v5006_v29 = vrot.slane %v18028_v63, %v19267_v46  ;;  %v13481_v22 = vsel %vm3146_vm11, %v13480_v20, %v13479_v54  ;;  %v5053_v61 = vrot.slane %v18030_v21, %v19267_v46 }
 0x2df   : > { %v13471_v1 = vsel %vm3152_vm13, %v13470_v37, %v13469_v2  ;;  %v5061_v36 = vcombine.high %v18031_v4, %v18031_v4  ;;  %v13483_v14 = vsel %vm3149_vm12, %v13482_v55, %v13481_v22  ;;  %v5013_v11 = vrot.slane %v4999_v3, %v19267_v46 }
 0x2e0   : > { %v13473_v34 = vsel %vm3155_vm14, %v13472_v17, %v13471_v1  ;;  %v5014_v51 = vcombine.high %v5006_v29, %v5006_v29  ;;  %v13485_v41 = vsel %vm3152_vm13, %v13484_v44, %v13483_v14  ;;  %v5068_v53 = vrot.slane %v18031_v4, %v19267_v46 }
 0x2e1   : > { %v13475_v47 = vsel %vm3158_vm15, %v13474_v25, %v13473_v34  ;;  %v5075_v27 = vrot.slane %v5061_v36, %v19267_v46  ;;  %v13487_v19 = vsel %vm3155_vm14, %v13486_v43, %v13485_v41  ;;  %v5015_v49 = vcombine.high %v5013_v11, %v5013_v11 }
 0x2e2   : > { %v5085_v60 = vcombine.high %v18032_v31, %v18032_v31  ;;  %v5092_v30 = vrot.slane %v18032_v31, %v19267_v46  ;;  %v13489_v18 = vsel %vm3158_vm15, %v13488_v58, %v13487_v19  ;;  %v5076_v32 = vcombine.high %v5068_v53, %v5068_v53 }
 0x2e3   : > { %v5077_v6 = vcombine.high %v5075_v27, %v5075_v27  ;;  %v5115_v48 = vrot.slane %v18033_v28, %v19267_v46  ;;  %v13520_v15 = vpack.c.b16 %v13489_v18, %v13475_v47  ;;  %v5811_v45 = vrot.slane %v5013_v11, %v19267_v46 }
 0x2e4   : > { %v5099_v24 = vrot.slane %v5085_v60, %v19267_v46  ;;  %v5100_v33 = vcombine.high %v5092_v30, %v5092_v30  ;;  %v5825_v52 = vrot.slane %v5014_v51, %v19267_v46  ;;  %v5839_v39 = vrot.slane %v5015_v49, %v19267_v46 }
 0x2e5   : > { %v5909_v5 = vrot.slane %v5053_v61, %v19267_v46  ;;  %v5923_v57 = vrot.slane %v5075_v27, %v19267_v46  ;;  %18884 = vmatprep.mubr.bf16.mxu0 %v13520_v15  ;;  %v5818_v50 = vrot.slane %v5811_v45, %v19267_v46  ;;  %v5937_v40 = vrot.slane %v5076_v32, %v19267_v46  ;;  %v500_v15 = vld [vmem:[#allocation2 + $0xc0] sm:$0x1] }
 0x2e6   : > { %v5101_v63 = vcombine.high %v5099_v24, %v5099_v24  ;;  %v5951_v37 = vrot.slane %v5077_v6, %v19267_v46  ;;  %v5832_v17 = vrot.slane %v5825_v52, %v19267_v46  ;;  %v5846_v21 = vrot.slane %v5839_v39, %v19267_v46 }
 0x2e7   : > { %v5916_v4 = vrot.slane %v5909_v5, %v19267_v46  ;;  %v5930_v8 = vrot.slane %v5923_v57, %v19267_v46  ;;  %v5944_v25 = vrot.slane %v5937_v40, %v19267_v46  ;;  %v5965_v13 = vrot.slane %v5092_v30, %v19267_v46  ;;  %v18608_v30 = vld [vmem:[%s19169_s28 + $0x78] sm:$0xff]   ;;  %v19109_v40 = vld [vmem:[%s23040_s1] ss:$0 sm:$0xff] }
 0x2e8   : > { %v5958_v59 = vrot.slane %v5951_v37, %v19267_v46  ;;  %v5979_v16 = vrot.slane %v5099_v24, %v19267_v46  ;;  %v5993_v20 = vrot.slane %v5100_v33, %v19267_v46  ;;  %v6007_v55 = vrot.slane %v5101_v63, %v19267_v46 }
 0x2e9   : > { %v6021_v44 = vrot.slane %v5115_v48, %v19267_v46  ;;  %v6077_v62 = vunpack.c.l.b16 %v5818_v50  ;;  %v21958_v7 = vrot.slane %v5965_v13, %v19267_v46  ;;  %v6078_v58 = vunpack.c.l.b16 %v5832_v17 }
 0x2ea   : > { %v21961_v43 = vrot.slane %v5979_v16, %v19267_v46  ;;  %v6079_v2 = vunpack.c.l.b16 %v5846_v21  ;;  %v6000_v54 = vrot.slane %v5993_v20, %v19267_v46  ;;  %v6014_v3 = vrot.slane %v6007_v55, %v19267_v46  ;;  %v19110_v16 = vld [vmem:[%s23041_s2] ss:$0 sm:$0xff] }
 0x2eb   : > { %v6028_v29 = vrot.slane %v6021_v44, %v19267_v46  ;;  %v6084_v1 = vunpack.c.l.b16 %v5916_v4  ;;  %v6085_v22 = vunpack.c.l.b16 %v5930_v8  ;;  %v6086_v31 = vunpack.c.l.b16 %v5944_v25 }
 0x2ec   : > { %v6087_v61 = vunpack.c.l.b16 %v5958_v59  ;;  %v6088_v36 = vunpack.c.l.b16 %v21958_v7  ;;  %v6089_v34 = vunpack.c.l.b16 %v21961_v43  ;;  %v21968_v14 = vunpack.c.l.b16 %v6000_v54 }
 0x2ed   : > { %v21970_v28 = vunpack.c.l.b16 %v6014_v3  ;;  %v6092_v11 = vunpack.c.l.b16 %v6028_v29  ;;  %v6177_v51 = vrot.slane %v6078_v58, 7  ;;  %v6179_v47 = vrot.slane %v6079_v2, 6 }
 0x2ee   : > { %v6181_v41 = vrot.slane %v13386_v38, 5  ;;  %v6183_v53 = vrot.slane %v13387_v0, 4  ;;  %v6185_v27 = vrot.slane %v21902_v26, 3  ;;  %v6187_v19 = vrot.slane %v21904_v10, 2 }
 0x2ef   : > { %v6189_v49 = vrot.slane %v6084_v1, 1  ;;  %v6191_v60 = vrot.slane %v6086_v31, 7  ;;  %v6178_v18 = vsel %vm3140_vm2, %v6177_v51, %v6077_v62  ;;  %v6193_v32 = vrot.slane %v6087_v61, 6 }
 0x2f0   : > { %v6195_v6 = vrot.slane %v6088_v36, 5  ;;  %v6197_v48 = vrot.slane %v6089_v34, 4  ;;  %v6180_v24 = vsel %vm3143_vm6, %v6179_v47, %v6178_v18  ;;  %v6199_v35 = vrot.slane %v21968_v14, 3 }
 0x2f1   : > { %v6192_v56 = vsel %vm3140_vm2, %v6191_v60, %v6085_v22  ;;  %v6201_v38 = vrot.slane %v21970_v28, 2  ;;  %v18270_v0 = vld.sshfl [vmem:[#allocation2 + $0xa8] sm:$0x33 pattern:$0x75316420]  ;;  %v6182_v26 = vsel %vm3146_vm11, %v6181_v41, %v6180_v24  ;;  %v6203_v33 = vrot.slane %v6092_v11, 1 }
 0x2f2   : > { %v6194_v10 = vsel %vm3143_vm6, %v6193_v32, %v6192_v56  ;;  %v18572_v45 = vunpack.c.l.bf16 %v18608_v30  ;;  %v6184_v52 = vsel %vm3149_vm12, %v6183_v53, %v6182_v26  ;;  %v18573_v5 = vunpack.c.h.bf16 %v18608_v30 }
 0x2f3   : > { %v6196_v39 = vsel %vm3146_vm11, %v6195_v6, %v6194_v10  ;;  %v501_v57 = vsel %vm19234_vm3, 0, %v500_v15  ;;  %v6186_v63 = vsel %vm3152_vm13, %v6185_v27, %v6184_v52  ;;  %v12340_v17 = vcombine.high %v18270_v0, %v18270_v0 }
 0x2f4   : > { %v6198_v50 = vsel %vm3149_vm12, %v6197_v48, %v6196_v39  ;;  %v355_v37 = vmul.f32 %v19109_v40, %v18572_v45  ;;  %502 = vst [vmem:[#allocation2 + $0xc0] sm:$0x1] %v501_v57  ;;  %v6188_v21 = vsel %vm3155_vm14, %v6187_v19, %v6186_v63  ;;  %v356_v8 = vmul.f32 %v19109_v40, %v18573_v5  ;;  %v18060_v57 = vld.sshfl [vmem:[#allocation2 + $0x24] sm:$0x33 pattern:$0x75316420] }
 0x2f5   : > { %v6200_v4 = vsel %vm3152_vm13, %v6199_v35, %v6198_v50  ;;  %v12347_v25 = vrot.slane %v18270_v0, %v19267_v46  ;;  %v6190_v59 = vsel %vm3158_vm15, %v6189_v49, %v6188_v21  ;;  %v12354_v55 = vrot.slane %v12340_v17, %v19267_v46  ;;  %v18058_v49 = vld.sshfl [vmem:[#allocation2 + $0xc] sm:$0x33 pattern:$0x75316420] }
 0x2f6   : > { %v6202_v13 = vsel %vm3155_vm14, %v6201_v38, %v6200_v4  ;;  %v394_v20 = vadd.f32 %v19110_v16, %v355_v37  ;;  %v395_v62 = vadd.f32 %v19110_v16, %v356_v8  ;;  %v13496_v31 = vrot.slane %v6088_v36, 4  ;;  %v18059_v36 = vld.sshfl [vmem:[#allocation2 + $0x10] sm:$0x33 pattern:$0x75316420] }
 0x2f7   : > { %v6204_v44 = vsel %vm3158_vm15, %v6203_v33, %v6202_v13  ;;  %v12355_v7 = vcombine.high %v12347_v25, %v12347_v25  ;;  %v13124_v43 = vrot.slane %v12347_v25, %v19267_v46  ;;  %v12356_v54 = vcombine.high %v12354_v55, %v12354_v55  ;;  %v18061_v21 = vld.sshfl [vmem:[#allocation2 + $0x28] sm:$0x33 pattern:$0x75316420] }
 0x2f8   : > { %v6208_v58 = vpack.c.b16 %v6204_v44, %v6190_v59  ;;  %v426_v2 = vmax.f32 %v394_v20, 0.0  ;;  %v13138_v3 = vrot.slane %v12354_v55, %v19267_v46  ;;  %v427_v29 = vmax.f32 %v395_v62, 0.0 }
 0x2f9   : > { %v13131_v1 = vrot.slane %v13124_v43, %v19267_v46  ;;  %v13152_v22 = vrot.slane %v12355_v7, %v19267_v46  ;;  %v13166_v51 = vrot.slane %v12356_v54, %v19267_v46  ;;  %v13498_v47 = vrot.slane %v6089_v34, 3 }
 0x2fa   : > { %18789 = vmatmul.mubr.bf16.gmra.mrb[4].mxu1 %v6208_v58  ;;  %v18500_v61 = vpack.c.bf16 %v426_v2, %v426_v2  ;;  %v13145_v11 = vrot.slane %v13138_v3, %v19267_v46  ;;  %v18501_v41 = vpack.c.bf16 %v427_v29, %v427_v29  ;;  %v13500_v19 = vrot.slane %v21968_v14, 2 }
 0x2fb   : > { %v13159_v53 = vrot.slane %v13152_v22, %v19267_v46  ;;  %v13390_v27 = vunpack.c.l.b16 %v13131_v1  ;;  %v13173_v18 = vrot.slane %v13166_v51, %v19267_v46  ;;  %v13502_v24 = vrot.slane %v21970_v28, 1  ;;  %v1062_v26 = vld [vmem:[#allocation2 + $0xc0] sm:$0xf] }
 0x2fc   : > { %v891_v60 = vshrl.u32 %v18500_v61, 16  ;;  %v894_v30 = vshll.u32 %v18500_v61, 16  ;;  %v13391_v32 = vunpack.c.l.b16 %v13145_v11  ;;  %v899_v6 = vshrl.u32 %v18501_v41, 16 }
 0x2fd   : > { %v902_v48 = vshll.u32 %v18501_v41, 16  ;;  %v13392_v15 = vunpack.c.l.b16 %v13159_v53  ;;  %v13393_v34 = vunpack.c.l.b16 %v13173_v18  ;;  %v6373_v38 = vcombine.high %v18058_v49, %v18058_v49 }
 0x2fe   : > { %v893_v56 = vrot.slane %v891_v60, 7  ;;  %v13490_v35 = vrot.slane %v13391_v32, 7  ;;  %v22015_v0 = vrot.slane %v899_v6, 7  ;;  %v6380_v10 = vrot.slane %v18058_v49, %v19267_v46 }
 0x2ff   : > { %v13492_v14 = vrot.slane %v13392_v15, 6  ;;  %v6397_v33 = vcombine.high %v18059_v36, %v18059_v36  ;;  %v13494_v5 = vrot.slane %v13393_v34, 5  ;;  %v6387_v50 = vrot.slane %v6373_v38, %v19267_v46 }
 0x300   : > { %v896_v45 = vor.u32 %v894_v30, %v893_v56  ;;  %v897_v52 = vrot.slane %v893_v56, 4  ;;  %v13491_v39 = vsel %vm3140_vm2, %v13490_v35, %v13390_v27  ;;  %v904_v63 = vor.u32 %v902_v48, %v22015_v0 }
 0x301   : > { %v13493_v28 = vsel %vm3143_vm6, %v13492_v14, %v13491_v39  ;;  %v6388_v40 = vcombine.high %v6380_v10, %v6380_v10  ;;  %v6404_v4 = vrot.slane %v18059_v36, %v19267_v46  ;;  %v6411_v8 = vrot.slane %v6397_v33, %v19267_v46 }
 0x302   : > { %v1063_v37 = vsel %vm19333_vm10, %v896_v45, %v1062_v26  ;;  %v13495_v17 = vsel %vm3146_vm11, %v13494_v5, %v13493_v28  ;;  %v905_v25 = vsel %vm19262_vm7, %v897_v52, %v904_v63  ;;  %v6389_v13 = vcombine.high %v6387_v50, %v6387_v50  ;;  %v22096_v26 = vld [vmem:[%s23042_s3 + $0x200] sm:$0xff]  }
 0x303   : > { %1064 = vst [vmem:[#allocation2 + $0xc0] sm:$0xf] %v1063_v37  ;;  %v13497_v59 = vsel %vm3149_vm12, %v13496_v31, %v13495_v17  ;;  %v6421_v16 = vcombine.high %v18060_v57, %v18060_v57  ;;  %1065 = vst [vmem:[#allocation2 + $0xc4] sm:$0xf] %v905_v25  ;;  %v6412_v12 = vcombine.high %v6404_v4, %v6404_v4  ;;  %18912 = vmatprep.subr.bf16.mxu0 %v22096_v26 }
 0x304   : > { %v13499_v20 = vsel %vm3152_vm13, %v13498_v47, %v13497_v59  ;;  %v6413_v55 = vcombine.high %v6411_v8, %v6411_v8  ;;  %v6428_v44 = vrot.slane %v18060_v57, %v19267_v46  ;;  %v6445_v43 = vcombine.high %v18061_v21, %v18061_v21  ;;  %18936 = vmatprep.subr.bf16.mxu1 %v22096_v26 }
 0x305   : > { %v13501_v62 = vsel %vm3155_vm14, %v13500_v19, %v13499_v20  ;;  %v22034_v7 = vrot.slane %v6421_v16, %v19267_v46  ;;  %v22037_v42 = vrot.slane %v18061_v21, %v19267_v46  ;;  %v6773_v54 = vrot.slane %v6380_v10, %v19267_v46 }
 0x306   : > { %v22040_v58 = vsel %vm3158_vm15, %v13502_v24, %v13501_v62  ;;  %v6436_v2 = vcombine.high %v6428_v44, %v6428_v44  ;;  %v6787_v3 = vrot.slane %v6387_v50, %v19267_v46  ;;  %v22047_v1 = vrot.slane %v6445_v43, %v19267_v46 }
 0x307   : > { %v6437_v29 = vcombine.high %v22034_v7, %v22034_v7  ;;  %v6460_v22 = vcombine.high %v22037_v42, %v22037_v42  ;;  %v22052_v31 = vrot.slane %v6388_v40, %v19267_v46  ;;  %v22055_v61 = vrot.slane %v6773_v54, %v19267_v46 }
 0x308   : > { %v22058_v11 = vrot.slane %v6787_v3, %v19267_v46  ;;  %v22061_v51 = vrot.slane %v6389_v13, %v19267_v46  ;;  %v6829_v47 = vrot.slane %v6404_v4, %v19267_v46  ;;  %v6461_v41 = vcombine.high %v22047_v1, %v22047_v1 }
 0x309   : > { %v6808_v53 = vrot.slane %v22052_v31, %v19267_v46  ;;  %v6843_v27 = vrot.slane %v6411_v8, %v19267_v46  ;;  %v22070_v19 = vrot.slane %v6412_v12, %v19267_v46  ;;  %v22078_v18 = vrot.slane %v6413_v55, %v19267_v46 }
 0x30a   : > { %v18272_v49 = vld.sshfl [vmem:[#allocation2 + $0xc0] sm:$0x33 pattern:$0x75316420]  ;;  %v6822_v60 = vrot.slane %v22061_v51, %v19267_v46  ;;  %v22075_v30 = vrot.slane %v6829_v47, %v19267_v46  ;;  %v6885_v32 = vrot.slane %v6428_v44, %v19267_v46  ;;  %v6899_v45 = vrot.slane %v22034_v7, %v19267_v46 }
 0x30b   : > { %v18273_v36 = vld.sshfl [vmem:[#allocation2 + $0xc4] sm:$0x33 pattern:$0x75316420]  ;;  %v12388_v6 = vcombine.high %v18272_v49, %v18272_v49  ;;  %v12395_v48 = vrot.slane %v18272_v49, %v19267_v46  ;;  %v22083_v15 = vrot.slane %v6843_v27, %v19267_v46  ;;  %v6864_v24 = vrot.slane %v22070_v19, %v19267_v46 }
 0x30c   : > { %v12412_v56 = vcombine.high %v18273_v36, %v18273_v36  ;;  %v12419_v34 = vrot.slane %v18273_v36, %v19267_v46  ;;  %v6878_v35 = vrot.slane %v22078_v18, %v19267_v46  ;;  %v22091_v38 = vrot.slane %v6885_v32, %v19267_v46  ;;  %v18298_v19 = vld.sshfl [vmem:[#allocation2 + $0x18] sm:$0x33 pattern:$0x75316420] }
 0x30d   : > { %v12402_v14 = vrot.slane %v12388_v6, %v19267_v46  ;;  %v12403_v10 = vcombine.high %v12395_v48, %v12395_v48  ;;  %v13236_v33 = vrot.slane %v12395_v48, %v19267_v46  ;;  %v22105_v57 = vrot.slane %v6436_v2, %v19267_v46  ;;  %v18299_v18 = vld.sshfl [vmem:[#allocation2 + $0x1c] sm:$0x33 pattern:$0x75316420] }
 0x30e   : > { %v12426_v52 = vrot.slane %v12412_v56, %v19267_v46  ;;  %v12427_v39 = vcombine.high %v12419_v34, %v12419_v34  ;;  %v13292_v5 = vrot.slane %v12419_v34, %v19267_v46  ;;  %v6906_v2 = vrot.slane %v6899_v45, %v19267_v46 }
 0x30f   : > { %v12404_v63 = vcombine.high %v12402_v14, %v12402_v14  ;;  %v13243_v28 = vrot.slane %v13236_v33, %v19267_v46  ;;  %v13250_v50 = vrot.slane %v12402_v14, %v19267_v46  ;;  %v13264_v40 = vrot.slane %v12403_v10, %v19267_v46 }
 0x310   : > { %v12428_v37 = vcombine.high %v12426_v52, %v12426_v52  ;;  %v13299_v17 = vrot.slane %v13292_v5, %v19267_v46  ;;  %v13306_v21 = vrot.slane %v12426_v52, %v19267_v46  ;;  %v13320_v4 = vrot.slane %v12427_v39, %v19267_v46 }
 0x311   : > { %v13257_v8 = vrot.slane %v13250_v50, %v19267_v46  ;;  %v13271_v25 = vrot.slane %v13264_v40, %v19267_v46  ;;  %v13278_v59 = vrot.slane %v12404_v63, %v19267_v46  ;;  %v13398_v13 = vunpack.c.l.b16 %v13243_v28 }
 0x312   : > { %v13313_v16 = vrot.slane %v13306_v21, %v19267_v46  ;;  %v13327_v20 = vrot.slane %v13320_v4, %v19267_v46  ;;  %v13334_v12 = vrot.slane %v12428_v37, %v19267_v46  ;;  %v13402_v55 = vunpack.c.l.b16 %v13299_v17 }
 0x313   : > { %v13285_v44 = vrot.slane %v13278_v59, %v19267_v46  ;;  %v13399_v62 = vunpack.c.l.b16 %v13257_v8  ;;  %v13400_v43 = vunpack.c.l.b16 %v13271_v25  ;;  %v6920_v6 = vrot.slane %v22105_v57, %v19267_v46 }
 0x314   : > { %v13341_v54 = vrot.slane %v13334_v12, %v19267_v46  ;;  %v13403_v3 = vunpack.c.l.b16 %v13313_v16  ;;  %v13404_v47 = vunpack.c.l.b16 %v13327_v20  ;;  %v13510_v27 = vrot.slane %v13402_v55, 4 }
 0x315   : > { %v13401_v49 = vunpack.c.l.b16 %v13285_v44  ;;  %v13504_v32 = vrot.slane %v13399_v62, 7  ;;  %v13506_v36 = vrot.slane %v13400_v43, 6  ;;  %v6927_v14 = vrot.slane %v6437_v29, %v19267_v46 }
 0x316   : > { %v13405_v48 = vunpack.c.l.b16 %v13341_v54  ;;  %v13512_v56 = vrot.slane %v13403_v3, 3  ;;  %v13514_v34 = vrot.slane %v13404_v47, 2  ;;  %v6941_v45 = vrot.slane %v22037_v42, %v19267_v46 }
 0x317   : > { %v13505_v10 = vsel %vm3140_vm2, %v13504_v32, %v13398_v13  ;;  %v13508_v33 = vrot.slane %v13401_v49, 5  ;;  %v6955_v52 = vrot.slane %v22047_v1, %v19267_v46  ;;  %v6934_v57 = vrot.slane %v6927_v14, %v19267_v46 }
 0x318   : > { %v13507_v39 = vsel %vm3143_vm6, %v13506_v36, %v13505_v10  ;;  %v13516_v5 = vrot.slane %v13405_v48, 1  ;;  %v6969_v7 = vrot.slane %v6460_v22, %v19267_v46  ;;  %v6948_v63 = vrot.slane %v6941_v45, %v19267_v46  ;;  %v18300_v45 = vld.sshfl [vmem:[#allocation2 + $0x20] sm:$0x1 pattern:$0x75316420] }
 0x319   : > { %v13509_v29 = vsel %vm3146_vm11, %v13508_v33, %v13507_v39  ;;  %v6962_v28 = vrot.slane %v6955_v52, %v19267_v46  ;;  %v6983_v50 = vrot.slane %v6461_v41, %v19267_v46  ;;  %v7663_v17 = vunpack.c.l.b16 %v22055_v61 }
 0x31a   : > { %v13511_v40 = vsel %vm3149_vm12, %v13510_v27, %v13509_v29  ;;  %v6976_v37 = vrot.slane %v6969_v7, %v19267_v46  ;;  %v7664_v42 = vunpack.c.l.b16 %v22058_v11  ;;  %v7665_v4 = vunpack.c.l.b16 %v6808_v53  ;;  %v18302_v7 = vld.sshfl [vmem:[#allocation2 + $0x34] sm:$0x33 pattern:$0x75316420] }
 0x31b   : > { %v13513_v22 = vsel %vm3152_vm13, %v13512_v56, %v13511_v40  ;;  %v6990_v21 = vrot.slane %v6983_v50, %v19267_v46  ;;  %v7666_v1 = vunpack.c.l.b16 %v6822_v60  ;;  %v7667_v8 = vunpack.c.l.b16 %v22075_v30  ;;  %v22187_v40 = vld.sshfl [vmem:[#allocation2 + $0x38] sm:$0x1 pattern:$0x75316420] }
 0x31c   : > { %v13515_v41 = vsel %vm3155_vm14, %v13514_v34, %v13513_v22  ;;  %v7668_v61 = vunpack.c.l.b16 %v22083_v15  ;;  %v7669_v11 = vunpack.c.l.b16 %v6864_v24  ;;  %v7670_v31 = vunpack.c.l.b16 %v6878_v35  ;;  %v18301_v34 = vld.sshfl [vmem:[#allocation2 + $0x30] sm:$0x33 pattern:$0x75316420] }
 0x31d   : > { %v13517_v25 = vsel %vm3158_vm15, %v13516_v5, %v13515_v41  ;;  %v7671_v53 = vunpack.c.l.b16 %v22091_v38  ;;  %v7672_v51 = vunpack.c.l.b16 %v6906_v2  ;;  %v7673_v59 = vunpack.c.l.b16 %v6920_v6 }
 0x31e   : > { %v13521_v60 = vpack.c.b16 %v13517_v25, %v22040_v58  ;;  %v7674_v13 = vunpack.c.l.b16 %v6934_v57  ;;  %v7675_v30 = vunpack.c.l.b16 %v6948_v63  ;;  %v7676_v16 = vunpack.c.l.b16 %v6962_v28 }
 0x31f   : > { %v7677_v15 = vunpack.c.l.b16 %v6976_v37  ;;  %v7678_v20 = vunpack.c.l.b16 %v6990_v21  ;;  %v7727_v12 = vrot.slane %v7664_v42, 7  ;;  %v7729_v24 = vrot.slane %v7665_v4, 6 }
 0x320   : > { %18885 = vmatmul.mubr.bf16.gmra.mrb[4].mxu0 %v13521_v60  ;;  %v7731_v55 = vrot.slane %v7666_v1, 5  ;;  %v7733_v44 = vrot.slane %v7667_v8, 4  ;;  %v7735_v62 = vrot.slane %v7668_v61, 3  ;;  %v7737_v38 = vrot.slane %v7669_v11, 2 }
 0x321   : > { %v7728_v35 = vsel %vm3140_vm2, %v7727_v12, %v7663_v17  ;;  %v7739_v43 = vrot.slane %v7670_v31, 1  ;;  %v7741_v2 = vrot.slane %v7672_v51, 7  ;;  %v7743_v54 = vrot.slane %v7673_v59, 6 }
 0x322   : > { %v7730_v58 = vsel %vm3143_vm6, %v7729_v24, %v7728_v35  ;;  %v7745_v3 = vrot.slane %v7674_v13, 5  ;;  %v7747_v47 = vrot.slane %v7675_v30, 4  ;;  %v7749_v32 = vrot.slane %v7676_v16, 3 }
 0x323   : > { %v7732_v27 = vsel %vm3146_vm11, %v7731_v55, %v7730_v58  ;;  %v7742_v49 = vsel %vm3140_vm2, %v7741_v2, %v7671_v53  ;;  %v7751_v36 = vrot.slane %v7677_v15, 2  ;;  %v7753_v56 = vrot.slane %v7678_v20, 1 }
 0x324   : > { %v7734_v6 = vsel %vm3149_vm12, %v7733_v44, %v7732_v27  ;;  %v7744_v48 = vsel %vm3143_vm6, %v7743_v54, %v7742_v49  ;;  %v13702_v14 = vcombine.high %v18298_v19, %v18298_v19  ;;  %v13709_v52 = vrot.slane %v18298_v19, %v19267_v46 }
 0x325   : > { %v7736_v10 = vsel %vm3152_vm13, %v7735_v62, %v7734_v6  ;;  %v7746_v33 = vsel %vm3146_vm11, %v7745_v3, %v7744_v48  ;;  %v13726_v39 = vcombine.high %v18299_v18, %v18299_v18  ;;  %v13733_v63 = vrot.slane %v18299_v18, %v19267_v46 }
 0x326   : > { %v7738_v5 = vsel %vm3155_vm14, %v7737_v38, %v7736_v10  ;;  %v7748_v57 = vsel %vm3149_vm12, %v7747_v47, %v7746_v33  ;;  %v13716_v29 = vrot.slane %v13702_v14, %v19267_v46  ;;  %v13717_v37 = vcombine.high %v13709_v52, %v13709_v52 }
 0x327   : > { %v7740_v28 = vsel %vm3158_vm15, %v7739_v43, %v7738_v5  ;;  %v7750_v50 = vsel %vm3152_vm13, %v7749_v32, %v7748_v57  ;;  %v13740_v17 = vrot.slane %v13726_v39, %v19267_v46  ;;  %v13741_v21 = vcombine.high %v13733_v63, %v13733_v63 }
 0x328   : > { %v7752_v42 = vsel %vm3155_vm14, %v7751_v36, %v7750_v50  ;;  %v13718_v22 = vcombine.high %v13716_v29, %v13716_v29  ;;  %v13756_v4 = vrot.slane %v18300_v45, %v19267_v46  ;;  %v13764_v8 = vcombine.high %v18301_v34, %v18301_v34 }
 0x329   : > { %v7754_v1 = vsel %vm3158_vm15, %v7753_v56, %v7752_v42  ;;  %v13742_v41 = vcombine.high %v13740_v17, %v13740_v17  ;;  %v13771_v61 = vrot.slane %v18301_v34, %v19267_v46  ;;  %v13788_v25 = vcombine.high %v18302_v7, %v18302_v7 }
 0x32a   : > { %v7839_v11 = vpack.c.b16 %v7754_v1, %v7740_v28  ;;  %v13795_v31 = vrot.slane %v18302_v7, %v19267_v46  ;;  %v13818_v53 = vrot.slane %v22187_v40, %v19267_v46  ;;  %v13778_v51 = vrot.slane %v13764_v8, %v19267_v46 }
 0x32b   : > { %v13779_v60 = vcombine.high %v13771_v61, %v13771_v61  ;;  %v14192_v59 = vshrl.u32 %v13709_v52, 16  ;;  %v14197_v13 = vshll.u32 %v13716_v29, 16  ;;  %v13802_v30 = vrot.slane %v13788_v25, %v19267_v46 }
 0x32c   : > { %18808 = vmatprep.mubr.bf16.mxu1 %v7839_v11  ;;  %v13803_v16 = vcombine.high %v13795_v31, %v13795_v31  ;;  %v14200_v15 = vshrl.u32 %v13716_v29, 16  ;;  %v14205_v20 = vshll.u32 %v13717_v37, 16  ;;  %v13780_v12 = vcombine.high %v13778_v51, %v13778_v51 }
 0x32d   : > { %v14199_v19 = vsel %vm19323_vm9, %v14192_v59, %v14197_v13  ;;  %v14208_v24 = vshrl.u32 %v13717_v37, 16  ;;  %v14213_v55 = vshll.u32 %v13718_v22, 16  ;;  %v13804_v44 = vcombine.high %v13802_v30, %v13802_v30 }
 0x32e   : > { %v14207_v62 = vsel %vm19323_vm9, %v14200_v15, %v14205_v20  ;;  %v14216_v18 = vshrl.u32 %v13718_v22, 16  ;;  %v14221_v35 = vshll.u32 %v13733_v63, 16  ;;  %v14224_v43 = vshrl.u32 %v13733_v63, 16 }
 0x32f   : > { %v14215_v38 = vsel %vm19323_vm9, %v14208_v24, %v14213_v55  ;;  %v14229_v2 = vshll.u32 %v13740_v17, 16  ;;  %v14232_v58 = vshrl.u32 %v13740_v17, 16  ;;  %v14237_v3 = vshll.u32 %v13741_v21, 16 }
 0x330   : > { %v14223_v54 = vsel %vm19323_vm9, %v14216_v18, %v14221_v35  ;;  %v14240_v47 = vshrl.u32 %v13741_v21, 16  ;;  %v14245_v27 = vshll.u32 %v13742_v41, 16  ;;  %v14248_v32 = vshrl.u32 %v13742_v41, 16 }
 0x331   : > { %v14231_v49 = vsel %vm19323_vm9, %v14224_v43, %v14229_v2  ;;  %v14253_v36 = vshll.u32 %v13756_v4, 16  ;;  %v14257_v6 = vshrl.u32 %v13771_v61, 16  ;;  %v14239_v48 = vsel %vm19323_vm9, %v14232_v58, %v14237_v3 }
 0x332   : > { %v14247_v56 = vsel %vm19323_vm9, %v14240_v47, %v14245_v27  ;;  %v14262_v34 = vshll.u32 %v13778_v51, 16  ;;  %v14265_v14 = vshrl.u32 %v13778_v51, 16  ;;  %v14270_v33 = vshll.u32 %v13779_v60, 16 }
 0x333   : > { %v14255_v10 = vsel %vm19323_vm9, %v14248_v32, %v14253_v36  ;;  %v14273_v45 = vshrl.u32 %v13779_v60, 16  ;;  %v14278_v52 = vshll.u32 %v13780_v12, 16  ;;  %v14281_v5 = vshrl.u32 %v13780_v12, 16 }
 0x334   : > { %v14264_v39 = vsel %vm19323_vm9, %v14257_v6, %v14262_v34  ;;  %v14286_v57 = vshll.u32 %v13795_v31, 16  ;;  %v14289_v7 = vshrl.u32 %v13795_v31, 16  ;;  %v14272_v29 = vsel %vm19323_vm9, %v14265_v14, %v14270_v33 }
 0x335   : > { %v14280_v63 = vsel %vm19323_vm9, %v14273_v45, %v14278_v52  ;;  %v14294_v28 = vshll.u32 %v13802_v30, 16  ;;  %v14297_v50 = vshrl.u32 %v13802_v30, 16  ;;  %v14302_v37 = vshll.u32 %v13803_v16, 16 }
 0x336   : > { %v14288_v40 = vsel %vm19323_vm9, %v14281_v5, %v14286_v57  ;;  %v14305_v17 = vshrl.u32 %v13803_v16, 16  ;;  %v14310_v42 = vshll.u32 %v13804_v44, 16  ;;  %v14313_v21 = vshrl.u32 %v13804_v44, 16 }
 0x337   : > { %v14296_v22 = vsel %vm19323_vm9, %v14289_v7, %v14294_v28  ;;  %v14318_v4 = vshll.u32 %v13818_v53, 16  ;;  %v14734_v1 = vrot.slane %v14199_v19, %v19267_v46  ;;  %v14304_v41 = vsel %vm19323_vm9, %v14297_v50, %v14302_v37  ;;  %v18062_v37 = vld.sshfl [vmem:[#allocation2 + $0x3c] sm:$0x33 pattern:$0x75316420] }
 0x338   : > { %v14312_v8 = vsel %vm19323_vm9, %v14305_v17, %v14310_v42  ;;  %v14748_v61 = vrot.slane %v14207_v62, %v19267_v46  ;;  %v14762_v11 = vrot.slane %v14215_v38, %v19267_v46  ;;  %v14776_v51 = vrot.slane %v14223_v54, %v19267_v46 }
 0x339   : > { %v14320_v25 = vsel %vm19323_vm9, %v14313_v21, %v14318_v4  ;;  %v14741_v31 = vrot.slane %v14734_v1, %v19267_v46  ;;  %v14790_v53 = vrot.slane %v14231_v49, %v19267_v46  ;;  %v14804_v13 = vrot.slane %v14239_v48, %v19267_v46  ;;  %v18063_v4 = vld.sshfl [vmem:[#allocation2 + $0x40] sm:$0x33 pattern:$0x75316420] }
 0x33a   : > { %v14755_v60 = vrot.slane %v14748_v61, %v19267_v46  ;;  %v14769_v59 = vrot.slane %v14762_v11, %v19267_v46  ;;  %v14818_v30 = vrot.slane %v14247_v56, %v19267_v46  ;;  %v14783_v16 = vrot.slane %v14776_v51, %v19267_v46 }
 0x33b   : > { %v14797_v15 = vrot.slane %v14790_v53, %v19267_v46  ;;  %v14832_v20 = vrot.slane %v14255_v10, %v19267_v46  ;;  %v14846_v12 = vrot.slane %v14264_v39, %v19267_v46  ;;  %v14811_v19 = vrot.slane %v14804_v13, %v19267_v46 }
 0x33c   : > { %v14825_v24 = vrot.slane %v14818_v30, %v19267_v46  ;;  %v14860_v55 = vrot.slane %v14272_v29, %v19267_v46  ;;  %v14874_v44 = vrot.slane %v14280_v63, %v19267_v46  ;;  %v14888_v35 = vrot.slane %v14288_v40, %v19267_v46 }
 0x33d   : > { %v14839_v62 = vrot.slane %v14832_v20, %v19267_v46  ;;  %v14853_v18 = vrot.slane %v14846_v12, %v19267_v46  ;;  %v14902_v38 = vrot.slane %v14296_v22, %v19267_v46  ;;  %v14916_v58 = vrot.slane %v14304_v41, %v19267_v46 }
 0x33e   : > { %v14867_v43 = vrot.slane %v14860_v55, %v19267_v46  ;;  %v14881_v2 = vrot.slane %v14874_v44, %v19267_v46  ;;  %v14930_v54 = vrot.slane %v14312_v8, %v19267_v46  ;;  %v14895_v3 = vrot.slane %v14888_v35, %v19267_v46  ;;  %v18065_v35 = vld.sshfl [vmem:[#allocation2 + $0x58] sm:$0x33 pattern:$0x75316420] }
 0x33f   : > { %v14909_v47 = vrot.slane %v14902_v38, %v19267_v46  ;;  %v14944_v27 = vrot.slane %v14320_v25, %v19267_v46  ;;  %v15624_v49 = vunpack.c.l.b16 %v14741_v31  ;;  %v14923_v32 = vrot.slane %v14916_v58, %v19267_v46 }
 0x340   : > { %v14937_v36 = vrot.slane %v14930_v54, %v19267_v46  ;;  %v15625_v6 = vunpack.c.l.b16 %v14755_v60  ;;  %v15626_v48 = vunpack.c.l.b16 %v14769_v59  ;;  %v15627_v34 = vunpack.c.l.b16 %v14783_v16 }
 0x341   : > { %v14951_v56 = vrot.slane %v14944_v27, %v19267_v46  ;;  %v15628_v14 = vunpack.c.l.b16 %v14797_v15  ;;  %v15629_v10 = vunpack.c.l.b16 %v14811_v19  ;;  %v15630_v33 = vunpack.c.l.b16 %v14825_v24  ;;  %v18064_v24 = vld.sshfl [vmem:[#allocation2 + $0x54] sm:$0x33 pattern:$0x75316420] }
 0x342   : > { %v15631_v45 = vunpack.c.l.b16 %v14839_v62  ;;  %v15632_v52 = vunpack.c.l.b16 %v14853_v18  ;;  %v15633_v39 = vunpack.c.l.b16 %v14867_v43  ;;  %v15634_v5 = vunpack.c.l.b16 %v14881_v2 }
 0x343   : > { %v15635_v57 = vunpack.c.l.b16 %v14895_v3  ;;  %v15636_v7 = vunpack.c.l.b16 %v14909_v47  ;;  %v15637_v29 = vunpack.c.l.b16 %v14923_v32  ;;  %v15638_v63 = vunpack.c.l.b16 %v14937_v36 }
 0x344   : > { %v15639_v28 = vunpack.c.l.b16 %v14951_v56  ;;  %v15688_v50 = vrot.slane %v15625_v6, 7  ;;  %v15690_v40 = vrot.slane %v15626_v48, 6  ;;  %v15692_v17 = vrot.slane %v15627_v34, 5 }
 0x345   : > { %v15694_v42 = vrot.slane %v15628_v14, 4  ;;  %v15696_v22 = vrot.slane %v15629_v10, 3  ;;  %v15698_v21 = vrot.slane %v15630_v33, 2  ;;  %v15700_v41 = vrot.slane %v15631_v45, 1 }
 0x346   : > { %v15689_v1 = vsel %vm3140_vm2, %v15688_v50, %v15624_v49  ;;  %v15702_v8 = vrot.slane %v15633_v39, 7  ;;  %v15704_v61 = vrot.slane %v15634_v5, 6  ;;  %v15706_v25 = vrot.slane %v15635_v57, 5 }
 0x347   : > { %v15691_v11 = vsel %vm3143_vm6, %v15690_v40, %v15689_v1  ;;  %v15708_v31 = vrot.slane %v15636_v7, 4  ;;  %v15710_v51 = vrot.slane %v15637_v29, 3  ;;  %v15712_v59 = vrot.slane %v15638_v63, 2 }
 0x348   : > { %v15693_v53 = vsel %vm3146_vm11, %v15692_v17, %v15691_v11  ;;  %v15703_v60 = vsel %vm3140_vm2, %v15702_v8, %v15632_v52  ;;  %v15714_v13 = vrot.slane %v15639_v28, 1  ;;  %v6469_v15 = vcombine.high %v18062_v37, %v18062_v37 }
 0x349   : > { %v15695_v30 = vsel %vm3149_vm12, %v15694_v42, %v15693_v53  ;;  %v15705_v16 = vsel %vm3143_vm6, %v15704_v61, %v15703_v60  ;;  %v6476_v20 = vrot.slane %v18062_v37, %v19267_v46  ;;  %v6493_v55 = vcombine.high %v18063_v4, %v18063_v4 }
 0x34a   : > { %v15697_v12 = vsel %vm3152_vm13, %v15696_v22, %v15695_v30  ;;  %v15707_v19 = vsel %vm3146_vm11, %v15706_v25, %v15705_v16  ;;  %v6500_v44 = vrot.slane %v18063_v4, %v19267_v46  ;;  %v6483_v38 = vrot.slane %v6469_v15, %v19267_v46 }
 0x34b   : > { %v15699_v62 = vsel %vm3155_vm14, %v15698_v21, %v15697_v12  ;;  %v15709_v18 = vsel %vm3149_vm12, %v15708_v31, %v15707_v19  ;;  %v6484_v43 = vcombine.high %v6476_v20, %v6476_v20  ;;  %v6507_v54 = vrot.slane %v6493_v55, %v19267_v46 }
 0x34c   : > { %v15701_v2 = vsel %vm3158_vm15, %v15700_v41, %v15699_v62  ;;  %v15711_v58 = vsel %vm3152_vm13, %v15710_v51, %v15709_v18  ;;  %v6508_v3 = vcombine.high %v6500_v44, %v6500_v44  ;;  %v6485_v27 = vcombine.high %v6483_v38, %v6483_v38 }
 0x34d   : > { %v15713_v47 = vsel %vm3155_vm14, %v15712_v59, %v15711_v58  ;;  %v6517_v49 = vcombine.high %v18064_v24, %v18064_v24  ;;  %v6524_v32 = vrot.slane %v18064_v24, %v19267_v46  ;;  %v6509_v6 = vcombine.high %v6507_v54, %v6507_v54 }
 0x34e   : > { %v15715_v36 = vsel %vm3158_vm15, %v15714_v13, %v15713_v47  ;;  %v6541_v48 = vcombine.high %v18065_v35, %v18065_v35  ;;  %v6548_v56 = vrot.slane %v18065_v35, %v19267_v46  ;;  %v6997_v33 = vrot.slane %v6476_v20, %v19267_v46 }
 0x34f   : > { %v15800_v34 = vpack.c.b16 %v15715_v36, %v15701_v2  ;;  %v6531_v14 = vrot.slane %v6517_v49, %v19267_v46  ;;  %v6532_v10 = vcombine.high %v6524_v32, %v6524_v32  ;;  %v7011_v39 = vrot.slane %v6483_v38, %v19267_v46 }
 0x350   : > { %v6555_v45 = vrot.slane %v6541_v48, %v19267_v46  ;;  %v6556_v52 = vcombine.high %v6548_v56, %v6548_v56  ;;  %v7025_v5 = vrot.slane %v6484_v43, %v19267_v46  ;;  %v7004_v7 = vrot.slane %v6997_v33, %v19267_v46 }
 0x351   : > { %18904 = vmatprep.mubr.bf16.mxu0 %v15800_v34  ;;  %v6533_v57 = vcombine.high %v6531_v14, %v6531_v14  ;;  %v7039_v29 = vrot.slane %v6485_v27, %v19267_v46  ;;  %v7053_v63 = vrot.slane %v6500_v44, %v19267_v46  ;;  %v7018_v50 = vrot.slane %v7011_v39, %v19267_v46 }
 0x352   : > { %v6557_v28 = vcombine.high %v6555_v45, %v6555_v45  ;;  %v7032_v40 = vrot.slane %v7025_v5, %v19267_v46  ;;  %v7067_v37 = vrot.slane %v6507_v54, %v19267_v46  ;;  %v7081_v22 = vrot.slane %v6508_v3, %v19267_v46 }
 0x353   : > { %v7046_v17 = vrot.slane %v7039_v29, %v19267_v46  ;;  %v7060_v42 = vrot.slane %v7053_v63, %v19267_v46  ;;  %v7095_v21 = vrot.slane %v6509_v6, %v19267_v46  ;;  %v7109_v1 = vrot.slane %v6524_v32, %v19267_v46  ;;  %v18304_v6 = vld.sshfl [vmem:[#allocation2 + $0x48] sm:$0x33 pattern:$0x75316420] }
 0x354   : > { %v7074_v4 = vrot.slane %v7067_v37, %v19267_v46  ;;  %v7123_v41 = vrot.slane %v6531_v14, %v19267_v46  ;;  %v7137_v8 = vrot.slane %v6532_v10, %v19267_v46  ;;  %v7088_v61 = vrot.slane %v7081_v22, %v19267_v46  ;;  %v18305_v10 = vld.sshfl [vmem:[#allocation2 + $0x4c] sm:$0x33 pattern:$0x75316420] }
 0x355   : > { %v7102_v11 = vrot.slane %v7095_v21, %v19267_v46  ;;  %v7151_v25 = vrot.slane %v6533_v57, %v19267_v46  ;;  %v7165_v31 = vrot.slane %v6548_v56, %v19267_v46  ;;  %v7116_v51 = vrot.slane %v7109_v1, %v19267_v46  ;;  %v18307_v22 = vld.sshfl [vmem:[#allocation2 + $0x60] sm:$0x33 pattern:$0x75316420] }
 0x356   : > { %v7130_v53 = vrot.slane %v7123_v41, %v19267_v46  ;;  %v7144_v60 = vrot.slane %v7137_v8, %v19267_v46  ;;  %v7179_v59 = vrot.slane %v6555_v45, %v19267_v46  ;;  %v7193_v16 = vrot.slane %v6556_v52, %v19267_v46  ;;  %v18306_v41 = vld.sshfl [vmem:[#allocation2 + $0x50] sm:$0x1 pattern:$0x75316420] }
 0x357   : > { %v7158_v13 = vrot.slane %v7151_v25, %v19267_v46  ;;  %v7172_v30 = vrot.slane %v7165_v31, %v19267_v46  ;;  %v7207_v15 = vrot.slane %v6557_v28, %v19267_v46  ;;  %v7679_v12 = vunpack.c.l.b16 %v7004_v7  ;;  %v18308_v31 = vld.sshfl [vmem:[#allocation2 + $0x64] sm:$0x33 pattern:$0x75316420] }
 0x358   : > { %v7186_v20 = vrot.slane %v7179_v59, %v19267_v46  ;;  %v7680_v19 = vunpack.c.l.b16 %v7018_v50  ;;  %v7681_v24 = vunpack.c.l.b16 %v7032_v40  ;;  %v7200_v55 = vrot.slane %v7193_v16, %v19267_v46 }
 0x359   : > { %v7214_v44 = vrot.slane %v7207_v15, %v19267_v46  ;;  %v7682_v62 = vunpack.c.l.b16 %v7046_v17  ;;  %v7683_v18 = vunpack.c.l.b16 %v7060_v42  ;;  %v7684_v35 = vunpack.c.l.b16 %v7074_v4 }
 0x35a   : > { %v7685_v38 = vunpack.c.l.b16 %v7088_v61  ;;  %v7686_v43 = vunpack.c.l.b16 %v7102_v11  ;;  %v7687_v2 = vunpack.c.l.b16 %v7116_v51  ;;  %v7688_v58 = vunpack.c.l.b16 %v7130_v53 }
 0x35b   : > { %v7689_v54 = vunpack.c.l.b16 %v7144_v60  ;;  %v7690_v3 = vunpack.c.l.b16 %v7158_v13  ;;  %v7691_v47 = vunpack.c.l.b16 %v7172_v30  ;;  %v7692_v27 = vunpack.c.l.b16 %v7186_v20  ;;  %v22332_v13 = vld.sshfl [vmem:[#allocation2 + $0x68] sm:$0x1 pattern:$0x75316420] }
 0x35c   : > { %v7693_v49 = vunpack.c.l.b16 %v7200_v55  ;;  %v7694_v32 = vunpack.c.l.b16 %v7214_v44  ;;  %v7755_v36 = vrot.slane %v7680_v19, 7  ;;  %v7757_v48 = vrot.slane %v7681_v24, 6 }
 0x35d   : > { %v7759_v56 = vrot.slane %v7682_v62, 5  ;;  %v7761_v34 = vrot.slane %v7683_v18, 4  ;;  %v7763_v14 = vrot.slane %v7684_v35, 3  ;;  %v7765_v45 = vrot.slane %v7685_v38, 2 }
 0x35e   : > { %v7756_v33 = vsel %vm3140_vm2, %v7755_v36, %v7679_v12  ;;  %v7767_v52 = vrot.slane %v7686_v43, 1  ;;  %v7769_v39 = vrot.slane %v7688_v58, 7  ;;  %v7771_v57 = vrot.slane %v7689_v54, 6 }
 0x35f   : > { %v7758_v5 = vsel %vm3143_vm6, %v7757_v48, %v7756_v33  ;;  %v7773_v7 = vrot.slane %v7690_v3, 5  ;;  %v7775_v29 = vrot.slane %v7691_v47, 4  ;;  %v7777_v50 = vrot.slane %v7692_v27, 3 }
 0x360   : > { %v7760_v63 = vsel %vm3146_vm11, %v7759_v56, %v7758_v5  ;;  %v7770_v28 = vsel %vm3140_vm2, %v7769_v39, %v7687_v2  ;;  %v7779_v40 = vrot.slane %v7693_v49, 2  ;;  %v7781_v42 = vrot.slane %v7694_v32, 1  ;;  %v22345_v2 = vld [vmem:[%s23042_s3 + $0x208] sm:$0xff]  }
 0x361   : > { %v7762_v37 = vsel %vm3149_vm12, %v7761_v34, %v7760_v63  ;;  %v7772_v17 = vsel %vm3143_vm6, %v7771_v57, %v7770_v28  ;;  %v13826_v21 = vcombine.high %v18304_v6, %v18304_v6  ;;  %v13833_v8 = vrot.slane %v18304_v6, %v19267_v46 }
 0x362   : > { %v7764_v4 = vsel %vm3152_vm13, %v7763_v14, %v7762_v37  ;;  %v7774_v1 = vsel %vm3146_vm11, %v7773_v7, %v7772_v17  ;;  %v13850_v61 = vcombine.high %v18305_v10, %v18305_v10  ;;  %v13857_v53 = vrot.slane %v18305_v10, %v19267_v46 }
 0x363   : > { %v7766_v11 = vsel %vm3155_vm14, %v7765_v45, %v7764_v4  ;;  %v7776_v25 = vsel %vm3149_vm12, %v7775_v29, %v7774_v1  ;;  %v13840_v51 = vrot.slane %v13826_v21, %v19267_v46  ;;  %v13841_v30 = vcombine.high %v13833_v8, %v13833_v8 }
 0x364   : > { %v7768_v60 = vsel %vm3158_vm15, %v7767_v52, %v7766_v11  ;;  %v7778_v59 = vsel %vm3152_vm13, %v7777_v50, %v7776_v25  ;;  %v13864_v16 = vrot.slane %v13850_v61, %v19267_v46  ;;  %v13865_v12 = vcombine.high %v13857_v53, %v13857_v53 }
 0x365   : > { %v7780_v15 = vsel %vm3155_vm14, %v7779_v40, %v7778_v59  ;;  %v13842_v20 = vcombine.high %v13840_v51, %v13840_v51  ;;  %v13880_v19 = vrot.slane %v18306_v41, %v19267_v46  ;;  %v13888_v44 = vcombine.high %v18307_v22, %v18307_v22 }
 0x366   : > { %v7782_v24 = vsel %vm3158_vm15, %v7781_v42, %v7780_v15  ;;  %v13866_v55 = vcombine.high %v13864_v16, %v13864_v16  ;;  %v13895_v62 = vrot.slane %v18307_v22, %v19267_v46  ;;  %v13912_v35 = vcombine.high %v18308_v31, %v18308_v31 }
 0x367   : > { %v7840_v18 = vpack.c.b16 %v7782_v24, %v7768_v60  ;;  %v13919_v38 = vrot.slane %v18308_v31, %v19267_v46  ;;  %v13942_v43 = vrot.slane %v22332_v13, %v19267_v46  ;;  %v13902_v58 = vrot.slane %v13888_v44, %v19267_v46 }
 0x368   : > { %v13903_v54 = vcombine.high %v13895_v62, %v13895_v62  ;;  %v14322_v3 = vshrl.u32 %v13833_v8, 16  ;;  %v14327_v47 = vshll.u32 %v13840_v51, 16  ;;  %v13926_v27 = vrot.slane %v13912_v35, %v19267_v46 }
 0x369   : > { %18809 = vmatmul.mubr.bf16.vlgmr.msra.gmra.mrb[0].mxu1 %v7840_v18  ;;  %v13927_v49 = vcombine.high %v13919_v38, %v13919_v38  ;;  %v14330_v32 = vshrl.u32 %v13840_v51, 16  ;;  %v14335_v36 = vshll.u32 %v13841_v30, 16  ;;  %v13904_v6 = vcombine.high %v13902_v58, %v13902_v58 }
 0x36a   : > { %v14329_v48 = vsel %vm19323_vm9, %v14322_v3, %v14327_v47  ;;  %v14338_v56 = vshrl.u32 %v13841_v30, 16  ;;  %v14343_v34 = vshll.u32 %v13842_v20, 16  ;;  %18944 = vmatpush3.bf16.msra.mxu1 %v22096_v26  ;;  %v13928_v14 = vcombine.high %v13926_v27, %v13926_v27 }
 0x36b   : > { %v14337_v10 = vsel %vm19323_vm9, %v14330_v32, %v14335_v36  ;;  %v14346_v33 = vshrl.u32 %v13842_v20, 16  ;;  %v14351_v45 = vshll.u32 %v13857_v53, 16  ;;  %18937 = vmatprep.subr.bf16.mxu1 %v22345_v2  ;;  %v14354_v39 = vshrl.u32 %v13857_v53, 16 }
 0x36c   : > { %v14345_v52 = vsel %vm19323_vm9, %v14338_v56, %v14343_v34  ;;  %v14359_v5 = vshll.u32 %v13864_v16, 16  ;;  %v14362_v57 = vshrl.u32 %v13864_v16, 16  ;;  %v14367_v29 = vshll.u32 %v13865_v12, 16 }
 0x36d   : > { %v14353_v7 = vsel %vm19323_vm9, %v14346_v33, %v14351_v45  ;;  %v14370_v63 = vshrl.u32 %v13865_v12, 16  ;;  %v14375_v26 = vshll.u32 %v13866_v55, 16  ;;  %v14378_v50 = vshrl.u32 %v13866_v55, 16 }
 0x36e   : > { %v14361_v28 = vsel %vm19323_vm9, %v14354_v39, %v14359_v5  ;;  %v14383_v40 = vshll.u32 %v13880_v19, 16  ;;  %v14387_v37 = vshrl.u32 %v13895_v62, 16  ;;  %18945 = vmatpush3.bf16.msra.mxu1 %v22345_v2  ;;  %v14369_v17 = vsel %vm19323_vm9, %v14362_v57, %v14367_v29 }
 0x36f   : > { %v14377_v42 = vsel %vm19323_vm9, %v14370_v63, %v14375_v26  ;;  %v14392_v22 = vshll.u32 %v13902_v58, 16  ;;  %v14395_v21 = vshrl.u32 %v13902_v58, 16  ;;  %v14400_v1 = vshll.u32 %v13903_v54, 16 }
 0x370   : > { %v14385_v4 = vsel %vm19323_vm9, %v14378_v50, %v14383_v40  ;;  %v14403_v41 = vshrl.u32 %v13903_v54, 16  ;;  %v14408_v8 = vshll.u32 %v13904_v6, 16  ;;  %v14411_v11 = vshrl.u32 %v13904_v6, 16 }
 0x371   : > { %v14394_v61 = vsel %vm19323_vm9, %v14387_v37, %v14392_v22  ;;  %v14416_v25 = vshll.u32 %v13919_v38, 16  ;;  %v14419_v31 = vshrl.u32 %v13919_v38, 16  ;;  %v14402_v51 = vsel %vm19323_vm9, %v14395_v21, %v14400_v1 }
 0x372   : > { %v14410_v53 = vsel %vm19323_vm9, %v14403_v41, %v14408_v8  ;;  %v14424_v60 = vshll.u32 %v13926_v27, 16  ;;  %v14427_v59 = vshrl.u32 %v13926_v27, 16  ;;  %v14432_v30 = vshll.u32 %v13927_v49, 16 }
 0x373   : > { %v14418_v13 = vsel %vm19323_vm9, %v14411_v11, %v14416_v25  ;;  %v14435_v16 = vshrl.u32 %v13927_v49, 16  ;;  %v14440_v15 = vshll.u32 %v13928_v14, 16  ;;  %v14443_v12 = vshrl.u32 %v13928_v14, 16 }
 0x374   : > { %v14426_v20 = vsel %vm19323_vm9, %v14419_v31, %v14424_v60  ;;  %v14448_v19 = vshll.u32 %v13942_v43, 16  ;;  %v14958_v24 = vrot.slane %v14329_v48, %v19267_v46  ;;  %v14434_v55 = vsel %vm19323_vm9, %v14427_v59, %v14432_v30  ;;  %v18066_v30 = vld.sshfl [vmem:[#allocation2 + $0x6c] sm:$0x33 pattern:$0x75316420] }
 0x375   : > { %v14442_v44 = vsel %vm19323_vm9, %v14435_v16, %v14440_v15  ;;  %v14972_v62 = vrot.slane %v14337_v10, %v19267_v46  ;;  %v14986_v18 = vrot.slane %v14345_v52, %v19267_v46  ;;  %v15000_v58 = vrot.slane %v14353_v7, %v19267_v46 }
 0x376   : > { %v14450_v35 = vsel %vm19323_vm9, %v14443_v12, %v14448_v19  ;;  %v14965_v38 = vrot.slane %v14958_v24, %v19267_v46  ;;  %v15014_v43 = vrot.slane %v14361_v28, %v19267_v46  ;;  %v15028_v47 = vrot.slane %v14369_v17, %v19267_v46  ;;  %v18067_v19 = vld.sshfl [vmem:[#allocation2 + $0x70] sm:$0x33 pattern:$0x75316420] }
 0x377   : > { %v14979_v54 = vrot.slane %v14972_v62, %v19267_v46  ;;  %v14993_v3 = vrot.slane %v14986_v18, %v19267_v46  ;;  %v15042_v27 = vrot.slane %v14377_v42, %v19267_v46  ;;  %v15007_v49 = vrot.slane %v15000_v58, %v19267_v46 }
 0x378   : > { %v15021_v32 = vrot.slane %v15014_v43, %v19267_v46  ;;  %v15056_v36 = vrot.slane %v14385_v4, %v19267_v46  ;;  %v15070_v6 = vrot.slane %v14394_v61, %v19267_v46  ;;  %v15035_v48 = vrot.slane %v15028_v47, %v19267_v46 }
 0x379   : > { %v15049_v56 = vrot.slane %v15042_v27, %v19267_v46  ;;  %v15084_v34 = vrot.slane %v14402_v51, %v19267_v46  ;;  %v15098_v14 = vrot.slane %v14410_v53, %v19267_v46  ;;  %v15112_v45 = vrot.slane %v14418_v13, %v19267_v46 }
 0x37a   : > { %v15063_v10 = vrot.slane %v15056_v36, %v19267_v46  ;;  %v15077_v33 = vrot.slane %v15070_v6, %v19267_v46  ;;  %v15126_v52 = vrot.slane %v14426_v20, %v19267_v46  ;;  %v15140_v57 = vrot.slane %v14434_v55, %v19267_v46 }
 0x37b   : > { %v15091_v39 = vrot.slane %v15084_v34, %v19267_v46  ;;  %v15105_v5 = vrot.slane %v15098_v14, %v19267_v46  ;;  %v15154_v7 = vrot.slane %v14442_v44, %v19267_v46  ;;  %v15119_v29 = vrot.slane %v15112_v45, %v19267_v46 }
 0x37c   : > { %v15133_v63 = vrot.slane %v15126_v52, %v19267_v46  ;;  %v15168_v26 = vrot.slane %v14450_v35, %v19267_v46  ;;  %v15640_v28 = vunpack.c.l.b16 %v14965_v38  ;;  %v15147_v50 = vrot.slane %v15140_v57, %v19267_v46  ;;  %v18069_v52 = vld.sshfl [vmem:[#allocation2 + $0x88] sm:$0x33 pattern:$0x75316420] }
 0x37d   : > { %v15161_v40 = vrot.slane %v15154_v7, %v19267_v46  ;;  %v15641_v37 = vunpack.c.l.b16 %v14979_v54  ;;  %v15642_v17 = vunpack.c.l.b16 %v14993_v3  ;;  %v15643_v22 = vunpack.c.l.b16 %v15007_v49 }
 0x37e   : > { %v15175_v42 = vrot.slane %v15168_v26, %v19267_v46  ;;  %v15644_v21 = vunpack.c.l.b16 %v15021_v32  ;;  %v15645_v4 = vunpack.c.l.b16 %v15035_v48  ;;  %v15646_v1 = vunpack.c.l.b16 %v15049_v56  ;;  %v18068_v56 = vld.sshfl [vmem:[#allocation2 + $0x84] sm:$0x33 pattern:$0x75316420]  ;;  %v22441_v26 = vld [vmem:[%s23042_s3 + $0x218] sm:$0xff]  }
 0x37f   : > { %v15647_v41 = vunpack.c.l.b16 %v15063_v10  ;;  %v15648_v8 = vunpack.c.l.b16 %v15077_v33  ;;  %v15649_v61 = vunpack.c.l.b16 %v15091_v39  ;;  %v15650_v11 = vunpack.c.l.b16 %v15105_v5  ;;  %v22429_v10 = vld [vmem:[%s23042_s3 + $0x210] sm:$0xff]  }
 0x380   : > { %v15651_v25 = vunpack.c.l.b16 %v15119_v29  ;;  %v15652_v31 = vunpack.c.l.b16 %v15133_v63  ;;  %v15653_v51 = vunpack.c.l.b16 %v15147_v50  ;;  %v15654_v53 = vunpack.c.l.b16 %v15161_v40  ;;  %18938 = vmatprep.subr.bf16.mxu1 %v22429_v10 }
 0x381   : > { %v15655_v60 = vunpack.c.l.b16 %v15175_v42  ;;  %v15716_v59 = vrot.slane %v15641_v37, 7  ;;  %v15718_v13 = vrot.slane %v15642_v17, 6  ;;  %v15720_v16 = vrot.slane %v15643_v22, 5  ;;  %18946 = vmatpush3.bf16.msra.mxu1 %v22429_v10 }
 0x382   : > { %v15722_v15 = vrot.slane %v15644_v21, 4  ;;  %v15724_v20 = vrot.slane %v15645_v4, 3  ;;  %v15726_v12 = vrot.slane %v15646_v1, 2  ;;  %v15728_v55 = vrot.slane %v15647_v41, 1  ;;  %18939 = vmatprep.subr.bf16.mxu1 %v22441_v26 }
 0x383   : > { %v15717_v24 = vsel %vm3140_vm2, %v15716_v59, %v15640_v28  ;;  %v15730_v44 = vrot.slane %v15649_v61, 7  ;;  %v15732_v62 = vrot.slane %v15650_v11, 6  ;;  %v15734_v35 = vrot.slane %v15651_v25, 5 }
 0x384   : > { %v15719_v18 = vsel %vm3143_vm6, %v15718_v13, %v15717_v24  ;;  %v15736_v38 = vrot.slane %v15652_v31, 4  ;;  %v15738_v58 = vrot.slane %v15653_v51, 3  ;;  %v15740_v3 = vrot.slane %v15654_v53, 2  ;;  %v22462_v13 = vld [vmem:[%s23042_s3 + $0x220] sm:$0xff]  }
 0x385   : > { %v15721_v43 = vsel %vm3146_vm11, %v15720_v16, %v15719_v18  ;;  %v15731_v54 = vsel %vm3140_vm2, %v15730_v44, %v15648_v8  ;;  %v15742_v47 = vrot.slane %v15655_v60, 1  ;;  %v6565_v32 = vcombine.high %v18066_v30, %v18066_v30  ;;  %18947 = vmatpush3.bf16.msra.mxu1 %v22441_v26 }
 0x386   : > { %v15723_v27 = vsel %vm3149_vm12, %v15722_v15, %v15721_v43  ;;  %v15733_v49 = vsel %vm3143_vm6, %v15732_v62, %v15731_v54  ;;  %v6572_v36 = vrot.slane %v18066_v30, %v19267_v46  ;;  %v6589_v34 = vcombine.high %v18067_v19, %v18067_v19  ;;  %v19111_v30 = vld [vmem:[%s23042_s3 + $0x200] sm:$0xff]   ;;  %18940 = vmatprep.subr.bf16.mxu1 %v22462_v13 }
 0x387   : > { %v15725_v6 = vsel %vm3152_vm13, %v15724_v20, %v15723_v27  ;;  %v15735_v48 = vsel %vm3146_vm11, %v15734_v35, %v15733_v49  ;;  %v6596_v14 = vrot.slane %v18067_v19, %v19267_v46  ;;  %v6579_v39 = vrot.slane %v6565_v32, %v19267_v46 }
 0x388   : > { %v15727_v33 = vsel %vm3155_vm14, %v15726_v12, %v15725_v6  ;;  %v15737_v45 = vsel %vm3149_vm12, %v15736_v38, %v15735_v48  ;;  %v6580_v5 = vcombine.high %v6572_v36, %v6572_v36  ;;  %v6603_v29 = vrot.slane %v6589_v34, %v19267_v46 }
 0x389   : > { %v15729_v57 = vsel %vm3158_vm15, %v15728_v55, %v15727_v33  ;;  %v15739_v7 = vsel %vm3152_vm13, %v15738_v58, %v15737_v45  ;;  %v6604_v63 = vcombine.high %v6596_v14, %v6596_v14  ;;  %v6581_v50 = vcombine.high %v6579_v39, %v6579_v39  ;;  %18948 = vmatpush3.bf16.msra.mxu1 %v22462_v13 }
 0x38a   : > { %v15741_v28 = vsel %vm3155_vm14, %v15740_v3, %v15739_v7  ;;  %v6613_v40 = vcombine.high %v18068_v56, %v18068_v56  ;;  %v6620_v37 = vrot.slane %v18068_v56, %v19267_v46  ;;  %v6605_v42 = vcombine.high %v6603_v29, %v6603_v29  ;;  %v22509_v7 = vld [vmem:[%s23042_s3 + $0x230] sm:$0xff]  }
 0x38b   : > { %v15743_v17 = vsel %vm3158_vm15, %v15742_v47, %v15741_v28  ;;  %v6637_v22 = vcombine.high %v18069_v52, %v18069_v52  ;;  %v6644_v21 = vrot.slane %v18069_v52, %v19267_v46  ;;  %v7221_v8 = vrot.slane %v6572_v36, %v19267_v46  ;;  %v22488_v47 = vld [vmem:[%s23042_s3 + $0x228] sm:$0xff]  }
 0x38c   : > { %v15801_v4 = vpack.c.b16 %v15743_v17, %v15729_v57  ;;  %v6627_v1 = vrot.slane %v6613_v40, %v19267_v46  ;;  %v6628_v41 = vcombine.high %v6620_v37, %v6620_v37  ;;  %v7235_v25 = vrot.slane %v6579_v39, %v19267_v46  ;;  %18941 = vmatprep.subr.bf16.mxu1 %v22488_v47 }
 0x38d   : > { %v6651_v61 = vrot.slane %v6637_v22, %v19267_v46  ;;  %v6652_v11 = vcombine.high %v6644_v21, %v6644_v21  ;;  %v7249_v31 = vrot.slane %v6580_v5, %v19267_v46  ;;  %v22455_v53 = vrot.slane %v7221_v8, %v19267_v46  ;;  %18949 = vmatpush3.bf16.msra.mxu1 %v22488_v47 }
 0x38e   : > { %18905 = vmatmul.mubr.bf16.vlgmr.msra.gmra.mrb[0].mxu0 %v15801_v4  ;;  %v6629_v51 = vcombine.high %v6627_v1, %v6627_v1  ;;  %v7263_v60 = vrot.slane %v6581_v50, %v19267_v46  ;;  %v7277_v59 = vrot.slane %v6596_v14, %v19267_v46  ;;  %v7242_v15 = vrot.slane %v7235_v25, %v19267_v46 }
 0x38f   : > { %18913 = vmatpush3.bf16.msra.mxu0 %v19111_v30  ;;  %v6653_v16 = vcombine.high %v6651_v61, %v6651_v61  ;;  %v7256_v20 = vrot.slane %v7249_v31, %v19267_v46  ;;  %v7291_v12 = vrot.slane %v6603_v29, %v19267_v46  ;;  %v7305_v55 = vrot.slane %v6604_v63, %v19267_v46  ;;  %v18311_v31 = vld.sshfl [vmem:[#allocation2 + $0x7c] sm:$0x33 pattern:$0x75316420] }
 0x390   : > { %18914 = vmatprep.subr.bf16.mxu0 %v22345_v2  ;;  %v7270_v19 = vrot.slane %v7263_v60, %v19267_v46  ;;  %v7284_v24 = vrot.slane %v7277_v59, %v19267_v46  ;;  %v7319_v44 = vrot.slane %v6605_v42, %v19267_v46  ;;  %v7333_v18 = vrot.slane %v6620_v37, %v19267_v46 }
 0x391   : > { %v7298_v62 = vrot.slane %v7291_v12, %v19267_v46  ;;  %v7347_v35 = vrot.slane %v6627_v1, %v19267_v46  ;;  %v7361_v38 = vrot.slane %v6628_v41, %v19267_v46  ;;  %v7312_v58 = vrot.slane %v7305_v55, %v19267_v46  ;;  %v18310_v41 = vld.sshfl [vmem:[#allocation2 + $0x78] sm:$0x33 pattern:$0x75316420]  ;;  %18942 = vmatprep.subr.bf16.mxu1 %v22509_v7 }
 0x392   : > { %v7326_v43 = vrot.slane %v7319_v44, %v19267_v46  ;;  %v7375_v54 = vrot.slane %v6629_v51, %v19267_v46  ;;  %v7389_v3 = vrot.slane %v6644_v21, %v19267_v46  ;;  %v7340_v27 = vrot.slane %v7333_v18, %v19267_v46  ;;  %18950 = vmatpush3.bf16.msra.mxu1 %v22509_v7  ;;  %v18313_v18 = vld.sshfl [vmem:[#allocation2 + $0x90] sm:$0x33 pattern:$0x75316420] }
 0x393   : > { %18915 = vmatpush3.bf16.msra.mxu0 %v22345_v2  ;;  %v7354_v49 = vrot.slane %v7347_v35, %v19267_v46  ;;  %v7368_v32 = vrot.slane %v7361_v38, %v19267_v46  ;;  %v7403_v36 = vrot.slane %v6651_v61, %v19267_v46  ;;  %v7417_v56 = vrot.slane %v6652_v11, %v19267_v46 }
 0x394   : > { %v7382_v6 = vrot.slane %v7375_v54, %v19267_v46  ;;  %v7396_v48 = vrot.slane %v7389_v3, %v19267_v46  ;;  %v7431_v34 = vrot.slane %v6653_v16, %v19267_v46  ;;  %18916 = vmatprep.subr.bf16.mxu0 %v22429_v10  ;;  %v7695_v14 = vunpack.c.l.b16 %v22455_v53 }
 0x395   : > { %v7410_v2 = vrot.slane %v7403_v36, %v19267_v46  ;;  %v7696_v33 = vunpack.c.l.b16 %v7242_v15  ;;  %v7697_v45 = vunpack.c.l.b16 %v7256_v20  ;;  %v7424_v52 = vrot.slane %v7417_v56, %v19267_v46 }
 0x396   : > { %v7438_v39 = vrot.slane %v7431_v34, %v19267_v46  ;;  %v7698_v5 = vunpack.c.l.b16 %v7270_v19  ;;  %v7699_v57 = vunpack.c.l.b16 %v7284_v24  ;;  %v7700_v29 = vunpack.c.l.b16 %v7298_v62  ;;  %v22541_v34 = vld.sshfl [vmem:[#allocation2 + $0x98] sm:$0x1 pattern:$0x75316420] }
 0x397   : > { %v7701_v63 = vunpack.c.l.b16 %v7312_v58  ;;  %v7702_v28 = vunpack.c.l.b16 %v7326_v43  ;;  %v7703_v50 = vunpack.c.l.b16 %v7340_v27  ;;  %18917 = vmatpush3.bf16.msra.mxu0 %v22429_v10  ;;  %v7704_v40 = vunpack.c.l.b16 %v7354_v49  ;;  %v22518_v10 = vld [vmem:[%s23042_s3 + $0x238] sm:$0xff]   ;;  %v18312_v43 = vld.sshfl [vmem:[#allocation2 + $0x80] sm:$0x1 pattern:$0x75316420] }
 0x398   : > { %v7705_v37 = vunpack.c.l.b16 %v7368_v32  ;;  %v7706_v17 = vunpack.c.l.b16 %v7382_v6  ;;  %v7707_v42 = vunpack.c.l.b16 %v7396_v48  ;;  %18918 = vmatprep.subr.bf16.mxu0 %v22441_v26  ;;  %v7708_v22 = vunpack.c.l.b16 %v7410_v2  ;;  %18943 = vmatprep.subr.bf16.mxu1 %v22518_v10  ;;  %v18314_v32 = vld.sshfl [vmem:[#allocation2 + $0x94] sm:$0x33 pattern:$0x75316420] }
 0x399   : > { %v7709_v21 = vunpack.c.l.b16 %v7424_v52  ;;  %v7710_v4 = vunpack.c.l.b16 %v7438_v39  ;;  %v7783_v1 = vrot.slane %v7696_v33, 7  ;;  %v7785_v8 = vrot.slane %v7697_v45, 6  ;;  %18951 = vmatpush3.bf16.msra.mxu1 %v22518_v10 }
 0x39a   : > { %v7787_v61 = vrot.slane %v7698_v5, 5  ;;  %v7789_v11 = vrot.slane %v7699_v57, 4  ;;  %v7791_v25 = vrot.slane %v7700_v29, 3  ;;  %v7793_v53 = vrot.slane %v7701_v63, 2 }
 0x39b   : > { %v7784_v51 = vsel %vm3140_vm2, %v7783_v1, %v7695_v14  ;;  %v7795_v60 = vrot.slane %v7702_v28, 1  ;;  %v7797_v59 = vrot.slane %v7704_v40, 7  ;;  %18919 = vmatpush3.bf16.msra.mxu0 %v22441_v26  ;;  %v7799_v16 = vrot.slane %v7705_v37, 6 }
 0x39c   : > { %v7786_v30 = vsel %vm3143_vm6, %v7785_v8, %v7784_v51  ;;  %v7801_v15 = vrot.slane %v7706_v17, 5  ;;  %v7803_v20 = vrot.slane %v7707_v42, 4  ;;  %18920 = vmatprep.subr.bf16.mxu0 %v22462_v13  ;;  %v7805_v24 = vrot.slane %v7708_v22, 3 }
 0x39d   : > { %v7788_v12 = vsel %vm3146_vm11, %v7787_v61, %v7786_v30  ;;  %v7798_v19 = vsel %vm3140_vm2, %v7797_v59, %v7703_v50  ;;  %v7807_v55 = vrot.slane %v7709_v21, 2  ;;  %v7809_v26 = vrot.slane %v7710_v4, 1 }
 0x39e   : > { %v7790_v44 = vsel %vm3149_vm12, %v7789_v11, %v7788_v12  ;;  %v7800_v62 = vsel %vm3143_vm6, %v7799_v16, %v7798_v19  ;;  %v13950_v35 = vcombine.high %v18310_v41, %v18310_v41  ;;  %v13957_v54 = vrot.slane %v18310_v41, %v19267_v46 }
 0x39f   : > { %v7792_v38 = vsel %vm3152_vm13, %v7791_v25, %v7790_v44  ;;  %v7802_v58 = vsel %vm3146_vm11, %v7801_v15, %v7800_v62  ;;  %v13974_v3 = vcombine.high %v18311_v31, %v18311_v31  ;;  %18921 = vmatpush3.bf16.msra.mxu0 %v22462_v13  ;;  %v13981_v6 = vrot.slane %v18311_v31, %v19267_v46 }
 0x3a0   : > { %v7794_v27 = vsel %vm3155_vm14, %v7793_v53, %v7792_v38  ;;  %v7804_v49 = vsel %vm3149_vm12, %v7803_v20, %v7802_v58  ;;  %v13964_v36 = vrot.slane %v13950_v35, %v19267_v46  ;;  %18922 = vmatprep.subr.bf16.mxu0 %v22488_v47  ;;  %v13965_v2 = vcombine.high %v13957_v54, %v13957_v54 }
 0x3a1   : > { %v7796_v48 = vsel %vm3158_vm15, %v7795_v60, %v7794_v27  ;;  %v7806_v56 = vsel %vm3152_vm13, %v7805_v24, %v7804_v49  ;;  %v13988_v13 = vrot.slane %v13974_v3, %v19267_v46  ;;  %v13989_v45 = vcombine.high %v13981_v6, %v13981_v6 }
 0x3a2   : > { %v7808_v14 = vsel %vm3155_vm14, %v7807_v55, %v7806_v56  ;;  %v13966_v33 = vcombine.high %v13964_v36, %v13964_v36  ;;  %v14004_v52 = vrot.slane %v18312_v43, %v19267_v46  ;;  %v14012_v57 = vcombine.high %v18313_v18, %v18313_v18 }
 0x3a3   : > { %v7810_v39 = vsel %vm3158_vm15, %v7809_v26, %v7808_v14  ;;  %v13990_v5 = vcombine.high %v13988_v13, %v13988_v13  ;;  %v14019_v29 = vrot.slane %v18313_v18, %v19267_v46  ;;  %18923 = vmatpush3.bf16.msra.mxu0 %v22488_v47  ;;  %v14036_v28 = vcombine.high %v18314_v32, %v18314_v32 }
 0x3a4   : > { %v7841_v63 = vpack.c.b16 %v7810_v39, %v7796_v48  ;;  %v14043_v50 = vrot.slane %v18314_v32, %v19267_v46  ;;  %v14066_v40 = vrot.slane %v22541_v34, %v19267_v46  ;;  %18924 = vmatprep.subr.bf16.mxu0 %v22509_v7  ;;  %v14026_v37 = vrot.slane %v14012_v57, %v19267_v46 }
 0x3a5   : > { %v14027_v17 = vcombine.high %v14019_v29, %v14019_v29  ;;  %v14452_v42 = vshrl.u32 %v13957_v54, 16  ;;  %v14457_v22 = vshll.u32 %v13964_v36, 16  ;;  %v14050_v21 = vrot.slane %v14036_v28, %v19267_v46 }
 0x3a6   : > { %18812 = vmatprep.mubr.bf16.mxu1 %v7841_v63  ;;  %v14051_v4 = vcombine.high %v14043_v50, %v14043_v50  ;;  %v14460_v1 = vshrl.u32 %v13964_v36, 16  ;;  %v14465_v47 = vshll.u32 %v13965_v2, 16  ;;  %v14028_v41 = vcombine.high %v14026_v37, %v14026_v37 }
 0x3a7   : > { %v14459_v8 = vsel %vm19323_vm9, %v14452_v42, %v14457_v22  ;;  %v14468_v61 = vshrl.u32 %v13965_v2, 16  ;;  %v14473_v11 = vshll.u32 %v13966_v33, 16  ;;  %18925 = vmatpush3.bf16.msra.mxu0 %v22509_v7  ;;  %v14052_v25 = vcombine.high %v14050_v21, %v14050_v21 }
 0x3a8   : > { %v14467_v31 = vsel %vm19323_vm9, %v14460_v1, %v14465_v47  ;;  %v14476_v51 = vshrl.u32 %v13966_v33, 16  ;;  %v14481_v53 = vshll.u32 %v13981_v6, 16  ;;  %18926 = vmatprep.subr.bf16.mxu0 %v22518_v10  ;;  %v14484_v59 = vshrl.u32 %v13981_v6, 16 }
 0x3a9   : > { %v14475_v60 = vsel %vm19323_vm9, %v14468_v61, %v14473_v11  ;;  %v14489_v30 = vshll.u32 %v13988_v13, 16  ;;  %v14492_v16 = vshrl.u32 %v13988_v13, 16  ;;  %v14497_v20 = vshll.u32 %v13989_v45, 16 }
 0x3aa   : > { %v14483_v15 = vsel %vm19323_vm9, %v14476_v51, %v14481_v53  ;;  %v14500_v12 = vshrl.u32 %v13989_v45, 16  ;;  %v14505_v7 = vshll.u32 %v13990_v5, 16  ;;  %v14508_v24 = vshrl.u32 %v13990_v5, 16 }
 0x3ab   : > { %v14491_v19 = vsel %vm19323_vm9, %v14484_v59, %v14489_v30  ;;  %v14513_v55 = vshll.u32 %v14004_v52, 16  ;;  %v14517_v44 = vshrl.u32 %v14019_v29, 16  ;;  %18927 = vmatpush3.bf16.msra.mxu0 %v22518_v10  ;;  %v14499_v62 = vsel %vm19323_vm9, %v14492_v16, %v14497_v20 }
 0x3ac   : > { %v14507_v26 = vsel %vm19323_vm9, %v14500_v12, %v14505_v7  ;;  %v14522_v18 = vshll.u32 %v14026_v37, 16  ;;  %v14525_v35 = vshrl.u32 %v14026_v37, 16  ;;  %v14530_v58 = vshll.u32 %v14027_v17, 16 }
 0x3ad   : > { %v14515_v38 = vsel %vm19323_vm9, %v14508_v24, %v14513_v55  ;;  %v14533_v43 = vshrl.u32 %v14027_v17, 16  ;;  %v14538_v54 = vshll.u32 %v14028_v41, 16  ;;  %v14541_v27 = vshrl.u32 %v14028_v41, 16 }
 0x3ae   : > { %v14524_v3 = vsel %vm19323_vm9, %v14517_v44, %v14522_v18  ;;  %v14546_v49 = vshll.u32 %v14043_v50, 16  ;;  %v14549_v10 = vshrl.u32 %v14043_v50, 16  ;;  %v14532_v32 = vsel %vm19323_vm9, %v14525_v35, %v14530_v58 }
 0x3af   : > { %v14540_v36 = vsel %vm19323_vm9, %v14533_v43, %v14538_v54  ;;  %v14554_v6 = vshll.u32 %v14050_v21, 16  ;;  %v14557_v48 = vshrl.u32 %v14050_v21, 16  ;;  %v14562_v34 = vshll.u32 %v14051_v4, 16 }
 0x3b0   : > { %v14548_v56 = vsel %vm19323_vm9, %v14541_v27, %v14546_v49  ;;  %v14565_v2 = vshrl.u32 %v14051_v4, 16  ;;  %v14570_v13 = vshll.u32 %v14052_v25, 16  ;;  %v14573_v33 = vshrl.u32 %v14052_v25, 16 }
 0x3b1   : > { %v14556_v14 = vsel %vm19323_vm9, %v14549_v10, %v14554_v6  ;;  %v14578_v45 = vshll.u32 %v14066_v40, 16  ;;  %v15182_v52 = vrot.slane %v14459_v8, %v19267_v46  ;;  %v14564_v39 = vsel %vm19323_vm9, %v14557_v48, %v14562_v34 }
 0x3b2   : > { %v14572_v5 = vsel %vm19323_vm9, %v14565_v2, %v14570_v13  ;;  %v15196_v57 = vrot.slane %v14467_v31, %v19267_v46  ;;  %v15210_v29 = vrot.slane %v14475_v60, %v19267_v46  ;;  %v15224_v50 = vrot.slane %v14483_v15, %v19267_v46 }
 0x3b3   : > { %v14580_v63 = vsel %vm19323_vm9, %v14573_v33, %v14578_v45  ;;  %v15189_v28 = vrot.slane %v15182_v52, %v19267_v46  ;;  %v15238_v40 = vrot.slane %v14491_v19, %v19267_v46  ;;  %v15252_v42 = vrot.slane %v14499_v62, %v19267_v46  ;;  %v18071_v33 = vld.sshfl [vmem:[#allocation2 + $0xa0] sm:$0x33 pattern:$0x75316420] }
 0x3b4   : > { %v15203_v37 = vrot.slane %v15196_v57, %v19267_v46  ;;  %v15217_v17 = vrot.slane %v15210_v29, %v19267_v46  ;;  %v15266_v22 = vrot.slane %v14507_v26, %v19267_v46  ;;  %v15231_v21 = vrot.slane %v15224_v50, %v19267_v46 }
 0x3b5   : > { %v15245_v4 = vrot.slane %v15238_v40, %v19267_v46  ;;  %v15280_v1 = vrot.slane %v14515_v38, %v19267_v46  ;;  %v15294_v47 = vrot.slane %v14524_v3, %v19267_v46  ;;  %v15259_v41 = vrot.slane %v15252_v42, %v19267_v46 }
 0x3b6   : > { %v15273_v8 = vrot.slane %v15266_v22, %v19267_v46  ;;  %v15308_v61 = vrot.slane %v14532_v32, %v19267_v46  ;;  %v15322_v11 = vrot.slane %v14540_v36, %v19267_v46  ;;  %v15336_v51 = vrot.slane %v14548_v56, %v19267_v46  ;;  %v18070_v56 = vld.sshfl [vmem:[#allocation2 + $0x9c] sm:$0x33 pattern:$0x75316420] }
 0x3b7   : > { %v15287_v25 = vrot.slane %v15280_v1, %v19267_v46  ;;  %v15301_v31 = vrot.slane %v15294_v47, %v19267_v46  ;;  %v15350_v53 = vrot.slane %v14556_v14, %v19267_v46  ;;  %v15364_v30 = vrot.slane %v14564_v39, %v19267_v46 }
 0x3b8   : > { %v15315_v60 = vrot.slane %v15308_v61, %v19267_v46  ;;  %v15329_v59 = vrot.slane %v15322_v11, %v19267_v46  ;;  %v15378_v16 = vrot.slane %v14572_v5, %v19267_v46  ;;  %v15343_v15 = vrot.slane %v15336_v51, %v19267_v46 }
 0x3b9   : > { %v15357_v20 = vrot.slane %v15350_v53, %v19267_v46  ;;  %v15392_v12 = vrot.slane %v14580_v63, %v19267_v46  ;;  %v15656_v7 = vunpack.c.l.b16 %v15189_v28  ;;  %v15371_v19 = vrot.slane %v15364_v30, %v19267_v46 }
 0x3ba   : > { %v15385_v24 = vrot.slane %v15378_v16, %v19267_v46  ;;  %v15657_v55 = vunpack.c.l.b16 %v15203_v37  ;;  %v15658_v44 = vunpack.c.l.b16 %v15217_v17  ;;  %v15659_v26 = vunpack.c.l.b16 %v15231_v21 }
 0x3bb   : > { %v15399_v62 = vrot.slane %v15392_v12, %v19267_v46  ;;  %v15660_v18 = vunpack.c.l.b16 %v15245_v4  ;;  %v15661_v35 = vunpack.c.l.b16 %v15259_v41  ;;  %v15662_v38 = vunpack.c.l.b16 %v15273_v8  ;;  %v18072_v41 = vld.sshfl [vmem:[#allocation2 + $0xb4] sm:$0x33 pattern:$0x75316420] }
 0x3bc   : > { %v15663_v58 = vunpack.c.l.b16 %v15287_v25  ;;  %v15664_v43 = vunpack.c.l.b16 %v15301_v31  ;;  %v15665_v54 = vunpack.c.l.b16 %v15315_v60  ;;  %v15666_v3 = vunpack.c.l.b16 %v15329_v59  ;;  %v18073_v31 = vld.sshfl [vmem:[#allocation2 + $0xb8] sm:$0x33 pattern:$0x75316420] }
 0x3bd   : > { %v15667_v27 = vunpack.c.l.b16 %v15343_v15  ;;  %v15668_v49 = vunpack.c.l.b16 %v15357_v20  ;;  %v15669_v10 = vunpack.c.l.b16 %v15371_v19  ;;  %v15670_v32 = vunpack.c.l.b16 %v15385_v24 }
 0x3be   : > { %v15671_v36 = vunpack.c.l.b16 %v15399_v62  ;;  %v15744_v6 = vrot.slane %v15657_v55, 7  ;;  %v15746_v48 = vrot.slane %v15658_v44, 6  ;;  %v15748_v34 = vrot.slane %v15659_v26, 5 }
 0x3bf   : > { %v15750_v2 = vrot.slane %v15660_v18, 4  ;;  %v15752_v13 = vrot.slane %v15661_v35, 3  ;;  %v15754_v14 = vrot.slane %v15662_v38, 2  ;;  %v15756_v52 = vrot.slane %v15663_v58, 1 }
 0x3c0   : > { %v15745_v45 = vsel %vm3140_vm2, %v15744_v6, %v15656_v7  ;;  %v15758_v39 = vrot.slane %v15665_v54, 7  ;;  %v15760_v5 = vrot.slane %v15666_v3, 6  ;;  %v15762_v29 = vrot.slane %v15667_v27, 5 }
 0x3c1   : > { %v15747_v57 = vsel %vm3143_vm6, %v15746_v48, %v15745_v45  ;;  %v15764_v63 = vrot.slane %v15668_v49, 4  ;;  %v15766_v28 = vrot.slane %v15669_v10, 3  ;;  %v15768_v37 = vrot.slane %v15670_v32, 2 }
 0x3c2   : > { %v15749_v50 = vsel %vm3146_vm11, %v15748_v34, %v15747_v57  ;;  %v15759_v40 = vsel %vm3140_vm2, %v15758_v39, %v15664_v43  ;;  %v15770_v17 = vrot.slane %v15671_v36, 1  ;;  %v6661_v21 = vcombine.high %v18070_v56, %v18070_v56 }
 0x3c3   : > { %v15751_v42 = vsel %vm3149_vm12, %v15750_v2, %v15749_v50  ;;  %v15761_v22 = vsel %vm3143_vm6, %v15760_v5, %v15759_v40  ;;  %v6668_v4 = vrot.slane %v18070_v56, %v19267_v46  ;;  %v6685_v8 = vcombine.high %v18071_v33, %v18071_v33 }
 0x3c4   : > { %v15753_v1 = vsel %vm3152_vm13, %v15752_v13, %v15751_v42  ;;  %v15763_v47 = vsel %vm3146_vm11, %v15762_v29, %v15761_v22  ;;  %v6692_v61 = vrot.slane %v18071_v33, %v19267_v46  ;;  %v6675_v51 = vrot.slane %v6661_v21, %v19267_v46 }
 0x3c5   : > { %v15755_v11 = vsel %vm3155_vm14, %v15754_v14, %v15753_v1  ;;  %v15765_v25 = vsel %vm3149_vm12, %v15764_v63, %v15763_v47  ;;  %v6676_v53 = vcombine.high %v6668_v4, %v6668_v4  ;;  %v6699_v30 = vrot.slane %v6685_v8, %v19267_v46 }
 0x3c6   : > { %v15757_v60 = vsel %vm3158_vm15, %v15756_v52, %v15755_v11  ;;  %v15767_v59 = vsel %vm3152_vm13, %v15766_v28, %v15765_v25  ;;  %v6700_v16 = vcombine.high %v6692_v61, %v6692_v61  ;;  %v6677_v20 = vcombine.high %v6675_v51, %v6675_v51 }
 0x3c7   : > { %v15769_v15 = vsel %vm3155_vm14, %v15768_v37, %v15767_v59  ;;  %v6709_v12 = vcombine.high %v18072_v41, %v18072_v41  ;;  %v6716_v7 = vrot.slane %v18072_v41, %v19267_v46  ;;  %v6701_v24 = vcombine.high %v6699_v30, %v6699_v30 }
 0x3c8   : > { %v15771_v19 = vsel %vm3158_vm15, %v15770_v17, %v15769_v15  ;;  %v6733_v55 = vcombine.high %v18073_v31, %v18073_v31  ;;  %v6740_v44 = vrot.slane %v18073_v31, %v19267_v46  ;;  %v7445_v35 = vrot.slane %v6668_v4, %v19267_v46 }
 0x3c9   : > { %v15802_v62 = vpack.c.b16 %v15771_v19, %v15757_v60  ;;  %v6723_v26 = vrot.slane %v6709_v12, %v19267_v46  ;;  %v6724_v18 = vcombine.high %v6716_v7, %v6716_v7  ;;  %v7459_v43 = vrot.slane %v6675_v51, %v19267_v46 }
 0x3ca   : > { %v6747_v38 = vrot.slane %v6733_v55, %v19267_v46  ;;  %v6748_v58 = vcombine.high %v6740_v44, %v6740_v44  ;;  %v7473_v54 = vrot.slane %v6676_v53, %v19267_v46  ;;  %v7452_v27 = vrot.slane %v7445_v35, %v19267_v46 }
 0x3cb   : > { %18908 = vmatprep.mubr.bf16.mxu0 %v15802_v62  ;;  %v6725_v3 = vcombine.high %v6723_v26, %v6723_v26  ;;  %v7487_v49 = vrot.slane %v6677_v20, %v19267_v46  ;;  %v7501_v10 = vrot.slane %v6692_v61, %v19267_v46  ;;  %v7466_v36 = vrot.slane %v7459_v43, %v19267_v46  ;;  %v18316_v62 = vld.sshfl [vmem:[#allocation2 + $0xa8] sm:$0x33 pattern:$0x75316420] }
 0x3cc   : > { %v6749_v32 = vcombine.high %v6747_v38, %v6747_v38  ;;  %v7480_v6 = vrot.slane %v7473_v54, %v19267_v46  ;;  %v7515_v48 = vrot.slane %v6699_v30, %v19267_v46  ;;  %v7529_v2 = vrot.slane %v6700_v16, %v19267_v46 }
 0x3cd   : > { %v7494_v56 = vrot.slane %v7487_v49, %v19267_v46  ;;  %v7508_v34 = vrot.slane %v7501_v10, %v19267_v46  ;;  %v7543_v13 = vrot.slane %v6701_v24, %v19267_v46  ;;  %v7557_v33 = vrot.slane %v6716_v7, %v19267_v46 }
 0x3ce   : > { %v7522_v14 = vrot.slane %v7515_v48, %v19267_v46  ;;  %v7571_v45 = vrot.slane %v6723_v26, %v19267_v46  ;;  %v7585_v52 = vrot.slane %v6724_v18, %v19267_v46  ;;  %v7536_v39 = vrot.slane %v7529_v2, %v19267_v46 }
 0x3cf   : > { %v7550_v5 = vrot.slane %v7543_v13, %v19267_v46  ;;  %v7599_v57 = vrot.slane %v6725_v3, %v19267_v46  ;;  %v7613_v29 = vrot.slane %v6740_v44, %v19267_v46  ;;  %v7564_v63 = vrot.slane %v7557_v33, %v19267_v46 }
 0x3d0   : > { %v7578_v28 = vrot.slane %v7571_v45, %v19267_v46  ;;  %v7592_v50 = vrot.slane %v7585_v52, %v19267_v46  ;;  %v7627_v40 = vrot.slane %v6747_v38, %v19267_v46  ;;  %v7641_v42 = vrot.slane %v6748_v58, %v19267_v46  ;;  %v550_v58 = vld [vmem:[#allocation2 + $0xc8] sm:$0x1]  ;;  %v18318_v52 = vld.sshfl [vmem:[#allocation2 + $0xb0] sm:$0x1 pattern:$0x75316420] }
 0x3d1   : > { %v7606_v37 = vrot.slane %v7599_v57, %v19267_v46  ;;  %v7620_v17 = vrot.slane %v7613_v29, %v19267_v46  ;;  %v7655_v22 = vrot.slane %v6749_v32, %v19267_v46  ;;  %v7711_v4 = vunpack.c.l.b16 %v7452_v27  ;;  %v18319_v29 = vld.sshfl [vmem:[#allocation2 + $0xc0] sm:$0x33 pattern:$0x75316420] }
 0x3d2   : > { %v7634_v21 = vrot.slane %v7627_v40, %v19267_v46  ;;  %v7712_v1 = vunpack.c.l.b16 %v7466_v36  ;;  %v7713_v47 = vunpack.c.l.b16 %v7480_v6  ;;  %v7648_v41 = vrot.slane %v7641_v42, %v19267_v46  ;;  %v18317_v6 = vld.sshfl [vmem:[#allocation2 + $0xac] sm:$0x33 pattern:$0x75316420] }
 0x3d3   : > { %v7662_v8 = vrot.slane %v7655_v22, %v19267_v46  ;;  %v7714_v61 = vunpack.c.l.b16 %v7494_v56  ;;  %v7715_v11 = vunpack.c.l.b16 %v7508_v34  ;;  %v7716_v25 = vunpack.c.l.b16 %v7522_v14 }
 0x3d4   : > { %v7717_v31 = vunpack.c.l.b16 %v7536_v39  ;;  %v7718_v51 = vunpack.c.l.b16 %v7550_v5  ;;  %v7719_v53 = vunpack.c.l.b16 %v7564_v63  ;;  %v7720_v60 = vunpack.c.l.b16 %v7578_v28 }
 0x3d5   : > { %v7721_v59 = vunpack.c.l.b16 %v7592_v50  ;;  %v7722_v30 = vunpack.c.l.b16 %v7606_v37  ;;  %v7723_v16 = vunpack.c.l.b16 %v7620_v17  ;;  %v7724_v15 = vunpack.c.l.b16 %v7634_v21  ;;  %v18320_v37 = vld.sshfl [vmem:[#allocation2 + $0xc4] sm:$0x33 pattern:$0x75316420] }
 0x3d6   : > { %v7725_v20 = vunpack.c.l.b16 %v7648_v41  ;;  %v7726_v12 = vunpack.c.l.b16 %v7662_v8  ;;  %v7811_v7 = vrot.slane %v7712_v1, 7  ;;  %v7813_v19 = vrot.slane %v7713_v47, 6 }
 0x3d7   : > { %v7815_v24 = vrot.slane %v7714_v61, 5  ;;  %v7817_v55 = vrot.slane %v7715_v11, 4  ;;  %v7819_v44 = vrot.slane %v7716_v25, 3  ;;  %v7821_v18 = vrot.slane %v7717_v31, 2 }
 0x3d8   : > { %v7812_v26 = vsel %vm3140_vm2, %v7811_v7, %v7711_v4  ;;  %v7823_v35 = vrot.slane %v7718_v51, 1  ;;  %v7825_v38 = vrot.slane %v7720_v60, 7  ;;  %v7827_v54 = vrot.slane %v7721_v59, 6 }
 0x3d9   : > { %v7814_v43 = vsel %vm3143_vm6, %v7813_v19, %v7812_v26  ;;  %v7829_v3 = vrot.slane %v7722_v30, 5  ;;  %v7831_v27 = vrot.slane %v7723_v16, 4  ;;  %v7833_v32 = vrot.slane %v7724_v15, 3 }
 0x3da   : > { %v7816_v49 = vsel %vm3146_vm11, %v7815_v24, %v7814_v43  ;;  %v7826_v10 = vsel %vm3140_vm2, %v7825_v38, %v7719_v53  ;;  %v7835_v36 = vrot.slane %v7725_v20, 2  ;;  %v7837_v34 = vrot.slane %v7726_v12, 1 }
 0x3db   : > { %v7818_v48 = vsel %vm3149_vm12, %v7817_v55, %v7816_v49  ;;  %v7828_v56 = vsel %vm3143_vm6, %v7827_v54, %v7826_v10  ;;  %v551_v13 = vsel %vm19247_vm5, 0, %v550_v58  ;;  %v906_v45 = vrot.slane %v22015_v0, 4 }
 0x3dc   : > { %v7820_v14 = vsel %vm3152_vm13, %v7819_v44, %v7818_v48  ;;  %v7830_v33 = vsel %vm3146_vm11, %v7829_v3, %v7828_v56  ;;  %552 = vst [vmem:[#allocation2 + $0xc8] sm:$0x1] %v551_v13  ;;  %v14074_v39 = vcombine.high %v18316_v62, %v18316_v62  ;;  %v14081_v63 = vrot.slane %v18316_v62, %v19267_v46 }
 0x3dd   : > { %v7822_v5 = vsel %vm3155_vm14, %v7821_v18, %v7820_v14  ;;  %v7832_v57 = vsel %vm3149_vm12, %v7831_v27, %v7830_v33  ;;  %v14098_v28 = vcombine.high %v18317_v6, %v18317_v6  ;;  %v14105_v42 = vrot.slane %v18317_v6, %v19267_v46 }
 0x3de   : > { %v7824_v50 = vsel %vm3158_vm15, %v7823_v35, %v7822_v5  ;;  %v7834_v40 = vsel %vm3152_vm13, %v7833_v32, %v7832_v57  ;;  %v14088_v17 = vrot.slane %v14074_v39, %v19267_v46  ;;  %v14089_v22 = vcombine.high %v14081_v63, %v14081_v63 }
 0x3df   : > { %v7836_v0 = vsel %vm3155_vm14, %v7835_v36, %v7834_v40  ;;  %v14112_v21 = vrot.slane %v14098_v28, %v19267_v46  ;;  %v14128_v4 = vrot.slane %v18318_v52, %v19267_v46  ;;  %v14113_v41 = vcombine.high %v14105_v42, %v14105_v42 }
 0x3e0   : > { %v7838_v1 = vsel %vm3158_vm15, %v7837_v34, %v7836_v0  ;;  %v14090_v47 = vcombine.high %v14088_v17, %v14088_v17  ;;  %v14136_v8 = vcombine.high %v18319_v29, %v18319_v29  ;;  %v14143_v25 = vrot.slane %v18319_v29, %v19267_v46 }
 0x3e1   : > { %v7842_v61 = vpack.c.b16 %v7838_v1, %v7824_v50  ;;  %v14114_v11 = vcombine.high %v14112_v21, %v14112_v21  ;;  %v14160_v31 = vcombine.high %v18320_v37, %v18320_v37  ;;  %v14167_v53 = vrot.slane %v18320_v37, %v19267_v46 }
 0x3e2   : > { %v14150_v51 = vrot.slane %v14136_v8, %v19267_v46  ;;  %v14582_v60 = vshrl.u32 %v14081_v63, 16  ;;  %v14587_v59 = vshll.u32 %v14088_v17, 16  ;;  %v14151_v16 = vcombine.high %v14143_v25, %v14143_v25 }
 0x3e3   : > { %18813 = vmatmul.mubr.bf16.gmra.mrb[4].mxu1 %v7842_v61  ;;  %v1066_v30 = vld [vmem:[#allocation2 + $0xc8] sm:$0x1]  ;;  %v14174_v15 = vrot.slane %v14160_v31, %v19267_v46  ;;  %v14590_v20 = vshrl.u32 %v14088_v17, 16  ;;  %v14595_v12 = vshll.u32 %v14089_v22, 16  ;;  %v14175_v24 = vcombine.high %v14167_v53, %v14167_v53 }
 0x3e4   : > { %v1067_v7 = vsel %vm19234_vm3, %v906_v45, %v1066_v30  ;;  %v14152_v19 = vcombine.high %v14150_v51, %v14150_v51  ;;  %v14589_v55 = vsel %vm19323_vm9, %v14582_v60, %v14587_v59  ;;  %v14598_v26 = vshrl.u32 %v14089_v22, 16 }
 0x3e5   : > { %1068 = vst [vmem:[#allocation2 + $0xc8] sm:$0x1] %v1067_v7  ;;  %v14176_v44 = vcombine.high %v14174_v15, %v14174_v15  ;;  %v14597_v62 = vsel %vm19323_vm9, %v14590_v20, %v14595_v12  ;;  %v14603_v18 = vshll.u32 %v14090_v47, 16  ;;  %v14606_v35 = vshrl.u32 %v14090_v47, 16 }
 0x3e6   : > { %v14611_v38 = vshll.u32 %v14105_v42, 16  ;;  %v14614_v58 = vshrl.u32 %v14105_v42, 16  ;;  %v14619_v43 = vshll.u32 %v14112_v21, 16  ;;  %v14622_v54 = vshrl.u32 %v14112_v21, 16 }
 0x3e7   : > { %v14605_v23 = vsel %vm19323_vm9, %v14598_v26, %v14603_v18  ;;  %v14627_v3 = vshll.u32 %v14113_v41, 16  ;;  %v14630_v27 = vshrl.u32 %v14113_v41, 16  ;;  %v14635_v32 = vshll.u32 %v14114_v11, 16 }
 0x3e8   : > { %v14613_v49 = vsel %vm19323_vm9, %v14606_v35, %v14611_v38  ;;  %v14621_v10 = vsel %vm19323_vm9, %v14614_v58, %v14619_v43  ;;  %v14638_v36 = vshrl.u32 %v14114_v11, 16  ;;  %v14643_v48 = vshll.u32 %v14128_v4, 16 }
 0x3e9   : > { %v14629_v6 = vsel %vm19323_vm9, %v14622_v54, %v14627_v3  ;;  %v14647_v56 = vshrl.u32 %v14143_v25, 16  ;;  %v14652_v34 = vshll.u32 %v14150_v51, 16  ;;  %v14637_v2 = vsel %vm19323_vm9, %v14630_v27, %v14635_v32 }
 0x3ea   : > { %v14655_v13 = vshrl.u32 %v14150_v51, 16  ;;  %v14660_v14 = vshll.u32 %v14151_v16, 16  ;;  %v14663_v33 = vshrl.u32 %v14151_v16, 16  ;;  %v14645_v45 = vsel %vm19323_vm9, %v14638_v36, %v14643_v48 }
 0x3eb   : > { %v14654_v52 = vsel %vm19323_vm9, %v14647_v56, %v14652_v34  ;;  %v14668_v39 = vshll.u32 %v14152_v19, 16  ;;  %v14671_v5 = vshrl.u32 %v14152_v19, 16  ;;  %v14676_v63 = vshll.u32 %v14167_v53, 16 }
 0x3ec   : > { %v18321_v57 = vld.sshfl [vmem:[#allocation2 + $0xc8] sm:$0x1 pattern:$0x75316420]  ;;  %v14662_v29 = vsel %vm19323_vm9, %v14655_v13, %v14660_v14  ;;  %v14679_v28 = vshrl.u32 %v14167_v53, 16  ;;  %v15406_v50 = vrot.slane %v14589_v55, %v19267_v46  ;;  %v14684_v17 = vshll.u32 %v14174_v15, 16 }
 0x3ed   : > { %v14190_v40 = vrot.slane %v18321_v57, %v19267_v46  ;;  %v14670_v37 = vsel %vm19323_vm9, %v14663_v33, %v14668_v39  ;;  %v14687_v42 = vshrl.u32 %v14174_v15, 16  ;;  %v14678_v0 = vsel %vm19323_vm9, %v14671_v5, %v14676_v63  ;;  %v18410_v63 = vld.sshfl [vmem:[#allocation2 + $0x18] sm:$0x32 pattern:$0x75316420] }
 0x3ee   : > { %v14692_v22 = vshll.u32 %v14175_v24, 16  ;;  %v14695_v21 = vshrl.u32 %v14175_v24, 16  ;;  %v14700_v4 = vshll.u32 %v14176_v44, 16  ;;  %v14686_v1 = vsel %vm19323_vm9, %v14679_v28, %v14684_v17 }
 0x3ef   : > { %v14703_v47 = vshrl.u32 %v14176_v44, 16  ;;  %v14708_v41 = vshll.u32 %v14190_v40, 16  ;;  %v15413_v8 = vrot.slane %v15406_v50, %v19267_v46  ;;  %v15420_v25 = vrot.slane %v14597_v62, %v19267_v46  ;;  %v18411_v17 = vld.sshfl [vmem:[#allocation2 + $0x1c] sm:$0x33 pattern:$0x75316420] }
 0x3f0   : > { %v14694_v61 = vsel %vm19323_vm9, %v14687_v42, %v14692_v22  ;;  %v14702_v11 = vsel %vm19323_vm9, %v14695_v21, %v14700_v4  ;;  %v15434_v31 = vrot.slane %v14605_v23, %v19267_v46  ;;  %v15448_v53 = vrot.slane %v14613_v49, %v19267_v46 }
 0x3f1   : > { %v14710_v51 = vsel %vm19323_vm9, %v14703_v47, %v14708_v41  ;;  %v15462_v60 = vrot.slane %v14621_v10, %v19267_v46  ;;  %v15476_v59 = vrot.slane %v14629_v6, %v19267_v46  ;;  %v15427_v30 = vrot.slane %v15420_v25, %v19267_v46 }
 0x3f2   : > { %v15441_v16 = vrot.slane %v15434_v31, %v19267_v46  ;;  %v15490_v15 = vrot.slane %v14637_v2, %v19267_v46  ;;  %v15504_v20 = vrot.slane %v14645_v45, %v19267_v46  ;;  %v15455_v12 = vrot.slane %v15448_v53, %v19267_v46 }
 0x3f3   : > { %v15469_v7 = vrot.slane %v15462_v60, %v19267_v46  ;;  %v15483_v9 = vrot.slane %v15476_v59, %v19267_v46  ;;  %v15518_v19 = vrot.slane %v14654_v52, %v19267_v46  ;;  %v15532_v44 = vrot.slane %v14662_v29, %v19267_v46 }
 0x3f4   : > { %v15497_v24 = vrot.slane %v15490_v15, %v19267_v46  ;;  %v15511_v55 = vrot.slane %v15504_v20, %v19267_v46  ;;  %v15546_v62 = vrot.slane %v14670_v37, %v19267_v46  ;;  %v15560_v18 = vrot.slane %v14678_v0, %v19267_v46 }
 0x3f5   : > { %v15525_v26 = vrot.slane %v15518_v19, %v19267_v46  ;;  %v15574_v35 = vrot.slane %v14686_v1, %v19267_v46  ;;  %v15588_v38 = vrot.slane %v14694_v61, %v19267_v46  ;;  %v15539_v58 = vrot.slane %v15532_v44, %v19267_v46 }
 0x3f6   : > { %v15553_v43 = vrot.slane %v15546_v62, %v19267_v46  ;;  %v15602_v23 = vrot.slane %v14702_v11, %v19267_v46  ;;  %v15616_v54 = vrot.slane %v14710_v51, %v19267_v46  ;;  %v15567_v3 = vrot.slane %v15560_v18, %v19267_v46  ;;  %v18414_v62 = vld.sshfl [vmem:[#allocation2 + $0x34] sm:$0x33 pattern:$0x75316420] }
 0x3f7   : > { %v15581_v27 = vrot.slane %v15574_v35, %v19267_v46  ;;  %v15595_v49 = vrot.slane %v15588_v38, %v19267_v46  ;;  %v15672_v10 = vunpack.c.l.b16 %v15413_v8  ;;  %v15673_v6 = vunpack.c.l.b16 %v15427_v30 }
 0x3f8   : > { %v15609_v32 = vrot.slane %v15602_v23, %v19267_v46  ;;  %v15623_v36 = vrot.slane %v15616_v54, %v19267_v46  ;;  %v15674_v48 = vunpack.c.l.b16 %v15441_v16  ;;  %v15675_v56 = vunpack.c.l.b16 %v15455_v12  ;;  %v18412_v16 = vld.sshfl [vmem:[#allocation2 + $0x20] sm:$0x1 pattern:$0x75316420] }
 0x3f9   : > { %v15676_v34 = vunpack.c.l.b16 %v15469_v7  ;;  %v15677_v2 = vunpack.c.l.b16 %v15483_v9  ;;  %v15678_v13 = vunpack.c.l.b16 %v15497_v24  ;;  %v15679_v14 = vunpack.c.l.b16 %v15511_v55  ;;  %v18413_v9 = vld.sshfl [vmem:[#allocation2 + $0x30] sm:$0x32 pattern:$0x75316420] }
 0x3fa   : > { %v15680_v33 = vunpack.c.l.b16 %v15525_v26  ;;  %v15681_v45 = vunpack.c.l.b16 %v15539_v58  ;;  %v15682_v52 = vunpack.c.l.b16 %v15553_v43  ;;  %v15683_v39 = vunpack.c.l.b16 %v15567_v3  ;;  %v18415_v58 = vld.sshfl [vmem:[#allocation2 + $0x38] sm:$0x1 pattern:$0x75316420] }
 0x3fb   : > { %v15684_v5 = vunpack.c.l.b16 %v15581_v27  ;;  %v15685_v57 = vunpack.c.l.b16 %v15595_v49  ;;  %v15686_v29 = vunpack.c.l.b16 %v15609_v32  ;;  %v15687_v28 = vunpack.c.l.b16 %v15623_v36 }
 0x3fc   : > { %v15772_v50 = vrot.slane %v15673_v6, 7  ;;  %v15774_v40 = vrot.slane %v15674_v48, 6  ;;  %v15776_v37 = vrot.slane %v15675_v56, 5  ;;  %v15778_v42 = vrot.slane %v15676_v34, 4 }
 0x3fd   : > { %v15780_v0 = vrot.slane %v15677_v2, 3  ;;  %v15782_v22 = vrot.slane %v15678_v13, 2  ;;  %v15784_v21 = vrot.slane %v15679_v14, 1  ;;  %v15786_v1 = vrot.slane %v15681_v45, 7 }
 0x3fe   : > { %v15773_v4 = vsel %vm3140_vm2, %v15772_v50, %v15672_v10  ;;  %v15788_v47 = vrot.slane %v15682_v52, 6  ;;  %v15790_v41 = vrot.slane %v15683_v39, 5  ;;  %v15792_v61 = vrot.slane %v15684_v5, 4 }
 0x3ff   : > { %v15775_v8 = vsel %vm3143_vm6, %v15774_v40, %v15773_v4  ;;  %v15794_v11 = vrot.slane %v15685_v57, 3  ;;  %v15796_v25 = vrot.slane %v15686_v29, 2  ;;  %v15787_v51 = vsel %vm3140_vm2, %v15786_v1, %v15680_v33 }
 0x400   : > { %v15777_v31 = vsel %vm3146_vm11, %v15776_v37, %v15775_v8  ;;  %v15798_v53 = vrot.slane %v15687_v28, 1  ;;  %v15984_v60 = vcombine.high %v18410_v63, %v18410_v63  ;;  %v15789_v30 = vsel %vm3143_vm6, %v15788_v47, %v15787_v51 }
 0x401   : > { %v15779_v59 = vsel %vm3149_vm12, %v15778_v42, %v15777_v31  ;;  %v15991_v15 = vrot.slane %v18410_v63, %v19267_v46  ;;  %v16008_v20 = vcombine.high %v18411_v17, %v18411_v17  ;;  %v15791_v7 = vsel %vm3146_vm11, %v15790_v41, %v15789_v30 }
 0x402   : > { %v15781_v12 = vsel %vm3152_vm13, %v15780_v0, %v15779_v59  ;;  %v15998_v19 = vrot.slane %v15984_v60, %v19267_v46  ;;  %v16015_v24 = vrot.slane %v18411_v17, %v19267_v46  ;;  %v15793_v44 = vsel %vm3149_vm12, %v15792_v61, %v15791_v7 }
 0x403   : > { %v15783_v55 = vsel %vm3155_vm14, %v15782_v22, %v15781_v12  ;;  %v15999_v26 = vcombine.high %v15991_v15, %v15991_v15  ;;  %v16022_v18 = vrot.slane %v16008_v20, %v19267_v46  ;;  %v15795_v38 = vsel %vm3152_vm13, %v15794_v11, %v15793_v44 }
 0x404   : > { %v15785_v35 = vsel %vm3158_vm15, %v15784_v21, %v15783_v55  ;;  %v16000_v43 = vcombine.high %v15998_v19, %v15998_v19  ;;  %v16023_v23 = vcombine.high %v16015_v24, %v16015_v24  ;;  %v15797_v54 = vsel %vm3155_vm14, %v15796_v25, %v15795_v38 }
 0x405   : > { %v16024_v3 = vcombine.high %v16022_v18, %v16022_v18  ;;  %v16038_v27 = vrot.slane %v18412_v16, %v19267_v46  ;;  %v16046_v49 = vcombine.high %v18413_v9, %v18413_v9  ;;  %v15799_v10 = vsel %vm3158_vm15, %v15798_v53, %v15797_v54 }
 0x406   : > { %v16053_v32 = vrot.slane %v18413_v9, %v19267_v46  ;;  %v16070_v36 = vcombine.high %v18414_v62, %v18414_v62  ;;  %v16077_v6 = vrot.slane %v18414_v62, %v19267_v46  ;;  %v15803_v48 = vpack.c.b16 %v15799_v10, %v15785_v35 }
 0x407   : > { %v16060_v56 = vrot.slane %v16046_v49, %v19267_v46  ;;  %v16100_v34 = vrot.slane %v18415_v58, %v19267_v46  ;;  %v16496_v2 = vrot.slane %v15998_v19, %v19267_v46  ;;  %v16510_v45 = vrot.slane %v15999_v26, %v19267_v46 }
 0x408   : > { %v16061_v13 = vcombine.high %v16053_v32, %v16053_v32  ;;  %v16084_v14 = vrot.slane %v16070_v36, %v19267_v46  ;;  %v16085_v33 = vcombine.high %v16077_v6, %v16077_v6  ;;  %18909 = vmatmul.mubr.bf16.gmra.mrb[4].mxu0 %v15803_v48  ;;  %v16524_v5 = vrot.slane %v16000_v43, %v19267_v46  ;;  %v18423_v36 = vld.sshfl [vmem:[#allocation2 + $0x7c] sm:$0x33 pattern:$0x75316420] }
 0x409   : > { %v16062_v52 = vcombine.high %v16060_v56, %v16060_v56  ;;  %v16503_v39 = vrot.slane %v16496_v2, %v19267_v46  ;;  %v16538_v57 = vrot.slane %v16015_v24, %v19267_v46  ;;  %v16517_v63 = vrot.slane %v16510_v45, %v19267_v46 }
 0x40a   : > { %v16086_v29 = vcombine.high %v16084_v14, %v16084_v14  ;;  %v16552_v28 = vrot.slane %v16022_v18, %v19267_v46  ;;  %v16566_v50 = vrot.slane %v16023_v23, %v19267_v46  ;;  %v16531_v40 = vrot.slane %v16524_v5, %v19267_v46 }
 0x40b   : > { %v16545_v37 = vrot.slane %v16538_v57, %v19267_v46  ;;  %v16580_v17 = vrot.slane %v16024_v3, %v19267_v46  ;;  %v16594_v42 = vrot.slane %v16038_v27, %v19267_v46  ;;  %v16608_v21 = vrot.slane %v16060_v56, %v19267_v46  ;;  %v18422_v3 = vld.sshfl [vmem:[#allocation2 + $0x78] sm:$0x32 pattern:$0x75316420] }
 0x40c   : > { %v16559_v0 = vrot.slane %v16552_v28, %v19267_v46  ;;  %v16573_v22 = vrot.slane %v16566_v50, %v19267_v46  ;;  %v16622_v4 = vrot.slane %v16061_v13, %v19267_v46  ;;  %v16636_v41 = vrot.slane %v16062_v52, %v19267_v46 }
 0x40d   : > { %v16587_v1 = vrot.slane %v16580_v17, %v19267_v46  ;;  %v16601_v47 = vrot.slane %v16594_v42, %v19267_v46  ;;  %v16650_v8 = vrot.slane %v16077_v6, %v19267_v46  ;;  %v16615_v61 = vrot.slane %v16608_v21, %v19267_v46  ;;  %v18424_v21 = vld.sshfl [vmem:[#allocation2 + $0x80] sm:$0x1 pattern:$0x75316420] }
 0x40e   : > { %v16629_v11 = vrot.slane %v16622_v4, %v19267_v46  ;;  %v16664_v25 = vrot.slane %v16084_v14, %v19267_v46  ;;  %v16678_v31 = vrot.slane %v16085_v33, %v19267_v46  ;;  %v16643_v51 = vrot.slane %v16636_v41, %v19267_v46 }
 0x40f   : > { %v16657_v53 = vrot.slane %v16650_v8, %v19267_v46  ;;  %v16692_v60 = vrot.slane %v16086_v29, %v19267_v46  ;;  %v16706_v59 = vrot.slane %v16100_v34, %v19267_v46  ;;  %v17386_v15 = vunpack.c.l.b16 %v16503_v39  ;;  %v18426_v8 = vld.sshfl [vmem:[#allocation2 + $0x94] sm:$0x33 pattern:$0x75316420] }
 0x410   : > { %v16671_v30 = vrot.slane %v16664_v25, %v19267_v46  ;;  %v16685_v16 = vrot.slane %v16678_v31, %v19267_v46  ;;  %v17387_v20 = vunpack.c.l.b16 %v16517_v63  ;;  %v17388_v9 = vunpack.c.l.b16 %v16531_v40 }
 0x411   : > { %v16699_v12 = vrot.slane %v16692_v60, %v19267_v46  ;;  %v16713_v7 = vrot.slane %v16706_v59, %v19267_v46  ;;  %v17389_v19 = vunpack.c.l.b16 %v16545_v37  ;;  %v17390_v24 = vunpack.c.l.b16 %v16559_v0  ;;  %v18425_v37 = vld.sshfl [vmem:[#allocation2 + $0x90] sm:$0x32 pattern:$0x75316420] }
 0x412   : > { %v17391_v55 = vunpack.c.l.b16 %v16573_v22  ;;  %v17392_v44 = vunpack.c.l.b16 %v16587_v1  ;;  %v17393_v62 = vunpack.c.l.b16 %v16601_v47  ;;  %v17394_v26 = vunpack.c.l.b16 %v16615_v61 }
 0x413   : > { %v17395_v18 = vunpack.c.l.b16 %v16629_v11  ;;  %v17396_v35 = vunpack.c.l.b16 %v16643_v51  ;;  %v17397_v38 = vunpack.c.l.b16 %v16657_v53  ;;  %v17398_v58 = vunpack.c.l.b16 %v16671_v30  ;;  %v18427_v51 = vld.sshfl [vmem:[#allocation2 + $0x98] sm:$0x1 pattern:$0x75316420] }
 0x414   : > { %v17399_v43 = vunpack.c.l.b16 %v16685_v16  ;;  %v17400_v23 = vunpack.c.l.b16 %v16699_v12  ;;  %v17401_v54 = vunpack.c.l.b16 %v16713_v7  ;;  %v17450_v27 = vrot.slane %v17387_v20, 7 }
 0x415   : > { %v17452_v49 = vrot.slane %v17388_v9, 6  ;;  %v17454_v10 = vrot.slane %v17389_v19, 5  ;;  %v17456_v32 = vrot.slane %v17390_v24, 4  ;;  %v17458_v6 = vrot.slane %v17391_v55, 3 }
 0x416   : > { %v17460_v48 = vrot.slane %v17392_v44, 2  ;;  %v17462_v56 = vrot.slane %v17393_v62, 1  ;;  %v17464_v34 = vrot.slane %v17395_v18, 7  ;;  %v17451_v2 = vsel %vm3140_vm2, %v17450_v27, %v17386_v15 }
 0x417   : > { %v17466_v13 = vrot.slane %v17396_v35, 6  ;;  %v17468_v14 = vrot.slane %v17397_v38, 5  ;;  %v17470_v33 = vrot.slane %v17398_v58, 4  ;;  %v17453_v45 = vsel %vm3143_vm6, %v17452_v49, %v17451_v2 }
 0x418   : > { %v17465_v52 = vsel %vm3140_vm2, %v17464_v34, %v17394_v26  ;;  %v17472_v39 = vrot.slane %v17399_v43, 3  ;;  %v17474_v5 = vrot.slane %v17400_v23, 2  ;;  %v17455_v57 = vsel %vm3146_vm11, %v17454_v10, %v17453_v45 }
 0x419   : > { %v17467_v29 = vsel %vm3143_vm6, %v17466_v13, %v17465_v52  ;;  %v17476_v63 = vrot.slane %v17401_v54, 1  ;;  %v16232_v28 = vcombine.high %v18422_v3, %v18422_v3  ;;  %v17457_v50 = vsel %vm3149_vm12, %v17456_v32, %v17455_v57 }
 0x41a   : > { %v17469_v40 = vsel %vm3146_vm11, %v17468_v14, %v17467_v29  ;;  %v16239_v17 = vrot.slane %v18422_v3, %v19267_v46  ;;  %v16256_v42 = vcombine.high %v18423_v36, %v18423_v36  ;;  %v17459_v0 = vsel %vm3152_vm13, %v17458_v6, %v17457_v50 }
 0x41b   : > { %v17471_v22 = vsel %vm3149_vm12, %v17470_v33, %v17469_v40  ;;  %v16246_v4 = vrot.slane %v16232_v28, %v19267_v46  ;;  %v16263_v1 = vrot.slane %v18423_v36, %v19267_v46  ;;  %v17461_v47 = vsel %vm3155_vm14, %v17460_v48, %v17459_v0 }
 0x41c   : > { %v17473_v41 = vsel %vm3152_vm13, %v17472_v39, %v17471_v22  ;;  %v16247_v61 = vcombine.high %v16239_v17, %v16239_v17  ;;  %v16270_v11 = vrot.slane %v16256_v42, %v19267_v46  ;;  %v17463_v25 = vsel %vm3158_vm15, %v17462_v56, %v17461_v47 }
 0x41d   : > { %v17475_v31 = vsel %vm3155_vm14, %v17474_v5, %v17473_v41  ;;  %v16248_v53 = vcombine.high %v16246_v4, %v16246_v4  ;;  %v16271_v60 = vcombine.high %v16263_v1, %v16263_v1  ;;  %v16286_v16 = vrot.slane %v18424_v21, %v19267_v46 }
 0x41e   : > { %v17477_v59 = vsel %vm3158_vm15, %v17476_v63, %v17475_v31  ;;  %v16272_v30 = vcombine.high %v16270_v11, %v16270_v11  ;;  %v16294_v15 = vcombine.high %v18425_v37, %v18425_v37  ;;  %v16301_v12 = vrot.slane %v18425_v37, %v19267_v46 }
 0x41f   : > { %v17562_v20 = vpack.c.b16 %v17477_v59, %v17463_v25  ;;  %v16318_v7 = vcombine.high %v18426_v8, %v18426_v8  ;;  %v16325_v9 = vrot.slane %v18426_v8, %v19267_v46  ;;  %v16348_v24 = vrot.slane %v18427_v51, %v19267_v46 }
 0x420   : > { %v16308_v19 = vrot.slane %v16294_v15, %v19267_v46  ;;  %v16944_v55 = vrot.slane %v16246_v4, %v19267_v46  ;;  %v16958_v44 = vrot.slane %v16247_v61, %v19267_v46  ;;  %v16309_v62 = vcombine.high %v16301_v12, %v16301_v12 }
 0x421   : > { %18928 = vmatprep.mubr.bf16.mxu0 %v17562_v20  ;;  %v16332_v26 = vrot.slane %v16318_v7, %v19267_v46  ;;  %v16333_v18 = vcombine.high %v16325_v9, %v16325_v9  ;;  %v16972_v35 = vrot.slane %v16248_v53, %v19267_v46  ;;  %v16986_v23 = vrot.slane %v16263_v1, %v19267_v46  ;;  %v18417_v7 = vld.sshfl [vmem:[#allocation2 + $0x4c] sm:$0x33 pattern:$0x75316420] }
 0x422   : > { %v16310_v38 = vcombine.high %v16308_v19, %v16308_v19  ;;  %v16951_v58 = vrot.slane %v16944_v55, %v19267_v46  ;;  %v16965_v43 = vrot.slane %v16958_v44, %v19267_v46  ;;  %v17000_v27 = vrot.slane %v16270_v11, %v19267_v46 }
 0x423   : > { %v16334_v54 = vcombine.high %v16332_v26, %v16332_v26  ;;  %v16979_v3 = vrot.slane %v16972_v35, %v19267_v46  ;;  %v17014_v49 = vrot.slane %v16271_v60, %v19267_v46  ;;  %v16993_v10 = vrot.slane %v16986_v23, %v19267_v46 }
 0x424   : > { %v17028_v32 = vrot.slane %v16272_v30, %v19267_v46  ;;  %v17042_v36 = vrot.slane %v16286_v16, %v19267_v46  ;;  %v17056_v6 = vrot.slane %v16308_v19, %v19267_v46  ;;  %v17007_v48 = vrot.slane %v17000_v27, %v19267_v46  ;;  %v18416_v30 = vld.sshfl [vmem:[#allocation2 + $0x48] sm:$0x32 pattern:$0x75316420] }
 0x425   : > { %v17021_v56 = vrot.slane %v17014_v49, %v19267_v46  ;;  %v17070_v34 = vrot.slane %v16309_v62, %v19267_v46  ;;  %v17084_v2 = vrot.slane %v16310_v38, %v19267_v46  ;;  %v17098_v45 = vrot.slane %v16325_v9, %v19267_v46  ;;  %v18419_v27 = vld.sshfl [vmem:[#allocation2 + $0x60] sm:$0x32 pattern:$0x75316420] }
 0x426   : > { %v17035_v13 = vrot.slane %v17028_v32, %v19267_v46  ;;  %v17049_v14 = vrot.slane %v17042_v36, %v19267_v46  ;;  %v17063_v33 = vrot.slane %v17056_v6, %v19267_v46  ;;  %v17112_v5 = vrot.slane %v16332_v26, %v19267_v46  ;;  %v18418_v36 = vld.sshfl [vmem:[#allocation2 + $0x50] sm:$0x1 pattern:$0x75316420] }
 0x427   : > { %v17077_v52 = vrot.slane %v17070_v34, %v19267_v46  ;;  %v17091_v39 = vrot.slane %v17084_v2, %v19267_v46  ;;  %v17126_v57 = vrot.slane %v16333_v18, %v19267_v46  ;;  %v17105_v29 = vrot.slane %v17098_v45, %v19267_v46  ;;  %v18420_v2 = vld.sshfl [vmem:[#allocation2 + $0x64] sm:$0x33 pattern:$0x75316420] }
 0x428   : > { %v17140_v63 = vrot.slane %v16334_v54, %v19267_v46  ;;  %v17154_v28 = vrot.slane %v16348_v24, %v19267_v46  ;;  %v17418_v50 = vunpack.c.l.b16 %v16951_v58  ;;  %v17119_v40 = vrot.slane %v17112_v5, %v19267_v46 }
 0x429   : > { %v17133_v37 = vrot.slane %v17126_v57, %v19267_v46  ;;  %v17419_v17 = vunpack.c.l.b16 %v16965_v43  ;;  %v17420_v42 = vunpack.c.l.b16 %v16979_v3  ;;  %v17421_v21 = vunpack.c.l.b16 %v16993_v10 }
 0x42a   : > { %v17147_v0 = vrot.slane %v17140_v63, %v19267_v46  ;;  %v17161_v22 = vrot.slane %v17154_v28, %v19267_v46  ;;  %v17422_v4 = vunpack.c.l.b16 %v17007_v48  ;;  %v17423_v1 = vunpack.c.l.b16 %v17021_v56 }
 0x42b   : > { %v17424_v47 = vunpack.c.l.b16 %v17035_v13  ;;  %v17425_v41 = vunpack.c.l.b16 %v17049_v14  ;;  %v17426_v8 = vunpack.c.l.b16 %v17063_v33  ;;  %v17427_v61 = vunpack.c.l.b16 %v17077_v52  ;;  %v18421_v52 = vld.sshfl [vmem:[#allocation2 + $0x68] sm:$0x1 pattern:$0x75316420] }
 0x42c   : > { %v17428_v11 = vunpack.c.l.b16 %v17091_v39  ;;  %v17429_v25 = vunpack.c.l.b16 %v17105_v29  ;;  %v17430_v31 = vunpack.c.l.b16 %v17119_v40  ;;  %v17431_v51 = vunpack.c.l.b16 %v17133_v37 }
 0x42d   : > { %v17432_v53 = vunpack.c.l.b16 %v17147_v0  ;;  %v17433_v60 = vunpack.c.l.b16 %v17161_v22  ;;  %v17506_v59 = vrot.slane %v17419_v17, 7  ;;  %v17508_v16 = vrot.slane %v17420_v42, 6 }
 0x42e   : > { %v17510_v15 = vrot.slane %v17421_v21, 5  ;;  %v17512_v20 = vrot.slane %v17422_v4, 4  ;;  %v17514_v12 = vrot.slane %v17423_v1, 3  ;;  %v17516_v19 = vrot.slane %v17424_v47, 2 }
 0x42f   : > { %v17507_v9 = vsel %vm3140_vm2, %v17506_v59, %v17418_v50  ;;  %v17518_v24 = vrot.slane %v17425_v41, 1  ;;  %v17520_v55 = vrot.slane %v17427_v61, 7  ;;  %v17522_v62 = vrot.slane %v17428_v11, 6 }
 0x430   : > { %v17509_v44 = vsel %vm3143_vm6, %v17508_v16, %v17507_v9  ;;  %v17524_v26 = vrot.slane %v17429_v25, 5  ;;  %v17526_v18 = vrot.slane %v17430_v31, 4  ;;  %v17528_v58 = vrot.slane %v17431_v51, 3 }
 0x431   : > { %v17511_v35 = vsel %vm3146_vm11, %v17510_v15, %v17509_v44  ;;  %v17521_v38 = vsel %vm3140_vm2, %v17520_v55, %v17426_v8  ;;  %v17530_v43 = vrot.slane %v17432_v53, 2  ;;  %v17532_v3 = vrot.slane %v17433_v60, 1 }
 0x432   : > { %v17513_v23 = vsel %vm3149_vm12, %v17512_v20, %v17511_v35  ;;  %v17523_v54 = vsel %vm3143_vm6, %v17522_v62, %v17521_v38  ;;  %v16108_v49 = vcombine.high %v18416_v30, %v18416_v30  ;;  %v16115_v6 = vrot.slane %v18416_v30, %v19267_v46 }
 0x433   : > { %v17515_v10 = vsel %vm3152_vm13, %v17514_v12, %v17513_v23  ;;  %v17525_v32 = vsel %vm3146_vm11, %v17524_v26, %v17523_v54  ;;  %v16132_v48 = vcombine.high %v18417_v7, %v18417_v7  ;;  %v16139_v14 = vrot.slane %v18417_v7, %v19267_v46 }
 0x434   : > { %v17517_v56 = vsel %vm3155_vm14, %v17516_v19, %v17515_v10  ;;  %v17527_v34 = vsel %vm3149_vm12, %v17526_v18, %v17525_v32  ;;  %v16122_v13 = vrot.slane %v16108_v49, %v19267_v46  ;;  %v16123_v39 = vcombine.high %v16115_v6, %v16115_v6 }
 0x435   : > { %v17519_v33 = vsel %vm3158_vm15, %v17518_v24, %v17517_v56  ;;  %v17529_v45 = vsel %vm3152_vm13, %v17528_v58, %v17527_v34  ;;  %v16146_v5 = vrot.slane %v16132_v48, %v19267_v46  ;;  %v16147_v63 = vcombine.high %v16139_v14, %v16139_v14 }
 0x436   : > { %v17531_v57 = vsel %vm3155_vm14, %v17530_v43, %v17529_v45  ;;  %v16124_v29 = vcombine.high %v16122_v13, %v16122_v13  ;;  %v16162_v28 = vrot.slane %v18418_v36, %v19267_v46  ;;  %v16170_v37 = vcombine.high %v18419_v27, %v18419_v27 }
 0x437   : > { %v17533_v50 = vsel %vm3158_vm15, %v17532_v3, %v17531_v57  ;;  %v16148_v40 = vcombine.high %v16146_v5, %v16146_v5  ;;  %v16177_v17 = vrot.slane %v18419_v27, %v19267_v46  ;;  %v16194_v0 = vcombine.high %v18420_v2, %v18420_v2 }
 0x438   : > { %v17564_v42 = vpack.c.b16 %v17533_v50, %v17519_v33  ;;  %v16201_v22 = vrot.slane %v18420_v2, %v19267_v46  ;;  %v16224_v21 = vrot.slane %v18421_v52, %v19267_v46  ;;  %v16184_v4 = vrot.slane %v16170_v37, %v19267_v46 }
 0x439   : > { %v16185_v1 = vcombine.high %v16177_v17, %v16177_v17  ;;  %v16720_v47 = vrot.slane %v16122_v13, %v19267_v46  ;;  %v16734_v41 = vrot.slane %v16123_v39, %v19267_v46  ;;  %v16208_v8 = vrot.slane %v16194_v0, %v19267_v46  ;;  %v18428_v0 = vld.sshfl [vmem:[#allocation2 + $0xa8] sm:$0x32 pattern:$0x75316420] }
 0x43a   : > { %18932 = vmatprep.mubr.bf16.mxu1 %v17564_v42  ;;  %v16209_v61 = vcombine.high %v16201_v22, %v16201_v22  ;;  %v16748_v11 = vrot.slane %v16124_v29, %v19267_v46  ;;  %v16762_v25 = vrot.slane %v16139_v14, %v19267_v46  ;;  %v16186_v31 = vcombine.high %v16184_v4, %v16184_v4 }
 0x43b   : > { %v16727_v51 = vrot.slane %v16720_v47, %v19267_v46  ;;  %v16741_v53 = vrot.slane %v16734_v41, %v19267_v46  ;;  %v16776_v60 = vrot.slane %v16146_v5, %v19267_v46  ;;  %v16210_v59 = vcombine.high %v16208_v8, %v16208_v8  ;;  %v18429_v47 = vld.sshfl [vmem:[#allocation2 + $0xac] sm:$0x33 pattern:$0x75316420] }
 0x43c   : > { %v16755_v30 = vrot.slane %v16748_v11, %v19267_v46  ;;  %v16769_v16 = vrot.slane %v16762_v25, %v19267_v46  ;;  %v16790_v15 = vrot.slane %v16147_v63, %v19267_v46  ;;  %v22916_v20 = vpop.f32.mrb[0].mxu1  ;;  %v16804_v7 = vrot.slane %v16148_v40, %v19267_v46 }
 0x43d   : > { %v16783_v12 = vrot.slane %v16776_v60, %v19267_v46  ;;  %v16818_v9 = vrot.slane %v16162_v28, %v19267_v46  ;;  %v16832_v19 = vrot.slane %v16184_v4, %v19267_v46  ;;  %v22922_v24 = vpop.f32.mrb[1].mxu1  ;;  %v16846_v44 = vrot.slane %v16185_v1, %v19267_v46 }
 0x43e   : > { %v16797_v55 = vrot.slane %v16790_v15, %v19267_v46  ;;  %v16860_v62 = vrot.slane %v16186_v31, %v19267_v46  ;;  %v16874_v26 = vrot.slane %v16201_v22, %v19267_v46  ;;  %v22928_v18 = vpop.f32.mrb[2].mxu1  ;;  %v16811_v35 = vrot.slane %v16804_v7, %v19267_v46  ;;  %v18431_v7 = vld.sshfl [vmem:[#allocation2 + $0xc0] sm:$0x32 pattern:$0x75316420] }
 0x43f   : > { %v16825_v38 = vrot.slane %v16818_v9, %v19267_v46  ;;  %v16839_v58 = vrot.slane %v16832_v19, %v19267_v46  ;;  %v16888_v43 = vrot.slane %v16208_v8, %v19267_v46  ;;  %v22934_v23 = vpop.f32.mrb[3].mxu1  ;;  %v16853_v54 = vrot.slane %v16846_v44, %v19267_v46 }
 0x440   : > { %v16867_v3 = vrot.slane %v16860_v62, %v19267_v46  ;;  %v16881_v27 = vrot.slane %v16874_v26, %v19267_v46  ;;  %v16902_v49 = vrot.slane %v16209_v61, %v19267_v46  ;;  %v16916_v32 = vrot.slane %v16210_v59, %v19267_v46  ;;  %v18432_v62 = vld.sshfl [vmem:[#allocation2 + $0xc4] sm:$0x33 pattern:$0x75316420] }
 0x441   : > { %v16895_v10 = vrot.slane %v16888_v43, %v19267_v46  ;;  %v16930_v36 = vrot.slane %v16224_v21, %v19267_v46  ;;  %v17402_v6 = vunpack.c.l.b16 %v16727_v51  ;;  %v17403_v56 = vunpack.c.l.b16 %v16741_v53  ;;  %v18430_v43 = vld.sshfl [vmem:[#allocation2 + $0xb0] sm:$0x1 pattern:$0x75316420] }
 0x442   : > { %v16909_v48 = vrot.slane %v16902_v49, %v19267_v46  ;;  %v17404_v34 = vunpack.c.l.b16 %v16755_v30  ;;  %v17405_v2 = vunpack.c.l.b16 %v16769_v16  ;;  %v16923_v13 = vrot.slane %v16916_v32, %v19267_v46 }
 0x443   : > { %v16937_v14 = vrot.slane %v16930_v36, %v19267_v46  ;;  %v17406_v33 = vunpack.c.l.b16 %v16783_v12  ;;  %v17407_v45 = vunpack.c.l.b16 %v16797_v55  ;;  %v17408_v52 = vunpack.c.l.b16 %v16811_v35 }
 0x444   : > { %v17409_v39 = vunpack.c.l.b16 %v16825_v38  ;;  %v17410_v5 = vunpack.c.l.b16 %v16839_v58  ;;  %v17411_v57 = vunpack.c.l.b16 %v16853_v54  ;;  %v17412_v29 = vunpack.c.l.b16 %v16867_v3 }
 0x445   : > { %v17413_v63 = vunpack.c.l.b16 %v16881_v27  ;;  %v17414_v28 = vunpack.c.l.b16 %v16895_v10  ;;  %v17415_v50 = vunpack.c.l.b16 %v16909_v48  ;;  %v17416_v40 = vunpack.c.l.b16 %v16923_v13 }
 0x446   : > { %v17417_v37 = vunpack.c.l.b16 %v16937_v14  ;;  %v17478_v17 = vrot.slane %v17403_v56, 7  ;;  %v17480_v42 = vrot.slane %v17404_v34, 6  ;;  %v17482_v22 = vrot.slane %v17405_v2, 5 }
 0x447   : > { %v17484_v21 = vrot.slane %v17406_v33, 4  ;;  %v17486_v4 = vrot.slane %v17407_v45, 3  ;;  %v17488_v1 = vrot.slane %v17408_v52, 2  ;;  %v17490_v8 = vrot.slane %v17409_v39, 1 }
 0x448   : > { %v17479_v41 = vsel %vm3140_vm2, %v17478_v17, %v17402_v6  ;;  %v17492_v61 = vrot.slane %v17411_v57, 7  ;;  %v17494_v11 = vrot.slane %v17412_v29, 6  ;;  %v17496_v31 = vrot.slane %v17413_v63, 5 }
 0x449   : > { %v17481_v25 = vsel %vm3143_vm6, %v17480_v42, %v17479_v41  ;;  %v17498_v51 = vrot.slane %v17414_v28, 4  ;;  %v17500_v53 = vrot.slane %v17415_v50, 3  ;;  %v17502_v30 = vrot.slane %v17416_v40, 2 }
 0x44a   : > { %v17483_v60 = vsel %vm3146_vm11, %v17482_v22, %v17481_v25  ;;  %v17493_v59 = vsel %vm3140_vm2, %v17492_v61, %v17410_v5  ;;  %v17504_v16 = vrot.slane %v17417_v37, 1  ;;  %v16356_v9 = vcombine.high %v18428_v0, %v18428_v0  ;;  %v18433_v33 = vld.sshfl [vmem:[#allocation2 + $0xc8] sm:$0x1 pattern:$0x75316420] }
 0x44b   : > { %v17485_v15 = vsel %vm3149_vm12, %v17484_v21, %v17483_v60  ;;  %v17495_v12 = vsel %vm3143_vm6, %v17494_v11, %v17493_v59  ;;  %v16363_v19 = vrot.slane %v18428_v0, %v19267_v46  ;;  %v16380_v26 = vcombine.high %v18429_v47, %v18429_v47 }
 0x44c   : > { %v17487_v55 = vsel %vm3152_vm13, %v17486_v4, %v17485_v15  ;;  %v17497_v44 = vsel %vm3146_vm11, %v17496_v31, %v17495_v12  ;;  %v16387_v35 = vrot.slane %v18429_v47, %v19267_v46  ;;  %v16370_v54 = vrot.slane %v16356_v9, %v19267_v46 }
 0x44d   : > { %v17489_v38 = vsel %vm3155_vm14, %v17488_v1, %v17487_v55  ;;  %v17499_v58 = vsel %vm3149_vm12, %v17498_v51, %v17497_v44  ;;  %v16371_v49 = vcombine.high %v16363_v19, %v16363_v19  ;;  %v16394_v10 = vrot.slane %v16380_v26, %v19267_v46 }
 0x44e   : > { %v17491_v3 = vsel %vm3158_vm15, %v17490_v8, %v17489_v38  ;;  %v17501_v27 = vsel %vm3152_vm13, %v17500_v53, %v17499_v58  ;;  %v16372_v36 = vcombine.high %v16370_v54, %v16370_v54  ;;  %v16395_v6 = vcombine.high %v16387_v35, %v16387_v35 }
 0x44f   : > { %v17503_v32 = vsel %vm3155_vm14, %v17502_v30, %v17501_v27  ;;  %v16418_v48 = vcombine.high %v18431_v7, %v18431_v7  ;;  %v16410_v34 = vrot.slane %v18430_v43, %v19267_v46  ;;  %v16425_v2 = vrot.slane %v18431_v7, %v19267_v46 }
 0x450   : > { %v17505_v56 = vsel %vm3158_vm15, %v17504_v16, %v17503_v32  ;;  %v16442_v13 = vcombine.high %v18432_v62, %v18432_v62  ;;  %v16396_v45 = vcombine.high %v16394_v10, %v16394_v10  ;;  %v16449_v39 = vrot.slane %v18432_v62, %v19267_v46 }
 0x451   : > { %v17563_v14 = vpack.c.b16 %v17505_v56, %v17491_v3  ;;  %v16432_v52 = vrot.slane %v16418_v48, %v19267_v46  ;;  %v16433_v5 = vcombine.high %v16425_v2, %v16425_v2  ;;  %v17168_v29 = vrot.slane %v16370_v54, %v19267_v46 }
 0x452   : > { %v16456_v57 = vrot.slane %v16442_v13, %v19267_v46  ;;  %v17182_v63 = vrot.slane %v16371_v49, %v19267_v46  ;;  %v17196_v50 = vrot.slane %v16372_v36, %v19267_v46  ;;  %v17210_v40 = vrot.slane %v16387_v35, %v19267_v46 }
 0x453   : > { %18929 = vmatmul.mubr.bf16.vlgmr.msra.gmra.mrb[0].mxu0 %v17563_v14  ;;  %v16434_v28 = vcombine.high %v16432_v52, %v16432_v52  ;;  %v16457_v37 = vcombine.high %v16449_v39, %v16449_v39  ;;  %v16472_v42 = vrot.slane %v18433_v33, %v19267_v46  ;;  %v17224_v0 = vrot.slane %v16394_v10, %v19267_v46 }
 0x454   : > { %v16458_v17 = vcombine.high %v16456_v57, %v16456_v57  ;;  %v17175_v22 = vrot.slane %v17168_v29, %v19267_v46  ;;  %v17189_v21 = vrot.slane %v17182_v63, %v19267_v46  ;;  %v17238_v4 = vrot.slane %v16395_v6, %v19267_v46 }
 0x455   : > { %v17252_v1 = vrot.slane %v16396_v45, %v19267_v46  ;;  %v17203_v47 = vrot.slane %v17196_v50, %v19267_v46  ;;  %v17266_v41 = vrot.slane %v16410_v34, %v19267_v46  ;;  %v17280_v8 = vrot.slane %v16432_v52, %v19267_v46 }
 0x456   : > { %v17294_v61 = vrot.slane %v16433_v5, %v19267_v46  ;;  %v17217_v11 = vrot.slane %v17210_v40, %v19267_v46  ;;  %v17231_v25 = vrot.slane %v17224_v0, %v19267_v46  ;;  %v17308_v31 = vrot.slane %v16434_v28, %v19267_v46 }
 0x457   : > { %v17322_v51 = vrot.slane %v16449_v39, %v19267_v46  ;;  %v17245_v53 = vrot.slane %v17238_v4, %v19267_v46  ;;  %v17259_v60 = vrot.slane %v17252_v1, %v19267_v46  ;;  %v17273_v59 = vrot.slane %v17266_v41, %v19267_v46 }
 0x458   : > { %v17336_v30 = vrot.slane %v16456_v57, %v19267_v46  ;;  %v17301_v16 = vrot.slane %v17294_v61, %v19267_v46  ;;  %v17315_v15 = vrot.slane %v17308_v31, %v19267_v46  ;;  %v17350_v12 = vrot.slane %v16457_v37, %v19267_v46 }
 0x459   : > { %v17364_v7 = vrot.slane %v16458_v17, %v19267_v46  ;;  %v17287_v9 = vrot.slane %v17280_v8, %v19267_v46  ;;  %v17329_v19 = vrot.slane %v17322_v51, %v19267_v46  ;;  %v17378_v44 = vrot.slane %v16472_v42, %v19267_v46 }
 0x45a   : > { %v17343_v55 = vrot.slane %v17336_v30, %v19267_v46  ;;  %v17357_v62 = vrot.slane %v17350_v12, %v19267_v46  ;;  %v17435_v26 = vunpack.c.l.b16 %v17189_v21  ;;  %v17436_v35 = vunpack.c.l.b16 %v17203_v47 }
 0x45b   : > { %v17437_v38 = vunpack.c.l.b16 %v17217_v11  ;;  %v17371_v58 = vrot.slane %v17364_v7, %v19267_v46  ;;  %v17385_v43 = vrot.slane %v17378_v44, %v19267_v46  ;;  %v17438_v54 = vunpack.c.l.b16 %v17231_v25 }
 0x45c   : > { %v17439_v3 = vunpack.c.l.b16 %v17245_v53  ;;  %v17434_v27 = vunpack.c.l.b16 %v17175_v22  ;;  %v17440_v49 = vunpack.c.l.b16 %v17259_v60  ;;  %v17443_v10 = vunpack.c.l.b16 %v17301_v16 }
 0x45d   : > { %v17444_v32 = vunpack.c.l.b16 %v17315_v15  ;;  %v17441_v36 = vunpack.c.l.b16 %v17273_v59  ;;  %v17442_v6 = vunpack.c.l.b16 %v17287_v9  ;;  %v17445_v48 = vunpack.c.l.b16 %v17329_v19 }
 0x45e   : > { %v17446_v56 = vunpack.c.l.b16 %v17343_v55  ;;  %v17447_v34 = vunpack.c.l.b16 %v17357_v62  ;;  %v17534_v2 = vrot.slane %v17435_v26, 7  ;;  %v17536_v13 = vrot.slane %v17436_v35, 6 }
 0x45f   : > { %v17538_v14 = vrot.slane %v17437_v38, 5  ;;  %v17448_v33 = vunpack.c.l.b16 %v17371_v58  ;;  %v17449_v45 = vunpack.c.l.b16 %v17385_v43  ;;  %v17540_v52 = vrot.slane %v17438_v54, 4 }
 0x460   : > { %v17542_v39 = vrot.slane %v17439_v3, 3  ;;  %v17535_v46 = vsel %vm3140_vm2, %v17534_v2, %v17434_v27  ;;  %v17548_v5 = vrot.slane %v17443_v10, 7  ;;  %v17550_v57 = vrot.slane %v17444_v32, 6 }
 0x461   : > { %v17552_v29 = vrot.slane %v17445_v48, 5  ;;  %v17537_v63 = vsel %vm3143_vm6, %v17536_v13, %v17535_v46  ;;  %v17544_v28 = vrot.slane %v17440_v49, 2  ;;  %v17554_v50 = vrot.slane %v17446_v56, 4 }
 0x462   : > { %v17539_v40 = vsel %vm3146_vm11, %v17538_v14, %v17537_v63  ;;  %v17546_v37 = vrot.slane %v17441_v36, 1  ;;  %v17549_v17 = vsel %vm3140_vm2, %v17548_v5, %v17442_v6  ;;  %v17556_v42 = vrot.slane %v17447_v34, 3 }
 0x463   : > { %v17541_v0 = vsel %vm3149_vm12, %v17540_v52, %v17539_v40  ;;  %v17551_v22 = vsel %vm3143_vm6, %v17550_v57, %v17549_v17  ;;  %v17558_v21 = vrot.slane %v17448_v33, 2  ;;  %v17560_v47 = vrot.slane %v17449_v45, 1 }
 0x464   : > { %v17543_v4 = vsel %vm3152_vm13, %v17542_v39, %v17541_v0  ;;  %v17553_v1 = vsel %vm3146_vm11, %v17552_v29, %v17551_v22 }
 0x465   : > { %v17545_v41 = vsel %vm3155_vm14, %v17544_v28, %v17543_v4  ;;  %v17555_v8 = vsel %vm3149_vm12, %v17554_v50, %v17553_v1 }
 0x466   : > { %v17547_v61 = vsel %vm3158_vm15, %v17546_v37, %v17545_v41  ;;  %v17557_v11 = vsel %vm3152_vm13, %v17556_v42, %v17555_v8 }
 0x467   : > { %v17559_v25 = vsel %vm3155_vm14, %v17558_v21, %v17557_v11 }
 0x468   : > { %v17561_v31 = vsel %vm3158_vm15, %v17560_v47, %v17559_v25 }
 0x469   : > { %v17565_v51 = vpack.c.b16 %v17561_v31, %v17547_v61 }
 0x46b   : > { %18933 = vmatmul.mubr.bf16.vlgmr.msra.gmra.mrb[8].mxu1 %v17565_v51 }
 0x4b6   : > { %v18814_v53 = vpop.f32.mrb[4].mxu1 }
 0x4b7   : > { %v7945_v60 = vpop.f32.mrb[5].mxu1 }
 0x4b8   : > { %v18815_v59 = vpop.f32.mrb[6].mxu1 }
 0x4b9   : > { %v7948_v30 = vpop.f32.mrb[7].mxu1 }
 0x4db   : > { %v18910_v16 = vpop.f32.mrb[4].mxu0 }
 0x4dc   : > { %v18956_v15 = vadd.f32 %v18910_v16, %v18814_v53  ;;  %v15906_v12 = vpop.f32.mrb[5].mxu0 }
 0x4dd   : > { %v18958_v7 = vadd.f32 %v15906_v12, %v7945_v60  ;;  %v18911_v9 = vpop.f32.mrb[6].mxu0 }
 0x4de   : > { %v18960_v19 = vadd.f32 %v18911_v9, %v18815_v59  ;;  %v15909_v55 = vpop.f32.mrb[7].mxu0 }
 0x4df   : > { %v18962_v44 = vadd.f32 %v15909_v55, %v7948_v30  ;;  %v17755_v55 = vld [vmem:[%s23045_s6] sm:$0x1] }
 0x526   : > { %v18930_v62 = vpop.f32.mrb[0].mxu0 }
 0x527   : > { %v18952_v26 = vadd.f32 %v18930_v62, %v22916_v20  ;;  %v17652_v35 = vpop.f32.mrb[1].mxu0 }
 0x528   : > { %v18953_v38 = vadd.f32 %v17652_v35, %v22922_v24  ;;  %v18931_v58 = vpop.f32.mrb[2].mxu0 }
 0x529   : > { %v18954_v43 = vadd.f32 %v18931_v58, %v22928_v18  ;;  %v17655_v54 = vpop.f32.mrb[3].mxu0 }
 0x52a   : > { %v18955_v3 = vadd.f32 %v17655_v54, %v22934_v23 }
 0x52b   : > { %v17692_v27 = vpack.c.bf16 %v18954_v43, %v18952_v26 }
 0x52c   : > { %v17691_v49 = vpack.c.bf16 %v18955_v3, %v18953_v38 }
 0x52d   : > { %18609 = vst [vmem:[%s19174_s7 + $0x8] sm:$0xff] %v17692_v27   ;;  %v17733_v10 = vunpack.c.l.bf16 %v17692_v27  ;;  %v17734_v6 = vunpack.c.h.bf16 %v17692_v27 }
 0x52e   : > { %18578 = vst [vmem:[%s19174_s7] sm:$0xff] %v17691_v49   ;;  %v17731_v32 = vunpack.c.l.bf16 %v17691_v49  ;;  %v17732_v36 = vunpack.c.h.bf16 %v17691_v49 }
 0x52f   : > { %v17758_v34 = vmul.f32 %v17733_v10, %v17733_v10  ;;  %v17759_v18 = vmul.f32 %v17734_v6, %v17734_v6 }
 0x530   : > { %v17740_v48 = vadd.f32 %v17732_v36, %v17731_v32  ;;  %v17756_v56 = vmul.f32 %v17731_v32, %v17731_v32  ;;  %v17757_v20 = vmul.f32 %v17732_v36, %v17732_v36 }
 0x532   : > { %v17741_v2 = vadd.f32 %v17740_v48, %v17733_v10  ;;  %v17764_v24 = vadd.f32 %v17757_v20, %v17756_v56 }
 0x534   : > { %v17765_v13 = vadd.f32 %v17764_v24, %v17758_v34  ;;  %v17742_v14 = vadd.f32 %v17741_v2, %v17734_v6 }
 0x536   : > { %v17766_v23 = vadd.f32 %v17765_v13, %v17759_v18 }
 0x53e   : > { %v18934_v33 = vpop.f32.mrb[8].mxu1 }
 0x53f   : > { %v18957_v45 = vadd.f32 %v18956_v15, %v18934_v33  ;;  %v17668_v52 = vpop.f32.mrb[9].mxu1 }
 0x540   : > { %v18959_v39 = vadd.f32 %v18958_v7, %v17668_v52  ;;  %v18935_v46 = vpop.f32.mrb[10].mxu1  ;;  %v17739_v7 = vld [vmem:[%s23044_s5] sm:$0x1] }
 0x541   : > { %v18961_v5 = vadd.f32 %v18960_v19, %v18935_v46  ;;  %v17671_v57 = vpop.f32.mrb[11].mxu1 }
 0x542   : > { %v18963_v29 = vadd.f32 %v18962_v44, %v17671_v57 }
 0x543   : > { %v17694_v63 = vpack.c.bf16 %v18961_v5, %v18957_v45 }
 0x544   : > { %v17693_v28 = vpack.c.bf16 %v18963_v29, %v18959_v39 }
 0x545   : > { %18611 = vst [vmem:[%s19174_s7 + $0x18] sm:$0xff] %v17694_v63   ;;  %v17737_v37 = vunpack.c.l.bf16 %v17694_v63  ;;  %v17738_v0 = vunpack.c.h.bf16 %v17694_v63 }
 0x546   : > { %18610 = vst [vmem:[%s19174_s7 + $0x10] sm:$0xff] %v17693_v28   ;;  %v17735_v50 = vunpack.c.l.bf16 %v17693_v28  ;;  %v17736_v40 = vunpack.c.h.bf16 %v17693_v28 }
 0x547   : > { %v17762_v1 = vmul.f32 %v17737_v37, %v17737_v37  ;;  %v17763_v8 = vmul.f32 %v17738_v0, %v17738_v0 }
 0x548   : > { %v17743_v17 = vadd.f32 %v17742_v14, %v17735_v50  ;;  %v17760_v42 = vmul.f32 %v17735_v50, %v17735_v50  ;;  %v17761_v21 = vmul.f32 %v17736_v40, %v17736_v40 }
 0x54a   : > { %v17744_v22 = vadd.f32 %v17743_v17, %v17736_v40  ;;  %v17767_v4 = vadd.f32 %v17766_v23, %v17760_v42 }
 0x54c   : > { %v17745_v47 = vadd.f32 %v17744_v22, %v17737_v37  ;;  %v17768_v41 = vadd.f32 %v17767_v4, %v17761_v21 }
 0x54e   : > { %v17746_v61 = vadd.f32 %v17745_v47, %v17738_v0  ;;  %v17769_v11 = vadd.f32 %v17768_v41, %v17762_v1 }
 0x550   : > { %v17747_v25 = vrot.slane %v17746_v61, 4  ;;  %v17770_v31 = vadd.f32 %v17769_v11, %v17763_v8 }
 0x552   : > { %v17748_v51 = vadd.f32 %v17747_v25, %v17746_v61  ;;  %v17771_v53 = vrot.slane %v17770_v31, 4 }
 0x554   : > { %v17749_v60 = vrot.slane %v17748_v51, 2  ;;  %v17772_v59 = vadd.f32 %v17771_v53, %v17770_v31 }
 0x556   : > { %v17750_v30 = vadd.f32 %v17749_v60, %v17748_v51  ;;  %v17773_v16 = vrot.slane %v17772_v59, 2 }
 0x558   : > { %v17751_v15 = vrot.slane %v17750_v30, 1  ;;  %v17774_v12 = vadd.f32 %v17773_v16, %v17772_v59 }
 0x55a   : > { %v17752_v9 = vadd.f32 %v17751_v15, %v17750_v30  ;;  %v17775_v19 = vrot.slane %v17774_v12, 1 }
 0x55c   : > { %v17753_v44 = vadd.f32 %v17752_v9, %v17739_v7  ;;  %v17776_v62 = vadd.f32 %v17775_v19, %v17774_v12 }
 0x55e   : > { %17754 = vst [vmem:[%s23044_s5] sm:$0x1] %v17753_v44  ;;  %v17777_v26 = vadd.f32 %v17776_v62, %v17755_v55 }
 0x560   : > { %17778 = vst [vmem:[%s23045_s6] sm:$0x1] %v17777_v26 }
 0x561 PF: > { %s17_s21 = sadd.s32 1, %s19118_s21  }
 0x562   : > { %p14_p5 = scmp.ge.s32.totalorder %s17_s21, 4  }
 0x564   :  { %16 = sbr.rel (!%p14_p5) target bundleno = 1 (0x1), region = 97 }

</bundles_post_ra>
